<compile_context>
chip_gen: v7x
topology: tpu7x:2x2x1
jax: 0.10.0
libtpu: 0.0.40
codegen_flags: <defaults>
</compile_context>

<pallas_src>
import functools
import math

import jax
import jax.numpy as jnp
from jax.experimental import pallas as pl
from jax.experimental.pallas import tpu as pltpu

NEG_INF = -1e30


# ----------------------------- shared math (works in- and out-of-kernel) -----------------------------

def _recip(x, approx=False):
    if approx:
        return pl.reciprocal(x, approx=True)   # EUP, only valid inside the kernel
    return 1.0 / x


def _erf(x, approx=False):
    # Abramowitz & Stegun 7.1.26 polynomial approximation of erf, |error| <= 1.5e-7 (f32).
    a1, a2, a3, a4, a5 = 0.254829592, -0.284496736, 1.421413741, -1.453152027, 1.061405429
    p = 0.3275911
    ax = jnp.abs(x)
    t = _recip(1.0 + p * ax, approx)
    poly = ((((a5 * t + a4) * t + a3) * t + a2) * t + a1) * t
    y = 1.0 - poly * jnp.exp(-ax * ax)
    return jnp.where(x >= 0, y, -y)


def _gelu(x, approx=False):
    # Exact (erf-based) GELU, matching torch.nn.functional.gelu default.
    return 0.5 * x * (1.0 + _erf(x * (1.0 / math.sqrt(2.0)), approx))


def _layer_norm(x, gamma, beta, eps=1e-5):
    mu = jnp.mean(x, axis=-1, keepdims=True)
    var = jnp.mean((x - mu) ** 2, axis=-1, keepdims=True)
    return (x - mu) * jax.lax.rsqrt(var + eps) * gamma + beta


# ----------------------------- Pallas kernel: all encoder layers fused -----------------------------

def _fused_encoder_kernel(qbid_ref, kbid_ref, x_ref,
                          wqkv_ref, bqkv_ref, wo_ref, bo_ref,
                          g1_ref, be1_ref, w1_ref, b1_ref, w2_ref, b2_ref,
                          g2_ref, be2_ref,
                          o_ref, *, num_heads, hidden):
    H = hidden
    NH = num_heads
    dh = H // NH
    bf16 = jnp.bfloat16

    l = pl.program_id(0)

    # Layer 0 reads the kernel input; later layers read the resident output block, which
    # carries the running activations across the sequential layer grid.
    @pl.when(l == 0)
    def _():
        o_ref[...] = x_ref[...]

    x = o_ref[...]                                   # (BS, H) f32
    BS = x.shape[0]

    # Attention keep-mask rebuilt from two length-BS vectors (padded keys carry batch id -1,
    # so they never match any query's batch id).  O(BS^2) VALU but no O(BS^2) HBM/VMEM array.
    keep = qbid_ref[...] == kbid_ref[...]            # (BS,1) == (1,BS) -> (BS, BS) bool

    # --- self attention (1/sqrt(dh) already folded into the Q columns of wqkv/bqkv) --------
    qkv = jnp.dot(x.astype(bf16), wqkv_ref[0],
                  preferred_element_type=jnp.float32) + bqkv_ref[0]          # (BS, 3H)
    q = qkv[:, 0:H].reshape(BS, NH, dh)
    k = qkv[:, H:2 * H].reshape(BS, NH, dh)
    v = qkv[:, 2 * H:3 * H].reshape(BS, NH, dh)

    s = jnp.einsum('qhd,khd->hqk', q.astype(bf16), k.astype(bf16),
                   preferred_element_type=jnp.float32)                       # (NH, BS, BS)
    s = jnp.where(keep, s, NEG_INF)

    m = jnp.max(s, axis=-1, keepdims=True)
    e = jnp.exp(s - m)                                                       # un-normalized probs
    denom = jnp.sum(e, axis=-1, keepdims=True)                               # (NH, BS, 1)

    # Flash-style: normalize AFTER the PV matmul (touches (NH,BS,dh) instead of (NH,BS,BS)).
    ctx = jnp.einsum('hqk,khd->hqd', e.astype(bf16), v.astype(bf16),
                     preferred_element_type=jnp.float32)                     # (NH, BS, dh)
    ctx = ctx * pl.reciprocal(denom, approx=True)
    ctx = jnp.transpose(ctx, (1, 0, 2)).reshape(BS, H)                       # (BS, H)

    attn = jnp.dot(ctx.astype(bf16), wo_ref[0],
                   preferred_element_type=jnp.float32) + bo_ref[0]           # (BS, H)

    # --- residual + norm1 -----------------------------------------------------------
    y = _layer_norm(x + attn, g1_ref[0], be1_ref[0])

    # --- feed-forward (exact erf GELU, f32; hidden under weight DMA at these shapes) -------
    h1 = jnp.dot(y.astype(bf16), w1_ref[0],
                 preferred_element_type=jnp.float32) + b1_ref[0]             # (BS, F)
    h1 = _gelu(h1)
    ffn = jnp.dot(h1.astype(bf16), w2_ref[0],
                  preferred_element_type=jnp.float32) + b2_ref[0]            # (BS, H)

    # --- residual + norm2: write back into the carried output block ------------------
    o_ref[...] = _layer_norm(y + ffn, g2_ref[0], be2_ref[0])


def fused_encoder_pallas(x2d, qbid, kbid, params, *, num_heads):
    """x2d: (B*S, H) f32; qbid: (B*S,1) int32; kbid: (1,B*S) int32; params: layer-stacked."""
    BS, H = x2d.shape
    L = params["wqkv"].shape[0]
    F = params["w1"].shape[2]
    NH = num_heads
    dh = H // NH
    bf16 = jnp.bfloat16

    # Fold the 1/sqrt(dh) score scale into the Q projection (weights AND bias), then cast the
    # big weights to bf16 (halves the dominant HBM traffic).  Biases / LN params stay f32.
    scale = 1.0 / math.sqrt(dh)
    wqkv = params["wqkv"].at[:, :, 0:H].multiply(scale).astype(bf16)
    bqkv = params["bqkv"].at[:, :, 0:H].multiply(scale)
    wo = params["wo"].astype(bf16)
    w1 = params["w1"].astype(bf16)
    w2 = params["w2"].astype(bf16)

    inputs = (qbid, kbid, x2d,
              wqkv, bqkv, wo, params["bo"],
              params["g1"], params["be1"], w1, params["b1"],
              w2, params["b2"], params["g2"], params["be2"])

    kernel = functools.partial(_fused_encoder_kernel, num_heads=NH, hidden=H)

    cost = pl.CostEstimate(
        flops=int(L * 2 * BS * (3 * H * H + H * H + 2 * H * F + 2 * BS * H)),
        transcendentals=int(L * (NH * BS * BS + 2 * BS * F)),
        bytes_accessed=int(sum(a.nbytes for a in inputs) + BS * H * 4),
    )

    def build(weight_buffers):
        def wspec(arr):   # big per-layer weight slab, streamed by layer id
            _, a, b = arr.shape
            if weight_buffers is None:
                return pl.BlockSpec((1, a, b), lambda l: (l, 0, 0))
            return pl.BlockSpec((1, a, b), lambda l: (l, 0, 0),
                                pipeline_mode=pl.Buffered(weight_buffers))

        def pspec(arr):   # small per-layer params (biases / LN), default double-buffering
            _, a, b = arr.shape
            return pl.BlockSpec((1, a, b), lambda l: (l, 0, 0))

        return pl.pallas_call(
            kernel,
            out_shape=jax.ShapeDtypeStruct((BS, H), jnp.float32),
            grid=(L,),
            in_specs=[
                pl.BlockSpec((BS, 1), lambda l: (0, 0)),      # query batch ids
                pl.BlockSpec((1, BS), lambda l: (0, 0)),      # key batch ids (-1 = padded)
                pl.BlockSpec((BS, H), lambda l: (0, 0)),      # input activations
                wspec(wqkv), pspec(bqkv),                     # in-proj
                wspec(wo), pspec(params["bo"]),               # out-proj
                pspec(params["g1"]), pspec(params["be1"]),    # norm1
                wspec(w1), pspec(params["b1"]),               # linear1
                wspec(w2), pspec(params["b2"]),               # linear2
                pspec(params["g2"]), pspec(params["be2"]),    # norm2
            ],
            out_specs=pl.BlockSpec((BS, H), lambda l: (0, 0)),  # resident across layers (carry)
            compiler_params=pltpu.CompilerParams(dimension_semantics=("arbitrary",)),
            cost_estimate=cost,
        )

    try:
        out = build(3)(*inputs)        # triple-buffered weight prefetch
        jax.block_until_ready(out)
        return out
    except Exception:
        # pipeline_mode / pl.Buffered not supported by this jax build -> default double-buffer.
        return build(None)(*inputs)


# ----------------------------- Sem_Encoder forward (glue in plain JAX) -----------------------------

def _mask_vectors(lang_mask, B, NLANG, NS):
    S = NLANG + NS
    BS = B * S
    pad = jnp.concatenate([lang_mask.astype(bool), jnp.zeros((B, NS), bool)],
                          axis=1).reshape(BS)                       # True = padded key
    bid = jnp.repeat(jnp.arange(B, dtype=jnp.int32), S)             # (BS,)
    qbid = bid.reshape(BS, 1)
    kbid = jnp.where(pad, jnp.int32(-1), bid).reshape(1, BS)
    return qbid, kbid


def sem_encoder_forward(lang_rep, obj_rep, lang_mask, obj_mask, params, *, num_heads):
    del obj_mask  # the PyTorch forward re-creates obj_mask as all-False
    B, NLANG, H = lang_rep.shape
    NS = obj_rep.shape[1]
    S = NLANG + NS
    BS = B * S

    qbid, kbid = _mask_vectors(lang_mask, B, NLANG, NS)
    x2d = jnp.concatenate([lang_rep, obj_rep], axis=1).astype(jnp.float32).reshape(BS, H)

    out2d = fused_encoder_pallas(x2d, qbid, kbid, params, num_heads=num_heads)
    x_out = out2d.reshape(B, S, H)

    lang_feature = x_out[:, 0, :]
    scene_hidden_states = x_out[:, NLANG:, :]
    return lang_feature, scene_hidden_states


# ------------------- matched reference: mirrors the kernel's bf16-operand policy -------------------

def _matched_layer(x2d, keep, p, l, num_heads, hidden):
    H, NH = hidden, num_heads
    dh = H // NH
    bf16 = jnp.bfloat16
    BS = x2d.shape[0]
    scale = 1.0 / math.sqrt(dh)

    wqkv = p["wqkv"][l].at[:, 0:H].multiply(scale).astype(bf16)
    bqkv = p["bqkv"][l].at[:, 0:H].multiply(scale)
    qkv = jnp.dot(x2d.astype(bf16), wqkv, preferred_element_type=jnp.float32) + bqkv
    q = qkv[:, 0:H].reshape(BS, NH, dh)
    k = qkv[:, H:2 * H].reshape(BS, NH, dh)
    v = qkv[:, 2 * H:].reshape(BS, NH, dh)

    s = jnp.einsum('qhd,khd->hqk', q.astype(bf16), k.astype(bf16),
                   preferred_element_type=jnp.float32)
    s = jnp.where(keep, s, NEG_INF)
    m = jnp.max(s, axis=-1, keepdims=True)
    e = jnp.exp(s - m)
    denom = jnp.sum(e, axis=-1, keepdims=True)
    ctx = jnp.einsum('hqk,khd->hqd', e.astype(bf16), v.astype(bf16),
                     preferred_element_type=jnp.float32)
    ctx = ctx / denom
    ctx = jnp.transpose(ctx, (1, 0, 2)).reshape(BS, H)

    attn = jnp.dot(ctx.astype(bf16), p["wo"][l].astype(bf16),
                   preferred_element_type=jnp.float32) + p["bo"][l]
    y = _layer_norm(x2d + attn, p["g1"][l], p["be1"][l])

    h1 = jnp.dot(y.astype(bf16), p["w1"][l].astype(bf16),
                 preferred_element_type=jnp.float32) + p["b1"][l]
    h1 = _gelu(h1)
    ffn = jnp.dot(h1.astype(bf16), p["w2"][l].astype(bf16),
                  preferred_element_type=jnp.float32) + p["b2"][l]
    return _layer_norm(y + ffn, p["g2"][l], p["be2"][l])


def sem_encoder_matched_ref(lang_rep, obj_rep, lang_mask, params, *, num_heads):
    B, NLANG, H = lang_rep.shape
    NS = obj_rep.shape[1]
    S = NLANG + NS
    BS = B * S
    qbid, kbid = _mask_vectors(lang_mask, B, NLANG, NS)
    keep = qbid == kbid                                           # (BS, BS)
    x = jnp.concatenate([lang_rep, obj_rep], axis=1).astype(jnp.float32).reshape(BS, H)
    for l in range(params["wqkv"].shape[0]):
        x = _matched_layer(x, keep, params, l, num_heads, H)
    x = x.reshape(B, S, H)
    return x[:, 0, :], x[:, NLANG:, :]


# ------------------- independent pure-f32 reference (PyTorch semantics) -------------------

def _gelu_exact(x):
    return 0.5 * x * (1.0 + jax.lax.erf(x / math.sqrt(2.0)))


def _ref_encoder_layer(x, pad_bias, p, l, num_heads):
    B, S, H = x.shape
    dh = H // num_heads
    qkv = x @ p["wqkv"][l] + p["bqkv"][l]
    q, k, v = qkv[..., :H], qkv[..., H:2 * H], qkv[..., 2 * H:]

    def heads(t):
        return t.reshape(B, S, num_heads, dh).transpose(0, 2, 1, 3)

    qh, kh, vh = heads(q), heads(k), heads(v)
    s = jnp.einsum("bhqd,bhkd->bhqk", qh, kh) / math.sqrt(dh)
    s = s + pad_bias[:, None, :, :]
    probs = jax.nn.softmax(s, axis=-1)
    ctx = jnp.einsum("bhqk,bhkd->bhqd", probs, vh).transpose(0, 2, 1, 3).reshape(B, S, H)
    y = _layer_norm(x + ctx @ p["wo"][l] + p["bo"][l], p["g1"][l], p["be1"][l])
    ffn = _gelu_exact(y @ p["w1"][l] + p["b1"][l])
    return _layer_norm(y + ffn @ p["w2"][l] + p["b2"][l], p["g2"][l], p["be2"][l])


def sem_encoder_ref(lang_rep, obj_rep, lang_mask, obj_mask, params, *, num_heads):
    del obj_mask
    B, NLANG, H = lang_rep.shape
    NS = obj_rep.shape[1]
    padding = jnp.concatenate([lang_mask.astype(bool), jnp.zeros((B, NS), bool)], axis=1)
    pad_bias = jnp.where(padding, NEG_INF, 0.0).astype(jnp.float32)[:, None, :]
    x = jnp.concatenate([lang_rep, obj_rep], axis=1).astype(jnp.float32)
    for l in range(params["wqkv"].shape[0]):
        x = _ref_encoder_layer(x, pad_bias, params, l, num_heads)
    return x[:, 0, :], x[:, NLANG:, :]


# ----------------------------- deterministic parameter init (layer-stacked) -----------------------------

def init_params(key, H, F, num_layers, scale=0.05):
    L = num_layers
    ks = jax.random.split(key, 8)
    return dict(
        wqkv=jax.random.normal(ks[0], (L, H, 3 * H), jnp.float32) * scale,
        bqkv=jax.random.normal(ks[1], (L, 1, 3 * H), jnp.float32) * scale,
        wo=jax.random.normal(ks[2], (L, H, H), jnp.float32) * scale,
        bo=jax.random.normal(ks[3], (L, 1, H), jnp.float32) * scale,
        g1=jnp.ones((L, 1, H), jnp.float32),
        be1=jnp.zeros((L, 1, H), jnp.float32),
        w1=jax.random.normal(ks[4], (L, H, F), jnp.float32) * scale,
        b1=jax.random.normal(ks[5], (L, 1, F), jnp.float32) * scale,
        w2=jax.random.normal(ks[6], (L, F, H), jnp.float32) * scale,
        b2=jax.random.normal(ks[7], (L, 1, H), jnp.float32) * scale,
        g2=jnp.ones((L, 1, H), jnp.float32),
        be2=jnp.zeros((L, 1, H), jnp.float32),
    )


# ----------------------------- main -----------------------------

if __name__ == "__main__":
    B, NLANG, NS = 2, 6, 10       # S = NLANG + NS = 16 tokens, B*S = 32 rows
    H, NH, NLAYERS = 64, 8, 3     # hidden_size=64, num_heads=8, num_layers=3
    F = 2048                      # dim_feedforward hardcoded in the module

    key = jax.random.PRNGKey(0)
    k1, k2, kp = jax.random.split(key, 3)
    lang_rep = jax.random.normal(k1, (B, NLANG, H), jnp.float32)
    obj_rep = jax.random.normal(k2, (B, NS, H), jnp.float32)
    lang_mask = jnp.array([[False, False, False, False, False, False],
                           [False, False, False, False, True, True]], dtype=bool)
    obj_mask = jnp.zeros((B, NS), dtype=bool)  # ignored: forward recreates it as zeros

    params = init_params(kp, H, F, NLAYERS)

    lang_feat, scene_hs = sem_encoder_forward(lang_rep, obj_rep, lang_mask, obj_mask,
                                              params, num_heads=NH)
    jax.block_until_ready((lang_feat, scene_hs))

    # shape / finiteness sanity
    assert lang_feat.shape == (B, H)
    assert scene_hs.shape == (B, NS, H)
    assert bool(jnp.all(jnp.isfinite(lang_feat))) and bool(jnp.all(jnp.isfinite(scene_hs)))

    # (a) tight check against a reference that mirrors the kernel's bf16-operand policy
    lf_m, sh_m = sem_encoder_matched_ref(lang_rep, obj_rep, lang_mask, params, num_heads=NH)
    assert bool(jnp.allclose(lang_feat, lf_m, atol=1e-2, rtol=1e-2))
    assert bool(jnp.allclose(scene_hs, sh_m, atol=1e-2, rtol=1e-2))

    # (b) gross-sanity check against an independent pure-f32 PyTorch-semantics reference
    lf_ref, sh_ref = sem_encoder_ref(lang_rep, obj_rep, lang_mask, obj_mask,
                                     params, num_heads=NH)
    assert bool(jnp.allclose(lang_feat, lf_ref, atol=1e-1, rtol=1e-1))
    assert bool(jnp.allclose(scene_hs, sh_ref, atol=1e-1, rtol=1e-1))

    print("KERNEL_OK")
</pallas_src>

<mosaic_0001>
module attributes {stable_mosaic.version = 11 : i64} {
  func.func @_fused_encoder_kernel(%arg0: i32, %arg1: memref<32x1xi32, #tpu.memory_space<vmem>>, %arg2: memref<1x32xi32, #tpu.memory_space<vmem>>, %arg3: memref<32x64xf32, #tpu.memory_space<vmem>>, %arg4: memref<1x64x192xbf16, #tpu.memory_space<vmem>>, %arg5: memref<1x1x192xf32, #tpu.memory_space<vmem>>, %arg6: memref<1x64x64xbf16, #tpu.memory_space<vmem>>, %arg7: memref<1x1x64xf32, #tpu.memory_space<vmem>>, %arg8: memref<1x1x64xf32, #tpu.memory_space<vmem>>, %arg9: memref<1x1x64xf32, #tpu.memory_space<vmem>>, %arg10: memref<1x64x2048xbf16, #tpu.memory_space<vmem>>, %arg11: memref<1x1x2048xf32, #tpu.memory_space<vmem>>, %arg12: memref<1x2048x64xbf16, #tpu.memory_space<vmem>>, %arg13: memref<1x1x64xf32, #tpu.memory_space<vmem>>, %arg14: memref<1x1x64xf32, #tpu.memory_space<vmem>>, %arg15: memref<1x1x64xf32, #tpu.memory_space<vmem>>, %arg16: memref<32x64xf32, #tpu.memory_space<vmem>>) attributes {dimension_semantics = [#tpu.dimension_semantics<arbitrary>], iteration_bounds = array<i64: 3>, scalar_prefetch = 0 : i64, scratch_operands = 0 : i64, tpu.core_type = #tpu.core_type<tc>, window_params = [{pipeline_mode = #tpu.pipeline_mode<synchronous>, transform_indices = @transform_0, window_bounds = array<i64: 32, 1>}, {pipeline_mode = #tpu.pipeline_mode<synchronous>, transform_indices = @transform_1, window_bounds = array<i64: 1, 32>}, {pipeline_mode = #tpu.pipeline_mode<synchronous>, transform_indices = @transform_2, window_bounds = array<i64: 32, 64>}, {transform_indices = @transform_3, window_bounds = array<i64: 1, 64, 192>}, {transform_indices = @transform_4, window_bounds = array<i64: 1, 1, 192>}, {transform_indices = @transform_5, window_bounds = array<i64: 1, 64, 64>}, {transform_indices = @transform_6, window_bounds = array<i64: 1, 1, 64>}, {transform_indices = @transform_7, window_bounds = array<i64: 1, 1, 64>}, {transform_indices = @transform_8, window_bounds = array<i64: 1, 1, 64>}, {transform_indices = @transform_9, window_bounds = array<i64: 1, 64, 2048>}, {transform_indices = @transform_10, window_bounds = array<i64: 1, 1, 2048>}, {transform_indices = @transform_11, window_bounds = array<i64: 1, 2048, 64>}, {transform_indices = @transform_12, window_bounds = array<i64: 1, 1, 64>}, {transform_indices = @transform_13, window_bounds = array<i64: 1, 1, 64>}, {transform_indices = @transform_14, window_bounds = array<i64: 1, 1, 64>}, {pipeline_mode = #tpu.pipeline_mode<synchronous>, transform_indices = @transform_15, window_bounds = array<i64: 32, 64>}]} {
    %c0_i32 = arith.constant 0 : i32
    %0 = arith.cmpi eq, %arg0, %c0_i32 : i32
    %1 = arith.extui %0 : i1 to i32
    %c0_i32_0 = arith.constant 0 : i32
    %2 = arith.cmpi ne, %1, %c0_i32_0 : i32
    scf.if %2 {
      %c0_77 = arith.constant 0 : index
      %c0_78 = arith.constant 0 : index
      %164 = vector.load %arg3[%c0_77, %c0_78] : memref<32x64xf32, #tpu.memory_space<vmem>>, vector<32x64xf32>
      %c0_79 = arith.constant 0 : index
      %c0_80 = arith.constant 0 : index
      %165 = vector.load %arg16[%c0_79, %c0_80] : memref<32x64xf32, #tpu.memory_space<vmem>>, vector<32x64xf32>
      tpu.vector_store %arg16[%c0_79, %c0_80], %164 {strides = array<i32>} : memref<32x64xf32, #tpu.memory_space<vmem>>, vector<32x64xf32>,
    } else {
    }
    %c0 = arith.constant 0 : index
    %c0_1 = arith.constant 0 : index
    %3 = vector.load %arg16[%c0, %c0_1] : memref<32x64xf32, #tpu.memory_space<vmem>>, vector<32x64xf32>
    %c0_2 = arith.constant 0 : index
    %c0_3 = arith.constant 0 : index
    %4 = vector.load %arg1[%c0_2, %c0_3] : memref<32x1xi32, #tpu.memory_space<vmem>>, vector<32x1xi32>
    %c0_4 = arith.constant 0 : index
    %c0_5 = arith.constant 0 : index
    %5 = vector.load %arg2[%c0_4, %c0_5] : memref<1x32xi32, #tpu.memory_space<vmem>>, vector<1x32xi32>
    %6 = vector.broadcast %4 : vector<32x1xi32> to vector<32x32xi32>
    %7 = vector.broadcast %5 : vector<1x32xi32> to vector<32x32xi32>
    %8 = arith.cmpi eq, %6, %7 : vector<32x32xi32>
    %9 = arith.truncf %3 : vector<32x64xf32> to vector<32x64xbf16>
    %c0_6 = arith.constant 0 : index
    %c0_7 = arith.constant 0 : index
    %c0_8 = arith.constant 0 : index
    %10 = vector.load %arg4[%c0_6, %c0_7, %c0_8] : memref<1x64x192xbf16, #tpu.memory_space<vmem>>, vector<1x64x192xbf16>
    %11 = vector.shape_cast %10 : vector<1x64x192xbf16> to vector<64x192xbf16>
    %cst = arith.constant dense<0.000000e+00> : vector<32x192xf32>
    %12 = tpu.matmul %9, %11, %cst {dimension_numbers = #tpu.dot_dimension_numbers<[1], [0], [0], [1], [0, 0, 1, 1], [], []>} : vector<32x64xbf16>, vector<64x192xbf16>, vector<32x192xf32> -> vector<32x192xf32>
    %c0_9 = arith.constant 0 : index
    %c0_10 = arith.constant 0 : index
    %c0_11 = arith.constant 0 : index
    %13 = vector.load %arg5[%c0_9, %c0_10, %c0_11] : memref<1x1x192xf32, #tpu.memory_space<vmem>>, vector<1x1x192xf32>
    %14 = vector.shape_cast %13 : vector<1x1x192xf32> to vector<1x192xf32>
    %15 = vector.broadcast %14 : vector<1x192xf32> to vector<32x192xf32>
    %16 = arith.addf %12, %15 : vector<32x192xf32>
    %17 = vector.extract_strided_slice %16 {offsets = [0, 0], sizes = [32, 64], strides = [1, 1]} : vector<32x192xf32> to vector<32x64xf32>
    %18 = vector.shape_cast %17 : vector<32x64xf32> to vector<32x8x8xf32>
    %19 = vector.extract_strided_slice %16 {offsets = [0, 64], sizes = [32, 64], strides = [1, 1]} : vector<32x192xf32> to vector<32x64xf32>
    %20 = vector.shape_cast %19 : vector<32x64xf32> to vector<32x8x8xf32>
    %21 = vector.extract_strided_slice %16 {offsets = [0, 128], sizes = [32, 64], strides = [1, 1]} : vector<32x192xf32> to vector<32x64xf32>
    %22 = vector.shape_cast %21 : vector<32x64xf32> to vector<32x8x8xf32>
    %23 = arith.truncf %18 : vector<32x8x8xf32> to vector<32x8x8xbf16>
    %24 = arith.truncf %20 : vector<32x8x8xf32> to vector<32x8x8xbf16>
    "tpu.trace_start"() <{level = 10 : i32, message = "qhd,khd->hqk"}> : () -> ()
    %cst_12 = arith.constant dense<0.000000e+00> : vector<8x32x32xf32>
    %25 = tpu.matmul %23, %24, %cst_12 {dimension_numbers = #tpu.dot_dimension_numbers<[2], [2], [0], [0], [0, 1, 0, 0, 1, 0], [1], [1]>} : vector<32x8x8xbf16>, vector<32x8x8xbf16>, vector<8x32x32xf32> -> vector<8x32x32xf32>
    %cst_13 = arith.constant -1.000000e+30 : f32
    "tpu.trace_stop"() : () -> ()
    %26 = vector.shape_cast %8 : vector<32x32xi1> to vector<1x32x32xi1>
    %27 = vector.broadcast %26 : vector<1x32x32xi1> to vector<8x32x32xi1>
    %28 = vector.broadcast %cst_13 : f32 to vector<8x32x32xf32>
    %29 = arith.select %27, %25, %28 : vector<8x32x32xi1>, vector<8x32x32xf32>
    %cst_14 = arith.constant dense<0xFF800000> : vector<8x32xf32>
    %30 = vector.multi_reduction <maximumf>, %29, %cst_14 [2] : vector<8x32x32xf32> to vector<8x32xf32>
    %31 = vector.shape_cast %30 : vector<8x32xf32> to vector<8x32x1xf32>
    %32 = vector.broadcast %31 : vector<8x32x1xf32> to vector<8x32x32xf32>
    %33 = arith.subf %29, %32 : vector<8x32x32xf32>
    %34 = math.exp %33 : vector<8x32x32xf32>
    %cst_15 = arith.constant dense<0.000000e+00> : vector<8x32xf32>
    %35 = vector.multi_reduction <add>, %34, %cst_15 [2] : vector<8x32x32xf32> to vector<8x32xf32>
    %36 = vector.shape_cast %35 : vector<8x32xf32> to vector<8x32x1xf32>
    %37 = arith.truncf %34 : vector<8x32x32xf32> to vector<8x32x32xbf16>
    %38 = arith.truncf %22 : vector<32x8x8xf32> to vector<32x8x8xbf16>
    "tpu.trace_start"() <{level = 10 : i32, message = "hqk,khd->hqd"}> : () -> ()
    %cst_16 = arith.constant dense<0.000000e+00> : vector<8x32x8xf32>
    %39 = tpu.matmul %37, %38, %cst_16 {dimension_numbers = #tpu.dot_dimension_numbers<[2], [0], [1], [2], [0, 0, 0, 1, 1, 2], [0], [1]>} : vector<8x32x32xbf16>, vector<32x8x8xbf16>, vector<8x32x8xf32> -> vector<8x32x8xf32>
    "tpu.trace_stop"() : () -> ()
    %40 = tpu.reciprocal %36 {approx = true} : vector<8x32x1xf32> -> vector<8x32x1xf32>
    %41 = vector.broadcast %40 : vector<8x32x1xf32> to vector<8x32x8xf32>
    %42 = arith.mulf %39, %41 : vector<8x32x8xf32>
    %43 = tpu.transpose %42, [1, 0, 2] : vector<8x32x8xf32> -> vector<32x8x8xf32>
    %44 = vector.shape_cast %43 : vector<32x8x8xf32> to vector<32x64xf32>
    %45 = arith.truncf %44 : vector<32x64xf32> to vector<32x64xbf16>
    %c0_17 = arith.constant 0 : index
    %c0_18 = arith.constant 0 : index
    %c0_19 = arith.constant 0 : index
    %46 = vector.load %arg6[%c0_17, %c0_18, %c0_19] : memref<1x64x64xbf16, #tpu.memory_space<vmem>>, vector<1x64x64xbf16>
    %47 = vector.shape_cast %46 : vector<1x64x64xbf16> to vector<64x64xbf16>
    %cst_20 = arith.constant dense<0.000000e+00> : vector<32x64xf32>
    %48 = tpu.matmul %45, %47, %cst_20 {dimension_numbers = #tpu.dot_dimension_numbers<[1], [0], [0], [1], [0, 0, 1, 1], [], []>} : vector<32x64xbf16>, vector<64x64xbf16>, vector<32x64xf32> -> vector<32x64xf32>
    %c0_21 = arith.constant 0 : index
    %c0_22 = arith.constant 0 : index
    %c0_23 = arith.constant 0 : index
    %49 = vector.load %arg7[%c0_21, %c0_22, %c0_23] : memref<1x1x64xf32, #tpu.memory_space<vmem>>, vector<1x1x64xf32>
    %50 = vector.shape_cast %49 : vector<1x1x64xf32> to vector<1x64xf32>
    %51 = vector.broadcast %50 : vector<1x64xf32> to vector<32x64xf32>
    %52 = arith.addf %48, %51 : vector<32x64xf32>
    %53 = arith.addf %3, %52 : vector<32x64xf32>
    %c0_24 = arith.constant 0 : index
    %c0_25 = arith.constant 0 : index
    %c0_26 = arith.constant 0 : index
    %54 = vector.load %arg8[%c0_24, %c0_25, %c0_26] : memref<1x1x64xf32, #tpu.memory_space<vmem>>, vector<1x1x64xf32>
    %55 = vector.shape_cast %54 : vector<1x1x64xf32> to vector<1x64xf32>
    %c0_27 = arith.constant 0 : index
    %c0_28 = arith.constant 0 : index
    %c0_29 = arith.constant 0 : index
    %56 = vector.load %arg9[%c0_27, %c0_28, %c0_29] : memref<1x1x64xf32, #tpu.memory_space<vmem>>, vector<1x1x64xf32>
    %57 = vector.shape_cast %56 : vector<1x1x64xf32> to vector<1x64xf32>
    %cst_30 = arith.constant dense<0.000000e+00> : vector<32xf32>
    %58 = vector.multi_reduction <add>, %53, %cst_30 [1] : vector<32x64xf32> to vector<32xf32>
    %59 = vector.shape_cast %58 : vector<32xf32> to vector<32x1xf32>
    %cst_31 = arith.constant 6.400000e+01 : f32
    %60 = vector.broadcast %cst_31 : f32 to vector<32x1xf32>
    %61 = arith.divf %59, %60 : vector<32x1xf32>
    %62 = vector.broadcast %61 : vector<32x1xf32> to vector<32x64xf32>
    %63 = arith.subf %53, %62 : vector<32x64xf32>
    %64 = arith.mulf %63, %63 : vector<32x64xf32>
    %cst_32 = arith.constant dense<0.000000e+00> : vector<32xf32>
    %65 = vector.multi_reduction <add>, %64, %cst_32 [1] : vector<32x64xf32> to vector<32xf32>
    %66 = vector.shape_cast %65 : vector<32xf32> to vector<32x1xf32>
    %cst_33 = arith.constant 6.400000e+01 : f32
    %67 = vector.broadcast %cst_33 : f32 to vector<32x1xf32>
    %68 = arith.divf %66, %67 : vector<32x1xf32>
    %69 = vector.broadcast %61 : vector<32x1xf32> to vector<32x64xf32>
    %70 = arith.subf %53, %69 : vector<32x64xf32>
    %cst_34 = arith.constant 9.99999974E-6 : f32
    %71 = vector.broadcast %cst_34 : f32 to vector<32x1xf32>
    %72 = arith.addf %68, %71 : vector<32x1xf32>
    %73 = math.rsqrt %72 : vector<32x1xf32>
    %74 = vector.broadcast %73 : vector<32x1xf32> to vector<32x64xf32>
    %75 = arith.mulf %70, %74 : vector<32x64xf32>
    %76 = vector.broadcast %55 : vector<1x64xf32> to vector<32x64xf32>
    %77 = arith.mulf %75, %76 : vector<32x64xf32>
    %78 = vector.broadcast %57 : vector<1x64xf32> to vector<32x64xf32>
    %79 = arith.addf %77, %78 : vector<32x64xf32>
    %80 = arith.truncf %79 : vector<32x64xf32> to vector<32x64xbf16>
    %c0_35 = arith.constant 0 : index
    %c0_36 = arith.constant 0 : index
    %c0_37 = arith.constant 0 : index
    %81 = vector.load %arg10[%c0_35, %c0_36, %c0_37] : memref<1x64x2048xbf16, #tpu.memory_space<vmem>>, vector<1x64x2048xbf16>
    %82 = vector.shape_cast %81 : vector<1x64x2048xbf16> to vector<64x2048xbf16>
    %cst_38 = arith.constant dense<0.000000e+00> : vector<32x2048xf32>
    %83 = tpu.matmul %80, %82, %cst_38 {dimension_numbers = #tpu.dot_dimension_numbers<[1], [0], [0], [1], [0, 0, 1, 1], [], []>} : vector<32x64xbf16>, vector<64x2048xbf16>, vector<32x2048xf32> -> vector<32x2048xf32>
    %c0_39 = arith.constant 0 : index
    %c0_40 = arith.constant 0 : index
    %c0_41 = arith.constant 0 : index
    %84 = vector.load %arg11[%c0_39, %c0_40, %c0_41] : memref<1x1x2048xf32, #tpu.memory_space<vmem>>, vector<1x1x2048xf32>
    %85 = vector.shape_cast %84 : vector<1x1x2048xf32> to vector<1x2048xf32>
    %86 = vector.broadcast %85 : vector<1x2048xf32> to vector<32x2048xf32>
    %87 = arith.addf %83, %86 : vector<32x2048xf32>
    %cst_42 = arith.constant 5.000000e-01 : f32
    %88 = vector.broadcast %cst_42 : f32 to vector<32x2048xf32>
    %89 = arith.mulf %88, %87 : vector<32x2048xf32>
    %cst_43 = arith.constant 0.707106769 : f32
    %90 = vector.broadcast %cst_43 : f32 to vector<32x2048xf32>
    %91 = arith.mulf %87, %90 : vector<32x2048xf32>
    %92 = math.absf %91 : vector<32x2048xf32>
    %cst_44 = arith.constant 0.327591091 : f32
    %93 = vector.broadcast %cst_44 : f32 to vector<32x2048xf32>
    %94 = arith.mulf %93, %92 : vector<32x2048xf32>
    %cst_45 = arith.constant 1.000000e+00 : f32
    %95 = vector.broadcast %cst_45 : f32 to vector<32x2048xf32>
    %96 = arith.addf %95, %94 : vector<32x2048xf32>
    %cst_46 = arith.constant 1.000000e+00 : f32
    %97 = vector.broadcast %cst_46 : f32 to vector<32x2048xf32>
    %98 = arith.divf %97, %96 : vector<32x2048xf32>
    %cst_47 = arith.constant 1.06140542 : f32
    %99 = vector.broadcast %cst_47 : f32 to vector<32x2048xf32>
    %100 = arith.mulf %99, %98 : vector<32x2048xf32>
    %cst_48 = arith.constant -1.45315206 : f32
    %101 = vector.broadcast %cst_48 : f32 to vector<32x2048xf32>
    %102 = arith.addf %100, %101 : vector<32x2048xf32>
    %103 = arith.mulf %102, %98 : vector<32x2048xf32>
    %cst_49 = arith.constant 1.42141378 : f32
    %104 = vector.broadcast %cst_49 : f32 to vector<32x2048xf32>
    %105 = arith.addf %103, %104 : vector<32x2048xf32>
    %106 = arith.mulf %105, %98 : vector<32x2048xf32>
    %cst_50 = arith.constant -0.284496725 : f32
    %107 = vector.broadcast %cst_50 : f32 to vector<32x2048xf32>
    %108 = arith.addf %106, %107 : vector<32x2048xf32>
    %109 = arith.mulf %108, %98 : vector<32x2048xf32>
    %cst_51 = arith.constant 0.254829586 : f32
    %110 = vector.broadcast %cst_51 : f32 to vector<32x2048xf32>
    %111 = arith.addf %109, %110 : vector<32x2048xf32>
    %112 = arith.mulf %111, %98 : vector<32x2048xf32>
    %cst_52 = arith.constant 0.000000e+00 : f32
    %113 = vector.broadcast %cst_52 : f32 to vector<32x2048xf32>
    %114 = arith.subf %113, %92 : vector<32x2048xf32>
    %115 = arith.mulf %114, %92 : vector<32x2048xf32>
    %116 = math.exp %115 : vector<32x2048xf32>
    %117 = arith.mulf %112, %116 : vector<32x2048xf32>
    %cst_53 = arith.constant 1.000000e+00 : f32
    %118 = vector.broadcast %cst_53 : f32 to vector<32x2048xf32>
    %119 = arith.subf %118, %117 : vector<32x2048xf32>
    %cst_54 = arith.constant 0.000000e+00 : f32
    %120 = vector.broadcast %cst_54 : f32 to vector<32x2048xf32>
    %121 = arith.cmpf oge, %91, %120 : vector<32x2048xf32>
    %cst_55 = arith.constant 0.000000e+00 : f32
    %122 = vector.broadcast %cst_55 : f32 to vector<32x2048xf32>
    %123 = arith.subf %122, %119 : vector<32x2048xf32>
    %124 = arith.select %121, %119, %123 : vector<32x2048xi1>, vector<32x2048xf32>
    %cst_56 = arith.constant 1.000000e+00 : f32
    %125 = vector.broadcast %cst_56 : f32 to vector<32x2048xf32>
    %126 = arith.addf %125, %124 : vector<32x2048xf32>
    %127 = arith.mulf %89, %126 : vector<32x2048xf32>
    %128 = arith.truncf %127 : vector<32x2048xf32> to vector<32x2048xbf16>
    %c0_57 = arith.constant 0 : index
    %c0_58 = arith.constant 0 : index
    %c0_59 = arith.constant 0 : index
    %129 = vector.load %arg12[%c0_57, %c0_58, %c0_59] : memref<1x2048x64xbf16, #tpu.memory_space<vmem>>, vector<1x2048x64xbf16>
    %130 = vector.shape_cast %129 : vector<1x2048x64xbf16> to vector<2048x64xbf16>
    %cst_60 = arith.constant dense<0.000000e+00> : vector<32x64xf32>
    %131 = tpu.matmul %128, %130, %cst_60 {dimension_numbers = #tpu.dot_dimension_numbers<[1], [0], [0], [1], [0, 0, 1, 1], [], []>} : vector<32x2048xbf16>, vector<2048x64xbf16>, vector<32x64xf32> -> vector<32x64xf32>
    %c0_61 = arith.constant 0 : index
    %c0_62 = arith.constant 0 : index
    %c0_63 = arith.constant 0 : index
    %132 = vector.load %arg13[%c0_61, %c0_62, %c0_63] : memref<1x1x64xf32, #tpu.memory_space<vmem>>, vector<1x1x64xf32>
    %133 = vector.shape_cast %132 : vector<1x1x64xf32> to vector<1x64xf32>
    %134 = vector.broadcast %133 : vector<1x64xf32> to vector<32x64xf32>
    %135 = arith.addf %131, %134 : vector<32x64xf32>
    %136 = arith.addf %79, %135 : vector<32x64xf32>
    %c0_64 = arith.constant 0 : index
    %c0_65 = arith.constant 0 : index
    %c0_66 = arith.constant 0 : index
    %137 = vector.load %arg14[%c0_64, %c0_65, %c0_66] : memref<1x1x64xf32, #tpu.memory_space<vmem>>, vector<1x1x64xf32>
    %138 = vector.shape_cast %137 : vector<1x1x64xf32> to vector<1x64xf32>
    %c0_67 = arith.constant 0 : index
    %c0_68 = arith.constant 0 : index
    %c0_69 = arith.constant 0 : index
    %139 = vector.load %arg15[%c0_67, %c0_68, %c0_69] : memref<1x1x64xf32, #tpu.memory_space<vmem>>, vector<1x1x64xf32>
    %140 = vector.shape_cast %139 : vector<1x1x64xf32> to vector<1x64xf32>
    %cst_70 = arith.constant dense<0.000000e+00> : vector<32xf32>
    %141 = vector.multi_reduction <add>, %136, %cst_70 [1] : vector<32x64xf32> to vector<32xf32>
    %142 = vector.shape_cast %141 : vector<32xf32> to vector<32x1xf32>
    %cst_71 = arith.constant 6.400000e+01 : f32
    %143 = vector.broadcast %cst_71 : f32 to vector<32x1xf32>
    %144 = arith.divf %142, %143 : vector<32x1xf32>
    %145 = vector.broadcast %144 : vector<32x1xf32> to vector<32x64xf32>
    %146 = arith.subf %136, %145 : vector<32x64xf32>
    %147 = arith.mulf %146, %146 : vector<32x64xf32>
    %cst_72 = arith.constant dense<0.000000e+00> : vector<32xf32>
    %148 = vector.multi_reduction <add>, %147, %cst_72 [1] : vector<32x64xf32> to vector<32xf32>
    %149 = vector.shape_cast %148 : vector<32xf32> to vector<32x1xf32>
    %cst_73 = arith.constant 6.400000e+01 : f32
    %150 = vector.broadcast %cst_73 : f32 to vector<32x1xf32>
    %151 = arith.divf %149, %150 : vector<32x1xf32>
    %152 = vector.broadcast %144 : vector<32x1xf32> to vector<32x64xf32>
    %153 = arith.subf %136, %152 : vector<32x64xf32>
    %cst_74 = arith.constant 9.99999974E-6 : f32
    %154 = vector.broadcast %cst_74 : f32 to vector<32x1xf32>
    %155 = arith.addf %151, %154 : vector<32x1xf32>
    %156 = math.rsqrt %155 : vector<32x1xf32>
    %157 = vector.broadcast %156 : vector<32x1xf32> to vector<32x64xf32>
    %158 = arith.mulf %153, %157 : vector<32x64xf32>
    %159 = vector.broadcast %138 : vector<1x64xf32> to vector<32x64xf32>
    %160 = arith.mulf %158, %159 : vector<32x64xf32>
    %161 = vector.broadcast %140 : vector<1x64xf32> to vector<32x64xf32>
    %162 = arith.addf %160, %161 : vector<32x64xf32>
    %c0_75 = arith.constant 0 : index
    %c0_76 = arith.constant 0 : index
    %163 = vector.load %arg16[%c0_75, %c0_76] : memref<32x64xf32, #tpu.memory_space<vmem>>, vector<32x64xf32>
    tpu.vector_store %arg16[%c0_75, %c0_76], %162 {strides = array<i32>} : memref<32x64xf32, #tpu.memory_space<vmem>>, vector<32x64xf32>,
    return
  }
  func.func @transform_0(%arg0: i32) -> (i32, i32) {
    %c0_i32 = arith.constant 0 : i32
    %c0_i32_0 = arith.constant 0 : i32
    %c0_i32_1 = arith.constant 0 : i32
    return %c0_i32, %c0_i32_0 : i32, i32
  }
  func.func @transform_1(%arg0: i32) -> (i32, i32) {
    %c0_i32 = arith.constant 0 : i32
    %c0_i32_0 = arith.constant 0 : i32
    %c0_i32_1 = arith.constant 0 : i32
    return %c0_i32, %c0_i32_0 : i32, i32
  }
  func.func @transform_2(%arg0: i32) -> (i32, i32) {
    %c0_i32 = arith.constant 0 : i32
    %c0_i32_0 = arith.constant 0 : i32
    %c0_i32_1 = arith.constant 0 : i32
    return %c0_i32, %c0_i32_0 : i32, i32
  }
  func.func @transform_3(%arg0: i32) -> (i32, i32, i32) {
    %c0_i32 = arith.constant 0 : i32
    %c0_i32_0 = arith.constant 0 : i32
    %c0_i32_1 = arith.constant 0 : i32
    return %arg0, %c0_i32, %c0_i32_0 : i32, i32, i32
  }
  func.func @transform_4(%arg0: i32) -> (i32, i32, i32) {
    %c0_i32 = arith.constant 0 : i32
    %c0_i32_0 = arith.constant 0 : i32
    %c0_i32_1 = arith.constant 0 : i32
    return %arg0, %c0_i32, %c0_i32_0 : i32, i32, i32
  }
  func.func @transform_5(%arg0: i32) -> (i32, i32, i32) {
    %c0_i32 = arith.constant 0 : i32
    %c0_i32_0 = arith.constant 0 : i32
    %c0_i32_1 = arith.constant 0 : i32
    return %arg0, %c0_i32, %c0_i32_0 : i32, i32, i32
  }
  func.func @transform_6(%arg0: i32) -> (i32, i32, i32) {
    %c0_i32 = arith.constant 0 : i32
    %c0_i32_0 = arith.constant 0 : i32
    %c0_i32_1 = arith.constant 0 : i32
    return %arg0, %c0_i32, %c0_i32_0 : i32, i32, i32
  }
  func.func @transform_7(%arg0: i32) -> (i32, i32, i32) {
    %c0_i32 = arith.constant 0 : i32
    %c0_i32_0 = arith.constant 0 : i32
    %c0_i32_1 = arith.constant 0 : i32
    return %arg0, %c0_i32, %c0_i32_0 : i32, i32, i32
  }
  func.func @transform_8(%arg0: i32) -> (i32, i32, i32) {
    %c0_i32 = arith.constant 0 : i32
    %c0_i32_0 = arith.constant 0 : i32
    %c0_i32_1 = arith.constant 0 : i32
    return %arg0, %c0_i32, %c0_i32_0 : i32, i32, i32
  }
  func.func @transform_9(%arg0: i32) -> (i32, i32, i32) {
    %c0_i32 = arith.constant 0 : i32
    %c0_i32_0 = arith.constant 0 : i32
    %c0_i32_1 = arith.constant 0 : i32
    return %arg0, %c0_i32, %c0_i32_0 : i32, i32, i32
  }
  func.func @transform_10(%arg0: i32) -> (i32, i32, i32) {
    %c0_i32 = arith.constant 0 : i32
    %c0_i32_0 = arith.constant 0 : i32
    %c0_i32_1 = arith.constant 0 : i32
    return %arg0, %c0_i32, %c0_i32_0 : i32, i32, i32
  }
  func.func @transform_11(%arg0: i32) -> (i32, i32, i32) {
    %c0_i32 = arith.constant 0 : i32
    %c0_i32_0 = arith.constant 0 : i32
    %c0_i32_1 = arith.constant 0 : i32
    return %arg0, %c0_i32, %c0_i32_0 : i32, i32, i32
  }
  func.func @transform_12(%arg0: i32) -> (i32, i32, i32) {
    %c0_i32 = arith.constant 0 : i32
    %c0_i32_0 = arith.constant 0 : i32
    %c0_i32_1 = arith.constant 0 : i32
    return %arg0, %c0_i32, %c0_i32_0 : i32, i32, i32
  }
  func.func @transform_13(%arg0: i32) -> (i32, i32, i32) {
    %c0_i32 = arith.constant 0 : i32
    %c0_i32_0 = arith.constant 0 : i32
    %c0_i32_1 = arith.constant 0 : i32
    return %arg0, %c0_i32, %c0_i32_0 : i32, i32, i32
  }
  func.func @transform_14(%arg0: i32) -> (i32, i32, i32) {
    %c0_i32 = arith.constant 0 : i32
    %c0_i32_0 = arith.constant 0 : i32
    %c0_i32_1 = arith.constant 0 : i32
    return %arg0, %c0_i32, %c0_i32_0 : i32, i32, i32
  }
  func.func @transform_15(%arg0: i32) -> (i32, i32) {
    %c0_i32 = arith.constant 0 : i32
    %c0_i32_0 = arith.constant 0 : i32
    %c0_i32_1 = arith.constant 0 : i32
    return %c0_i32, %c0_i32_0 : i32, i32
  }
}

</mosaic_0001>

<bundles_post_ra>
// kernel: tpu_custom_call.1
= control target key start
LH: loop header
LB: loop body
LE: loop exit
PB: predicated region body
PF: predicated region fallthrough
CT: control target
= control target key end

     0   :  { %s17687_s0 = inlined_call_operand.vmem [shape: s32[32,1], index: 0, kind: input, shape index: {}]   ;;  %s17688_s1 = inlined_call_operand.vmem [shape: s32[1,32], index: 1, kind: input, shape index: {}]   ;;  %s17689_s2 = inlined_call_operand.vmem [shape: f32[32,64], index: 2, kind: input, shape index: {}]   ;;  %s17690_s3 = inlined_call_operand.vmem [shape: bf16[3,64,192], index: 3, kind: input, shape index: {}]   ;;  %s17691_s4 = inlined_call_operand.vmem [shape: f32[3,1,192], index: 4, kind: input, shape index: {}]   ;;  %s17692_s5 = inlined_call_operand.vmem [shape: bf16[3,64,64], index: 5, kind: input, shape index: {}]   ;;  %s17693_s6 = inlined_call_operand.vmem [shape: f32[3,1,64], index: 6, kind: input, shape index: {}]   ;;  %s17694_s7 = inlined_call_operand.vmem [shape: f32[3,1,64], index: 7, kind: input, shape index: {}]   ;;  %s17695_s8 = inlined_call_operand.vmem [shape: f32[3,1,64], index: 8, kind: input, shape index: {}]   ;;  %s17696_s9 = inlined_call_operand.vmem [shape: bf16[3,64,2048], index: 9, kind: input, shape index: {}]   ;;  %s17697_s10 = inlined_call_operand.vmem [shape: f32[3,1,2048], index: 10, kind: input, shape index: {}]   ;;  %s17698_s11 = inlined_call_operand.vmem [shape: bf16[3,2048,64], index: 11, kind: input, shape index: {}]   ;;  %s17699_s12 = inlined_call_operand.vmem [shape: f32[3,1,64], index: 12, kind: input, shape index: {}]   ;;  %s17700_s13 = inlined_call_operand.vmem [shape: f32[3,1,64], index: 13, kind: input, shape index: {}]   ;;  %s17701_s14 = inlined_call_operand.vmem [shape: f32[3,1,64], index: 14, kind: input, shape index: {}]   ;;  %s17702_s15 = inlined_call_operand.hbm [shape: f32[32,64], index: 15, kind: output, shape index: {}]  }
   0x1   :  { %17791 = sst [smem:[#allocation70_spill]] %s17687_s0 }
   0x2   :  { %17792 = sst [smem:[#allocation71_spill]] %s17688_s1 }
   0x3   :  { %17793 = sst [smem:[#allocation72_spill]] %s17690_s3 }
   0x4   :  { %17794 = sst [smem:[#allocation73_spill]] %s17691_s4 }
   0x5   :  { %17795 = sst [smem:[#allocation74_spill]] %s17692_s5 }
   0x6   :  { %17796 = sst [smem:[#allocation75_spill]] %s17702_s15 }
   0x7   :  { %20 = vsyncpa [#allocation3], 0  ;;  %s13160_s18 = smov 0  }
   0x8 LB: > { %17797 = sst [smem:[#allocation5_spill]] %s13058_s18  ;;  %s13166_s19 = sadd.s32 4294967295, %s13058_s18   ;;  %s13058_s18 = sphi %s13160_s18, %s26_s18  }
   0x9   : > { %p11601_p0 = scmp.ge.s32.totalorder %s13058_s18, 1  ;;  %p529_p1 = scmp.lt.s32.totalorder %s13058_s18, 4 }
   0xb   : > { %p530_p2 = pnand %p11601_p0, %p529_p1 }
   0xd   : > { %533 = sbr.rel (%p530_p2) target bundleno = 3500 (0xdac), region = 80 }
  0x14   : > { %p613_p3 = scmp.lt.s32.totalorder %s13166_s19, 2  ;;  %s17798_s3 = sld [smem:[#allocation72_spill]] }
  0x15   : > { %s17799_s4 = sld [smem:[#allocation73_spill]]  ;;  %s17801_s5 = sld [smem:[#allocation74_spill]] }
  0x16   : > { %s13172_s20 = scalar_select %p613_p3, %s13166_s19, 2 }
  0x17   : > { %p11612_p4 = scmp.ne.s32.totalorder %s13166_s19, 0 }
  0x18   : > { %s11944_s21 = sshll.u32 %s13172_s20, 6  ;;  %s11604_s22 = sshll.u32 %s13172_s20, 1  ;;  %v664_v0 = vld [vmem:[%s17689_s2] sm:$0xff] (!%p11612_p4)  ;;  %vm668_vm0 = vcmask (!%p11612_p4), 523264   ;;  %v665_v1 = vld [vmem:[%s17689_s2 + $0x8] sm:$0xff] (!%p11612_p4)  ;;  %v666_v2 = vld [vmem:[%s17689_s2 + $0x10] sm:$0xff] (!%p11612_p4) }
  0x19   : > { %s11945_s29 = sshll.u32 %s13172_s20, 5  ;;  %s11609_s30 = sshll.u32 %s13172_s20, 4  ;;  %669 = vst.msk [vmem:[#allocation2] sm:$0xff] (!%p11612_p4), %vm668_vm0, %v664_v0  ;;  %670 = vst.msk [vmem:[#allocation2 + $0x8] sm:$0xff] (!%p11612_p4), %vm668_vm0, %v665_v1  ;;  %v667_v3 = vld [vmem:[%s17689_s2 + $0x18] sm:$0xff] (!%p11612_p4) }
  0x1a   : > { %s13179_s25 = scalar_lea.vmem %s17798_s3, %s11944_s21  ;;  %s13214_s15 = scalar_lea.vmem %s17697_s10, %s11609_s30  ;;  %671 = vst.msk [vmem:[#allocation2 + $0x10] sm:$0xff] (!%p11612_p4), %vm668_vm0, %v666_v2  ;;  %672 = vst.msk [vmem:[#allocation2 + $0x18] sm:$0xff] (!%p11612_p4), %vm668_vm0, %v667_v3 }
  0x1b   : > { %s13184_s28 = scalar_lea.vmem %s17799_s4, %s11604_s22  ;;  %s13194_s1 = scalar_lea.vmem %s17801_s5, %s11945_s29 }
  0x1c   : > { %17800 = sst [smem:[#allocation6_spill]] %s13184_s28  ;;  %s11946_s22 = sshll.u32 %s13172_s20, 9 }
  0x1d   : > { %s13208_s28 = scalar_lea.vmem %s17696_s9, %s11946_s22  ;;  %s11947_s18 = sshll.u32 %s13172_s20, 10 }
  0x1e   : > { %s13220_s23 = scalar_lea.vmem %s17698_s11, %s11947_s18  ;;  %663 = sbr.rel (%p11612_p4) target bundleno = 37 (0x25), region = 84 }
  0x25 PF: > { %v12472_v4 = vld [vmem:[%s13179_s25 + $0x4] ss:$8 sps:$4 sm:$0xff]   ;;  %v12474_v5 = vld [vmem:[%s13179_s25] ss:$8 sps:$4 sm:$0xff]   ;;  %v17707_v6 = vmov 0   ;;  %vm764_vm1 = vcmask 523264   ;;  %v714_v19 = vlaneseq  ;;  %s17834_s26 = scalar_lea.vmem %s17694_s7, %s13172_s20 }
  0x26   : > { %803 = vmatprep.mubr.bf16.mxu0 %v17707_v6  ;;  %771 = vmatprep.subr.bf16.mxu0 %v12472_v4  ;;  %v12475_v7 = vld [vmem:[%s13179_s25 + $0x14] ss:$8 sps:$4 sm:$0xff]   ;;  %v12477_v8 = vld [vmem:[%s13179_s25 + $0x10] ss:$8 sps:$4 sm:$0xff]   ;;  %v12478_v9 = vld [vmem:[%s13179_s25 + $0x24] ss:$8 sps:$4 sm:$0xff]  }
  0x27   : > { %772 = vmatpush1.bf16.msra.mxu0 %v12474_v5  ;;  %v12480_v10 = vld [vmem:[%s13179_s25 + $0x20] ss:$8 sps:$4 sm:$0xff]   ;;  %v12481_v11 = vld [vmem:[%s13179_s25 + $0x34] ss:$8 sps:$4 sm:$0xff]   ;;  %v12483_v12 = vld [vmem:[%s13179_s25 + $0x30] ss:$8 sps:$4 sm:$0xff]  }
  0x28   : > { %773 = vmatprep.subr.bf16.mxu0 %v12475_v7  ;;  %s17802_s24 = sld [smem:[#allocation6_spill]]  ;;  %v673_v13 = vld [vmem:[#allocation2] sm:$0xff]  ;;  %v674_v14 = vld [vmem:[#allocation2 + $0x8] sm:$0xff]  ;;  %v675_v16 = vld [vmem:[#allocation2 + $0x10] sm:$0xff]  ;;  %v13259_v20 = vshrl.u32 %v714_v19, 7  ;;  %s13061_s25 = smov 112  }
  0x29   : > { %v702_v15 = vpack.c.bf16 %v674_v14, %v673_v13  ;;  %v676_v17 = vld [vmem:[#allocation2 + $0x18] sm:$0xff]  ;;  %s13062_s4 = smov 120   ;;  %s13063_s27 = smov 104   ;;  %v13069_v42 = vmov 1983009808   ;;  %vm4180_vm2 = vcmask 64512  }
  0x2a   : > { %v703_v18 = vpack.c.bf16 %v676_v17, %v675_v16  ;;  %17803 = vst [vmem:[#allocation7_spill] sm:$0xff] %v13259_v20  ;;  %v13262_v21 = vsub.s32 0, %v13259_v20  ;;  %s13064_s30 = smov 96   ;;  %s13065_s16 = smov 88   ;;  %v915_v43 = vunpack.c.l.s4 %v13069_v42  ;;  %v13070_v47 = vmov 1934713408  }
  0x2b   : > { %774 = vmatpush1.bf16.msra.mxu0 %v12477_v8  ;;  %s13066_s18 = smov 80   ;;  %s13067_s29 = smov 72   ;;  %v979_v48 = vunpack.c.l.s4 %v13070_v47  ;;  %vm4187_vm3 = vcmask 1043456   ;;  %vm4686_vm4 = vcmask 261120   ;;  %vm7067_vm9 = vcmask 130048  }
  0x2c   : > { %775 = vmatprep.subr.bf16.mxu0 %v12478_v9  ;;  %17804 = vst [vmem:[#allocation8_spill] sm:$0xff] %v13262_v21  ;;  %s13068_s0 = smov 64   ;;  %v916_v46 = vunpack.c.0.s8 %v915_v43  ;;  %s17812_s21 = sld [smem:[#allocation70_spill]]  ;;  %vm7072_vm10 = vcmask 195584   ;;  %vm7081_vm11 = vcmask 326656   ;;  %vm7086_vm12 = vcmask 392192  }
  0x2d   : > { %v980_v56 = vunpack.c.0.s8 %v979_v48  ;;  %s17824_s17 = sld [smem:[#allocation71_spill]]  ;;  %vm7091_vm13 = vcmask 457728   ;;  %p12370_p5 = scmp.eq.s32.totalorder %s13166_s19, 2 }
  0x2e   : > { %v712_v22 = vld [vmem:[%s17802_s24] sm:$0x3]  ;;  %v13360_v53 = vsub.s32 %v916_v46, %v13259_v20 }
  0x2f   : > { %776 = vmatpush1.bf16.msra.mxu0 %v12480_v10  ;;  %v717_v23 = vrot.slane %v712_v22, %v13262_v21  ;;  %v13378_v8 = vsub.s32 %v980_v56, %v13259_v20 }
  0x30   : > { %777 = vmatprep.subr.bf16.mxu0 %v12481_v11 }
  0x33   : > { %778 = vmatpush1.bf16.msra.mxu0 %v12483_v12 }
  0x36   : > { %11622 = vmatmul.mubr.msk.bf16.vlgmr.msra.gmra.mrb[0].mxu0 %vm764_vm1, %v702_v15 }
  0x37   : > { %813 = vmatprep.mubr.bf16.mxu0 %v17707_v6 }
  0x3e   : > { %11623 = vmatmul.mubr.msk.bf16.gmra.mrb[4].mxu0 %vm764_vm1, %v703_v18 }
 0x109   : > { %v805_v24 = vpop.f32.mrb[0].mxu0 }
 0x10a   : > { %v13266_v25 = vadd.f32 %v805_v24, %v717_v23  ;;  %v13268_v26 = vpop.f32.mrb[1].mxu0 }
 0x10b   : > { %v809_v27 = vpop.f32.mrb[2].mxu0 }
 0x10c   : > { %v13270_v28 = vpop.f32.mrb[3].mxu0  ;;  %840 = vrot.lane.b32.xlu1 %v13266_v25, %s13061_s25  ;;  %828 = vrot.lane.b32.xlu0 %v13266_v25, %s13062_s4  ;;  %v13276_v29 = vadd.f32 %v809_v27, %v717_v23 }
 0x110   : > { %842 = vrot.lane.b32.xlu1 %v13276_v29, %s13061_s25  ;;  %852 = vrot.lane.b32.xlu0 %v13266_v25, %s13063_s27 }
 0x111   : > { %v815_v30 = vpop.f32.mrb[4].mxu0 }
 0x112   : > { %v13282_v31 = vpop.f32.mrb[5].mxu0  ;;  %v13306_v34 = vadd.f32 %v815_v30, %v717_v23 }
 0x113   : > { %v819_v32 = vpop.f32.mrb[6].mxu0 }
 0x114   : > { %854 = vrot.lane.b32.xlu1 %v13276_v29, %s13063_s27  ;;  %864 = vrot.lane.b32.xlu0 %v13266_v25, %s13064_s30  ;;  %v13288_v33 = vpop.f32.mrb[7].mxu0  ;;  %v13312_v35 = vadd.f32 %v819_v32, %v717_v23 }
 0x118   : > { %866 = vrot.lane.b32.xlu1 %v13276_v29, %s13064_s30  ;;  %876 = vrot.lane.b32.xlu0 %v13266_v25, %s13065_s16 }
 0x11c   : > { %878 = vrot.lane.b32.xlu1 %v13276_v29, %s13065_s16  ;;  %888 = vrot.lane.b32.xlu0 %v13266_v25, %s13066_s18 }
 0x120   : > { %890 = vrot.lane.b32.xlu1 %v13276_v29, %s13066_s18  ;;  %900 = vrot.lane.b32.xlu0 %v13266_v25, %s13067_s29 }
 0x124   : > { %902 = vrot.lane.b32.xlu1 %v13276_v29, %s13067_s29  ;;  %1456 = vrot.lane.b32.xlu0 %v13266_v25, %s13068_s0 }
 0x128   : > { %1458 = vrot.lane.b32.xlu1 %v13276_v29, %s13068_s0  ;;  %830 = vrot.lane.b32.xlu0 %v13276_v29, %s13062_s4 }
 0x12c   : > { %834 = vrot.lane.b32.xlu1 %v13312_v35, %s13062_s4  ;;  %832 = vrot.lane.b32.xlu0 %v13306_v34, %s13062_s4 }
 0x130   : > { %846 = vrot.lane.b32.xlu1 %v13312_v35, %s13061_s25  ;;  %844 = vrot.lane.b32.xlu0 %v13306_v34, %s13061_s25 }
 0x134   : > { %858 = vrot.lane.b32.xlu1 %v13312_v35, %s13063_s27  ;;  %856 = vrot.lane.b32.xlu0 %v13306_v34, %s13063_s27 }
 0x138   : > { %870 = vrot.lane.b32.xlu1 %v13312_v35, %s13064_s30  ;;  %868 = vrot.lane.b32.xlu0 %v13306_v34, %s13064_s30 }
 0x13c   : > { %882 = vrot.lane.b32.xlu1 %v13312_v35, %s13065_s16  ;;  %880 = vrot.lane.b32.xlu0 %v13306_v34, %s13065_s16 }
 0x140   : > { %894 = vrot.lane.b32.xlu1 %v13312_v35, %s13066_s18  ;;  %892 = vrot.lane.b32.xlu0 %v13306_v34, %s13066_s18 }
 0x144   : > { %906 = vrot.lane.b32.xlu1 %v13312_v35, %s13067_s29  ;;  %904 = vrot.lane.b32.xlu0 %v13306_v34, %s13067_s29 }
 0x148   : > { %1462 = vrot.lane.b32.xlu1 %v13312_v35, %s13068_s0  ;;  %1460 = vrot.lane.b32.xlu0 %v13306_v34, %s13068_s0 }
 0x17e   : > { %v841_v36 = vpop.permute.xlu1 %840  ;;  %v829_v37 = vpop.permute.xlu0 %828 }
 0x17f   : > { %1464 = vrot.lane.b32.xlu0 %v829_v37, %s13068_s0  ;;  %v912_v54 = vcombine.low %v13266_v25, %v841_v36  ;;  %v913_v55 = vcombine.high %v13266_v25, %v841_v36 }
 0x181   : > { %v920_v1 = vrot.slane %v912_v54, %v13360_v53  ;;  %v927_v2 = vrot.slane %v913_v55, %v13360_v53 }
 0x182   : > { %v13347_v38 = vpop.permute.xlu1 %842  ;;  %v853_v39 = vpop.permute.xlu0 %852 }
 0x183   : > { %1472 = vrot.lane.b32.xlu0 %v841_v36, %s13068_s0  ;;  %v928_v49 = vcombine.low %v829_v37, %v853_v39  ;;  %v929_v52 = vcombine.high %v829_v37, %v853_v39  ;;  %v1048_v3 = vcombine.low %v13276_v29, %v13347_v38  ;;  %v1049_v4 = vcombine.high %v13276_v29, %v13347_v38 }
 0x185   : > { %v936_v57 = vrot.slane %v928_v49, %v13360_v53  ;;  %v943_v61 = vrot.slane %v929_v52, %v13360_v53  ;;  %v1056_v23 = vrot.slane %v1048_v3, %v13360_v53  ;;  %v1063_v24 = vrot.slane %v1049_v4, %v13360_v53 }
 0x186   : > { %v13350_v40 = vpop.permute.xlu1 %854  ;;  %v865_v41 = vpop.permute.xlu0 %864 }
 0x187   : > { %1480 = vrot.lane.b32.xlu0 %v853_v39, %s13068_s0  ;;  %v976_v9 = vcombine.low %v920_v1, %v936_v57  ;;  %v977_v13 = vcombine.high %v920_v1, %v936_v57  ;;  %v992_v14 = vcombine.low %v927_v2, %v943_v61  ;;  %v993_v30 = vcombine.high %v927_v2, %v943_v61 }
 0x189   : > { %v13396_v29 = vrot.slane %v976_v9, %v13378_v8  ;;  %v13402_v39 = vrot.slane %v977_v13, %v13378_v8  ;;  %v1007_v55 = vrot.slane %v993_v30, %v13378_v8 }
 0x18a   : > { %v13353_v44 = vpop.permute.xlu1 %866  ;;  %v877_v45 = vpop.permute.xlu0 %876 }
 0x18b   : > { %1488 = vrot.lane.b32.xlu0 %v865_v41, %s13068_s0 }
 0x18e   : > { %v13356_v50 = vpop.permute.xlu1 %878  ;;  %v889_v51 = vpop.permute.xlu0 %888 }
 0x18f   : > { %1496 = vrot.lane.b32.xlu0 %v877_v45, %s13068_s0  ;;  %v944_v58 = vcombine.low %v865_v41, %v889_v51  ;;  %v945_v62 = vcombine.high %v865_v41, %v889_v51  ;;  %v13405_v41 = vrot.slane %v992_v14, %v13378_v8 }
 0x191   : > { %v952_v10 = vrot.slane %v944_v58, %v13360_v53  ;;  %v959_v15 = vrot.slane %v945_v62, %v13360_v53 }
 0x192   : > { %v13365_v59 = vpop.permute.xlu1 %890  ;;  %v901_v60 = vpop.permute.xlu0 %900 }
 0x193   : > { %v960_v63 = vcombine.low %v877_v45, %v901_v60  ;;  %v961_v0 = vcombine.high %v877_v45, %v901_v60  ;;  %1504 = vrot.lane.b32.xlu0 %v889_v51, %s13068_s0  ;;  %v1080_v16 = vcombine.low %v13353_v44, %v13365_v59  ;;  %v1081_v32 = vcombine.high %v13353_v44, %v13365_v59 }
 0x195   : > { %v968_v5 = vrot.slane %v960_v63, %v13360_v53  ;;  %v975_v7 = vrot.slane %v961_v0, %v13360_v53  ;;  %v1088_v45 = vrot.slane %v1080_v16, %v13360_v53  ;;  %v1095_v56 = vrot.slane %v1081_v32, %v13360_v53 }
 0x196   : > { %v13381_v11 = vpop.permute.xlu1 %902  ;;  %v13383_v12 = vpop.permute.xlu0 %1456 }
 0x197   : > { %1512 = vrot.lane.b32.xlu0 %v901_v60, %s13068_s0  ;;  %v1008_v17 = vcombine.low %v952_v10, %v968_v5  ;;  %v1009_v18 = vcombine.high %v952_v10, %v968_v5  ;;  %v1096_v19 = vcombine.low %v13356_v50, %v13381_v11  ;;  %v1097_v22 = vcombine.high %v13356_v50, %v13381_v11 }
 0x198   : > { %v1024_v25 = vcombine.low %v959_v15, %v975_v7  ;;  %v1025_v27 = vcombine.high %v959_v15, %v975_v7 }
 0x199   : > { %v1104_v36 = vrot.slane %v1096_v19, %v13360_v53  ;;  %v1016_v46 = vrot.slane %v1008_v17, %v13378_v8  ;;  %v1023_v47 = vrot.slane %v1009_v18, %v13378_v8  ;;  %v1111_v48 = vrot.slane %v1097_v22, %v13360_v53 }
 0x19a   : > { %v831_v37 = vpop.permute.xlu0 %830  ;;  %v1032_v49 = vrot.slane %v1024_v25, %v13378_v8  ;;  %v1039_v51 = vrot.slane %v1025_v27, %v13378_v8  ;;  %v13441_v19 = vpop.permute.xlu1 %1458 }
 0x19b   : > { %v1064_v42 = vcombine.low %v831_v37, %v13350_v40  ;;  %v1065_v43 = vcombine.high %v831_v37, %v13350_v40  ;;  %1466 = vrot.lane.b32.xlu1 %v831_v37, %s13068_s0  ;;  %v1144_v57 = vcombine.low %v1088_v45, %v1104_v36  ;;  %v1145_v58 = vcombine.high %v1088_v45, %v1104_v36 }
 0x19c   : > { %v1160_v1 = vcombine.low %v1095_v56, %v1111_v48  ;;  %v1161_v2 = vcombine.high %v1095_v56, %v1111_v48  ;;  %v1040_v3 = vcombine.low %v13396_v29, %v1016_v46  ;;  %v1042_v4 = vcombine.low %v13402_v39, %v1023_v47 }
 0x19d   : > { %v1072_v52 = vrot.slane %v1064_v42, %v13360_v53  ;;  %v1079_v54 = vrot.slane %v1065_v43, %v13360_v53  ;;  %v1044_v9 = vcombine.low %v13405_v41, %v1032_v49  ;;  %v1046_v10 = vcombine.low %v1007_v55, %v1039_v51 }
 0x19e   : > { %v13420_v60 = vpop.permute.xlu0 %832  ;;  %v1152_v13 = vrot.slane %v1144_v57, %v13378_v8  ;;  %v1168_v17 = vrot.slane %v1160_v1, %v13378_v8  ;;  %v1175_v18 = vrot.slane %v1161_v2, %v13378_v8  ;;  %v1043_v36 = vcombine.high %v13402_v39, %v1023_v47 }
 0x19f   : > { %v1112_v61 = vcombine.low %v1056_v23, %v1072_v52  ;;  %v1113_v62 = vcombine.high %v1056_v23, %v1072_v52  ;;  %v1128_v63 = vcombine.low %v1063_v24, %v1079_v54  ;;  %v1129_v0 = vcombine.high %v1063_v24, %v1079_v54  ;;  %1474 = vrot.lane.b32.xlu1 %v13347_v38, %s13068_s0  ;;  %v13456_v54 = vpop.permute.xlu1 %834 }
 0x1a0   : > { %1468 = vrot.lane.b32.xlu0 %v13420_v60, %s13068_s0  ;;  %v1159_v38 = vrot.slane %v1145_v58, %v13378_v8  ;;  %v11624_v24 = vpack.c.bf16 %v1044_v9, %v1040_v3  ;;  %v11625_v25 = vpack.c.bf16 %v1046_v10, %v1042_v4  ;;  %v1045_v37 = vcombine.high %v13405_v41, %v1032_v49 }
 0x1a1   : > { %v1120_v5 = vrot.slane %v1112_v61, %v13378_v8  ;;  %v1127_v7 = vrot.slane %v1113_v62, %v13378_v8  ;;  %v1136_v14 = vrot.slane %v1128_v63, %v13378_v8  ;;  %v1143_v15 = vrot.slane %v1129_v0, %v13378_v8 }
 0x1a2   : > { %v13435_v16 = vpop.permute.xlu0 %844  ;;  %v1047_v42 = vcombine.high %v1007_v55, %v1039_v51  ;;  %v2799_v48 = vrot.slane %v11624_v24, %v13360_v53  ;;  %v2807_v52 = vrot.slane %v11625_v25, %v13360_v53 }
 0x1a3   : > { %1482 = vrot.lane.b32.xlu1 %v13350_v40, %s13068_s0  ;;  %v1176_v22 = vcombine.low %v1120_v5, %v1152_v13  ;;  %v1178_v23 = vcombine.low %v1127_v7, %v1159_v38  ;;  %v1180_v30 = vcombine.low %v1136_v14, %v1168_v17  ;;  %v1182_v32 = vcombine.low %v1143_v15, %v1175_v18  ;;  %v13471_v63 = vpop.permute.xlu1 %846 }
 0x1a4   : > { %1476 = vrot.lane.b32.xlu0 %v13435_v16, %s13068_s0  ;;  %v1041_v40 = vcombine.high %v13396_v29, %v1016_v46  ;;  %v11629_v41 = vpack.c.bf16 %v1047_v42, %v1043_v36  ;;  %v1177_v46 = vcombine.high %v1120_v5, %v1152_v13  ;;  %v1179_v47 = vcombine.high %v1127_v7, %v1159_v38 }
 0x1a5   : > { %v11626_v43 = vpack.c.bf16 %v1180_v30, %v1176_v22  ;;  %v11627_v45 = vpack.c.bf16 %v1182_v32, %v1178_v23  ;;  %v1181_v49 = vcombine.high %v1136_v14, %v1168_v17  ;;  %v1183_v51 = vcombine.high %v1143_v15, %v1175_v18 }
 0x1a6   : > { %v13445_v27 = vpop.permute.xlu0 %856  ;;  %v11628_v39 = vpack.c.bf16 %v1045_v37, %v1041_v40  ;;  %v2824_v55 = vcombine.low %v2799_v48, %v2807_v52  ;;  %v2875_v0 = vrot.slane %v11629_v41, %v13360_v53 }
 0x1a7   : > { %1490 = vrot.lane.b32.xlu1 %v13353_v44, %s13068_s0  ;;  %v2815_v44 = vrot.slane %v11626_v43, %v13360_v53  ;;  %v2823_v29 = vrot.slane %v11627_v45, %v13360_v53  ;;  %v11630_v1 = vpack.c.bf16 %v1181_v49, %v1177_v46  ;;  %v11631_v2 = vpack.c.bf16 %v1183_v51, %v1179_v47  ;;  %v13490_v23 = vpop.permute.xlu1 %858 }
 0x1a8   : > { %1484 = vrot.lane.b32.xlu0 %v13445_v27, %s13068_s0  ;;  %v2867_v62 = vrot.slane %v11628_v39, %v13360_v53  ;;  %v2832_v3 = vrot.slane %v2824_v55, %v13378_v8 }
 0x1a9   : > { %v2840_v58 = vcombine.low %v2815_v44, %v2823_v29  ;;  %v2841_v61 = vcombine.high %v2815_v44, %v2823_v29  ;;  %v2883_v5 = vrot.slane %v11630_v1, %v13360_v53  ;;  %v2891_v7 = vrot.slane %v11631_v2, %v13360_v53 }
 0x1aa   : > { %v13458_v56 = vpop.permute.xlu0 %868  ;;  %v2892_v9 = vcombine.low %v2867_v62, %v2875_v0  ;;  %v2893_v10 = vcombine.high %v2867_v62, %v2875_v0 }
 0x1ab   : > { %1498 = vrot.lane.b32.xlu1 %v13356_v50, %s13068_s0  ;;  %v2825_v50 = vcombine.high %v2799_v48, %v2807_v52  ;;  %v2848_v4 = vrot.slane %v2840_v58, %v13378_v8  ;;  %v2908_v17 = vcombine.low %v2883_v5, %v2891_v7  ;;  %v2909_v18 = vcombine.high %v2883_v5, %v2891_v7  ;;  %v13508_v44 = vpop.permute.xlu1 %870 }
 0x1ac   : > { %1492 = vrot.lane.b32.xlu0 %v13458_v56, %s13068_s0  ;;  %v2900_v24 = vrot.slane %v2892_v9, %v13378_v8  ;;  %v2907_v30 = vrot.slane %v2893_v10, %v13378_v8 }
 0x1ad   : > { %v13483_v38 = vcombine.high %v2832_v3, %v2848_v4  ;;  %v2839_v14 = vrot.slane %v2825_v50, %v13378_v8  ;;  %v2856_v15 = vcombine.low %v2832_v3, %v2848_v4  ;;  %v2916_v25 = vrot.slane %v2908_v17, %v13378_v8 }
 0x1ae   : > { %v13466_v57 = vpop.permute.xlu0 %880  ;;  %v2923_v32 = vrot.slane %v2909_v18, %v13378_v8 }
 0x1af   : > { %1506 = vrot.lane.b32.xlu1 %v13365_v59, %s13068_s0  ;;  %v2855_v59 = vrot.slane %v2841_v61, %v13378_v8  ;;  %17805 = vst [vmem:[#allocation9_spill] sm:$0xff] %v13483_v38  ;;  %v13500_v36 = vcombine.high %v2900_v24, %v2916_v25  ;;  %v3067_v37 = vshrl.u32 %v2856_v15, 16  ;;  %v13516_v39 = vpop.permute.xlu1 %882  ;;  %v3073_v41 = vshrl.u32 %v13483_v38, 16 }
 0x1b0   : > { %1500 = vrot.lane.b32.xlu0 %v13466_v57, %s13068_s0  ;;  %v2927_v42 = vcombine.high %v2907_v30, %v2923_v32  ;;  %v13532_v55 = vcombine.low %v2907_v30, %v2923_v32 }
 0x1b1   : > { %v2859_v22 = vcombine.high %v2839_v14, %v2855_v59  ;;  %17806 = vst [vmem:[#allocation10_spill] sm:$0xff] %v13500_v36  ;;  %v3074_v46 = vshrl.u32 %v13500_v36, 16  ;;  %v13530_v51 = vcombine.low %v2839_v14, %v2855_v59 }
 0x1b2   : > { %v13481_v13 = vpop.permute.xlu0 %892  ;;  %17809 = vst [vmem:[#allocation13_spill] sm:$0xff] %v13532_v55  ;;  %v3080_v62 = vshrl.u32 %v13532_v55, 16  ;;  %v3086_v1 = vshrl.u32 %v2927_v42, 16 }
 0x1b3   : > { %1514 = vrot.lane.b32.xlu1 %v13381_v11, %s13068_s0  ;;  %v2924_v11 = vcombine.low %v2900_v24, %v2916_v25  ;;  %v3084_v48 = vpack.i.b16 %v2927_v42, %v2859_v22  ;;  %v13524_v47 = vpop.permute.xlu1 %894  ;;  %v13528_v49 = vpack.i.b16 %v3074_v46, %v3073_v41  ;;  %17808 = vst [vmem:[#allocation12_spill] sm:$0xff] %v13530_v51  ;;  %v3079_v61 = vshrl.u32 %v13530_v51, 16 }
 0x1b4   : > { %1508 = vrot.lane.b32.xlu0 %v13481_v13, %s13068_s0  ;;  %v3085_v0 = vshrl.u32 %v2859_v22, 16 }
 0x1b5   : > { %v3066_v43 = vpack.i.b16 %v2924_v11, %v2856_v15  ;;  %v3068_v45 = vshrl.u32 %v2924_v11, 16  ;;  %12272 = vmatprep.mubr.msk.bf16.mxu0 %vm4180_vm2, %v3084_v48  ;;  %17807 = vst [vmem:[#allocation11_spill] sm:$0xff] %v13528_v49  ;;  %v13542_v2 = vpack.i.b16 %v3080_v62, %v3079_v61 }
 0x1b6   : > { %v13496_v40 = vpop.permute.xlu0 %904  ;;  %v13544_v3 = vpack.i.b16 %v3086_v1, %v3085_v0 }
 0x1b7   : > { %1470 = vrot.lane.b32.xlu1 %v13456_v54, %s13068_s0  ;;  %12236 = vmatprep.mubr.msk.bf16.mxu1 %vm4180_vm2, %v3066_v43  ;;  %v13512_v29 = vpack.i.b16 %v3068_v45, %v3067_v37  ;;  %v13536_v58 = vpop.permute.xlu1 %906  ;;  %17810 = vst [vmem:[#allocation14_spill] sm:$0xff] %v13542_v2 }
 0x1b8   : > { %1516 = vrot.lane.b32.xlu0 %v13496_v40, %s13068_s0  ;;  %17811 = vst [vmem:[#allocation15_spill] sm:$0xff] %v13544_v3 }
 0x1ba   : > { %v13546_v4 = vpop.permute.xlu0 %1460 }
 0x1bb   : > { %1478 = vrot.lane.b32.xlu1 %v13471_v63, %s13068_s0  ;;  %v13551_v32 = vpop.permute.xlu1 %1462 }
 0x1bf   : > { %1486 = vrot.lane.b32.xlu1 %v13490_v23, %s13068_s0 }
 0x1c3   : > { %1494 = vrot.lane.b32.xlu1 %v13508_v44, %s13068_s0 }
 0x1c7   : > { %1502 = vrot.lane.b32.xlu1 %v13516_v39, %s13068_s0 }
 0x1cb   : > { %1510 = vrot.lane.b32.xlu1 %v13524_v47, %s13068_s0 }
 0x1cf   : > { %1518 = vrot.lane.b32.xlu1 %v13536_v58, %s13068_s0  ;;  %s17833_s0 = scalar_lea.vmem %s17693_s6, %s13172_s20 }
 0x1f1   : > { %v1465_v59 = vpop.permute.xlu0 %1464 }
 0x1f5   : > { %v1473_v5 = vpop.permute.xlu0 %1472 }
 0x1f6   : > { %v1552_v15 = vcombine.low %v13383_v12, %v1473_v5  ;;  %v1553_v24 = vcombine.high %v13383_v12, %v1473_v5 }
 0x1f8   : > { %v1560_v11 = vrot.slane %v1552_v15, %v13360_v53  ;;  %v1567_v48 = vrot.slane %v1553_v24, %v13360_v53 }
 0x1f9   : > { %v1481_v7 = vpop.permute.xlu0 %1480 }
 0x1fa   : > { %v1568_v14 = vcombine.low %v1465_v59, %v1481_v7  ;;  %v1569_v17 = vcombine.high %v1465_v59, %v1481_v7 }
 0x1fc   : > { %v1576_v22 = vrot.slane %v1568_v14, %v13360_v53  ;;  %v1583_v37 = vrot.slane %v1569_v17, %v13360_v53 }
 0x1fd   : > { %v1489_v9 = vpop.permute.xlu0 %1488 }
 0x1fe   : > { %v1616_v41 = vcombine.low %v1560_v11, %v1576_v22  ;;  %v1632_v1 = vcombine.low %v1567_v48, %v1583_v37  ;;  %v1617_v7 = vcombine.high %v1560_v11, %v1576_v22 }
 0x200   : > { %v1631_v22 = vrot.slane %v1617_v7, %v13378_v8 }
 0x201   : > { %v1497_v10 = vpop.permute.xlu0 %1496 }
 0x205   : > { %v1505_v18 = vpop.permute.xlu0 %1504 }
 0x206   : > { %v1584_v25 = vcombine.low %v1489_v9, %v1505_v18  ;;  %v1585_v30 = vcombine.high %v1489_v9, %v1505_v18 }
 0x208   : > { %v1592_v46 = vrot.slane %v1584_v25, %v13360_v53  ;;  %v1599_v12 = vrot.slane %v1585_v30, %v13360_v53  ;;  %v1633_v25 = vcombine.high %v1567_v48, %v1583_v37 }
 0x209   : > { %v1513_v42 = vpop.permute.xlu0 %1512 }
 0x20a   : > { %v1600_v43 = vcombine.low %v1497_v10, %v1513_v42  ;;  %v1601_v45 = vcombine.high %v1497_v10, %v1513_v42  ;;  %v1624_v10 = vrot.slane %v1616_v41, %v13378_v8  ;;  %v1647_v37 = vrot.slane %v1633_v25, %v13378_v8 }
 0x20c   : > { %v1608_v61 = vrot.slane %v1600_v43, %v13360_v53  ;;  %v1615_v62 = vrot.slane %v1601_v45, %v13360_v53  ;;  %v1640_v45 = vrot.slane %v1632_v1, %v13378_v8 }
 0x20d   : > { %v13560_v0 = vpop.permute.xlu1 %1466 }
 0x20e   : > { %v1648_v59 = vcombine.low %v1592_v46, %v1608_v61  ;;  %v1664_v5 = vcombine.low %v1599_v12, %v1615_v62  ;;  %v1649_v9 = vcombine.high %v1592_v46, %v1608_v61  ;;  %v1665_v14 = vcombine.high %v1599_v12, %v1615_v62 }
 0x210   : > { %v1656_v15 = vrot.slane %v1648_v59, %v13378_v8  ;;  %v1672_v17 = vrot.slane %v1664_v5, %v13378_v8  ;;  %v1663_v18 = vrot.slane %v1649_v9, %v13378_v8  ;;  %v1679_v11 = vrot.slane %v1665_v14, %v13378_v8 }
 0x211   : > { %v13566_v24 = vpop.permute.xlu1 %1474 }
 0x212   : > { %v13568_v30 = vpop.permute.xlu0 %1468  ;;  %v1681_v42 = vcombine.high %v1624_v10, %v1656_v15  ;;  %v1680_v43 = vcombine.low %v1624_v10, %v1656_v15  ;;  %v1684_v12 = vcombine.low %v1640_v45, %v1672_v17  ;;  %v1682_v61 = vcombine.low %v1631_v22, %v1663_v18 }
 0x213   : > { %v1686_v9 = vcombine.low %v1647_v37, %v1679_v11  ;;  %v1683_v10 = vcombine.high %v1631_v22, %v1663_v18  ;;  %v1688_v18 = vcombine.low %v13441_v19, %v13566_v24 }
 0x214   : > { %v2761_v41 = vpack.c.bf16 %v1681_v42, %v1681_v42  ;;  %v2760_v46 = vpack.c.bf16 %v1680_v43, %v1680_v43  ;;  %v2764_v48 = vpack.c.bf16 %v1684_v12, %v1684_v12  ;;  %v2762_v5 = vpack.c.bf16 %v1682_v61, %v1682_v61 }
 0x215   : > { %v1483_v62 = vpop.permute.xlu1 %1482  ;;  %v2766_v7 = vpack.c.bf16 %v1686_v9, %v1686_v9  ;;  %v2763_v14 = vpack.c.bf16 %v1683_v10, %v1683_v10  ;;  %v1685_v42 = vcombine.high %v1640_v45, %v1672_v17  ;;  %v1696_v10 = vrot.slane %v1688_v18, %v13360_v53 }
 0x216   : > { %v13573_v59 = vpop.permute.xlu0 %1476  ;;  %3128 = vxpose.xlu1.c.b16.start.end [1/1] (short) (narrow) %v2761_v41, 16  ;;  %3112 = vxpose.xlu0.c.b16.start.end [1/1] (short) (narrow) %v2760_v46, 16  ;;  %v1704_v41 = vcombine.low %v13560_v0, %v1483_v62  ;;  %v1687_v46 = vcombine.high %v1647_v37, %v1679_v11  ;;  %v1705_v45 = vcombine.high %v13560_v0, %v1483_v62 }
 0x217   : > { %v2765_v25 = vpack.c.bf16 %v1685_v42, %v1685_v42  ;;  %v1689_v37 = vcombine.high %v13441_v19, %v13566_v24 }
 0x218   : > { %v1712_v61 = vrot.slane %v1704_v41, %v13360_v53  ;;  %v2767_v17 = vpack.c.bf16 %v1687_v46, %v1687_v46  ;;  %v1719_v0 = vrot.slane %v1705_v45, %v13360_v53 }
 0x219   : > { %v1491_v1 = vpop.permute.xlu1 %1490 }
 0x21a   : > { %v13576_v15 = vpop.permute.xlu0 %1484  ;;  %3176 = vxpose.xlu1.c.b16.start.end [1/1] (short) (narrow) %v2764_v48, 16  ;;  %3144 = vxpose.xlu0.c.b16.start.end [1/1] (short) (narrow) %v2762_v5, 16  ;;  %v1752_v46 = vcombine.low %v1696_v10, %v1712_v61  ;;  %v1753_v18 = vcombine.high %v1696_v10, %v1712_v61 }
 0x21b   : > { %v1840_v45 = vcombine.low %v13568_v30, %v13576_v15 }
 0x21d   : > { %v1499_v43 = vpop.permute.xlu1 %1498 }
 0x21e   : > { %v13578_v50 = vpop.permute.xlu0 %1492  ;;  %3208 = vxpose.xlu1.c.b16.start.end [1/1] (short) (narrow) %v2766_v7, 16  ;;  %3160 = vxpose.xlu0.c.b16.start.end [1/1] (short) (narrow) %v2763_v14, 16 }
 0x221   : > { %v1507_v12 = vpop.permute.xlu1 %1506 }
 0x222   : > { %v13583_v22 = vpop.permute.xlu0 %1500  ;;  %3192 = vxpose.xlu0.c.b16.start.end [1/1] (short) (narrow) %v2765_v25, 16  ;;  %v1720_v48 = vcombine.low %v1491_v1, %v1507_v12  ;;  %v1721_v5 = vcombine.high %v1491_v1, %v1507_v12 }
 0x224   : > { %v1728_v42 = vrot.slane %v1720_v48, %v13360_v53  ;;  %v1735_v62 = vrot.slane %v1721_v5, %v13360_v53  ;;  %v1760_v48 = vrot.slane %v1752_v46, %v13378_v8 }
 0x225   : > { %v1515_v9 = vpop.permute.xlu1 %1514 }
 0x226   : > { %v1736_v7 = vcombine.low %v1499_v43, %v1515_v9  ;;  %v1737_v14 = vcombine.high %v1499_v43, %v1515_v9  ;;  %v13588_v11 = vpop.permute.xlu0 %1508  ;;  %3224 = vxpose.xlu0.c.b16.start.end [1/1] (short) (narrow) %v2767_v17, 16  ;;  %v1703_v9 = vrot.slane %v1689_v37, %v13360_v53 }
 0x227   : > { %v1856_v61 = vcombine.low %v13578_v50, %v13588_v11 }
 0x228   : > { %v1744_v41 = vrot.slane %v1736_v7, %v13360_v53  ;;  %v1751_v25 = vrot.slane %v1737_v14, %v13360_v53  ;;  %v1768_v52 = vcombine.low %v1703_v9, %v1719_v0 }
 0x229   : > { %v13597_v1 = vpop.permute.xlu1 %1470 }
 0x22a   : > { %v1517_v43 = vpop.permute.xlu0 %1516  ;;  %v1784_v12 = vcombine.low %v1728_v42, %v1744_v41  ;;  %v1785_v17 = vcombine.high %v1728_v42, %v1744_v41  ;;  %v1800_v24 = vcombine.low %v1735_v62, %v1751_v25  ;;  %v1767_v42 = vrot.slane %v1753_v18, %v13378_v8 }
 0x22b   : > { %v1872_v19 = vcombine.low %v13583_v22, %v1517_v43  ;;  %v1824_v41 = vcombine.low %v13546_v4, %v13573_v59  ;;  %v1776_v55 = vrot.slane %v1768_v52, %v13378_v8  ;;  %v1864_v18 = vrot.slane %v1856_v61, %v13360_v53 }
 0x22c   : > { %v1792_v7 = vrot.slane %v1784_v12, %v13378_v8  ;;  %v1799_v14 = vrot.slane %v1785_v17, %v13378_v8  ;;  %v1808_v12 = vrot.slane %v1800_v24, %v13378_v8  ;;  %v1801_v17 = vcombine.high %v1735_v62, %v1751_v25 }
 0x22d   : > { %v13606_v5 = vpop.permute.xlu1 %1478  ;;  %v1880_v46 = vrot.slane %v1872_v19, %v13360_v53  ;;  %v1832_v19 = vrot.slane %v1824_v41, %v13360_v53  ;;  %v1873_v24 = vcombine.high %v13583_v22, %v1517_v43  ;;  %v1841_v52 = vcombine.high %v13568_v30, %v13576_v15 }
 0x22e   : > { %v1816_v10 = vcombine.low %v1760_v48, %v1792_v7  ;;  %v1817_v37 = vcombine.high %v1760_v48, %v1792_v7  ;;  %v1818_v3 = vcombine.low %v1767_v42, %v1799_v14  ;;  %v1819_v2 = vcombine.high %v1767_v42, %v1799_v14 }
 0x22f   : > { %v1848_v48 = vrot.slane %v1840_v45, %v13360_v53  ;;  %v1769_v7 = vcombine.high %v1703_v9, %v1719_v0  ;;  %v1820_v25 = vcombine.low %v1776_v55, %v1808_v12  ;;  %v1815_v62 = vrot.slane %v1801_v17, %v13378_v8 }
 0x230   : > { %v2768_v6 = vpack.c.bf16 %v1816_v10, %v1816_v10  ;;  %v2769_v21 = vpack.c.bf16 %v1817_v37, %v1817_v37  ;;  %v2770_v10 = vpack.c.bf16 %v1818_v3, %v1818_v3  ;;  %v2771_v14 = vpack.c.bf16 %v1819_v2, %v1819_v2 }
 0x231   : > { %v13615_v51 = vpop.permute.xlu1 %1486  ;;  %v1821_v37 = vcombine.high %v1776_v55, %v1808_v12  ;;  %v1920_v42 = vcombine.low %v1864_v18, %v1880_v46  ;;  %v1857_v45 = vcombine.high %v13578_v50, %v13588_v11  ;;  %v1888_v22 = vcombine.low %v1832_v19, %v1848_v48 }
 0x232   : > { %3240 = vxpose.xlu1.c.b16.start.end [1/1] (short) (narrow) %v2768_v6, 16  ;;  %3256 = vxpose.xlu0.c.b16.start.end [1/1] (short) (narrow) %v2769_v21, 16  ;;  %v1783_v21 = vrot.slane %v1769_v7, %v13378_v8  ;;  %v1825_v0 = vcombine.high %v13546_v4, %v13573_v59  ;;  %v1887_v2 = vrot.slane %v1873_v24, %v13360_v53 }
 0x233   : > { %v2772_v55 = vpack.c.bf16 %v1820_v25, %v1820_v25  ;;  %v1921_v3 = vcombine.high %v1864_v18, %v1880_v46  ;;  %v2773_v43 = vpack.c.bf16 %v1821_v37, %v1821_v37  ;;  %v1928_v15 = vrot.slane %v1920_v42, %v13378_v8 }
 0x234   : > { %v1822_v9 = vcombine.low %v1783_v21, %v1815_v62  ;;  %v1823_v30 = vcombine.high %v1783_v21, %v1815_v62  ;;  %v1855_v50 = vrot.slane %v1841_v52, %v13360_v53  ;;  %v1871_v11 = vrot.slane %v1857_v45, %v13360_v53 }
 0x235   : > { %v13627_v6 = vpop.permute.xlu1 %1494  ;;  %v1889_v41 = vcombine.high %v1832_v19, %v1848_v48  ;;  %v1896_v12 = vrot.slane %v1888_v22, %v13378_v8  ;;  %v1839_v4 = vrot.slane %v1825_v0, %v13360_v53  ;;  %v1935_v59 = vrot.slane %v1921_v3, %v13378_v8 }
 0x236   : > { %3272 = vxpose.xlu1.c.b16.start.end [1/1] (short) (narrow) %v2770_v10, 16  ;;  %3288 = vxpose.xlu0.c.b16.start.end [1/1] (short) (narrow) %v2771_v14, 16  ;;  %v1936_v46 = vcombine.low %v1871_v11, %v1887_v2  ;;  %v2774_v17 = vpack.c.bf16 %v1822_v9, %v1822_v9  ;;  %v2775_v18 = vpack.c.bf16 %v1823_v30, %v1823_v30 }
 0x237   : > { %v1953_v7 = vcombine.high %v1896_v12, %v1928_v15  ;;  %v1952_v24 = vcombine.low %v1896_v12, %v1928_v15  ;;  %v1903_v62 = vrot.slane %v1889_v41, %v13378_v8  ;;  %v1904_v10 = vcombine.low %v1839_v4, %v1855_v50 }
 0x238   : > { %v1960_v48 = vcombine.low %v13551_v32, %v13606_v5  ;;  %v1976_v19 = vcombine.low %v13597_v1, %v13615_v51  ;;  %v1944_v37 = vrot.slane %v1936_v46, %v13378_v8  ;;  %v1937_v42 = vcombine.high %v1871_v11, %v1887_v2 }
 0x239   : > { %v1503_v61 = vpop.permute.xlu1 %1502  ;;  %v1955_v14 = vcombine.high %v1903_v62, %v1935_v59  ;;  %v2777_v45 = vpack.c.bf16 %v1953_v7, %v1953_v7  ;;  %v2776_v21 = vpack.c.bf16 %v1952_v24, %v1952_v24  ;;  %v1954_v22 = vcombine.low %v1903_v62, %v1935_v59 }
 0x23a   : > { %3304 = vxpose.xlu1.c.b16.start.end [1/1] (short) (narrow) %v2772_v55, 16  ;;  %3320 = vxpose.xlu0.c.b16.start.end [1/1] (short) (narrow) %v2773_v43, 16  ;;  %v1912_v55 = vrot.slane %v1904_v10, %v13378_v8  ;;  %v1905_v3 = vcombine.high %v1839_v4, %v1855_v50  ;;  %v1968_v43 = vrot.slane %v1960_v48, %v13360_v53 }
 0x23b   : > { %v1984_v9 = vrot.slane %v1976_v19, %v13360_v53  ;;  %v1951_v2 = vrot.slane %v1937_v42, %v13378_v8  ;;  %v2779_v46 = vpack.c.bf16 %v1955_v14, %v1955_v14  ;;  %v1961_v24 = vcombine.high %v13551_v32, %v13606_v5 }
 0x23c   : > { %v1957_v41 = vcombine.high %v1912_v55, %v1944_v37  ;;  %v1956_v12 = vcombine.low %v1912_v55, %v1944_v37  ;;  %v1919_v4 = vrot.slane %v1905_v3, %v13378_v8 }
 0x23d   : > { %v1511_v25 = vpop.permute.xlu1 %1510  ;;  %v2025_v42 = vcombine.high %v1968_v43, %v1984_v9  ;;  %v1975_v32 = vrot.slane %v1961_v24, %v13360_v53 }
 0x23e   : > { %3336 = vxpose.xlu1.c.b16.start.end [1/1] (short) (narrow) %v2774_v17, 16  ;;  %3352 = vxpose.xlu0.c.b16.start.end [1/1] (short) (narrow) %v2775_v18, 16  ;;  %v1992_v52 = vcombine.low %v13627_v6, %v1511_v25  ;;  %v2778_v17 = vpack.c.bf16 %v1954_v22, %v1954_v22  ;;  %v1993_v50 = vcombine.high %v13627_v6, %v1511_v25 }
 0x23f   : > { %v1977_v18 = vcombine.high %v13597_v1, %v13615_v51  ;;  %v1959_v10 = vcombine.high %v1919_v4, %v1951_v2  ;;  %v1958_v48 = vcombine.low %v1919_v4, %v1951_v2  ;;  %v2781_v19 = vpack.c.bf16 %v1957_v41, %v1957_v41 }
 0x240   : > { %v2000_v11 = vrot.slane %v1992_v52, %v13360_v53  ;;  %v2780_v14 = vpack.c.bf16 %v1956_v12, %v1956_v12  ;;  %v2007_v37 = vrot.slane %v1993_v50, %v13360_v53  ;;  %v2039_v55 = vrot.slane %v2025_v42, %v13378_v8 }
 0x241   : > { %v1519_v0 = vpop.permute.xlu1 %1518  ;;  %v1991_v51 = vrot.slane %v1977_v18, %v13360_v53  ;;  %v2783_v5 = vpack.c.bf16 %v1959_v10, %v1959_v10 }
 0x242   : > { %v2008_v30 = vcombine.low %v1503_v61, %v1519_v0  ;;  %3384 = vxpose.xlu0.c.b16.start.end [1/1] (short) (narrow) %v2777_v45, 16  ;;  %3368 = vxpose.xlu1.c.b16.start.end [1/1] (short) (narrow) %v2776_v21, 16  ;;  %v2009_v15 = vcombine.high %v1503_v61, %v1519_v0  ;;  %v2024_v61 = vcombine.low %v1968_v43, %v1984_v9 }
 0x243   : > { %v2782_v45 = vpack.c.bf16 %v1958_v48, %v1958_v48  ;;  %v2040_v3 = vcombine.low %v1975_v32, %v1991_v51 }
 0x244   : > { %v2016_v59 = vrot.slane %v2008_v30, %v13360_v53  ;;  %v2023_v62 = vrot.slane %v2009_v15, %v13360_v53  ;;  %v2032_v1 = vrot.slane %v2024_v61, %v13378_v8 }
 0x245   : > { %v2048_v2 = vrot.slane %v2040_v3, %v13378_v8 }
 0x246   : > { %3416 = vxpose.xlu0.c.b16.start.end [1/1] (short) (narrow) %v2779_v46, 16  ;;  %3400 = vxpose.xlu1.c.b16.start.end [1/1] (short) (narrow) %v2778_v17, 16  ;;  %v2056_v7 = vcombine.low %v2000_v11, %v2016_v59  ;;  %v2057_v25 = vcombine.high %v2000_v11, %v2016_v59  ;;  %v2072_v52 = vcombine.low %v2007_v37, %v2023_v62 }
 0x247   : > { %v2073_v15 = vcombine.high %v2007_v37, %v2023_v62  ;;  %v2041_v11 = vcombine.high %v1975_v32, %v1991_v51 }
 0x248   : > { %v2064_v6 = vrot.slane %v2056_v7, %v13378_v8  ;;  %v2071_v0 = vrot.slane %v2057_v25, %v13378_v8  ;;  %v2080_v30 = vrot.slane %v2072_v52, %v13378_v8 }
 0x249   : > { %v2087_v59 = vrot.slane %v2073_v15, %v13378_v8  ;;  %v2055_v18 = vrot.slane %v2041_v11, %v13378_v8 }
 0x24a   : > { %3448 = vxpose.xlu0.c.b16.start.end [1/1] (short) (narrow) %v2781_v19, 16  ;;  %3432 = vxpose.xlu1.c.b16.start.end [1/1] (short) (narrow) %v2780_v14, 16  ;;  %v2089_v21 = vcombine.high %v2032_v1, %v2064_v6  ;;  %v2088_v22 = vcombine.low %v2032_v1, %v2064_v6  ;;  %v2091_v43 = vcombine.high %v2039_v55, %v2071_v0 }
 0x24b   : > { %v2090_v9 = vcombine.low %v2039_v55, %v2071_v0  ;;  %v2093_v50 = vcombine.high %v2048_v2, %v2080_v30  ;;  %v2092_v4 = vcombine.low %v2048_v2, %v2080_v30  ;;  %v2095_v24 = vcombine.high %v2055_v18, %v2087_v59 }
 0x24c   : > { %v2785_v41 = vpack.c.bf16 %v2089_v21, %v2089_v21  ;;  %v2784_v12 = vpack.c.bf16 %v2088_v22, %v2088_v22  ;;  %v2787_v46 = vpack.c.bf16 %v2091_v43, %v2091_v43  ;;  %v2094_v62 = vcombine.low %v2055_v18, %v2087_v59 }
 0x24d   : > { %v2786_v17 = vpack.c.bf16 %v2090_v9, %v2090_v9  ;;  %v2789_v61 = vpack.c.bf16 %v2093_v50, %v2093_v50  ;;  %v2788_v7 = vpack.c.bf16 %v2092_v4, %v2092_v4  ;;  %v2791_v10 = vpack.c.bf16 %v2095_v24, %v2095_v24 }
 0x24e   : > { %3480 = vxpose.xlu0.c.b16.start.end [1/1] (short) (narrow) %v2783_v5, 16  ;;  %3464 = vxpose.xlu1.c.b16.start.end [1/1] (short) (narrow) %v2782_v45, 16  ;;  %v2790_v48 = vpack.c.bf16 %v2094_v62, %v2094_v62 }
 0x252   : > { %3512 = vxpose.xlu0.c.b16.start.end [1/1] (short) (narrow) %v2785_v41, 16  ;;  %3496 = vxpose.xlu1.c.b16.start.end [1/1] (short) (narrow) %v2784_v12, 16 }
 0x256   : > { %3544 = vxpose.xlu0.c.b16.start.end [1/1] (short) (narrow) %v2787_v46, 16  ;;  %3528 = vxpose.xlu1.c.b16.start.end [1/1] (short) (narrow) %v2786_v17, 16 }
 0x25a   : > { %3576 = vxpose.xlu0.c.b16.start.end [1/1] (short) (narrow) %v2789_v61, 16  ;;  %3560 = vxpose.xlu1.c.b16.start.end [1/1] (short) (narrow) %v2788_v7, 16 }
 0x25e   : > { %3608 = vxpose.xlu0.c.b16.start.end [1/1] (short) (narrow) %v2791_v10, 16  ;;  %3592 = vxpose.xlu1.c.b16.start.end [1/1] (short) (narrow) %v2790_v48, 16 }
 0x27c   : > { %v3120_v19 = vpop.trf.xlu0  ;;  %v3136_v6 = vpop.trf.xlu1 }
 0x280   : > { %v3152_v14 = vpop.trf.xlu0  ;;  %v3184_v37 = vpop.trf.xlu1 }
 0x281   : > { %v3624_v21 = vcombine.low %v3120_v19, %v3184_v37 }
 0x283   : > { %v13671_v15 = vrot.slane %v3624_v21, %v13360_v53 }
 0x284   : > { %v3168_v25 = vpop.trf.xlu0  ;;  %v3216_v1 = vpop.trf.xlu1 }
 0x285   : > { %v3632_v22 = vcombine.low %v3152_v14, %v3216_v1 }
 0x287   : > { %v13674_v41 = vrot.slane %v3632_v22, %v13360_v53 }
 0x288   : > { %v3200_v51 = vpop.trf.xlu0 }
 0x289   : > { %v3692_v0 = vcombine.low %v3136_v6, %v3200_v51  ;;  %v3656_v50 = vcombine.low %v13671_v15, %v13674_v41 }
 0x28b   : > { %v13677_v12 = vrot.slane %v3692_v0, %v13360_v53  ;;  %v3664_v14 = vrot.slane %v3656_v50, %v13378_v8 }
 0x28c   : > { %v3232_v42 = vpop.trf.xlu0 }
 0x28d   : > { %v3700_v55 = vcombine.low %v3168_v25, %v3232_v42 }
 0x28f   : > { %v13680_v43 = vrot.slane %v3700_v55, %v13360_v53 }
 0x291   : > { %v3724_v4 = vcombine.low %v13677_v12, %v13680_v43 }
 0x293   : > { %v3732_v25 = vrot.slane %v3724_v4, %v13378_v8 }
 0x298   : > { %v3248_v32 = vpop.trf.xlu1  ;;  %v3264_v5 = vpop.trf.xlu0 }
 0x29c   : > { %v3280_v52 = vpop.trf.xlu1  ;;  %v3296_v45 = vpop.trf.xlu0 }
 0x2a0   : > { %v3312_v3 = vpop.trf.xlu1  ;;  %v3328_v30 = vpop.trf.xlu0 }
 0x2a1   : > { %v3640_v9 = vcombine.low %v3248_v32, %v3312_v3  ;;  %v3708_v2 = vcombine.low %v3264_v5, %v3328_v30 }
 0x2a3   : > { %v13687_v18 = vrot.slane %v3640_v9, %v13360_v53  ;;  %v13690_v61 = vrot.slane %v3708_v2, %v13360_v53 }
 0x2a4   : > { %v3344_v11 = vpop.trf.xlu1  ;;  %v3360_v59 = vpop.trf.xlu0 }
 0x2a5   : > { %v3648_v46 = vcombine.low %v3280_v52, %v3344_v11  ;;  %v3716_v17 = vcombine.low %v3296_v45, %v3360_v59 }
 0x2a7   : > { %v13693_v7 = vrot.slane %v3648_v46, %v13360_v53  ;;  %v13696_v24 = vrot.slane %v3716_v17, %v13360_v53 }
 0x2a8   : > { %v3376_v62 = vpop.trf.xlu1  ;;  %v3392_v10 = vpop.trf.xlu0 }
 0x2a9   : > { %v3672_v48 = vcombine.low %v13687_v18, %v13693_v7  ;;  %v3740_v19 = vcombine.low %v13690_v61, %v13696_v24 }
 0x2ab   : > { %v3680_v6 = vrot.slane %v3672_v48, %v13378_v8  ;;  %v3748_v37 = vrot.slane %v3740_v19, %v13378_v8 }
 0x2ac   : > { %v3408_v51 = vpop.trf.xlu1  ;;  %v3424_v1 = vpop.trf.xlu0 }
 0x2ad   : > { %v3688_v42 = vcombine.low %v3664_v14, %v3680_v6  ;;  %v3756_v32 = vcombine.low %v3732_v25, %v3748_v37 }
 0x2af   : > { %v3898_v5 = vpack.i.b16 %v3756_v32, %v3688_v42  ;;  %v3900_v52 = vshrl.u32 %v3688_v42, 16  ;;  %v3901_v45 = vshrl.u32 %v3756_v32, 16 }
 0x2b0   : > { %v3440_v21 = vpop.trf.xlu1  ;;  %v3456_v22 = vpop.trf.xlu0 }
 0x2b1   : > { %3960 = vxpose.xlu1.c.b16.start [1/2] (short) (narrow) %v3898_v5, 16  ;;  %v3902_v0 = vpack.i.b16 %v3901_v45, %v3900_v52  ;;  %v3760_v17 = vcombine.low %v3376_v62, %v3440_v21  ;;  %v3828_v50 = vcombine.low %v3392_v10, %v3456_v22 }
 0x2b3   : > { %3976 = vxpose.xlu0.c.b16.start [1/2] (short) (narrow) %v3902_v0, 16  ;;  %v3767_v52 = vrot.slane %v3760_v17, %v13360_v53  ;;  %v3835_v45 = vrot.slane %v3828_v50, %v13360_v53  ;;  %v3657_v50 = vcombine.high %v13671_v15, %v13674_v41 }
 0x2b4   : > { %v3472_v55 = vpop.trf.xlu1  ;;  %v3488_v3 = vpop.trf.xlu0 }
 0x2b5   : > { %v3768_v59 = vcombine.low %v3408_v51, %v3472_v55  ;;  %v3836_v46 = vcombine.low %v3424_v1, %v3488_v3  ;;  %v3671_v15 = vrot.slane %v3657_v50, %v13378_v8 }
 0x2b7   : > { %v3775_v19 = vrot.slane %v3768_v59, %v13360_v53  ;;  %v3843_v42 = vrot.slane %v3836_v46, %v13360_v53  ;;  %v3741_v59 = vcombine.high %v13690_v61, %v13696_v24  ;;  %v3689_v46 = vcombine.high %v3664_v14, %v3680_v6 }
 0x2b8   : > { %v3504_v30 = vpop.trf.xlu1  ;;  %v3520_v9 = vpop.trf.xlu0 }
 0x2b9   : > { %v3792_v51 = vcombine.low %v3767_v52, %v3775_v19  ;;  %v3860_v1 = vcombine.low %v3835_v45, %v3843_v42  ;;  %v3755_v61 = vrot.slane %v3741_v59, %v13378_v8 }
 0x2bc   : > { %v3536_v2 = vpop.trf.xlu1  ;;  %v3552_v11 = vpop.trf.xlu0 }
 0x2c0   : > { %v3568_v4 = vpop.trf.xlu1  ;;  %v3584_v48 = vpop.trf.xlu0 }
 0x2c1   : > { %v3776_v32 = vcombine.low %v3504_v30, %v3568_v4  ;;  %v3844_v5 = vcombine.low %v3520_v9, %v3584_v48  ;;  %v3673_v30 = vcombine.high %v13687_v18, %v13693_v7  ;;  %v3800_v9 = vrot.slane %v3792_v51, %v13378_v8 }
 0x2c2   : > { %v3725_v18 = vcombine.high %v13677_v12, %v13680_v43  ;;  %v3793_v12 = vcombine.high %v3767_v52, %v3775_v19  ;;  %v3861_v43 = vcombine.high %v3835_v45, %v3843_v42 }
 0x2c3   : > { %v3783_v62 = vrot.slane %v3776_v32, %v13360_v53  ;;  %v3851_v10 = vrot.slane %v3844_v5, %v13360_v53  ;;  %v3687_v32 = vrot.slane %v3673_v30, %v13378_v8 }
 0x2c4   : > { %v3600_v0 = vpop.trf.xlu1  ;;  %v3616_v49 = vpop.trf.xlu0  ;;  %v3739_v41 = vrot.slane %v3725_v18, %v13378_v8  ;;  %v3807_v30 = vrot.slane %v3793_v12, %v13378_v8  ;;  %v678_v12 = vld [vmem:[%s17812_s21 + $0x8] sm:$0xff] }
 0x2c5   : > { %v3784_v38 = vcombine.low %v3536_v2, %v3600_v0  ;;  %v3852_v36 = vcombine.low %v3552_v11, %v3616_v49  ;;  %v3868_v2 = vrot.slane %v3860_v1, %v13378_v8  ;;  %v3908_v0 = vshrl.u32 %v3689_v46, 16 }
 0x2c6   : > { %v3691_v59 = vcombine.high %v3671_v15, %v3687_v32 }
 0x2c7   : > { %v3791_v21 = vrot.slane %v3784_v38, %v13360_v53  ;;  %v3859_v22 = vrot.slane %v3852_v36, %v13360_v53  ;;  %v3757_v38 = vcombine.high %v3732_v25, %v3748_v37 }
 0x2c8   : > { %v3924_v18 = vshrl.u32 %v3691_v59, 16 }
 0x2c9   : > { %v3808_v55 = vcombine.low %v3783_v62, %v3791_v21  ;;  %v3876_v3 = vcombine.low %v3851_v10, %v3859_v22  ;;  %v3809_v5 = vcombine.high %v3783_v62, %v3791_v21  ;;  %v3909_v51 = vshrl.u32 %v3757_v38, 16 }
 0x2ca   : > { %v3877_v24 = vcombine.high %v3851_v10, %v3859_v22  ;;  %v3906_v37 = vpack.i.b16 %v3757_v38, %v3689_v46  ;;  %v3758_v62 = vcombine.low %v3739_v41, %v3755_v61 }
 0x2cb   : > { %v3816_v49 = vrot.slane %v3808_v55, %v13378_v8  ;;  %v3884_v11 = vrot.slane %v3876_v3, %v13378_v8  ;;  %v3910_v1 = vpack.i.b16 %v3909_v51, %v3908_v0  ;;  %v3690_v55 = vcombine.low %v3671_v15, %v3687_v32 }
 0x2cc   : > { %v3823_v21 = vrot.slane %v3809_v5, %v13378_v8  ;;  %v3891_v3 = vrot.slane %v3877_v24, %v13378_v8  ;;  %v3917_v52 = vshrl.u32 %v3758_v62, 16  ;;  %v13739_v15 = vsub.s32 1, %v13259_v20 }
 0x2cd   : > { %v3824_v17 = vcombine.low %v3800_v9, %v3816_v49  ;;  %v3892_v36 = vcombine.low %v3868_v2, %v3884_v11  ;;  %v3825_v6 = vcombine.high %v3800_v9, %v3816_v49  ;;  %v3893_v25 = vcombine.high %v3868_v2, %v3884_v11 }
 0x2ce   : > { %v3875_v9 = vrot.slane %v3861_v43, %v13378_v8  ;;  %v3916_v19 = vshrl.u32 %v3690_v55, 16  ;;  %v3826_v45 = vcombine.low %v3807_v30, %v3823_v21  ;;  %v3914_v11 = vpack.i.b16 %v3758_v62, %v3690_v55  ;;  %17814 = vst [vmem:[#allocation16_spill] sm:$0xff] %v13739_v15  ;;  %v13016_v43 = vld [vmem:[%s17802_s24] sm:$0x3]  ;;  %s13071_s24 = smov 16  }
 0x2cf   : > { %v3930_v7 = vpack.i.b16 %v3892_v36, %v3824_v17  ;;  %v3932_v4 = vshrl.u32 %v3824_v17, 16  ;;  %v3933_v48 = vshrl.u32 %v3892_v36, 16  ;;  %v3940_v10 = vshrl.u32 %v3825_v6, 16 }
 0x2d0   : > { %v3941_v22 = vshrl.u32 %v3893_v25, 16  ;;  %v3938_v2 = vpack.i.b16 %v3893_v25, %v3825_v6  ;;  %v3894_v49 = vcombine.low %v3875_v9, %v3891_v3  ;;  %v3918_v46 = vpack.i.b16 %v3917_v52, %v3916_v19 }
 0x2d1   : > { %3961 = vxpose.xlu1.c.b16.end [2/2] (short) (narrow) %v3930_v7, 16  ;;  %v3934_v14 = vpack.i.b16 %v3933_v48, %v3932_v4  ;;  %v3948_v38 = vshrl.u32 %v3826_v45, 16  ;;  %v3759_v36 = vcombine.high %v3739_v41, %v3755_v61  ;;  %v3827_v48 = vcombine.high %v3807_v30, %v3823_v21  ;;  %v677_v61 = vld [vmem:[%s17812_s21] sm:$0xff]  ;;  %v679_v41 = vld [vmem:[%s17812_s21 + $0x10] sm:$0xff] }
 0x2d2   : > { %v3942_v42 = vpack.i.b16 %v3941_v22, %v3940_v10  ;;  %v3949_v17 = vshrl.u32 %v3894_v49, 16  ;;  %v3946_v50 = vpack.i.b16 %v3894_v49, %v3826_v45  ;;  %v3895_v5 = vcombine.high %v3875_v9, %v3891_v3 }
 0x2d3   : > { %3977 = vxpose.xlu0.c.b16.end [2/2] (short) (narrow) %v3934_v14, 16  ;;  %v3925_v4 = vshrl.u32 %v3759_v36, 16  ;;  %v3922_v0 = vpack.i.b16 %v3759_v36, %v3691_v59  ;;  %v3956_v24 = vshrl.u32 %v3827_v48, 16  ;;  %v17813_v25 = vmov 0  }
 0x2d4   : > { %v3950_v7 = vpack.i.b16 %v3949_v17, %v3948_v38  ;;  %v3957_v32 = vshrl.u32 %v3895_v5, 16  ;;  %v3954_v14 = vpack.i.b16 %v3895_v5, %v3827_v48  ;;  %v1321_v21 = vcombine.high %v13312_v35, %v13471_v63 }
 0x2d5   : > { %3992 = vxpose.xlu1.c.b16.start [1/2] (short) (narrow) %v3906_v37, 16  ;;  %v3926_v51 = vpack.i.b16 %v3925_v4, %v3924_v18  ;;  %v721_v37 = vrot.slane %v13016_v43, %v13739_v15  ;;  %v1337_v3 = vcombine.high %v13456_v54, %v13490_v23  ;;  %v1368_v10 = vcombine.low %v13516_v39, %v13536_v58 }
 0x2d6   : > { %v3958_v6 = vpack.i.b16 %v3957_v32, %v3956_v24  ;;  %v1184_v22 = vcombine.low %v13306_v34, %v13435_v16  ;;  %v1185_v30 = vcombine.high %v13306_v34, %v13435_v16  ;;  %v1369_v9 = vcombine.high %v13516_v39, %v13536_v58 }
 0x2d7   : > { %4008 = vxpose.xlu0.c.b16.start [1/2] (short) (narrow) %v3910_v1, 16  ;;  %v680_v1 = vld [vmem:[%s17812_s21 + $0x18] sm:$0xff]  ;;  %v13754_v55 = vadd.f32 %v13268_v26, %v721_v37  ;;  %v13757_v62 = vadd.f32 %v13270_v28, %v721_v37  ;;  %v13788_v26 = vadd.f32 %v13288_v33, %v721_v37  ;;  %v13791_v28 = vadd.f32 %v13282_v31, %v721_v37 }
 0x2d8   : > { %v1320_v31 = vcombine.low %v13312_v35, %v13471_v63  ;;  %v1336_v33 = vcombine.low %v13456_v54, %v13490_v23  ;;  %v1200_v35 = vcombine.low %v13420_v60, %v13445_v27  ;;  %v1201_v54 = vcombine.high %v13420_v60, %v13445_v27 }
 0x2d9   : > { %3993 = vxpose.xlu1.c.b16.end [2/2] (short) (narrow) %v3938_v2, 16  ;;  %v1352_v63 = vcombine.low %v13508_v44, %v13524_v47  ;;  %v1232_v23 = vcombine.low %v13466_v57, %v13496_v40  ;;  %v1353_v34 = vcombine.high %v13508_v44, %v13524_v47  ;;  %v1233_v16 = vcombine.high %v13466_v57, %v13496_v40 }
 0x2da   : > { %v1328_v2 = vrot.slane %v1320_v31, %v13360_v53  ;;  %v1344_v19 = vrot.slane %v1336_v33, %v13360_v53  ;;  %v1335_v39 = vrot.slane %v1321_v21, %v13360_v53  ;;  %v1351_v60 = vrot.slane %v1337_v3, %v13360_v53 }
 0x2db   : > { %4009 = vxpose.xlu0.c.b16.end [2/2] (short) (narrow) %v3942_v42, 16  ;;  %v1216_v27 = vcombine.low %v13458_v56, %v13481_v13  ;;  %v1376_v58 = vrot.slane %v1368_v10, %v13360_v53  ;;  %v1192_v42 = vrot.slane %v1184_v22, %v13360_v53  ;;  %v1199_v52 = vrot.slane %v1185_v30, %v13360_v53 }
 0x2dc   : > { %v1217_v44 = vcombine.high %v13458_v56, %v13481_v13  ;;  %v1383_v57 = vrot.slane %v1369_v9, %v13360_v53  ;;  %v1208_v40 = vrot.slane %v1200_v35, %v13360_v53  ;;  %v1215_v47 = vrot.slane %v1201_v54, %v13360_v53 }
 0x2dd   : > { %4024 = vxpose.xlu1.c.b16.start [1/2] (short) (narrow) %v3914_v11, 16  ;;  %v1360_v45 = vrot.slane %v1352_v63, %v13360_v53  ;;  %v1240_v49 = vrot.slane %v1232_v23, %v13360_v53  ;;  %v1384_v11 = vcombine.low %v1328_v2, %v1344_v19  ;;  %v1385_v59 = vcombine.high %v1328_v2, %v1344_v19 }
 0x2de   : > { %v1247_v38 = vrot.slane %v1233_v16, %v13360_v53  ;;  %v1400_v17 = vcombine.low %v1335_v39, %v1351_v60  ;;  %v1224_v36 = vrot.slane %v1216_v27, %v13360_v53  ;;  %v1231_v18 = vrot.slane %v1217_v44, %v13360_v53 }
 0x2df   : > { %4040 = vxpose.xlu0.c.b16.start [1/2] (short) (narrow) %v3918_v46, 16  ;;  %v1367_v46 = vrot.slane %v1353_v34, %v13360_v53  ;;  %v1416_v56 = vcombine.low %v1360_v45, %v1376_v58  ;;  %v1417_v13 = vcombine.high %v1360_v45, %v1376_v58  ;;  %v1248_v48 = vcombine.low %v1192_v42, %v1208_v40 }
 0x2e0   : > { %v1249_v5 = vcombine.high %v1192_v42, %v1208_v40  ;;  %v1264_v24 = vcombine.low %v1199_v52, %v1215_v47  ;;  %v1265_v32 = vcombine.high %v1199_v52, %v1215_v47  ;;  %v1408_v37 = vrot.slane %v1400_v17, %v13378_v8 }
 0x2e1   : > { %4025 = vxpose.xlu1.c.b16.end [2/2] (short) (narrow) %v3946_v50, 16  ;;  %v1401_v50 = vcombine.high %v1335_v39, %v1351_v60  ;;  %v1433_v4 = vcombine.high %v1367_v46, %v1383_v57  ;;  %v1431_v43 = vrot.slane %v1417_v13, %v13378_v8  ;;  %v1256_v3 = vrot.slane %v1248_v48, %v13378_v8 }
 0x2e2   : > { %v1263_v10 = vrot.slane %v1249_v5, %v13378_v8  ;;  %v1272_v9 = vrot.slane %v1264_v24, %v13378_v8  ;;  %v1279_v35 = vrot.slane %v1265_v32, %v13378_v8 }
 0x2e3   : > { %4041 = vxpose.xlu0.c.b16.end [2/2] (short) (narrow) %v3950_v7, 16  ;;  %v1432_v7 = vcombine.low %v1367_v46, %v1383_v57  ;;  %v1447_v33 = vrot.slane %v1433_v4, %v13378_v8 }
 0x2e5   : > { %4056 = vxpose.xlu1.c.b16.start [1/2] (short) (narrow) %v3922_v0, 16  ;;  %v1280_v0 = vcombine.low %v1224_v36, %v1240_v49  ;;  %v1440_v31 = vrot.slane %v1432_v7, %v13378_v8 }
 0x2e7   : > { %4072 = vxpose.xlu0.c.b16.start [1/2] (short) (narrow) %v3926_v51, 16  ;;  %v1281_v51 = vcombine.high %v1224_v36, %v1240_v49  ;;  %v1288_v22 = vrot.slane %v1280_v0, %v13378_v8  ;;  %v1452_v39 = vcombine.low %v1408_v37, %v1440_v31  ;;  %v1453_v60 = vcombine.high %v1408_v37, %v1440_v31 }
 0x2e9   : > { %4057 = vxpose.xlu1.c.b16.end [2/2] (short) (narrow) %v3954_v14, 16  ;;  %v1296_v14 = vcombine.low %v1231_v18, %v1247_v38  ;;  %v1295_v30 = vrot.slane %v1281_v51, %v13378_v8  ;;  %v1312_v42 = vcombine.low %v1256_v3, %v1288_v22  ;;  %v1313_v52 = vcombine.high %v1256_v3, %v1288_v22 }
 0x2eb   : > { %4073 = vxpose.xlu0.c.b16.end [2/2] (short) (narrow) %v3958_v6, 16  ;;  %v1297_v6 = vcombine.high %v1231_v18, %v1247_v38  ;;  %v1304_v54 = vrot.slane %v1296_v14, %v13378_v8  ;;  %v1314_v44 = vcombine.low %v1263_v10, %v1295_v30  ;;  %v1315_v57 = vcombine.high %v1263_v10, %v1295_v30 }
 0x2ed   : > { %12400 = vset.pattern.permute.xlu1 %v17813_v25  ;;  %v1311_v63 = vrot.slane %v1297_v6, %v13378_v8  ;;  %v1316_v40 = vcombine.low %v1272_v9, %v1304_v54  ;;  %v1317_v47 = vcombine.high %v1272_v9, %v1304_v54 }
 0x2ee   : > { %683 = vperm.xlu1 %12400, %v677_v61   ;;  %v1392_v61 = vrot.slane %v1384_v11, %v13378_v8 }
 0x2ef   : > { %v1318_v45 = vcombine.low %v1279_v35, %v1311_v63  ;;  %v1319_v49 = vcombine.high %v1279_v35, %v1311_v63 }
 0x2f1   : > { %v11633_v13 = vpack.c.bf16 %v1318_v45, %v1314_v44  ;;  %v11637_v18 = vpack.c.bf16 %v1319_v49, %v1315_v57 }
 0x2f2   : > { %689 = vperm.xlu1 %12400, %v679_v41   ;;  %v1399_v41 = vrot.slane %v1385_v59, %v13378_v8 }
 0x2f3   : > { %v2943_v32 = vrot.slane %v11633_v13, %v13360_v53  ;;  %v3011_v6 = vrot.slane %v11637_v18, %v13360_v53 }
 0x2f4   : > { %12401 = vset.pattern.permute.xlu0 %v17813_v25  ;;  %v1450_v34 = vcombine.low %v1399_v41, %v1431_v43  ;;  %v1451_v16 = vcombine.high %v1399_v41, %v1431_v43 }
 0x2f5   : > { %686 = vperm.xlu0 %12401, %v678_v12   ;;  %v1424_v12 = vrot.slane %v1416_v56, %v13378_v8  ;;  %v11632_v56 = vpack.c.bf16 %v1316_v40, %v1312_v42 }
 0x2f6   : > { %692 = vperm.xlu1 %12400, %v680_v1   ;;  %v1415_v1 = vrot.slane %v1401_v50, %v13378_v8  ;;  %v11636_v50 = vpack.c.bf16 %v1317_v47, %v1313_v52 }
 0x2f7   : > { %v1448_v2 = vcombine.low %v1392_v61, %v1424_v12  ;;  %v1449_v19 = vcombine.high %v1392_v61, %v1424_v12  ;;  %v2935_v24 = vrot.slane %v11632_v56, %v13360_v53 }
 0x2f8   : > { %v1454_v27 = vcombine.low %v1415_v1, %v1447_v33  ;;  %v1455_v58 = vcombine.high %v1415_v1, %v1447_v33  ;;  %v3003_v14 = vrot.slane %v11636_v50, %v13360_v53 }
 0x2f9   : > { %2100 = vrot.lane.b32.xlu0 %v13754_v55, %s13062_s4  ;;  %v11634_v46 = vpack.c.bf16 %v1452_v39, %v1448_v2  ;;  %v11638_v17 = vpack.c.bf16 %v1453_v60, %v1449_v19  ;;  %v2960_v1 = vcombine.low %v2935_v24, %v2943_v32  ;;  %v2961_v9 = vcombine.high %v2935_v24, %v2943_v32 }
 0x2fa   : > { %2102 = vrot.lane.b32.xlu1 %v13757_v62, %s13062_s4  ;;  %v11635_v38 = vpack.c.bf16 %v1454_v27, %v1450_v34  ;;  %v11639_v36 = vpack.c.bf16 %v1455_v58, %v1451_v16  ;;  %v3028_v33 = vcombine.low %v3003_v14, %v3011_v6  ;;  %v3029_v54 = vcombine.high %v3003_v14, %v3011_v6 }
 0x2fb   : > { %v2951_v4 = vrot.slane %v11634_v46, %v13360_v53  ;;  %v3019_v5 = vrot.slane %v11638_v17, %v13360_v53  ;;  %v2968_v34 = vrot.slane %v2960_v1, %v13378_v8  ;;  %v13906_v44 = vrot.slane %v2961_v9, %v13378_v8 }
 0x2fc   : > { %v2959_v48 = vrot.slane %v11635_v38, %v13360_v53  ;;  %v3027_v0 = vrot.slane %v11639_v36, %v13360_v53  ;;  %v3036_v39 = vrot.slane %v3028_v33, %v13378_v8  ;;  %v13912_v40 = vrot.slane %v3029_v54, %v13378_v8  ;;  %v17816_v33 = vld [vmem:[#allocation9_spill] sm:$0xff] }
 0x2fd   : > { %2112 = vrot.lane.b32.xlu0 %v13754_v55, %s13061_s25 }
 0x2fe   : > { %2114 = vrot.lane.b32.xlu1 %v13757_v62, %s13061_s25  ;;  %v2976_v31 = vcombine.low %v2951_v4, %v2959_v48  ;;  %v3044_v3 = vcombine.low %v3019_v5, %v3027_v0  ;;  %v2977_v35 = vcombine.high %v2951_v4, %v2959_v48  ;;  %v3045_v63 = vcombine.high %v3019_v5, %v3027_v0 }
 0x300   : > { %v2984_v16 = vrot.slane %v2976_v31, %v13378_v8  ;;  %v3052_v60 = vrot.slane %v3044_v3, %v13378_v8  ;;  %v13909_v57 = vrot.slane %v2977_v35, %v13378_v8  ;;  %v13915_v47 = vrot.slane %v3045_v63, %v13378_v8  ;;  %v17815_v31 = vld [vmem:[#allocation10_spill] sm:$0xff]  ;;  %v17818_v35 = vld [vmem:[#allocation11_spill] sm:$0xff] }
 0x301   : > { %2124 = vrot.lane.b32.xlu0 %v13754_v55, %s13063_s27  ;;  %v17817_v3 = vpack.i.b16 %v17815_v31, %v17816_v33 }
 0x302   : > { %2126 = vrot.lane.b32.xlu1 %v13757_v62, %s13063_s27  ;;  %v3060_v46 = vcombine.low %v3036_v39, %v3052_v60  ;;  %v13931_v13 = vcombine.high %v13906_v44, %v13909_v57  ;;  %v13935_v50 = vcombine.high %v13912_v40, %v13915_v47 }
 0x304   : > { %v3108_v14 = vpack.i.b16 %v13935_v50, %v13931_v13 }
 0x305   : > { %2136 = vrot.lane.b32.xlu0 %v13754_v55, %s13064_s30 }
 0x306   : > { %2138 = vrot.lane.b32.xlu1 %v13757_v62, %s13064_s30 }
 0x309   : > { %2148 = vrot.lane.b32.xlu0 %v13754_v55, %s13065_s16 }
 0x30a   : > { %2150 = vrot.lane.b32.xlu1 %v13757_v62, %s13065_s16 }
 0x30d   : > { %2160 = vrot.lane.b32.xlu0 %v13754_v55, %s13066_s18 }
 0x30e   : > { %2162 = vrot.lane.b32.xlu1 %v13757_v62, %s13066_s18 }
 0x311   : > { %2172 = vrot.lane.b32.xlu0 %v13754_v55, %s13067_s29 }
 0x312   : > { %2174 = vrot.lane.b32.xlu1 %v13757_v62, %s13067_s29 }
 0x315   : > { %2106 = vrot.lane.b32.xlu0 %v13788_v26, %s13062_s4 }
 0x316   : > { %2104 = vrot.lane.b32.xlu1 %v13791_v28, %s13062_s4  ;;  %s13073_s4 = smov 24  }
 0x319   : > { %2128 = vrot.lane.b32.xlu0 %v13791_v28, %s13063_s27 }
 0x31a   : > { %2116 = vrot.lane.b32.xlu1 %v13791_v28, %s13061_s25 }
 0x31d   : > { %2140 = vrot.lane.b32.xlu0 %v13791_v28, %s13064_s30 }
 0x31e   : > { %2118 = vrot.lane.b32.xlu1 %v13788_v26, %s13061_s25  ;;  %s13072_s25 = smov 8  }
 0x321   : > { %2152 = vrot.lane.b32.xlu0 %v13791_v28, %s13065_s16 }
 0x322   : > { %2130 = vrot.lane.b32.xlu1 %v13788_v26, %s13063_s27  ;;  %s13074_s27 = smov 32  }
 0x325   : > { %2164 = vrot.lane.b32.xlu0 %v13791_v28, %s13066_s18 }
 0x326   : > { %2142 = vrot.lane.b32.xlu1 %v13788_v26, %s13064_s30  ;;  %s13075_s30 = smov 40  }
 0x329   : > { %2176 = vrot.lane.b32.xlu0 %v13791_v28, %s13067_s29 }
 0x32a   : > { %2154 = vrot.lane.b32.xlu1 %v13788_v26, %s13065_s16  ;;  %s13076_s16 = smov 48  }
 0x32e   : > { %2166 = vrot.lane.b32.xlu1 %v13788_v26, %s13066_s18  ;;  %s18116_s18 = scalar_lea.vmem %s17701_s14, %s13172_s20 }
 0x332   : > { %2178 = vrot.lane.b32.xlu1 %v13788_v26, %s13067_s29  ;;  %s13078_s29 = smov [#allocation2]  }
 0x333   : > { %v3968_v21 = vpop.trf.xlu1 }
 0x335   : > { %v3984_v23 = vpop.trf.xlu0 }
 0x33b   : > { %v4000_v11 = vpop.trf.xlu1 }
 0x33d   : > { %v4016_v59 = vpop.trf.xlu0 }
 0x343   : > { %v4032_v7 = vpop.trf.xlu1 }
 0x344   : > { %v4088_v61 = vcombine.low %v3968_v21, %v4032_v7 }
 0x345   : > { %v4048_v51 = vpop.trf.xlu0 }
 0x346   : > { %v4122_v12 = vcombine.low %v3984_v23, %v4048_v51  ;;  %v4095_v10 = vrot.slane %v4088_v61, %v13360_v53  ;;  %v3092_v61 = vshrl.u32 %v3060_v46, 16 }
 0x348   : > { %v4129_v2 = vrot.slane %v4122_v12, %v13360_v53 }
 0x34b   : > { %v4064_v41 = vpop.trf.xlu1 }
 0x34c   : > { %v4096_v43 = vcombine.low %v4000_v11, %v4064_v41 }
 0x34d   : > { %v4080_v37 = vpop.trf.xlu0 }
 0x34e   : > { %v4103_v22 = vrot.slane %v4096_v43, %v13360_v53  ;;  %v4130_v30 = vcombine.low %v4016_v59, %v4080_v37  ;;  %v2992_v59 = vcombine.low %v2968_v34, %v2984_v16 }
 0x350   : > { %v4104_v21 = vcombine.low %v4095_v10, %v4103_v22  ;;  %v4105_v19 = vcombine.high %v4095_v10, %v4103_v22  ;;  %v4137_v23 = vrot.slane %v4130_v30, %v13360_v53  ;;  %v3090_v0 = vpack.i.b16 %v3060_v46, %v2992_v59 }
 0x351   : > { %v3091_v6 = vshrl.u32 %v2992_v59, 16  ;;  %v3061_v10 = vcombine.high %v3036_v39, %v3052_v60 }
 0x352   : > { %v13902_v27 = vrot.slane %v4105_v19, %v13378_v8  ;;  %v4138_v58 = vcombine.low %v4129_v2, %v4137_v23  ;;  %v4139_v42 = vcombine.high %v4129_v2, %v4137_v23  ;;  %v4112_v52 = vrot.slane %v4104_v21, %v13378_v8 }
 0x353   : > { %v3093_v12 = vpack.i.b16 %v3092_v61, %v3091_v6  ;;  %v3098_v2 = vshrl.u32 %v3061_v10, 16  ;;  %v3109_v6 = vshrl.u32 %v13931_v13, 16  ;;  %v3110_v61 = vshrl.u32 %v13935_v50, 16 }
 0x354   : > { %v13918_v45 = vrot.slane %v4139_v42, %v13378_v8  ;;  %v4146_v49 = vrot.slane %v4138_v58, %v13378_v8  ;;  %v4159_v11 = vshrl.u32 %v4112_v52, 16  ;;  %v13923_v36 = vcombine.high %v13902_v27, %v17813_v25  ;;  %v17819_v58 = vld [vmem:[#allocation13_spill] sm:$0xff]  ;;  %v17820_v42 = vld [vmem:[#allocation12_spill] sm:$0xff] }
 0x355   : > { %v4120_v51 = vcombine.high %v4112_v52, %v17813_v25 }
 0x356   : > { %v4158_v38 = vpack.i.b16 %v4146_v49, %v4112_v52  ;;  %v4160_v17 = vshrl.u32 %v4146_v49, 16  ;;  %v13927_v56 = vcombine.high %v13918_v45, %v17813_v25  ;;  %v4154_v48 = vcombine.high %v4146_v49, %v17813_v25 }
 0x357   : > { %v4165_v43 = vshrl.u32 %v4120_v51, 16  ;;  %v4170_v9 = vpack.i.b16 %v13918_v45, %v13902_v27  ;;  %v4172_v21 = vshrl.u32 %v13918_v45, 16  ;;  %v17821_v52 = vpack.i.b16 %v17819_v58, %v17820_v42 }
 0x358   : > { %12358 = vmatprep.subr.msk.bf16.mxu1 %vm4187_vm3, %v4158_v38  ;;  %v4189_v18 = vsel %vm4187_vm3, %v4158_v38, 0  ;;  %v4161_v7 = vpack.i.b16 %v4160_v17, %v4159_v11  ;;  %v4176_v4 = vpack.i.b16 %v13927_v56, %v13923_v36  ;;  %v4164_v32 = vpack.i.b16 %v4154_v48, %v4120_v51 }
 0x359   : > { %12235 = vmatpush3.bf16.msra.mxu1 %v4189_v18  ;;  %v4166_v41 = vshrl.u32 %v4154_v48, 16  ;;  %v4421_v39 = vsel %vm4187_vm3, %v4170_v9, 0  ;;  %v3062_v45 = vcombine.low %v13912_v40, %v13915_v47  ;;  %v4178_v59 = vshrl.u32 %v13927_v56, 16  ;;  %v17822_v48 = vld [vmem:[#allocation14_spill] sm:$0xff] }
 0x35a   : > { %12359 = vmatprep.subr.msk.bf16.mxu1 %vm4187_vm3, %v4161_v7  ;;  %12364 = vmatprep.subr.msk.bf16.mxu0 %vm4187_vm3, %v4176_v4  ;;  %v4537_v5 = vsel %vm4187_vm3, %v4176_v4, 0  ;;  %v4247_v24 = vsel %vm4187_vm3, %v4161_v7, 0  ;;  %v4305_v37 = vsel %vm4187_vm3, %v4164_v32, 0  ;;  %v4177_v17 = vshrl.u32 %v13923_v36, 16 }
 0x35b   : > { %12271 = vmatpush3.bf16.msra.mxu0 %v4537_v5  ;;  %v4167_v1 = vpack.i.b16 %v4166_v41, %v4165_v43  ;;  %v3104_v40 = vshrl.u32 %v3062_v45, 16 }
 0x35c   : > { %12237 = vmatmul.mubr.msk.bf16.vlgmr.msra.gmra.mrb[0].mxu1 %vm4180_vm2, %v3090_v0  ;;  %v4179_v4 = vpack.i.b16 %v4178_v59, %v4177_v17 }
 0x35d   : > { %12241 = vmatpush3.bf16.msra.mxu1 %v4247_v24  ;;  %12242 = vmatprep.mubr.msk.bf16.mxu1 %vm4180_vm2, %v13512_v29  ;;  %v2993_v29 = vcombine.high %v2968_v34, %v2984_v16  ;;  %v4363_v30 = vsel %vm4187_vm3, %v4167_v1, 0  ;;  %v4171_v34 = vshrl.u32 %v13902_v27, 16  ;;  %v2994_v27 = vcombine.low %v13906_v44, %v13909_v57 }
 0x35e   : > { %12360 = vmatprep.subr.msk.bf16.mxu1 %vm4187_vm3, %v4164_v32  ;;  %12273 = vmatmul.mubr.msk.bf16.vlgmr.msra.gmra.mrb[8].mxu0 %vm4180_vm2, %v3108_v14  ;;  %v4595_v36 = vsel %vm4187_vm3, %v4179_v4, 0  ;;  %v17823_v14 = vld [vmem:[#allocation15_spill] sm:$0xff] }
 0x35f   : > { %v3096_v22 = vpack.i.b16 %v3061_v10, %v2993_v29  ;;  %v3097_v63 = vshrl.u32 %v2993_v29, 16  ;;  %v4173_v60 = vpack.i.b16 %v4172_v21, %v4171_v34  ;;  %v3102_v38 = vpack.i.b16 %v3062_v45, %v2994_v27 }
 0x360   : > { %v3103_v57 = vshrl.u32 %v2994_v27, 16 }
 0x361   : > { %v3099_v23 = vpack.i.b16 %v3098_v2, %v3097_v63  ;;  %v4479_v7 = vsel %vm4187_vm3, %v4173_v60, 0 }
 0x362   : > { %v3105_v5 = vpack.i.b16 %v3104_v40, %v3103_v57 }
 0x364   : > { %12243 = vmatmul.mubr.msk.bf16.vlgmr.msra.gmra.mrb[4].mxu1 %vm4180_vm2, %v3093_v12 }
 0x365   : > { %12247 = vmatpush3.bf16.msra.mxu1 %v4305_v37  ;;  %12248 = vmatprep.mubr.msk.bf16.mxu1 %vm4180_vm2, %v17817_v3 }
 0x366   : > { %12361 = vmatprep.subr.msk.bf16.mxu1 %vm4187_vm3, %v4167_v1 }
 0x36c   : > { %12249 = vmatmul.mubr.msk.bf16.vlgmr.msra.gmra.mrb[8].mxu1 %vm4180_vm2, %v3096_v22  ;;  %v3111_v22 = vpack.i.b16 %v3110_v61, %v3109_v6 }
 0x36d   : > { %12253 = vmatpush3.bf16.msra.mxu1 %v4363_v30  ;;  %12254 = vmatprep.mubr.msk.bf16.mxu1 %vm4180_vm2, %v17818_v35  ;;  %v13967_v54 = vpop.permute.xlu1 %683 }
 0x36e   : > { %12362 = vmatprep.subr.msk.bf16.mxu1 %vm4187_vm3, %v4170_v9 }
 0x371   : > { %v13971_v19 = vpop.permute.xlu1 %689 }
 0x374   : > { %v13974_v16 = vpop.permute.xlu0 %686  ;;  %12255 = vmatmul.mubr.msk.bf16.vlgmr.msra.gmra.mrb[12].mxu1 %vm4180_vm2, %v3099_v23 }
 0x375   : > { %12259 = vmatpush3.bf16.msra.mxu1 %v4421_v39  ;;  %12260 = vmatprep.mubr.msk.bf16.mxu1 %vm4180_vm2, %v17821_v52  ;;  %v13982_v49 = vpop.permute.xlu1 %692 }
 0x376   : > { %12363 = vmatprep.subr.msk.bf16.mxu1 %vm4187_vm3, %v4173_v60 }
 0x378   : > { %v2101_v11 = vpop.permute.xlu0 %2100 }
 0x379   : > { %v2103_v46 = vpop.permute.xlu1 %2102 }
 0x37c   : > { %v2113_v18 = vpop.permute.xlu0 %2112  ;;  %12261 = vmatmul.mubr.msk.bf16.vlgmr.msra.gmra.mrb[16].mxu1 %vm4180_vm2, %v3102_v38 }
 0x37d   : > { %12265 = vmatpush3.bf16.msra.mxu1 %v4479_v7  ;;  %12266 = vmatprep.mubr.msk.bf16.mxu1 %vm4180_vm2, %v17822_v48  ;;  %v2115_v44 = vpop.permute.xlu1 %2114  ;;  %v2184_v41 = vcombine.low %v13754_v55, %v2113_v18  ;;  %v2185_v43 = vcombine.high %v13754_v55, %v2113_v18 }
 0x37e   : > { %12365 = vmatprep.subr.msk.bf16.mxu1 %vm4187_vm3, %v4179_v4  ;;  %v2320_v31 = vcombine.low %v13757_v62, %v2115_v44  ;;  %v2321_v29 = vcombine.high %v13757_v62, %v2115_v44 }
 0x37f   : > { %v2192_v13 = vrot.slane %v2184_v41, %v13360_v53  ;;  %v2199_v30 = vrot.slane %v2185_v43, %v13360_v53 }
 0x380   : > { %v2125_v47 = vpop.permute.xlu0 %2124  ;;  %v2328_v35 = vrot.slane %v2320_v31, %v13360_v53  ;;  %v2335_v62 = vrot.slane %v2321_v29, %v13360_v53 }
 0x381   : > { %v2127_v56 = vpop.permute.xlu1 %2126  ;;  %v2200_v51 = vcombine.low %v2101_v11, %v2125_v47  ;;  %v2201_v32 = vcombine.high %v2101_v11, %v2125_v47 }
 0x382   : > { %v2336_v12 = vcombine.low %v2103_v46, %v2127_v56  ;;  %v2337_v37 = vcombine.high %v2103_v46, %v2127_v56 }
 0x383   : > { %v2208_v33 = vrot.slane %v2200_v51, %v13360_v53  ;;  %v2215_v10 = vrot.slane %v2201_v32, %v13360_v53 }
 0x384   : > { %v2137_v0 = vpop.permute.xlu0 %2136  ;;  %12267 = vmatmul.mubr.msk.bf16.vlgmr.msra.gmra.mrb[20].mxu1 %vm4180_vm2, %v3105_v5  ;;  %v2344_v50 = vrot.slane %v2336_v12, %v13360_v53  ;;  %v14012_v55 = vrot.slane %v2337_v37, %v13360_v53 }
 0x385   : > { %12277 = vmatpush3.bf16.msra.mxu1 %v4595_v36  ;;  %v2139_v24 = vpop.permute.xlu1 %2138  ;;  %12278 = vmatprep.mubr.msk.bf16.mxu1 %vm4180_vm2, %v17823_v14  ;;  %v2248_v63 = vcombine.low %v2192_v13, %v2208_v33  ;;  %v2249_v21 = vcombine.high %v2192_v13, %v2208_v33  ;;  %v2264_v23 = vcombine.low %v2199_v30, %v2215_v10 }
 0x386   : > { %v2265_v34 = vcombine.high %v2199_v30, %v2215_v10  ;;  %v2384_v39 = vcombine.low %v2328_v35, %v2344_v50  ;;  %v2385_v42 = vcombine.high %v2328_v35, %v2344_v50  ;;  %v2400_v52 = vcombine.low %v2335_v62, %v14012_v55 }
 0x387   : > { %v14019_v59 = vrot.slane %v2248_v63, %v13378_v8  ;;  %v2401_v46 = vcombine.high %v2335_v62, %v14012_v55  ;;  %v14023_v7 = vrot.slane %v2249_v21, %v13378_v8  ;;  %v2272_v4 = vrot.slane %v2264_v23, %v13378_v8 }
 0x388   : > { %v2149_v1 = vpop.permute.xlu0 %2148  ;;  %v2279_v10 = vrot.slane %v2265_v34, %v13378_v8  ;;  %v2399_v62 = vrot.slane %v2385_v42, %v13378_v8  ;;  %v2408_v21 = vrot.slane %v2400_v52, %v13378_v8 }
 0x389   : > { %v2151_v3 = vpop.permute.xlu1 %2150 }
 0x38c   : > { %v2161_v9 = vpop.permute.xlu0 %2160  ;;  %12279 = vmatmul.mubr.msk.bf16.vlgmr.msra.gmra.mrb[24].mxu1 %vm4180_vm2, %v3111_v22  ;;  %v2392_v22 = vrot.slane %v2384_v39, %v13378_v8  ;;  %v2415_v39 = vrot.slane %v2401_v46, %v13378_v8 }
 0x38d   : > { %v2163_v2 = vpop.permute.xlu1 %2162  ;;  %v2216_v60 = vcombine.low %v2137_v0, %v2161_v9  ;;  %v2217_v58 = vcombine.high %v2137_v0, %v2161_v9 }
 0x38e   : > { %v2352_v27 = vcombine.low %v2139_v24, %v2163_v2  ;;  %v2353_v45 = vcombine.high %v2139_v24, %v2163_v2 }
 0x38f   : > { %v2224_v57 = vrot.slane %v2216_v60, %v13360_v53  ;;  %v2231_v40 = vrot.slane %v2217_v58, %v13360_v53 }
 0x390   : > { %v2173_v11 = vpop.permute.xlu0 %2172  ;;  %v2360_v5 = vrot.slane %v2352_v27, %v13360_v53  ;;  %v2367_v0 = vrot.slane %v2353_v45, %v13360_v53 }
 0x391   : > { %v2232_v38 = vcombine.low %v2149_v1, %v2173_v11  ;;  %v2233_v17 = vcombine.high %v2149_v1, %v2173_v11  ;;  %v2175_v18 = vpop.permute.xlu1 %2174 }
 0x392   : > { %v2368_v48 = vcombine.low %v2151_v3, %v2175_v18  ;;  %v2369_v44 = vcombine.high %v2151_v3, %v2175_v18 }
 0x393   : > { %v2240_v47 = vrot.slane %v2232_v38, %v13360_v53  ;;  %v2247_v56 = vrot.slane %v2233_v17, %v13360_v53 }
 0x394   : > { %v2376_v36 = vrot.slane %v2368_v48, %v13360_v53  ;;  %v2383_v51 = vrot.slane %v2369_v44, %v13360_v53  ;;  %v14034_v24 = vpop.permute.xlu0 %2106 }
 0x395   : > { %v2280_v32 = vcombine.low %v2224_v57, %v2240_v47  ;;  %v2281_v14 = vcombine.high %v2224_v57, %v2240_v47  ;;  %v2296_v6 = vcombine.low %v2231_v40, %v2247_v56  ;;  %v2297_v61 = vcombine.high %v2231_v40, %v2247_v56  ;;  %v2105_v41 = vpop.permute.xlu1 %2104 }
 0x396   : > { %v2416_v12 = vcombine.low %v2360_v5, %v2376_v36  ;;  %v2417_v43 = vcombine.high %v2360_v5, %v2376_v36  ;;  %v2432_v37 = vcombine.low %v2367_v0, %v2383_v51  ;;  %v2433_v1 = vcombine.high %v2367_v0, %v2383_v51 }
 0x397   : > { %v2288_v31 = vrot.slane %v2280_v32, %v13378_v8  ;;  %v2295_v33 = vrot.slane %v2281_v14, %v13378_v8  ;;  %v2304_v3 = vrot.slane %v2296_v6, %v13378_v8  ;;  %v2311_v29 = vrot.slane %v2297_v61, %v13378_v8 }
 0x398   : > { %v2424_v13 = vrot.slane %v2416_v12, %v13378_v8  ;;  %v2431_v50 = vrot.slane %v2417_v43, %v13378_v8  ;;  %v2129_v30 = vpop.permute.xlu0 %2128  ;;  %v2440_v35 = vrot.slane %v2432_v37, %v13378_v8  ;;  %v2447_v63 = vrot.slane %v2433_v1, %v13378_v8 }
 0x399   : > { %v2312_v55 = vcombine.low %v14019_v59, %v2288_v31  ;;  %v2314_v9 = vcombine.low %v14023_v7, %v2295_v33  ;;  %v2117_v2 = vpop.permute.xlu1 %2116  ;;  %v2316_v23 = vcombine.low %v2272_v4, %v2304_v3  ;;  %v2318_v34 = vcombine.low %v2279_v10, %v2311_v29 }
 0x39a   : > { %v2313_v60 = vcombine.high %v14019_v59, %v2288_v31  ;;  %v2315_v58 = vcombine.high %v14023_v7, %v2295_v33  ;;  %v2317_v27 = vcombine.high %v2272_v4, %v2304_v3  ;;  %v2319_v45 = vcombine.high %v2279_v10, %v2311_v29 }
 0x39b   : > { %v2448_v11 = vcombine.low %v2392_v22, %v2424_v13  ;;  %v2449_v38 = vcombine.high %v2392_v22, %v2424_v13  ;;  %v2450_v17 = vcombine.low %v2399_v62, %v2431_v50  ;;  %v11656_v48 = vpack.c.bf16 %v2316_v23, %v2312_v55 }
 0x39c   : > { %v14053_v18 = vpop.permute.xlu0 %2140  ;;  %v11657_v44 = vpack.c.bf16 %v2318_v34, %v2314_v9  ;;  %v2452_v42 = vcombine.low %v2408_v21, %v2440_v35  ;;  %v2454_v57 = vcombine.low %v2415_v39, %v2447_v63  ;;  %v2472_v40 = vcombine.low %v2105_v41, %v2129_v30 }
 0x39d   : > { %v2119_v52 = vpop.permute.xlu1 %2118  ;;  %v2473_v47 = vcombine.high %v2105_v41, %v2129_v30  ;;  %v2456_v46 = vcombine.low %v13791_v28, %v2117_v2  ;;  %v2457_v59 = vcombine.high %v13791_v28, %v2117_v2  ;;  %v11660_v56 = vpack.c.bf16 %v2317_v27, %v2313_v60 }
 0x39e   : > { %v2451_v7 = vcombine.high %v2399_v62, %v2431_v50  ;;  %v2453_v4 = vcombine.high %v2408_v21, %v2440_v35  ;;  %v2455_v5 = vcombine.high %v2415_v39, %v2447_v63  ;;  %v2480_v0 = vrot.slane %v2472_v40, %v13360_v53 }
 0x39f   : > { %v2487_v36 = vrot.slane %v2473_v47, %v13360_v53  ;;  %v2464_v51 = vrot.slane %v2456_v46, %v13360_v53  ;;  %v2471_v32 = vrot.slane %v2457_v59, %v13360_v53  ;;  %v11658_v6 = vpack.c.bf16 %v2452_v42, %v2448_v11 }
 0x3a0   : > { %v2153_v14 = vpop.permute.xlu0 %2152  ;;  %v11659_v61 = vpack.c.bf16 %v2454_v57, %v2450_v17  ;;  %v2592_v41 = vcombine.low %v13788_v26, %v2119_v52  ;;  %v2593_v12 = vcombine.high %v13788_v26, %v2119_v52  ;;  %v5030_v1 = vrot.slane %v11656_v48, %v13360_v53 }
 0x3a1   : > { %v2131_v28 = vpop.permute.xlu1 %2130  ;;  %v2520_v43 = vcombine.low %v2464_v51, %v2480_v0  ;;  %v2521_v37 = vcombine.high %v2464_v51, %v2480_v0  ;;  %v5038_v31 = vrot.slane %v11657_v44, %v13360_v53  ;;  %v2536_v33 = vcombine.low %v2471_v32, %v2487_v36 }
 0x3a2   : > { %v2537_v3 = vcombine.high %v2471_v32, %v2487_v36  ;;  %v2608_v29 = vcombine.low %v14034_v24, %v2131_v28  ;;  %v2609_v10 = vcombine.high %v14034_v24, %v2131_v28  ;;  %v11661_v22 = vpack.c.bf16 %v2319_v45, %v2315_v58 }
 0x3a3   : > { %v11662_v13 = vpack.c.bf16 %v2453_v4, %v2449_v38  ;;  %v11663_v50 = vpack.c.bf16 %v2455_v5, %v2451_v7  ;;  %v14068_v30 = vrot.slane %v2592_v41, %v13360_v53  ;;  %v14071_v55 = vrot.slane %v2593_v12, %v13360_v53 }
 0x3a4   : > { %v2165_v26 = vpop.permute.xlu0 %2164  ;;  %v14074_v9 = vrot.slane %v2608_v29, %v13360_v53  ;;  %v14077_v35 = vrot.slane %v2609_v10, %v13360_v53  ;;  %v14083_v24 = vrot.slane %v2520_v43, %v13378_v8  ;;  %v5046_v62 = vrot.slane %v11658_v6, %v13360_v53 }
 0x3a5   : > { %v2488_v63 = vcombine.low %v14053_v18, %v2165_v26  ;;  %v14080_v2 = vpop.permute.xlu1 %2142  ;;  %v5054_v21 = vrot.slane %v11659_v61, %v13360_v53  ;;  %v5055_v23 = vcombine.low %v5030_v1, %v5038_v31  ;;  %v14088_v34 = vrot.slane %v2521_v37, %v13378_v8 }
 0x3a6   : > { %v2544_v39 = vrot.slane %v2536_v33, %v13378_v8  ;;  %v2551_v60 = vrot.slane %v2537_v3, %v13378_v8  ;;  %v2489_v58 = vcombine.high %v14053_v18, %v2165_v26  ;;  %v2656_v27 = vcombine.low %v14068_v30, %v14074_v9 }
 0x3a7   : > { %v2657_v45 = vcombine.high %v14068_v30, %v14074_v9  ;;  %v5071_v38 = vcombine.low %v5046_v62, %v5054_v21  ;;  %v14098_v17 = vrot.slane %v11660_v56, %v13360_v53  ;;  %v2672_v48 = vcombine.low %v14071_v55, %v14077_v35 }
 0x3a8   : > { %v2177_v11 = vpop.permute.xlu0 %2176  ;;  %v2673_v44 = vcombine.high %v14071_v55, %v14077_v35  ;;  %v2496_v42 = vrot.slane %v2488_v63, %v13360_v53  ;;  %v5063_v18 = vrot.slane %v5055_v23, %v13378_v8  ;;  %v14110_v46 = vrot.slane %v11661_v22, %v13360_v53 }
 0x3a9   : > { %v14106_v57 = vpop.permute.xlu1 %2154  ;;  %v2504_v52 = vcombine.low %v2153_v14, %v2177_v11  ;;  %v2505_v40 = vcombine.high %v2153_v14, %v2177_v11  ;;  %v5079_v47 = vrot.slane %v5071_v38, %v13378_v8  ;;  %v14113_v59 = vrot.slane %v11662_v13, %v13360_v53 }
 0x3aa   : > { %v14116_v56 = vrot.slane %v11663_v50, %v13360_v53  ;;  %v5056_v7 = vcombine.high %v5030_v1, %v5038_v31  ;;  %v5072_v4 = vcombine.high %v5046_v62, %v5054_v21  ;;  %v2503_v5 = vrot.slane %v2489_v58, %v13360_v53 }
 0x3ab   : > { %v2512_v0 = vrot.slane %v2504_v52, %v13360_v53  ;;  %v2519_v36 = vrot.slane %v2505_v40, %v13360_v53  ;;  %v5123_v51 = vcombine.low %v14098_v17, %v14110_v46  ;;  %v14124_v32 = vrot.slane %v2656_v27, %v13378_v8 }
 0x3ac   : > { %v5087_v14 = vcombine.low %v5063_v18, %v5079_v47  ;;  %v5139_v6 = vcombine.low %v14113_v59, %v14116_v56  ;;  %v14128_v41 = vcombine.high %v5063_v18, %v5079_v47  ;;  %v14133_v33 = vrot.slane %v5056_v7, %v13378_v8 }
 0x3ad   : > { %v2167_v61 = vpop.permute.xlu1 %2166  ;;  %v2552_v12 = vcombine.low %v2496_v42, %v2512_v0  ;;  %v2553_v28 = vcombine.high %v2496_v42, %v2512_v0  ;;  %v2568_v43 = vcombine.low %v2503_v5, %v2519_v36  ;;  %v2569_v37 = vcombine.high %v2503_v5, %v2519_v36 }
 0x3ae   : > { %v5131_v1 = vrot.slane %v5123_v51, %v13378_v8  ;;  %v5147_v31 = vrot.slane %v5139_v6, %v13378_v8  ;;  %v14136_v3 = vrot.slane %v5072_v4, %v13378_v8  ;;  %v5299_v26 = vshrl.u32 %v5087_v14, 16 }
 0x3af   : > { %v2560_v29 = vrot.slane %v2552_v12, %v13378_v8  ;;  %v2567_v10 = vrot.slane %v2553_v28, %v13378_v8  ;;  %v2576_v22 = vrot.slane %v2568_v43, %v13378_v8  ;;  %v2583_v13 = vrot.slane %v2569_v37, %v13378_v8 }
 0x3b0   : > { %v5155_v50 = vcombine.low %v5131_v1, %v5147_v31  ;;  %v2624_v63 = vcombine.low %v14080_v2, %v2167_v61  ;;  %v2625_v62 = vcombine.high %v14080_v2, %v2167_v61  ;;  %v14149_v4 = vcombine.high %v5131_v1, %v5147_v31 }
 0x3b1   : > { %v2179_v21 = vpop.permute.xlu1 %2178  ;;  %v2584_v23 = vcombine.low %v14083_v24, %v2560_v29  ;;  %v2585_v58 = vcombine.high %v14083_v24, %v2560_v29  ;;  %v2586_v27 = vcombine.low %v14088_v34, %v2567_v10  ;;  %v2587_v11 = vcombine.high %v14088_v34, %v2567_v10 }
 0x3b2   : > { %v2588_v38 = vcombine.low %v2544_v39, %v2576_v22  ;;  %v2589_v42 = vcombine.high %v2544_v39, %v2576_v22  ;;  %v2590_v18 = vcombine.low %v2551_v60, %v2583_v13  ;;  %v2591_v52 = vcombine.high %v2551_v60, %v2583_v13 }
 0x3b3   : > { %v5297_v40 = vpack.i.b16 %v5155_v50, %v5087_v14  ;;  %v5300_v47 = vshrl.u32 %v5155_v50, 16  ;;  %v2640_v7 = vcombine.low %v14106_v57, %v2179_v21  ;;  %v2632_v51 = vrot.slane %v2624_v63, %v13360_v53 }
 0x3b4   : > { %v11664_v2 = vpack.c.bf16 %v2588_v38, %v2584_v23  ;;  %v11665_v5 = vpack.c.bf16 %v2590_v18, %v2586_v27  ;;  %v11668_v0 = vpack.c.bf16 %v2589_v42, %v2585_v58  ;;  %v11669_v36 = vpack.c.bf16 %v2591_v52, %v2587_v11 }
 0x3b5   : > { %12282 = vmatprep.subr.bf16.mxu0 %v5297_v40  ;;  %v5301_v24 = vpack.i.b16 %v5300_v47, %v5299_v26  ;;  %v2641_v34 = vcombine.high %v14106_v57, %v2179_v21  ;;  %v2648_v39 = vrot.slane %v2640_v7, %v13360_v53  ;;  %v2639_v12 = vrot.slane %v2625_v62, %v13360_v53 }
 0x3b6   : > { %12283 = vmatpush3.bf16.msra.mxu0 %v5297_v40  ;;  %v14155_v60 = vrot.slane %v11664_v2, %v13360_v53  ;;  %v14158_v14 = vrot.slane %v11665_v5, %v13360_v53  ;;  %v14161_v6 = vrot.slane %v11668_v0, %v13360_v53  ;;  %v14164_v61 = vrot.slane %v11669_v36, %v13360_v53 }
 0x3b7   : > { %12290 = vmatprep.subr.bf16.mxu1 %v5301_v24  ;;  %v2655_v57 = vrot.slane %v2641_v34, %v13360_v53  ;;  %v2688_v28 = vcombine.low %v2632_v51, %v2648_v39  ;;  %v2689_v43 = vcombine.high %v2632_v51, %v2648_v39  ;;  %v2671_v37 = vrot.slane %v2657_v45, %v13378_v8 }
 0x3b8   : > { %v2680_v1 = vrot.slane %v2672_v48, %v13378_v8  ;;  %v2687_v31 = vrot.slane %v2673_v44, %v13378_v8  ;;  %12291 = vmatpush3.bf16.msra.mxu1 %v5301_v24  ;;  %v14182_v29 = vpack.i.b16 %v14149_v4, %v14128_v41  ;;  %v5191_v22 = vcombine.low %v14155_v60, %v14158_v14 }
 0x3b9   : > { %v2696_v10 = vrot.slane %v2688_v28, %v13378_v8  ;;  %v2703_v30 = vrot.slane %v2689_v43, %v13378_v8  ;;  %v2704_v9 = vcombine.low %v2639_v12, %v2655_v57  ;;  %v2705_v45 = vcombine.high %v2639_v12, %v2655_v57 }
 0x3ba   : > { %v5259_v48 = vcombine.low %v14161_v6, %v14164_v61  ;;  %v5307_v55 = vshrl.u32 %v14128_v41, 16  ;;  %v5089_v35 = vcombine.low %v14133_v33, %v14136_v3  ;;  %v5124_v21 = vcombine.high %v14098_v17, %v14110_v46 }
 0x3bb   : > { %v2712_v44 = vrot.slane %v2704_v9, %v13378_v8  ;;  %v2719_v13 = vrot.slane %v2705_v45, %v13378_v8  ;;  %v2720_v50 = vcombine.low %v14124_v32, %v2696_v10  ;;  %v2721_v26 = vcombine.high %v14124_v32, %v2696_v10 }
 0x3bc   : > { %v2722_v63 = vcombine.low %v2671_v37, %v2703_v30  ;;  %v2723_v62 = vcombine.high %v2671_v37, %v2703_v30  ;;  %v5140_v23 = vcombine.high %v14113_v59, %v14116_v56  ;;  %v5199_v42 = vrot.slane %v5191_v22, %v13378_v8 }
 0x3bd   : > { %v2724_v58 = vcombine.low %v2680_v1, %v2712_v44  ;;  %v2725_v27 = vcombine.high %v2680_v1, %v2712_v44  ;;  %v2726_v11 = vcombine.low %v2687_v31, %v2719_v13  ;;  %v2727_v38 = vcombine.high %v2687_v31, %v2719_v13 }
 0x3be   : > { %v5138_v18 = vrot.slane %v5124_v21, %v13378_v8  ;;  %v5154_v52 = vrot.slane %v5140_v23, %v13378_v8  ;;  %v5192_v32 = vcombine.high %v14155_v60, %v14158_v14  ;;  %v5315_v2 = vshrl.u32 %v5089_v35, 16 }
 0x3bf   : > { %v11666_v40 = vpack.c.bf16 %v2724_v58, %v2720_v50  ;;  %v11667_v47 = vpack.c.bf16 %v2726_v11, %v2722_v63  ;;  %v11670_v7 = vpack.c.bf16 %v2725_v27, %v2721_v26  ;;  %v11671_v17 = vpack.c.bf16 %v2727_v38, %v2723_v62 }
 0x3c0   : > { %v5157_v46 = vcombine.low %v5138_v18, %v5154_v52  ;;  %v5260_v59 = vcombine.high %v14161_v6, %v14164_v61  ;;  %v5090_v56 = vcombine.high %v14133_v33, %v14136_v3  ;;  %v5267_v51 = vrot.slane %v5259_v48, %v13378_v8 }
 0x3c1   : > { %v5182_v5 = vrot.slane %v11666_v40, %v13360_v53  ;;  %v5190_v0 = vrot.slane %v11667_v47, %v13360_v53  ;;  %v5250_v36 = vrot.slane %v11670_v7, %v13360_v53  ;;  %v5258_v24 = vrot.slane %v11671_v17, %v13360_v53 }
 0x3c2   : > { %v14215_v34 = vpack.i.b16 %v5157_v46, %v5089_v35  ;;  %v5316_v39 = vshrl.u32 %v5157_v46, 16  ;;  %v5158_v60 = vcombine.high %v5138_v18, %v5154_v52  ;;  %v5323_v3 = vshrl.u32 %v5090_v56, 16 }
 0x3c3   : > { %v5207_v14 = vcombine.low %v5182_v5, %v5190_v0  ;;  %v5275_v12 = vcombine.low %v5250_v36, %v5258_v24  ;;  %v5208_v6 = vcombine.high %v5182_v5, %v5190_v0  ;;  %v5276_v61 = vcombine.high %v5250_v36, %v5258_v24 }
 0x3c4   : > { %v14217_v57 = vpack.i.b16 %v5316_v39, %v5315_v2  ;;  %v14219_v33 = vpack.i.b16 %v5158_v60, %v5090_v56  ;;  %v5324_v28 = vshrl.u32 %v5158_v60, 16  ;;  %v5308_v10 = vshrl.u32 %v14149_v4, 16  ;;  %v11613_v2 = vld [vmem:[%s17824_s17] ss:$0 sm:$0xff] }
 0x3c5   : > { %v5215_v43 = vrot.slane %v5207_v14, %v13378_v8  ;;  %v5283_v37 = vrot.slane %v5275_v12, %v13378_v8  ;;  %v5222_v1 = vrot.slane %v5208_v6, %v13378_v8  ;;  %v5290_v31 = vrot.slane %v5276_v61, %v13378_v8 }
 0x3c6   : > { %v5206_v30 = vrot.slane %v5192_v32, %v13378_v8  ;;  %v5274_v9 = vrot.slane %v5260_v59, %v13378_v8  ;;  %v14228_v45 = vpack.i.b16 %v5324_v28, %v5323_v3  ;;  %v14241_v7 = vpack.i.b16 %v5308_v10, %v5307_v55 }
 0x3c7   : > { %v5223_v22 = vcombine.low %v5199_v42, %v5215_v43  ;;  %v5291_v48 = vcombine.low %v5267_v51, %v5283_v37  ;;  %v5224_v35 = vcombine.high %v5199_v42, %v5215_v43  ;;  %v5292_v44 = vcombine.high %v5267_v51, %v5283_v37 }
 0x3c8   : > { %v5225_v13 = vcombine.low %v5206_v30, %v5222_v1  ;;  %v5293_v50 = vcombine.low %v5274_v9, %v5290_v31  ;;  %v5226_v26 = vcombine.high %v5206_v30, %v5222_v1  ;;  %v5294_v63 = vcombine.high %v5274_v9, %v5290_v31 }
 0x3c9   : > { %v5329_v62 = vpack.i.b16 %v5291_v48, %v5223_v22  ;;  %v5331_v21 = vshrl.u32 %v5223_v22, 16  ;;  %v5332_v23 = vshrl.u32 %v5291_v48, 16  ;;  %v14230_v58 = vpack.i.b16 %v5292_v44, %v5224_v35 }
 0x3ca   : > { %v5339_v4 = vshrl.u32 %v5224_v35, 16  ;;  %v5340_v27 = vshrl.u32 %v5292_v44, 16  ;;  %v14232_v11 = vpack.i.b16 %v5293_v50, %v5225_v13  ;;  %v5347_v38 = vshrl.u32 %v5225_v13, 16 }
 0x3cb   : > { %12284 = vmatprep.subr.bf16.mxu0 %v5329_v62  ;;  %v5333_v18 = vpack.i.b16 %v5332_v23, %v5331_v21  ;;  %v5348_v52 = vshrl.u32 %v5293_v50, 16  ;;  %v14234_v32 = vpack.i.b16 %v5294_v63, %v5226_v26  ;;  %v5355_v42 = vshrl.u32 %v5226_v26, 16 }
 0x3cc   : > { %12285 = vmatpush3.bf16.msra.mxu0 %v5329_v62  ;;  %v14236_v40 = vpack.i.b16 %v5340_v27, %v5339_v4  ;;  %v5356_v47 = vshrl.u32 %v5294_v63, 16  ;;  %vm14252_vm5 = vcmp.eq.s32.totalorder %v13971_v19, %v11613_v2  ;;  %vm14257_vm6 = vcmp.eq.s32.totalorder %v13967_v54, %v11613_v2 }
 0x3cd   : > { %12292 = vmatprep.subr.bf16.mxu1 %v5333_v18  ;;  %12298 = vmatprep.subr.bf16.mxu0 %v14182_v29  ;;  %v14243_v17 = vpack.i.b16 %v5348_v52, %v5347_v38  ;;  %vm14262_vm7 = vcmp.eq.s32.totalorder %v13974_v16, %v11613_v2  ;;  %vm14279_vm8 = vcmp.eq.s32.totalorder %v13982_v49, %v11613_v2 }
 0x3ce   : > { %12293 = vmatpush3.bf16.msra.mxu1 %v5333_v18  ;;  %v14245_v46 = vpack.i.b16 %v5356_v47, %v5355_v42 }
 0x3cf   : > { %12306 = vmatprep.subr.bf16.mxu1 %v14241_v7 }
 0x42f   : > { %v12238_v41 = vpop.f32.mrb[0].mxu1 }
 0x430   : > { %v14268_v5 = vsel %vm14252_vm5, %v12238_v41, -1e+30  ;;  %v4225_v0 = vpop.f32.mrb[1].mxu1 }
 0x431   : > { %v4693_v19 = vsel %vm4686_vm4, %v14268_v5, -inf  ;;  %v14274_v36 = vsel %vm14257_vm6, %v4225_v0, -1e+30  ;;  %v12239_v54 = vpop.f32.mrb[2].mxu1  ;;  %v14276_v24 = vpop.f32.mrb[8].mxu0 }
 0x432   : > { %v4687_v51 = vsel %vm4686_vm4, %v14274_v36, -inf  ;;  %v4228_v39 = vpop.f32.mrb[3].mxu1  ;;  %4694 = vmax.xlane.f32.xlu1 %v4693_v19  ;;  %v14287_v60 = vsel %vm14279_vm8, %v12239_v54, -1e+30  ;;  %v4573_v12 = vpop.f32.mrb[9].mxu0 }
 0x433   : > { %v14291_v14 = vsel %vm14262_vm7, %v4228_v39, -1e+30  ;;  %4688 = vmax.xlane.f32.xlu0 %v4687_v51  ;;  %v14295_v6 = vpop.f32.mrb[10].mxu0  ;;  %v4696_v3 = vsel %vm4686_vm4, %v14287_v60, -inf  ;;  %v14301_v28 = vsel %vm14257_vm6, %v4573_v12, -1e+30 }
 0x434   : > { %v4690_v49 = vsel %vm4686_vm4, %v14291_v14, -inf  ;;  %v4576_v61 = vpop.f32.mrb[11].mxu0  ;;  %v4759_v31 = vsel %vm4686_vm4, %v14301_v28, -inf }
 0x435   : > { %v14305_v43 = vsel %vm14262_vm7, %v4576_v61, -1e+30 }
 0x436   : > { %4691 = vmax.xlane.f32.xlu1 %v4690_v49  ;;  %v4762_v30 = vsel %vm4686_vm4, %v14305_v43, -inf }
 0x437   : > { %v12244_v37 = vpop.f32.mrb[4].mxu1  ;;  %4697 = vmax.xlane.f32.xlu0 %v4696_v3 }
 0x438   : > { %v4283_v1 = vpop.f32.mrb[5].mxu1  ;;  %v14313_v9 = vsel %vm14252_vm5, %v12244_v37, -1e+30 }
 0x439   : > { %v12245_v10 = vpop.f32.mrb[6].mxu1  ;;  %v14317_v48 = vsel %vm14257_vm6, %v4283_v1, -1e+30  ;;  %v4705_v35 = vsel %vm4686_vm4, %v14313_v9, -inf }
 0x43a   : > { %v4286_v22 = vpop.f32.mrb[7].mxu1  ;;  %4760 = vmax.xlane.f32.xlu1 %v4759_v31  ;;  %v4699_v44 = vsel %vm4686_vm4, %v14317_v48, -inf  ;;  %v14325_v13 = vsel %vm14279_vm8, %v12245_v10, -1e+30 }
 0x43b   : > { %4763 = vmax.xlane.f32.xlu0 %v4762_v30  ;;  %v4708_v23 = vsel %vm4686_vm4, %v14325_v13, -inf  ;;  %v14337_v27 = vsel %vm14262_vm7, %v4286_v22, -1e+30 }
 0x43c   : > { %v4702_v52 = vsel %vm4686_vm4, %v14337_v27, -inf }
 0x43e   : > { %4706 = vmax.xlane.f32.xlu1 %v4705_v35 }
 0x43f   : > { %v12250_v50 = vpop.f32.mrb[8].mxu1  ;;  %4700 = vmax.xlane.f32.xlu0 %v4699_v44 }
 0x440   : > { %v14329_v26 = vsel %vm14252_vm5, %v12250_v50, -1e+30  ;;  %v4341_v63 = vpop.f32.mrb[9].mxu1 }
 0x441   : > { %v4717_v62 = vsel %vm4686_vm4, %v14329_v26, -inf  ;;  %v12251_v21 = vpop.f32.mrb[10].mxu1  ;;  %v14349_v42 = vsel %vm14257_vm6, %v4341_v63, -1e+30 }
 0x442   : > { %v4344_v4 = vpop.f32.mrb[11].mxu1  ;;  %4718 = vmax.xlane.f32.xlu1 %v4717_v62  ;;  %v4711_v54 = vsel %vm4686_vm4, %v14349_v42, -inf  ;;  %v14361_v39 = vsel %vm14279_vm8, %v12251_v21, -1e+30 }
 0x443   : > { %v14341_v38 = vsel %vm14262_vm7, %v4344_v4, -1e+30  ;;  %4709 = vmax.xlane.f32.xlu0 %v4708_v23  ;;  %v4720_v12 = vsel %vm4686_vm4, %v14361_v39, -inf }
 0x444   : > { %v4714_v18 = vsel %vm4686_vm4, %v14341_v38, -inf }
 0x446   : > { %4715 = vmax.xlane.f32.xlu1 %v4714_v18 }
 0x447   : > { %v12256_v47 = vpop.f32.mrb[12].mxu1  ;;  %4703 = vmax.xlane.f32.xlu0 %v4702_v52 }
 0x448   : > { %v14353_v2 = vsel %vm14252_vm5, %v12256_v47, -1e+30  ;;  %v4399_v41 = vpop.f32.mrb[13].mxu1 }
 0x449   : > { %v4729_v0 = vsel %vm4686_vm4, %v14353_v2, -inf  ;;  %v12257_v19 = vpop.f32.mrb[14].mxu1  ;;  %v14367_v49 = vsel %vm14257_vm6, %v4399_v41, -1e+30 }
 0x44a   : > { %v4402_v51 = vpop.f32.mrb[15].mxu1  ;;  %4730 = vmax.xlane.f32.xlu1 %v4729_v0  ;;  %v4723_v10 = vsel %vm4686_vm4, %v14367_v49, -inf  ;;  %v14383_v35 = vsel %vm14279_vm8, %v12257_v19, -1e+30 }
 0x44b   : > { %4712 = vmax.xlane.f32.xlu0 %v4711_v54  ;;  %v4732_v50 = vsel %vm4686_vm4, %v14383_v35, -inf  ;;  %v14391_v63 = vsel %vm14262_vm7, %v4402_v51, -1e+30  ;;  %v14414_v54 = vsel %vm14252_vm5, %v14276_v24, -1e+30 }
 0x44c   : > { %v4726_v52 = vsel %vm4686_vm4, %v14391_v63, -inf }
 0x44f   : > { %v12262_v61 = vpop.f32.mrb[16].mxu1  ;;  %4721 = vmax.xlane.f32.xlu0 %v4720_v12 }
 0x450   : > { %v14371_v3 = vsel %vm14252_vm5, %v12262_v61, -1e+30  ;;  %v4457_v37 = vpop.f32.mrb[17].mxu1 }
 0x451   : > { %v4741_v1 = vsel %vm4686_vm4, %v14371_v3, -inf  ;;  %v12263_v31 = vpop.f32.mrb[18].mxu1  ;;  %v14379_v30 = vsel %vm14257_vm6, %v4457_v37, -1e+30 }
 0x452   : > { %v4460_v22 = vpop.f32.mrb[19].mxu1  ;;  %4742 = vmax.xlane.f32.xlu1 %v4741_v1  ;;  %v4735_v44 = vsel %vm4686_vm4, %v14379_v30, -inf  ;;  %v14407_v0 = vsel %vm14279_vm8, %v12263_v31, -1e+30  ;;  %v4765_v1 = vsel %vm4686_vm4, %v14414_v54, -inf }
 0x453   : > { %4724 = vmax.xlane.f32.xlu0 %v4723_v10  ;;  %v4744_v51 = vsel %vm4686_vm4, %v14407_v0, -inf  ;;  %v14420_v12 = vsel %vm14262_vm7, %v4460_v22, -1e+30 }
 0x454   : > { %v4738_v10 = vsel %vm4686_vm4, %v14420_v12, -inf }
 0x456   : > { %4736 = vmax.xlane.f32.xlu1 %v4735_v44 }
 0x457   : > { %v12268_v62 = vpop.f32.mrb[20].mxu1  ;;  %4733 = vmax.xlane.f32.xlu0 %v4732_v50 }
 0x458   : > { %v14395_v21 = vsel %vm14252_vm5, %v12268_v62, -1e+30  ;;  %v4515_v23 = vpop.f32.mrb[21].mxu1 }
 0x459   : > { %v4753_v4 = vsel %vm4686_vm4, %v14395_v21, -inf  ;;  %v12269_v18 = vpop.f32.mrb[22].mxu1  ;;  %v14403_v47 = vsel %vm14257_vm6, %v4515_v23, -1e+30 }
 0x45a   : > { %v4518_v41 = vpop.f32.mrb[23].mxu1  ;;  %4754 = vmax.xlane.f32.xlu1 %v4753_v4  ;;  %v4747_v19 = vsel %vm4686_vm4, %v14403_v47, -inf  ;;  %v14436_v50 = vsel %vm14279_vm8, %v12269_v18, -1e+30 }
 0x45b   : > { %4727 = vmax.xlane.f32.xlu0 %v4726_v52  ;;  %v4756_v23 = vsel %vm4686_vm4, %v14436_v50, -inf  ;;  %v14448_v4 = vsel %vm14262_vm7, %v4518_v41, -1e+30 }
 0x45c   : > { %v4750_v52 = vsel %vm4686_vm4, %v14448_v4, -inf }
 0x45e   : > { %4748 = vmax.xlane.f32.xlu1 %v4747_v19  ;;  %v14457_v19 = vsel %vm14279_vm8, %v14295_v6, -1e+30 }
 0x45f   : > { %v12280_v61 = vpop.f32.mrb[24].mxu1  ;;  %4745 = vmax.xlane.f32.xlu0 %v4744_v51  ;;  %v4768_v59 = vsel %vm4686_vm4, %v14457_v19, -inf }
 0x460   : > { %v4631_v37 = vpop.f32.mrb[25].mxu1  ;;  %v14444_v55 = vsel %vm14252_vm5, %v12280_v61, -1e+30 }
 0x461   : > { %v12281_v31 = vpop.f32.mrb[26].mxu1  ;;  %v14428_v24 = vsel %vm14257_vm6, %v4631_v37, -1e+30  ;;  %v4777_v18 = vsel %vm4686_vm4, %v14444_v55, -inf }
 0x462   : > { %v14432_v44 = vsel %vm14279_vm8, %v12281_v31, -1e+30  ;;  %v4634_v22 = vpop.f32.mrb[27].mxu1  ;;  %4766 = vmax.xlane.f32.xlu1 %v4765_v1  ;;  %v4771_v62 = vsel %vm4686_vm4, %v14428_v24, -inf }
 0x463   : > { %4739 = vmax.xlane.f32.xlu0 %v4738_v10  ;;  %v14463_v41 = vsel %vm14262_vm7, %v4634_v22, -1e+30  ;;  %v4780_v61 = vsel %vm4686_vm4, %v14432_v44, -inf }
 0x464   : > { %v4774_v51 = vsel %vm4686_vm4, %v14463_v41, -inf }
 0x466   : > { %4772 = vmax.xlane.f32.xlu1 %v4771_v62 }
 0x467   : > { %4757 = vmax.xlane.f32.xlu0 %v4756_v23 }
 0x46a   : > { %4778 = vmax.xlane.f32.xlu1 %v4777_v18 }
 0x46b   : > { %4751 = vmax.xlane.f32.xlu0 %v4750_v52 }
 0x46f   : > { %4769 = vmax.xlane.f32.xlu0 %v4768_v59 }
 0x473   : > { %4775 = vmax.xlane.f32.xlu0 %v4774_v51 }
 0x477   : > { %4781 = vmax.xlane.f32.xlu0 %v4780_v61 }
 0x4bf   : > { %v4695_v16 = vpop.xlane.xlu1 %4694 }
 0x4c0   : > { %v4785_v6 = vsub.f32 %v14268_v5, %v4695_v16  ;;  %v4689_v37 = vpop.xlane.xlu0 %4688 }
 0x4c1   : > { %v4783_v1 = vsub.f32 %v14274_v36, %v4689_v37 }
 0x4c2   : > { %v4819_v31 = vmul.f32 1.442695, %v4785_v6 }
 0x4c3   : > { %v4815_v10 = vmul.f32 1.442695, %v4783_v1  ;;  %v4692_v56 = vpop.xlane.xlu1 %4691 }
 0x4c4   : > { %12616 = vpow2.f32 %v4819_v31  ;;  %v4784_v22 = vsub.f32 %v14291_v14, %v4692_v56  ;;  %v4698_v62 = vpop.xlane.xlu0 %4697 }
 0x4c5   : > { %v4786_v23 = vsub.f32 %v14287_v60, %v4698_v62  ;;  %12618 = vpow2.f32 %v4815_v10 }
 0x4c6   : > { %v4817_v18 = vmul.f32 1.442695, %v4784_v22 }
 0x4c7   : > { %v4821_v52 = vmul.f32 1.442695, %v4786_v23  ;;  %v14473_v59 = vpop.xlane.xlu1 %4760 }
 0x4c8   : > { %12620 = vpow2.f32 %v4817_v18  ;;  %v14475_v51 = vpop.xlane.xlu0 %4763 }
 0x4c9   : > { %12622 = vpow2.f32 %v4821_v52 }
 0x4cb   : > { %v4707_v5 = vpop.xlane.xlu1 %4706 }
 0x4cc   : > { %v4701_v36 = vpop.xlane.xlu0 %4700  ;;  %v4789_v10 = vsub.f32 %v14313_v9, %v4707_v5 }
 0x4cd   : > { %v4787_v16 = vsub.f32 %v14317_v48, %v4701_v36 }
 0x4ce   : > { %v12617_v61 = vpop.eup %12616  ;;  %v4827_v9 = vmul.f32 1.442695, %v4789_v10 }
 0x4cf   : > { %v4719_v6 = vpop.xlane.xlu1 %4718  ;;  %v4885_v14 = vsel %vm4686_vm4, %v12617_v61, 0.0  ;;  %v12619_v37 = vpop.eup %12618  ;;  %v4823_v22 = vmul.f32 1.442695, %v4787_v16 }
 0x4d0   : > { %v4710_v1 = vpop.xlane.xlu0 %4709  ;;  %4886 = vadd.xlane.f32.xlu1 %v4885_v14  ;;  %v4879_v23 = vsel %vm4686_vm4, %v12619_v37, 0.0  ;;  %v4793_v5 = vsub.f32 %v14329_v26, %v4719_v6 }
 0x4d1   : > { %v4790_v60 = vsub.f32 %v14325_v13, %v4710_v1  ;;  %12624 = vpow2.f32 %v4823_v22 }
 0x4d2   : > { %v12621_v31 = vpop.eup %12620 }
 0x4d3   : > { %v12623_v56 = vpop.eup %12622  ;;  %v4716_v62 = vpop.xlane.xlu1 %4715  ;;  %v4975_v18 = vpack.c.bf16 %v12621_v31, %v12619_v37  ;;  %v4829_v52 = vmul.f32 1.442695, %v4790_v60  ;;  %v4835_v37 = vmul.f32 1.442695, %v4793_v5 }
 0x4d4   : > { %v4792_v48 = vsub.f32 %v14341_v38, %v4716_v62  ;;  %v4704_v36 = vpop.xlane.xlu0 %4703  ;;  %4880 = vadd.xlane.f32.xlu1 %v4879_v23  ;;  %v4888_v15 = vsel %vm4686_vm4, %v12623_v56, 0.0  ;;  %v4976_v20 = vpack.c.bf16 %v12623_v56, %v12617_v61  ;;  %v4882_v61 = vsel %vm4686_vm4, %v12621_v31, 0.0 }
 0x4d5   : > { %v4788_v14 = vsub.f32 %v14337_v27, %v4704_v36  ;;  %4889 = vadd.xlane.f32.xlu0 %v4888_v15  ;;  %12286 = vmatprep.mubr.msk.bf16.mxu0 %vm4686_vm4, %v4975_v18  ;;  %12626 = vpow2.f32 %v4829_v52 }
 0x4d6   : > { %12287 = vmatmul.mubr.msk.bf16.vlgmr.msra.gmra.mrb[12].mxu0 %vm4686_vm4, %v4976_v20  ;;  %v4833_v38 = vmul.f32 1.442695, %v4792_v48 }
 0x4d7   : > { %v4825_v13 = vmul.f32 1.442695, %v4788_v14  ;;  %12299 = vmatpush3.bf16.msra.mxu0 %v14182_v29  ;;  %v4731_v27 = vpop.xlane.xlu1 %4730 }
 0x4d8   : > { %12300 = vmatprep.subr.bf16.mxu0 %v14230_v58  ;;  %v4713_v16 = vpop.xlane.xlu0 %4712  ;;  %v4797_v48 = vsub.f32 %v14353_v2, %v4731_v27  ;;  %v4808_v2 = vsub.f32 %v14305_v43, %v14475_v51 }
 0x4d9   : > { %12628 = vpow2.f32 %v4825_v13  ;;  %v4791_v15 = vsub.f32 %v14349_v42, %v4713_v16  ;;  %4883 = vadd.xlane.f32.xlu0 %v4882_v61 }
 0x4da   : > { %12630 = vpow2.f32 %v4827_v9  ;;  %v4807_v9 = vsub.f32 %v14301_v28, %v14473_v59  ;;  %v4843_v61 = vmul.f32 1.442695, %v4797_v48  ;;  %v4865_v51 = vmul.f32 1.442695, %v4808_v2 }
 0x4db   : > { %v4831_v20 = vmul.f32 1.442695, %v4791_v15  ;;  %12301 = vmatpush3.bf16.msra.mxu0 %v14230_v58  ;;  %12632 = vpow2.f32 %v4833_v38  ;;  %v14495_v31 = vpop.eup %12624 }
 0x4dc   : > { %12314 = vmatprep.subr.bf16.mxu0 %v14215_v34  ;;  %v4722_v29 = vpop.xlane.xlu0 %4721  ;;  %v4863_v27 = vmul.f32 1.442695, %v4807_v9 }
 0x4dd   : > { %12634 = vpow2.f32 %v4831_v20  ;;  %v4794_v26 = vsub.f32 %v14361_v39, %v4722_v29 }
 0x4de   : > { %12636 = vpow2.f32 %v4835_v37 }
 0x4df   : > { %v4837_v6 = vmul.f32 1.442695, %v4794_v26  ;;  %v4743_v1 = vpop.xlane.xlu1 %4742  ;;  %v14497_v42 = vpop.eup %12626 }
 0x4e0   : > { %v4725_v60 = vpop.xlane.xlu0 %4724 }
 0x4e1   : > { %12638 = vpow2.f32 %v4837_v6  ;;  %v4795_v58 = vsub.f32 %v14367_v49, %v4725_v60 }
 0x4e3   : > { %v14499_v10 = vpop.eup %12628  ;;  %v4737_v56 = vpop.xlane.xlu1 %4736  ;;  %v4839_v49 = vmul.f32 1.442695, %v4795_v58 }
 0x4e4   : > { %v14502_v22 = vpop.eup %12630  ;;  %v4734_v62 = vpop.xlane.xlu0 %4733  ;;  %v4977_v39 = vpack.c.bf16 %v14499_v10, %v14495_v31  ;;  %v4799_v15 = vsub.f32 %v14379_v30, %v4737_v56  ;;  %v4801_v30 = vsub.f32 %v14371_v3, %v4743_v1 }
 0x4e5   : > { %v4798_v23 = vsub.f32 %v14383_v35, %v4734_v62  ;;  %v4978_v18 = vpack.c.bf16 %v14497_v42, %v14502_v22  ;;  %v14509_v52 = vpop.eup %12632  ;;  %12640 = vpow2.f32 %v4839_v49 }
 0x4e6   : > { %12294 = vmatprep.mubr.msk.bf16.mxu1 %vm4686_vm4, %v4977_v39  ;;  %v4847_v37 = vmul.f32 1.442695, %v4799_v15  ;;  %v4851_v60 = vmul.f32 1.442695, %v4801_v30 }
 0x4e7   : > { %v14513_v36 = vpop.eup %12634  ;;  %12295 = vmatmul.mubr.msk.bf16.vlgmr.msra.gmra.mrb[28].mxu1 %vm4686_vm4, %v4978_v18  ;;  %v14516_v14 = vpop.xlane.xlu1 %4754  ;;  %v4845_v35 = vmul.f32 1.442695, %v4798_v23 }
 0x4e8   : > { %12307 = vmatpush3.bf16.msra.mxu1 %v14241_v7  ;;  %v4728_v13 = vpop.xlane.xlu0 %4727  ;;  %v4979_v5 = vpack.c.bf16 %v14509_v52, %v14513_v36  ;;  %v14527_v16 = vpop.eup %12636 }
 0x4e9   : > { %v4796_v38 = vsub.f32 %v14391_v63, %v4728_v13  ;;  %12308 = vmatprep.subr.bf16.mxu1 %v14236_v40  ;;  %12642 = vpow2.f32 %v4845_v35 }
 0x4ea   : > { %12302 = vmatprep.mubr.msk.bf16.mxu0 %vm4686_vm4, %v4979_v5 }
 0x4eb   : > { %v14531_v28 = vpop.eup %12638  ;;  %v4841_v7 = vmul.f32 1.442695, %v4796_v38  ;;  %v4749_v59 = vpop.xlane.xlu1 %4748 }
 0x4ec   : > { %12309 = vmatpush3.bf16.msra.mxu1 %v14236_v40  ;;  %v4746_v43 = vpop.xlane.xlu0 %4745  ;;  %v4980_v63 = vpack.c.bf16 %v14531_v28, %v14527_v16  ;;  %v4803_v3 = vsub.f32 %v14403_v47, %v4749_v59 }
 0x4ed   : > { %12644 = vpow2.f32 %v4841_v7  ;;  %v4802_v20 = vsub.f32 %v14407_v0, %v4746_v43  ;;  %12322 = vmatprep.subr.bf16.mxu1 %v14217_v57 }
 0x4ee   : > { %12646 = vpow2.f32 %v4843_v61  ;;  %12303 = vmatmul.mubr.msk.bf16.vlgmr.msra.gmra.mrb[16].mxu0 %vm4686_vm4, %v4980_v63  ;;  %v4855_v39 = vmul.f32 1.442695, %v4803_v3 }
 0x4ef   : > { %v4853_v29 = vmul.f32 1.442695, %v4802_v20  ;;  %12315 = vmatpush3.bf16.msra.mxu0 %v14215_v34  ;;  %v4767_v40 = vpop.xlane.xlu1 %4766  ;;  %12648 = vpow2.f32 %v4863_v27  ;;  %v14547_v56 = vpop.eup %12640 }
 0x4f0   : > { %12316 = vmatprep.subr.bf16.mxu0 %v14232_v11  ;;  %v4809_v26 = vsub.f32 %v14414_v54, %v4767_v40  ;;  %v4740_v6 = vpop.xlane.xlu0 %4739  ;;  %12650 = vpow2.f32 %v4865_v51 }
 0x4f1   : > { %v4800_v0 = vsub.f32 %v14420_v12, %v4740_v6  ;;  %12652 = vpow2.f32 %v4847_v37  ;;  %v4805_v12 = vsub.f32 %v14395_v21, %v14516_v14 }
 0x4f2   : > { %v4867_v58 = vmul.f32 1.442695, %v4809_v26  ;;  %12654 = vpow2.f32 %v4853_v29 }
 0x4f3   : > { %v4849_v1 = vmul.f32 1.442695, %v4800_v0  ;;  %12317 = vmatpush3.bf16.msra.mxu0 %v14232_v11  ;;  %v14550_v62 = vpop.eup %12642  ;;  %v4773_v23 = vpop.xlane.xlu1 %4772  ;;  %v4859_v13 = vmul.f32 1.442695, %v4805_v12 }
 0x4f4   : > { %12656 = vpow2.f32 %v4867_v58  ;;  %12330 = vmatprep.subr.bf16.mxu0 %v14219_v33  ;;  %v4758_v34 = vpop.xlane.xlu0 %4757  ;;  %v4811_v2 = vsub.f32 %v14428_v24, %v4773_v23 }
 0x4f5   : > { %12658 = vpow2.f32 %v4849_v1  ;;  %v4806_v54 = vsub.f32 %v14436_v50, %v4758_v34 }
 0x4f6   : > { %12660 = vpow2.f32 %v4851_v60  ;;  %v4871_v63 = vmul.f32 1.442695, %v4811_v2 }
 0x4f7   : > { %v14554_v47 = vpop.eup %12644  ;;  %v4861_v18 = vmul.f32 1.442695, %v4806_v54  ;;  %12662 = vpow2.f32 %v4855_v39  ;;  %v4779_v61 = vpop.xlane.xlu1 %4778  ;;  %v4909_v39 = vsel %vm4686_vm4, %v14527_v16, 0.0 }
 0x4f8   : > { %v14556_v11 = vpop.eup %12646  ;;  %v4752_v48 = vpop.xlane.xlu0 %4751  ;;  %v4981_v49 = vpack.c.bf16 %v14554_v47, %v14547_v56 }
 0x4f9   : > { %v4804_v9 = vsub.f32 %v14448_v4, %v4752_v48  ;;  %v4982_v50 = vpack.c.bf16 %v14550_v62, %v14556_v11  ;;  %v12649_v35 = vpop.eup %12648  ;;  %12664 = vpow2.f32 %v4861_v18  ;;  %v4903_v48 = vsel %vm4686_vm4, %v14513_v36, 0.0 }
 0x4fa   : > { %12310 = vmatprep.mubr.msk.bf16.mxu1 %vm4686_vm4, %v4981_v49  ;;  %v14564_v21 = vpop.eup %12650  ;;  %v4921_v16 = vsel %vm4686_vm4, %v14556_v11, 0.0  ;;  %v4915_v36 = vsel %vm4686_vm4, %v14547_v56, 0.0  ;;  %v4906_v11 = vsel %vm4686_vm4, %v14509_v52, 0.0  ;;  %v4924_v56 = vsel %vm4686_vm4, %v14550_v62, 0.0 }
 0x4fb   : > { %v4857_v14 = vmul.f32 1.442695, %v4804_v9  ;;  %12311 = vmatmul.mubr.msk.bf16.vlgmr.msra.gmra.mrb[32].mxu1 %vm4686_vm4, %v4982_v50  ;;  %v14567_v5 = vpop.eup %12652  ;;  %v4987_v37 = vpack.c.bf16 %v14564_v21, %v12649_v35  ;;  %v4894_v9 = vsel %vm4686_vm4, %v14499_v10, 0.0 }
 0x4fc   : > { %12323 = vmatpush3.bf16.msra.mxu1 %v14217_v57  ;;  %v4770_v4 = vpop.xlane.xlu0 %4769  ;;  %v14571_v38 = vpop.eup %12654  ;;  %v4813_v57 = vsub.f32 %v14444_v55, %v4779_v61  ;;  %v4927_v10 = vsel %vm4686_vm4, %v14567_v5, 0.0 }
 0x4fd   : > { %12666 = vpow2.f32 %v4857_v14  ;;  %v4810_v15 = vsub.f32 %v14457_v19, %v4770_v4  ;;  %12324 = vmatprep.subr.bf16.mxu1 %v14243_v17  ;;  %v4936_v52 = vsel %vm4686_vm4, %v14571_v38, 0.0 }
 0x4fe   : > { %v12657_v7 = vpop.eup %12656  ;;  %12668 = vpow2.f32 %v4859_v13 }
 0x4ff   : > { %v14575_v59 = vpop.eup %12658  ;;  %v4869_v27 = vmul.f32 1.442695, %v4810_v15  ;;  %v4957_v43 = vsel %vm4686_vm4, %v12657_v7, 0.0 }
 0x500   : > { %v14578_v24 = vpop.eup %12660  ;;  %12325 = vmatpush3.bf16.msra.mxu1 %v14243_v17  ;;  %v4776_v51 = vpop.xlane.xlu0 %4775  ;;  %4958 = vadd.xlane.f32.xlu1 %v4957_v43  ;;  %v4983_v19 = vpack.c.bf16 %v14575_v59, %v14567_v5  ;;  %v4875_v17 = vmul.f32 1.442695, %v4813_v57  ;;  %v4930_v62 = vsel %vm4686_vm4, %v14575_v59, 0.0 }
 0x501   : > { %12670 = vpow2.f32 %v4869_v27  ;;  %v4812_v20 = vsub.f32 %v14463_v41, %v4776_v51  ;;  %12338 = vmatprep.subr.bf16.mxu1 %v14228_v45  ;;  %v4984_v30 = vpack.c.bf16 %v14571_v38, %v14578_v24  ;;  %v4951_v41 = vsel %vm4686_vm4, %v12649_v35, 0.0  ;;  %v14594_v40 = vpop.eup %12662 }
 0x502   : > { %12318 = vmatprep.mubr.msk.bf16.mxu0 %vm4686_vm4, %v4983_v19  ;;  %12672 = vpow2.f32 %v4871_v63  ;;  %v4933_v50 = vsel %vm4686_vm4, %v14578_v24, 0.0  ;;  %v4939_v13 = vsel %vm4686_vm4, %v14594_v40, 0.0 }
 0x503   : > { %v4873_v55 = vmul.f32 1.442695, %v4812_v20  ;;  %12319 = vmatmul.mubr.msk.bf16.vlgmr.msra.gmra.mrb[20].mxu0 %vm4686_vm4, %v4984_v30  ;;  %v14598_v6 = vpop.eup %12664 }
 0x504   : > { %12331 = vmatpush3.bf16.msra.mxu0 %v14219_v33  ;;  %v4782_v29 = vpop.xlane.xlu0 %4781  ;;  %12334 = vmatprep.mubr.msk.bf16.mxu0 %vm4686_vm4, %v4987_v37  ;;  %v4897_v33 = vsel %vm4686_vm4, %v14502_v22, 0.0 }
 0x505   : > { %12674 = vpow2.f32 %v4873_v55  ;;  %v4814_v26 = vsub.f32 %v14432_v44, %v4782_v29  ;;  %12332 = vmatprep.subr.bf16.mxu0 %v14234_v32  ;;  %4952 = vadd.xlane.f32.xlu1 %v4951_v41 }
 0x506   : > { %12676 = vpow2.f32 %v4875_v17 }
 0x507   : > { %v14600_v0 = vpop.eup %12666  ;;  %v4877_v60 = vmul.f32 1.442695, %v4814_v26 }
 0x508   : > { %v12669_v58 = vpop.eup %12668  ;;  %12333 = vmatpush3.bf16.msra.mxu0 %v14234_v32  ;;  %v4985_v3 = vpack.c.bf16 %v14600_v0, %v14594_v40  ;;  %v4891_v32 = vsel %vm4686_vm4, %v14495_v31, 0.0  ;;  %v4954_v31 = vsel %vm4686_vm4, %v14564_v21, 0.0  ;;  %v4942_v5 = vsel %vm4686_vm4, %v14600_v0, 0.0 }
 0x509   : > { %12678 = vpow2.f32 %v4877_v60  ;;  %4898 = vadd.xlane.f32.xlu1 %v4897_v33  ;;  %v4986_v44 = vpack.c.bf16 %v14598_v6, %v12669_v58  ;;  %v4945_v35 = vsel %vm4686_vm4, %v12669_v58, 0.0 }
 0x50a   : > { %12326 = vmatprep.mubr.msk.bf16.mxu1 %vm4686_vm4, %v4985_v3 }
 0x50b   : > { %v12671_v1 = vpop.eup %12670  ;;  %12327 = vmatmul.mubr.msk.bf16.vlgmr.msra.gmra.mrb[36].mxu1 %vm4686_vm4, %v4986_v44 }
 0x50c   : > { %12339 = vmatpush3.bf16.msra.mxu1 %v14228_v45  ;;  %v4960_v34 = vsel %vm4686_vm4, %v12671_v1, 0.0  ;;  %v4988_v22 = vpack.c.bf16 %v12671_v1, %v12657_v7  ;;  %v12673_v54 = vpop.eup %12672 }
 0x50d   : > { %12340 = vmatprep.subr.bf16.mxu1 %v14245_v46  ;;  %4892 = vadd.xlane.f32.xlu1 %v4891_v32  ;;  %v4963_v21 = vsel %vm4686_vm4, %v12673_v54, 0.0 }
 0x50e   : > { %4961 = vadd.xlane.f32.xlu0 %v4960_v34  ;;  %12335 = vmatmul.mubr.msk.bf16.vlgmr.msra.gmra.mrb[24].mxu0 %vm4686_vm4, %v4988_v22 }
 0x50f   : > { %v12675_v12 = vpop.eup %12674 }
 0x510   : > { %12341 = vmatpush3.bf16.msra.mxu1 %v14245_v46  ;;  %v4989_v45 = vpack.c.bf16 %v12675_v12, %v12673_v54  ;;  %v12677_v23 = vpop.eup %12676  ;;  %v4900_v46 = vsel %vm4686_vm4, %v14497_v42, 0.0  ;;  %v4912_v42 = vsel %vm4686_vm4, %v14531_v28, 0.0  ;;  %v4918_v28 = vsel %vm4686_vm4, %v14554_v47, 0.0 }
 0x511   : > { %4910 = vadd.xlane.f32.xlu1 %v4909_v39  ;;  %v4969_v14 = vsel %vm4686_vm4, %v12677_v23, 0.0  ;;  %v4948_v47 = vsel %vm4686_vm4, %v14598_v6, 0.0  ;;  %v4966_v2 = vsel %vm4686_vm4, %v12675_v12, 0.0 }
 0x512   : > { %4955 = vadd.xlane.f32.xlu0 %v4954_v31  ;;  %12342 = vmatprep.mubr.msk.bf16.mxu1 %vm4686_vm4, %v4989_v45 }
 0x513   : > { %v12679_v18 = vpop.eup %12678 }
 0x514   : > { %v4990_v49 = vpack.c.bf16 %v12679_v18, %v12677_v23  ;;  %v4972_v4 = vsel %vm4686_vm4, %v12679_v18, 0.0 }
 0x515   : > { %4904 = vadd.xlane.f32.xlu1 %v4903_v48 }
 0x516   : > { %4901 = vadd.xlane.f32.xlu0 %v4900_v46  ;;  %12343 = vmatmul.mubr.msk.bf16.vlgmr.msra.gmra.mrb[40].mxu1 %vm4686_vm4, %v4990_v49 }
 0x517   : > { %7779 = vmatprep.mubr.bf16.mxu1 %v17813_v25 }
 0x519   : > { %4922 = vadd.xlane.f32.xlu1 %v4921_v16 }
 0x51a   : > { %4895 = vadd.xlane.f32.xlu0 %v4894_v9 }
 0x51d   : > { %4916 = vadd.xlane.f32.xlu1 %v4915_v36 }
 0x51e   : > { %4913 = vadd.xlane.f32.xlu0 %v4912_v42 }
 0x521   : > { %4934 = vadd.xlane.f32.xlu1 %v4933_v50 }
 0x522   : > { %4907 = vadd.xlane.f32.xlu0 %v4906_v11 }
 0x525   : > { %4928 = vadd.xlane.f32.xlu1 %v4927_v10 }
 0x526   : > { %4925 = vadd.xlane.f32.xlu0 %v4924_v56 }
 0x529   : > { %4946 = vadd.xlane.f32.xlu1 %v4945_v35 }
 0x52a   : > { %4919 = vadd.xlane.f32.xlu0 %v4918_v28 }
 0x52d   : > { %4940 = vadd.xlane.f32.xlu1 %v4939_v13 }
 0x52e   : > { %4937 = vadd.xlane.f32.xlu0 %v4936_v52 }
 0x531   : > { %4964 = vadd.xlane.f32.xlu1 %v4963_v21 }
 0x532   : > { %4931 = vadd.xlane.f32.xlu0 %v4930_v62 }
 0x535   : > { %4970 = vadd.xlane.f32.xlu1 %v4969_v14 }
 0x536   : > { %4949 = vadd.xlane.f32.xlu0 %v4948_v47 }
 0x53a   : > { %4943 = vadd.xlane.f32.xlu0 %v4942_v5 }
 0x53e   : > { %4967 = vadd.xlane.f32.xlu0 %v4966_v2 }
 0x542   : > { %4973 = vadd.xlane.f32.xlu0 %v4972_v4 }
 0x55d   : > { %v4887_v38 = vpop.xlane.xlu1 %4886 }
 0x55e   : > { %12680 = vrcp.f32 %v4887_v38 }
 0x561   : > { %v4881_v61 = vpop.xlane.xlu1 %4880 }
 0x562   : > { %v4890_v7 = vpop.xlane.xlu0 %4889  ;;  %12682 = vrcp.f32 %v4881_v61 }
 0x563   : > { %12684 = vrcp.f32 %v4890_v7 }
 0x566   : > { %v4884_v43 = vpop.xlane.xlu0 %4883 }
 0x567   : > { %12686 = vrcp.f32 %v4884_v43 }
 0x568   : > { %v12681_v1 = vpop.eup %12680 }
 0x56c   : > { %v12683_v22 = vpop.eup %12682 }
 0x56d   : > { %v12685_v12 = vpop.eup %12684 }
 0x571   : > { %v12687_v45 = vpop.eup %12686 }
 0x58d   : > { %v4959_v15 = vpop.xlane.xlu1 %4958 }
 0x58e   : > { %12688 = vrcp.f32 %v4959_v15 }
 0x592   : > { %v4953_v59 = vpop.xlane.xlu1 %4952 }
 0x593   : > { %12690 = vrcp.f32 %v4953_v59 }
 0x596   : > { %v4899_v27 = vpop.xlane.xlu1 %4898 }
 0x598   : > { %v14665_v23 = vpop.eup %12688 }
 0x59a   : > { %v4893_v24 = vpop.xlane.xlu1 %4892 }
 0x59b   : > { %v4962_v63 = vpop.xlane.xlu0 %4961 }
 0x59d   : > { %v14667_v48 = vpop.eup %12690 }
 0x59e   : > { %v4911_v57 = vpop.xlane.xlu1 %4910 }
 0x59f   : > { %v4956_v51 = vpop.xlane.xlu0 %4955  ;;  %12692 = vrcp.f32 %v4911_v57 }
 0x5a2   : > { %v4905_v19 = vpop.xlane.xlu1 %4904 }
 0x5a3   : > { %v4902_v20 = vpop.xlane.xlu0 %4901  ;;  %12694 = vrcp.f32 %v4905_v19 }
 0x5a6   : > { %v4923_v30 = vpop.xlane.xlu1 %4922 }
 0x5a7   : > { %v4896_v37 = vpop.xlane.xlu0 %4895 }
 0x5a9   : > { %v12288_v55 = vpop.f32.mrb[12].mxu0  ;;  %v12693_v49 = vpop.eup %12692 }
 0x5aa   : > { %v4917_v17 = vpop.xlane.xlu1 %4916  ;;  %v5399_v29 = vpop.f32.mrb[13].mxu0  ;;  %v5833_v9 = vmul.f32 %v12681_v1, %v12288_v55 }
 0x5ab   : > { %v4914_v41 = vpop.xlane.xlu0 %4913  ;;  %v12289_v40 = vpop.f32.mrb[14].mxu0  ;;  %v5831_v11 = vmul.f32 %v12683_v22, %v5399_v29 }
 0x5ac   : > { %v5402_v26 = vpop.f32.mrb[15].mxu0  ;;  %12696 = vrcp.f32 %v4914_v41  ;;  %v5834_v10 = vmul.f32 %v12685_v12, %v12289_v40 }
 0x5ad   : > { %v12695_v16 = vpop.eup %12694  ;;  %v5832_v56 = vmul.f32 %v12687_v45, %v5402_v26 }
 0x5ae   : > { %v4935_v6 = vpop.xlane.xlu1 %4934 }
 0x5af   : > { %v4908_v0 = vpop.xlane.xlu0 %4907 }
 0x5b0   : > { %12698 = vrcp.f32 %v4908_v0 }
 0x5b1   : > { %12700 = vrcp.f32 %v4899_v27 }
 0x5b2   : > { %v4929_v60 = vpop.xlane.xlu1 %4928  ;;  %12702 = vrcp.f32 %v4893_v24 }
 0x5b3   : > { %v4926_v58 = vpop.xlane.xlu0 %4925  ;;  %12704 = vrcp.f32 %v4962_v63 }
 0x5b4   : > { %12706 = vrcp.f32 %v4956_v51 }
 0x5b5   : > { %12708 = vrcp.f32 %v4902_v20 }
 0x5b6   : > { %v4947_v3 = vpop.xlane.xlu1 %4946  ;;  %12710 = vrcp.f32 %v4923_v30  ;;  %v12697_v50 = vpop.eup %12696 }
 0x5b7   : > { %v4920_v33 = vpop.xlane.xlu0 %4919  ;;  %12712 = vrcp.f32 %v4896_v37 }
 0x5b8   : > { %12714 = vrcp.f32 %v4917_v17 }
 0x5b9   : > { %12716 = vrcp.f32 %v4935_v6 }
 0x5ba   : > { %v14661_v44 = vpop.f32.mrb[28].mxu1  ;;  %v4941_v31 = vpop.xlane.xlu1 %4940  ;;  %12718 = vrcp.f32 %v4929_v60 }
 0x5bb   : > { %v4938_v32 = vpop.xlane.xlu0 %4937  ;;  %v14663_v34 = vpop.f32.mrb[29].mxu1  ;;  %12720 = vrcp.f32 %v4926_v58 }
 0x5bc   : > { %v12297_v54 = vpop.f32.mrb[30].mxu1  ;;  %v12699_v52 = vpop.eup %12698  ;;  %12722 = vrcp.f32 %v4920_v33 }
 0x5bd   : > { %v5457_v39 = vpop.f32.mrb[31].mxu1  ;;  %v12701_v2 = vpop.eup %12700  ;;  %12724 = vrcp.f32 %v4947_v3 }
 0x5be   : > { %v4965_v21 = vpop.xlane.xlu1 %4964  ;;  %v12703_v15 = vpop.eup %12702  ;;  %12726 = vrcp.f32 %v4941_v31  ;;  %v5837_v17 = vmul.f32 %v12701_v2, %v14661_v44 }
 0x5bf   : > { %v4932_v18 = vpop.xlane.xlu0 %4931  ;;  %v14669_v27 = vpop.eup %12704  ;;  %12728 = vrcp.f32 %v4938_v32  ;;  %v5835_v29 = vmul.f32 %v12703_v15, %v14663_v34 }
 0x5c0   : > { %v14671_v57 = vpop.eup %12706  ;;  %12730 = vrcp.f32 %v4965_v21 }
 0x5c1   : > { %v12304_v46 = vpop.f32.mrb[16].mxu0  ;;  %v12709_v51 = vpop.eup %12708  ;;  %12732 = vrcp.f32 %v4932_v18 }
 0x5c2   : > { %v5841_v36 = vmul.f32 %v12693_v49, %v12304_v46  ;;  %v5509_v42 = vpop.f32.mrb[17].mxu0  ;;  %v12711_v19 = vpop.eup %12710  ;;  %v14675_v41 = vmul.f32 %v12709_v51, %v12297_v54 }
 0x5c3   : > { %v5839_v35 = vmul.f32 %v12695_v16, %v5509_v42  ;;  %v4950_v28 = vpop.xlane.xlu0 %4949  ;;  %v12305_v13 = vpop.f32.mrb[18].mxu0 }
 0x5c4   : > { %v6135_v62 = vcombine.low %v5833_v9, %v5841_v36  ;;  %v6136_v14 = vcombine.high %v5833_v9, %v5841_v36  ;;  %v5842_v47 = vmul.f32 %v12697_v50, %v12305_v13  ;;  %v5512_v5 = vpop.f32.mrb[19].mxu0  ;;  %v4971_v20 = vpop.xlane.xlu1 %4970 }
 0x5c5   : > { %v5863_v4 = vcombine.low %v5831_v11, %v5839_v35  ;;  %v5864_v38 = vcombine.high %v5831_v11, %v5839_v35  ;;  %v5840_v61 = vmul.f32 %v12699_v52, %v5512_v5  ;;  %v12713_v30 = vpop.eup %12712  ;;  %12734 = vrcp.f32 %v4971_v20 }
 0x5c6   : > { %v6271_v7 = vcombine.low %v5834_v10, %v5842_v47  ;;  %v6272_v59 = vcombine.high %v5834_v10, %v5842_v47  ;;  %v12715_v55 = vpop.eup %12714  ;;  %v14677_v40 = vmul.f32 %v12713_v30, %v5457_v39  ;;  %v6143_v6 = vrot.slane %v6135_v62, %v13360_v53 }
 0x5c7   : > { %v5999_v43 = vcombine.low %v5832_v56, %v5840_v61  ;;  %v6000_v24 = vcombine.high %v5832_v56, %v5840_v61  ;;  %v4944_v63 = vpop.xlane.xlu0 %4943  ;;  %v14679_v26 = vpop.eup %12716  ;;  %v6150_v0 = vrot.slane %v6136_v14, %v13360_v53  ;;  %v5871_v60 = vrot.slane %v5863_v4, %v13360_v53 }
 0x5c8   : > { %12736 = vrcp.f32 %v4950_v28  ;;  %v14684_v33 = vpop.eup %12718  ;;  %v5878_v3 = vrot.slane %v5864_v38, %v13360_v53  ;;  %v14688_v44 = vrot.slane %v6271_v7, %v13360_v53  ;;  %v14691_v1 = vrot.slane %v6272_v59, %v13360_v53 }
 0x5c9   : > { %v12721_v54 = vpop.eup %12720  ;;  %v14694_v12 = vrot.slane %v5999_v43, %v13360_v53  ;;  %v14697_v39 = vrot.slane %v6000_v24, %v13360_v53  ;;  %12738 = vrcp.f32 %v4944_v63 }
 0x5ca   : > { %v12723_v18 = vpop.eup %12722 }
 0x5cb   : > { %v4968_v37 = vpop.xlane.xlu0 %4967  ;;  %v14699_v36 = vpop.eup %12724 }
 0x5cc   : > { %12740 = vrcp.f32 %v4968_v37  ;;  %v14701_v10 = vpop.eup %12726 }
 0x5cd   : > { %v12729_v52 = vpop.eup %12728 }
 0x5ce   : > { %v12312_v58 = vpop.f32.mrb[32].mxu1  ;;  %v14711_v5 = vpop.eup %12730 }
 0x5cf   : > { %v4974_v32 = vpop.xlane.xlu0 %4973  ;;  %v5845_v34 = vmul.f32 %v12711_v19, %v12312_v58  ;;  %v5564_v22 = vpop.f32.mrb[33].mxu1 }
 0x5d0   : > { %v5843_v45 = vmul.f32 %v12715_v55, %v5564_v22  ;;  %v12313_v31 = vpop.f32.mrb[34].mxu1  ;;  %12742 = vrcp.f32 %v4974_v32  ;;  %v12733_v15 = vpop.eup %12732 }
 0x5d1   : > { %v6151_v49 = vcombine.low %v5837_v17, %v5845_v34  ;;  %v6152_v46 = vcombine.high %v5837_v17, %v5845_v34  ;;  %v5846_v16 = vmul.f32 %v12721_v54, %v12313_v31  ;;  %v5567_v9 = vpop.f32.mrb[35].mxu1  ;;  %v14713_v51 = vpop.eup %12734 }
 0x5d2   : > { %v5879_v42 = vcombine.low %v5835_v29, %v5843_v45  ;;  %v5880_v50 = vcombine.high %v5835_v29, %v5843_v45  ;;  %v5844_v11 = vmul.f32 %v12723_v18, %v5567_v9  ;;  %v14719_v17 = vpop.eup %12736 }
 0x5d3   : > { %v6159_v56 = vrot.slane %v6151_v49, %v13360_v53  ;;  %v6166_v35 = vrot.slane %v6152_v46, %v13360_v53  ;;  %v6287_v28 = vcombine.low %v14675_v41, %v5846_v16  ;;  %v6288_v13 = vcombine.high %v14675_v41, %v5846_v16  ;;  %v14725_v22 = vpop.eup %12738 }
 0x5d4   : > { %v5887_v21 = vrot.slane %v5879_v42, %v13360_v53  ;;  %v5894_v62 = vrot.slane %v5880_v50, %v13360_v53  ;;  %v6015_v14 = vcombine.low %v14677_v40, %v5844_v11  ;;  %v6016_v47 = vcombine.high %v14677_v40, %v5844_v11 }
 0x5d5   : > { %v6199_v2 = vcombine.low %v6143_v6, %v6159_v56  ;;  %v6200_v4 = vcombine.high %v6143_v6, %v6159_v56  ;;  %v6215_v38 = vcombine.low %v6150_v0, %v6166_v35  ;;  %v6216_v61 = vcombine.high %v6150_v0, %v6166_v35 }
 0x5d6   : > { %v5927_v7 = vcombine.low %v5871_v60, %v5887_v21  ;;  %v5928_v59 = vcombine.high %v5871_v60, %v5887_v21  ;;  %v5943_v43 = vcombine.low %v5878_v3, %v5894_v62  ;;  %v5944_v24 = vcombine.high %v5878_v3, %v5894_v62  ;;  %v12320_v63 = vpop.f32.mrb[20].mxu0  ;;  %v14727_v49 = vpop.eup %12740 }
 0x5d7   : > { %v6207_v19 = vrot.slane %v6199_v2, %v13378_v8  ;;  %v6214_v20 = vrot.slane %v6200_v4, %v13378_v8  ;;  %v6223_v30 = vrot.slane %v6215_v38, %v13378_v8  ;;  %v6230_v37 = vrot.slane %v6216_v61, %v13378_v8  ;;  %v5619_v55 = vpop.f32.mrb[21].mxu0 }
 0x5d8   : > { %v5935_v29 = vrot.slane %v5927_v7, %v13378_v8  ;;  %v5942_v41 = vrot.slane %v5928_v59, %v13378_v8  ;;  %v5951_v40 = vrot.slane %v5943_v43, %v13378_v8  ;;  %v5958_v6 = vrot.slane %v5944_v24, %v13378_v8  ;;  %v12321_v0 = vpop.f32.mrb[22].mxu0 }
 0x5d9   : > { %v11704_v60 = vcombine.low %v6207_v19, %v6214_v20  ;;  %v11706_v58 = vcombine.high %v6207_v19, %v6214_v20  ;;  %v11708_v3 = vcombine.low %v6223_v30, %v6230_v37  ;;  %v11710_v32 = vcombine.high %v6223_v30, %v6230_v37  ;;  %v5622_v34 = vpop.f32.mrb[23].mxu0 }
 0x5da   : > { %v11688_v54 = vcombine.low %v5935_v29, %v5942_v41  ;;  %v11690_v45 = vcombine.high %v5935_v29, %v5942_v41  ;;  %v11692_v31 = vcombine.low %v5951_v40, %v5958_v6  ;;  %v11694_v18 = vcombine.high %v5951_v40, %v5958_v6  ;;  %v14741_v50 = vpop.eup %12742 }
 0x5db   : > { %v14730_v46 = vrot.slane %v11704_v60, %v13360_v53  ;;  %v14733_v16 = vrot.slane %v11706_v58, %v13360_v53  ;;  %v14736_v9 = vrot.slane %v11708_v3, %v13360_v53  ;;  %v14739_v42 = vrot.slane %v11710_v32, %v13360_v53 }
 0x5dc   : > { %v14744_v11 = vrot.slane %v11688_v54, %v13360_v53  ;;  %v14747_v56 = vrot.slane %v11690_v45, %v13360_v53  ;;  %v14750_v35 = vrot.slane %v11692_v31, %v13360_v53  ;;  %v14753_v21 = vrot.slane %v11694_v18, %v13360_v53 }
 0x5dd   : > { %v6295_v62 = vrot.slane %v6287_v28, %v13360_v53  ;;  %v6302_v2 = vrot.slane %v6288_v13, %v13360_v53  ;;  %v6023_v4 = vrot.slane %v6015_v14, %v13360_v53  ;;  %v6030_v38 = vrot.slane %v6016_v47, %v13360_v53 }
 0x5de   : > { %v14760_v61 = vmul.f32 %v14679_v26, %v12320_v63  ;;  %v14763_v7 = vmul.f32 %v14684_v33, %v5619_v55  ;;  %v14765_v59 = vmul.f32 %v12729_v52, %v12321_v0  ;;  %v14767_v43 = vmul.f32 %v12733_v15, %v5622_v34  ;;  %v12328_v24 = vpop.f32.mrb[36].mxu1 }
 0x5df   : > { %v6335_v19 = vcombine.low %v14688_v44, %v6295_v62  ;;  %v6336_v28 = vcombine.high %v14688_v44, %v6295_v62  ;;  %v6351_v13 = vcombine.low %v14691_v1, %v6302_v2  ;;  %v6352_v14 = vcombine.high %v14691_v1, %v6302_v2  ;;  %v5674_v47 = vpop.f32.mrb[37].mxu1 }
 0x5e0   : > { %v6063_v26 = vcombine.low %v14694_v12, %v6023_v4  ;;  %v6064_v63 = vcombine.high %v14694_v12, %v6023_v4  ;;  %v6079_v33 = vcombine.low %v14697_v39, %v6030_v38  ;;  %v6080_v52 = vcombine.high %v14697_v39, %v6030_v38  ;;  %v12329_v15 = vpop.f32.mrb[38].mxu1 }
 0x5e1   : > { %v6343_v20 = vrot.slane %v6335_v19, %v13378_v8  ;;  %v6350_v30 = vrot.slane %v6336_v28, %v13378_v8  ;;  %v6359_v44 = vrot.slane %v6351_v13, %v13378_v8  ;;  %v6366_v37 = vrot.slane %v6352_v14, %v13378_v8  ;;  %v5677_v55 = vpop.f32.mrb[39].mxu1  ;;  %v12336_v1 = vpop.f32.mrb[24].mxu0 }
 0x5e2   : > { %v6071_v29 = vrot.slane %v6063_v26, %v13378_v8  ;;  %v6078_v41 = vrot.slane %v6064_v63, %v13378_v8  ;;  %v6087_v12 = vrot.slane %v6079_v33, %v13378_v8  ;;  %v6094_v40 = vrot.slane %v6080_v52, %v13378_v8  ;;  %v5729_v39 = vpop.f32.mrb[25].mxu0 }
 0x5e3   : > { %v11712_v6 = vcombine.low %v6343_v20, %v6350_v30  ;;  %v11714_v0 = vcombine.high %v6343_v20, %v6350_v30  ;;  %v11716_v60 = vcombine.low %v6359_v44, %v6366_v37  ;;  %v11718_v58 = vcombine.high %v6359_v44, %v6366_v37  ;;  %v12337_v3 = vpop.f32.mrb[26].mxu0 }
 0x5e4   : > { %v11696_v32 = vcombine.low %v6071_v29, %v6078_v41  ;;  %v11698_v34 = vcombine.high %v6071_v29, %v6078_v41  ;;  %v11700_v54 = vcombine.low %v6087_v12, %v6094_v40  ;;  %v11702_v45 = vcombine.high %v6087_v12, %v6094_v40  ;;  %v5732_v31 = vpop.f32.mrb[27].mxu0 }
 0x5e5   : > { %v6823_v18 = vrot.slane %v11712_v6, %v13360_v53  ;;  %v6839_v62 = vrot.slane %v11714_v0, %v13360_v53  ;;  %v6855_v2 = vrot.slane %v11716_v60, %v13360_v53  ;;  %v6871_v4 = vrot.slane %v11718_v58, %v13360_v53 }
 0x5e6   : > { %v14790_v38 = vrot.slane %v11696_v32, %v13360_v53  ;;  %v14793_v19 = vrot.slane %v11698_v34, %v13360_v53  ;;  %v14796_v28 = vrot.slane %v11700_v54, %v13360_v53  ;;  %v14799_v13 = vrot.slane %v11702_v45, %v13360_v53 }
 0x5e7   : > { %v5853_v14 = vmul.f32 %v14699_v36, %v12328_v24  ;;  %v14803_v26 = vmul.f32 %v14701_v10, %v5674_v47  ;;  %v14806_v63 = vmul.f32 %v14719_v17, %v12329_v15  ;;  %v14809_v33 = vmul.f32 %v14725_v22, %v5677_v55 }
 0x5e8   : > { %v5857_v52 = vmul.f32 %v14665_v23, %v12336_v1  ;;  %v5855_v20 = vmul.f32 %v14667_v48, %v5729_v39  ;;  %v5858_v30 = vmul.f32 %v14669_v27, %v12337_v3  ;;  %v5856_v44 = vmul.f32 %v14671_v57, %v5732_v31 }
 0x5e9   : > { %v6744_v36 = vcombine.high %v14730_v46, %v14733_v16  ;;  %v6776_v10 = vcombine.high %v14736_v9, %v14739_v42  ;;  %v6880_v24 = vcombine.high %v6823_v18, %v6839_v62  ;;  %v6912_v17 = vcombine.high %v6855_v2, %v6871_v4  ;;  %v12344_v47 = vpop.f32.mrb[40].mxu1 }
 0x5ea   : > { %v6167_v22 = vcombine.low %v14760_v61, %v5857_v52  ;;  %v6168_v15 = vcombine.high %v14760_v61, %v5857_v52  ;;  %v5895_v23 = vcombine.low %v14763_v7, %v5855_v20  ;;  %v5896_v48 = vcombine.high %v14763_v7, %v5855_v20  ;;  %v5784_v27 = vpop.f32.mrb[41].mxu1 }
 0x5eb   : > { %v6303_v57 = vcombine.low %v14765_v59, %v5858_v30  ;;  %v6304_v37 = vcombine.high %v14765_v59, %v5858_v30  ;;  %v6031_v55 = vcombine.low %v14767_v43, %v5856_v44  ;;  %v6032_v1 = vcombine.high %v14767_v43, %v5856_v44  ;;  %v12345_v29 = vpop.f32.mrb[42].mxu1 }
 0x5ec   : > { %v6175_v41 = vrot.slane %v6167_v22, %v13360_v53  ;;  %v6182_v12 = vrot.slane %v6168_v15, %v13360_v53  ;;  %v5903_v61 = vrot.slane %v5895_v23, %v13360_v53  ;;  %v5910_v40 = vrot.slane %v5896_v48, %v13360_v53  ;;  %v14831_v39 = vpop.f32.mrb[43].mxu1 }
 0x5ed   : > { %v14834_v7 = vrot.slane %v6303_v57, %v13360_v53  ;;  %v14837_v59 = vrot.slane %v6304_v37, %v13360_v53  ;;  %v14840_v6 = vrot.slane %v6031_v55, %v13360_v53  ;;  %v14843_v43 = vrot.slane %v6032_v1, %v13360_v53 }
 0x5ee   : > { %v14846_v0 = vrot.slane %v6744_v36, %v13378_v8  ;;  %v14849_v60 = vrot.slane %v6776_v10, %v13378_v8  ;;  %v14852_v58 = vrot.slane %v6880_v24, %v13378_v8  ;;  %v14855_v3 = vrot.slane %v6912_v17, %v13378_v8 }
 0x5ef   : > { %v6743_v32 = vcombine.low %v14730_v46, %v14733_v16  ;;  %v6775_v34 = vcombine.low %v14736_v9, %v14739_v42  ;;  %v6879_v54 = vcombine.low %v6823_v18, %v6839_v62  ;;  %v6911_v45 = vcombine.low %v6855_v2, %v6871_v4 }
 0x5f0   : > { %v6809_v31 = vcombine.low %v14846_v0, %v14849_v60  ;;  %v6945_v52 = vcombine.low %v14852_v58, %v14855_v3  ;;  %v5861_v20 = vmul.f32 %v14713_v51, %v12344_v47  ;;  %v5859_v30 = vmul.f32 %v14711_v5, %v5784_v27 }
 0x5f1   : > { %v14868_v44 = vrot.slane %v6743_v32, %v13378_v8  ;;  %v14871_v46 = vrot.slane %v6775_v34, %v13378_v8  ;;  %v14874_v16 = vrot.slane %v6879_v54, %v13378_v8  ;;  %v14877_v9 = vrot.slane %v6911_v45, %v13378_v8 }
 0x5f2   : > { %v12407_v42 = vpack.i.bf16 %v6945_v52, %v6809_v31  ;;  %v6183_v18 = vcombine.low %v5853_v14, %v5861_v20  ;;  %v6184_v62 = vcombine.high %v5853_v14, %v5861_v20  ;;  %v5911_v2 = vcombine.low %v14803_v26, %v5859_v30 }
 0x5f3   : > { %v6808_v5 = vcombine.high %v14868_v44, %v14871_v46  ;;  %v6944_v51 = vcombine.high %v14874_v16, %v14877_v9  ;;  %v5912_v4 = vcombine.high %v14803_v26, %v5859_v30  ;;  %v5862_v36 = vmul.f32 %v14741_v50, %v12345_v29 }
 0x5f4   : > { %12408 = vrot.lane.b32.xlu1 %v12407_v42, %s13071_s24  ;;  %v6191_v10 = vrot.slane %v6183_v18, %v13360_v53  ;;  %v6198_v24 = vrot.slane %v6184_v62, %v13360_v53  ;;  %v5919_v14 = vrot.slane %v5911_v2, %v13360_v53  ;;  %v6810_v17 = vcombine.high %v14846_v0, %v14849_v60 }
 0x5f5   : > { %v12402_v47 = vpack.i.bf16 %v6944_v51, %v6808_v5  ;;  %v5926_v22 = vrot.slane %v5912_v4, %v13360_v53  ;;  %v6319_v15 = vcombine.low %v14806_v63, %v5862_v36  ;;  %v6320_v26 = vcombine.high %v14806_v63, %v5862_v36 }
 0x5f6   : > { %v6231_v50 = vcombine.low %v6175_v41, %v6191_v10  ;;  %v6232_v23 = vcombine.high %v6175_v41, %v6191_v10  ;;  %v6247_v48 = vcombine.low %v6182_v12, %v6198_v24  ;;  %v6248_v27 = vcombine.high %v6182_v12, %v6198_v24 }
 0x5f7   : > { %12403 = vrot.lane.b32.xlu0 %v12402_v47, %s13072_s25  ;;  %v5959_v57 = vcombine.low %v5903_v61, %v5919_v14  ;;  %v5960_v37 = vcombine.high %v5903_v61, %v5919_v14  ;;  %v5975_v55 = vcombine.low %v5910_v40, %v5926_v22  ;;  %v5976_v1 = vcombine.high %v5910_v40, %v5926_v22 }
 0x5f8   : > { %v6239_v29 = vrot.slane %v6231_v50, %v13378_v8  ;;  %v6246_v0 = vrot.slane %v6232_v23, %v13378_v8  ;;  %v6255_v60 = vrot.slane %v6247_v48, %v13378_v8  ;;  %v6262_v32 = vrot.slane %v6248_v27, %v13378_v8 }
 0x5f9   : > { %v5967_v63 = vrot.slane %v5959_v57, %v13378_v8  ;;  %v5974_v41 = vrot.slane %v5960_v37, %v13378_v8  ;;  %v5983_v12 = vrot.slane %v5975_v55, %v13378_v8  ;;  %v5990_v34 = vrot.slane %v5976_v1, %v13378_v8 }
 0x5fa   : > { %v11705_v54 = vcombine.low %v6239_v29, %v6246_v0  ;;  %v11707_v61 = vcombine.high %v6239_v29, %v6246_v0  ;;  %v11709_v45 = vcombine.low %v6255_v60, %v6262_v32  ;;  %v11711_v40 = vcombine.high %v6255_v60, %v6262_v32 }
 0x5fb   : > { %v11689_v31 = vcombine.low %v5967_v63, %v5974_v41  ;;  %v11691_v52 = vcombine.high %v5967_v63, %v5974_v41  ;;  %v11693_v20 = vcombine.low %v5983_v12, %v5990_v34  ;;  %v11695_v30 = vcombine.high %v5983_v12, %v5990_v34 }
 0x5fc   : > { %v14905_v42 = vrot.slane %v11705_v54, %v13360_v53  ;;  %v14908_v18 = vrot.slane %v11707_v61, %v13360_v53  ;;  %v14911_v62 = vrot.slane %v11709_v45, %v13360_v53  ;;  %v14914_v2 = vrot.slane %v11711_v40, %v13360_v53 }
 0x5fd   : > { %v14917_v5 = vrot.slane %v11689_v31, %v13360_v53  ;;  %v14920_v51 = vrot.slane %v11691_v52, %v13360_v53  ;;  %v14923_v4 = vrot.slane %v11693_v20, %v13360_v53  ;;  %v14926_v36 = vrot.slane %v11695_v30, %v13360_v53 }
 0x5fe   : > { %v6327_v10 = vrot.slane %v6319_v15, %v13360_v53  ;;  %v6334_v24 = vrot.slane %v6320_v26, %v13360_v53  ;;  %v6946_v14 = vcombine.high %v14852_v58, %v14855_v3  ;;  %v6472_v47 = vcombine.high %v14744_v11, %v14747_v56 }
 0x5ff   : > { %v6504_v22 = vcombine.high %v14750_v35, %v14753_v21  ;;  %v6608_v50 = vcombine.high %v14790_v38, %v14793_v19  ;;  %v6640_v23 = vcombine.high %v14796_v28, %v14799_v13  ;;  %v5860_v15 = vmul.f32 %v14727_v49, %v14831_v39 }
 0x600   : > { %v6367_v26 = vcombine.low %v14834_v7, %v6327_v10  ;;  %v6368_v48 = vcombine.high %v14834_v7, %v6327_v10  ;;  %v6383_v58 = vcombine.low %v14837_v59, %v6334_v24  ;;  %v6384_v3 = vcombine.high %v14837_v59, %v6334_v24 }
 0x601   : > { %v12412_v27 = vpack.i.bf16 %v6946_v14, %v6810_v17  ;;  %v6486_v57 = vrot.slane %v6472_v47, %v13378_v8  ;;  %v6518_v37 = vrot.slane %v6504_v22, %v13378_v8  ;;  %v6622_v55 = vrot.slane %v6608_v50, %v13378_v8 }
 0x602   : > { %v6375_v1 = vrot.slane %v6367_v26, %v13378_v8  ;;  %v6382_v29 = vrot.slane %v6368_v48, %v13378_v8  ;;  %v6391_v49 = vrot.slane %v6383_v58, %v13378_v8  ;;  %v6398_v39 = vrot.slane %v6384_v3, %v13378_v8 }
 0x603   : > { %12413 = vrot.lane.b32.xlu1 %v12412_v27, %s13073_s4  ;;  %v6538_v7 = vcombine.high %v6486_v57, %v6518_v37  ;;  %v6654_v59 = vrot.slane %v6640_v23, %v13378_v8  ;;  %v6047_v17 = vcombine.low %v14809_v33, %v5860_v15  ;;  %v6048_v0 = vcombine.high %v14809_v33, %v5860_v15 }
 0x604   : > { %v11713_v60 = vcombine.low %v6375_v1, %v6382_v29  ;;  %v11715_v32 = vcombine.high %v6375_v1, %v6382_v29  ;;  %v11717_v63 = vcombine.low %v6391_v49, %v6398_v39  ;;  %v11719_v41 = vcombine.high %v6391_v49, %v6398_v39  ;;  %v12484_v39 = vld [vmem:[%s13194_s1] sm:$0xff]  }
 0x605   : > { %v6674_v12 = vcombine.high %v6622_v55, %v6654_v59  ;;  %v6055_v34 = vrot.slane %v6047_v17, %v13360_v53  ;;  %v6062_v54 = vrot.slane %v6048_v0, %v13360_v53  ;;  %v6471_v61 = vcombine.low %v14744_v11, %v14747_v56  ;;  %12346 = vmatprep.subr.bf16.mxu0 %v12484_v39 }
 0x606   : > { %v14961_v45 = vrot.slane %v11713_v60, %v13360_v53  ;;  %v14964_v40 = vrot.slane %v11715_v32, %v13360_v53  ;;  %v14967_v33 = vrot.slane %v11717_v63, %v13360_v53  ;;  %v14970_v31 = vrot.slane %v11719_v41, %v13360_v53  ;;  %12347 = vmatpush3.bf16.msra.mxu0 %v12484_v39 }
 0x607   : > { %v12427_v52 = vpack.i.bf16 %v6674_v12, %v6538_v7  ;;  %v6095_v20 = vcombine.low %v14840_v6, %v6055_v34  ;;  %v6096_v30 = vcombine.high %v14840_v6, %v6055_v34  ;;  %v6111_v10 = vcombine.low %v14843_v43, %v6062_v54 }
 0x608   : > { %v6112_v11 = vcombine.high %v14843_v43, %v6062_v54  ;;  %v14977_v56 = vrot.slane %v6471_v61, %v13378_v8  ;;  %v6503_v24 = vcombine.low %v14750_v35, %v14753_v21  ;;  %v6607_v14 = vcombine.low %v14790_v38, %v14793_v19 }
 0x609   : > { %12428 = vrot.lane.b32.xlu0 %v12427_v52, %s13073_s4  ;;  %v6103_v47 = vrot.slane %v6095_v20, %v13378_v8  ;;  %v6110_v22 = vrot.slane %v6096_v30, %v13378_v8  ;;  %v6119_v6 = vrot.slane %v6111_v10, %v13378_v8  ;;  %v6639_v50 = vcombine.low %v14796_v28, %v14799_v13  ;;  %v12485_v10 = vld [vmem:[%s13194_s1 + $0x8] sm:$0xff]  }
 0x60a   : > { %v6126_v43 = vrot.slane %v6112_v11, %v13378_v8  ;;  %v14990_v23 = vrot.slane %v6503_v24, %v13378_v8  ;;  %v14993_v35 = vrot.slane %v6607_v14, %v13378_v8  ;;  %v6537_v21 = vcombine.low %v6486_v57, %v6518_v37  ;;  %12348 = vmatprep.subr.bf16.mxu0 %v12485_v10 }
 0x60b   : > { %v11697_v38 = vcombine.low %v6103_v47, %v6110_v22  ;;  %v11699_v19 = vcombine.high %v6103_v47, %v6110_v22  ;;  %v14996_v15 = vrot.slane %v6639_v50, %v13378_v8  ;;  %v6673_v26 = vcombine.low %v6622_v55, %v6654_v59  ;;  %12349 = vmatpush3.bf16.msra.mxu0 %v12485_v10 }
 0x60c   : > { %v11701_v48 = vcombine.low %v6119_v6, %v6126_v43  ;;  %v11703_v58 = vcombine.high %v6119_v6, %v6126_v43  ;;  %v6536_v28 = vcombine.high %v14977_v56, %v14990_v23  ;;  %v6759_v13 = vcombine.low %v14905_v42, %v14908_v18 }
 0x60d   : > { %v15003_v3 = vrot.slane %v11697_v38, %v13360_v53  ;;  %v6574_v27 = vrot.slane %v11699_v19, %v13360_v53  ;;  %v6672_v57 = vcombine.high %v14993_v35, %v14996_v15  ;;  %v12422_v37 = vpack.i.bf16 %v6673_v26, %v6537_v21 }
 0x60e   : > { %v6590_v1 = vrot.slane %v11701_v48, %v13360_v53  ;;  %v6606_v55 = vrot.slane %v11703_v58, %v13360_v53  ;;  %v6767_v29 = vrot.slane %v6759_v13, %v13378_v8  ;;  %v6791_v49 = vcombine.low %v14911_v62, %v14914_v2 }
 0x60f   : > { %v12417_v7 = vpack.i.bf16 %v6672_v57, %v6536_v28  ;;  %v6895_v59 = vcombine.low %v14961_v45, %v14964_v40  ;;  %v6927_v17 = vcombine.low %v14967_v33, %v14970_v31  ;;  %v6487_v0 = vcombine.low %v14917_v5, %v14920_v51  ;;  %v12486_v28 = vld [vmem:[%s13194_s1 + $0x10] sm:$0xff]  }
 0x610   : > { %v6799_v60 = vrot.slane %v6791_v49, %v13378_v8  ;;  %v6519_v53 = vcombine.low %v14923_v4, %v14926_v36  ;;  %v6623_v32 = vcombine.low %v15003_v3, %v6574_v27  ;;  %v6655_v63 = vcombine.low %v6590_v1, %v6606_v55  ;;  %12350 = vmatprep.subr.bf16.mxu0 %v12486_v28 }
 0x611   : > { %12418 = vrot.lane.b32.xlu1 %v12417_v7, %s13072_s25  ;;  %v6903_v41 = vrot.slane %v6895_v59, %v13378_v8  ;;  %v6935_v12 = vrot.slane %v6927_v17, %v13378_v8  ;;  %v6495_v34 = vrot.slane %v6487_v0, %v13378_v8  ;;  %v6760_v54 = vcombine.high %v14905_v42, %v14908_v18 }
 0x612   : > { %v6811_v61 = vcombine.low %v6767_v29, %v6799_v60  ;;  %v6527_v52 = vrot.slane %v6519_v53, %v13378_v8  ;;  %v6631_v20 = vrot.slane %v6623_v32, %v13378_v8  ;;  %v6663_v30 = vrot.slane %v6655_v63, %v13378_v8  ;;  %12351 = vmatpush3.bf16.msra.mxu0 %v12486_v28 }
 0x613   : > { %v6947_v11 = vcombine.low %v6903_v41, %v6935_v12  ;;  %v6812_v24 = vcombine.high %v6767_v29, %v6799_v60  ;;  %v6948_v14 = vcombine.high %v6903_v41, %v6935_v12  ;;  %v6774_v47 = vrot.slane %v6760_v54, %v13378_v8 }
 0x614   : > { %v6539_v22 = vcombine.low %v6495_v34, %v6527_v52  ;;  %v6675_v6 = vcombine.low %v6631_v20, %v6663_v30  ;;  %v6540_v50 = vcombine.high %v6495_v34, %v6527_v52  ;;  %v6676_v43 = vcombine.high %v6631_v20, %v6663_v30 }
 0x615   : > { %12423 = vrot.lane.b32.xlu1 %v12422_v37, %s13071_s24  ;;  %v12432_v42 = vpack.i.bf16 %v6947_v11, %v6811_v61  ;;  %v12437_v18 = vpack.i.bf16 %v6948_v14, %v6812_v24  ;;  %v6792_v21 = vcombine.high %v14911_v62, %v14914_v2  ;;  %v6896_v38 = vcombine.high %v14961_v45, %v14964_v40  ;;  %s17835_s24 = scalar_lea.vmem %s17695_s8, %s13172_s20 }
 0x616   : > { %v12447_v19 = vpack.i.bf16 %v6675_v6, %v6539_v22  ;;  %v12452_v26 = vpack.i.bf16 %v6676_v43, %v6540_v50  ;;  %v6928_v48 = vcombine.high %v14967_v33, %v14970_v31  ;;  %v6488_v58 = vcombine.high %v14917_v5, %v14920_v51 }
 0x617   : > { %v6806_v13 = vrot.slane %v6792_v21, %v13378_v8  ;;  %v6910_v57 = vrot.slane %v6896_v38, %v13378_v8  ;;  %v6520_v62 = vcombine.high %v14923_v4, %v14926_v36  ;;  %v6624_v2 = vcombine.high %v15003_v3, %v6574_v27 }
 0x618   : > { %12448 = vrot.lane.b32.xlu0 %v12447_v19, %s13074_s27  ;;  %v6942_v45 = vrot.slane %v6928_v48, %v13378_v8  ;;  %v6502_v40 = vrot.slane %v6488_v58, %v13378_v8  ;;  %v6656_v33 = vcombine.high %v6590_v1, %v6606_v55  ;;  %v6943_v5 = vcombine.low %v14874_v16, %v14877_v9  ;;  %v12487_v55 = vld [vmem:[%s13194_s1 + $0x18] sm:$0xff]   ;;  %s13077_s1 = smov 56  }
 0x619   : > { %12433 = vrot.lane.b32.xlu1 %v12432_v42, %s13074_s27  ;;  %v6813_v51 = vcombine.low %v6774_v47, %v6806_v13  ;;  %v6534_v31 = vrot.slane %v6520_v62, %v13378_v8  ;;  %v6638_v37 = vrot.slane %v6624_v2, %v13378_v8  ;;  %v6814_v4 = vcombine.high %v6774_v47, %v6806_v13 }
 0x61a   : > { %v6949_v36 = vcombine.low %v6910_v57, %v6942_v45  ;;  %v6670_v3 = vrot.slane %v6656_v33, %v13378_v8  ;;  %v6950_v27 = vcombine.high %v6910_v57, %v6942_v45  ;;  %v6807_v29 = vcombine.low %v14868_v44, %v14871_v46  ;;  %12352 = vmatprep.subr.bf16.mxu0 %v12487_v55 }
 0x61b   : > { %v6541_v49 = vcombine.low %v6502_v40, %v6534_v31  ;;  %v6542_v1 = vcombine.high %v6502_v40, %v6534_v31  ;;  %v6535_v59 = vcombine.low %v14977_v56, %v14990_v23  ;;  %v6671_v8 = vcombine.low %v14993_v35, %v14996_v15  ;;  %12353 = vmatpush3.bf16.msra.mxu0 %v12487_v55 }
 0x61c   : > { %12453 = vrot.lane.b32.xlu0 %v12452_v26, %s13075_s30  ;;  %v12442_v16 = vpack.i.bf16 %v6949_v36, %v6813_v51  ;;  %v6677_v9 = vcombine.low %v6638_v37, %v6670_v3  ;;  %v12467_v39 = vpack.i.bf16 %v6950_v27, %v6814_v4  ;;  %v6678_v7 = vcombine.high %v6638_v37, %v6670_v3 }
 0x61d   : > { %12438 = vrot.lane.b32.xlu1 %v12437_v18, %s13075_s30  ;;  %s18115_s30 = scalar_lea.vmem %s17700_s13, %s13172_s20 }
 0x61e   : > { %v12457_v44 = vpack.i.bf16 %v6677_v9, %v6541_v49  ;;  %v12462_v46 = vpack.i.bf16 %v6678_v7, %v6542_v1 }
 0x620   : > { %12458 = vrot.lane.b32.xlu0 %v12457_v44, %s13076_s16 }
 0x621   : > { %12443 = vrot.lane.b32.xlu1 %v12442_v16, %s13076_s16 }
 0x624   : > { %12463 = vrot.lane.b32.xlu0 %v12462_v46, %s13077_s1 }
 0x625   : > { %12468 = vrot.lane.b32.xlu1 %v12467_v39, %s13077_s1 }
 0x666   : > { %v12409_v17 = vpop.permute.xlu1 %12408 }
 0x667   : > { %v12411_v35 = vunpack.i.h.bf16 %v12409_v17  ;;  %v12410_v15 = vunpack.i.l.bf16 %v12409_v17 }
 0x669   : > { %v12404_v60 = vpop.permute.xlu0 %12403 }
 0x66a   : > { %v12406_v56 = vunpack.i.h.bf16 %v12404_v60  ;;  %v12405_v23 = vunpack.i.l.bf16 %v12404_v60 }
 0x66c   : > { %v7066_v34 = vsel %vm4180_vm2, %v6943_v5, %v12406_v56  ;;  %v7065_v54 = vsel %vm4180_vm2, %v6807_v29, %v12405_v23 }
 0x66d   : > { %v7071_v11 = vsel %vm7067_vm9, %v7066_v34, %v12411_v35  ;;  %v7070_v24 = vsel %vm7067_vm9, %v7065_v54, %v12410_v15  ;;  %v11720_v35 = vld [vmem:[%s17833_s0] ss:$0 sm:$0xff]  ;;  %s11442_s0 = sshll.u32 %s13078_s29, 4  ;;  %s11443_s0 = int_to_ptr.vmem [resolvable:$true] %s11442_s0 }
 0x66e   : > { %p13029_p9 = scmp.lt.s32.totalorder %s11443_s0, %s11443_s0 }
 0x675   : > { %v12414_v0 = vpop.permute.xlu1 %12413 }
 0x676   : > { %v12416_v14 = vunpack.i.h.bf16 %v12414_v0  ;;  %v12415_v47 = vunpack.i.l.bf16 %v12414_v0 }
 0x678   : > { %v7075_v57 = vsel %vm7072_vm10, %v7070_v24, %v12415_v47  ;;  %v7076_v62 = vsel %vm7072_vm10, %v7071_v11, %v12416_v14  ;;  %v13018_v11 = vld [vmem:[#allocation2 + $0x10] sm:$0xff]  ;;  %v13019_v47 = vld [vmem:[#allocation2 + $0x8] sm:$0xff] }
 0x67b   : > { %v12429_v32 = vpop.permute.xlu0 %12428 }
 0x67c   : > { %v12431_v6 = vunpack.i.h.bf16 %v12429_v32  ;;  %v12430_v50 = vunpack.i.l.bf16 %v12429_v32 }
 0x683   : > { %v12419_v53 = vpop.permute.xlu1 %12418 }
 0x684   : > { %v12421_v61 = vunpack.i.h.bf16 %v12419_v53  ;;  %v12420_v52 = vunpack.i.l.bf16 %v12419_v53 }
 0x686   : > { %v7064_v43 = vsel %vm4180_vm2, %v6671_v8, %v12421_v61  ;;  %v7063_v42 = vsel %vm4180_vm2, %v6535_v59, %v12420_v52 }
 0x687   : > { %v12424_v63 = vpop.permute.xlu1 %12423 }
 0x688   : > { %v12426_v20 = vunpack.i.h.bf16 %v12424_v63  ;;  %v12425_v30 = vunpack.i.l.bf16 %v12424_v63 }
 0x68a   : > { %v12449_v41 = vpop.permute.xlu0 %12448  ;;  %v7068_v18 = vsel %vm7067_vm9, %v7063_v42, %v12425_v30  ;;  %v7069_v21 = vsel %vm7067_vm9, %v7064_v43, %v12426_v20  ;;  %v13017_v20 = vld [vmem:[#allocation2] sm:$0xff]  ;;  %v13020_v43 = vld [vmem:[#allocation2 + $0x18] sm:$0xff] }
 0x68b   : > { %v12434_v12 = vpop.permute.xlu1 %12433  ;;  %v12451_v38 = vunpack.i.h.bf16 %v12449_v41  ;;  %v12450_v19 = vunpack.i.l.bf16 %v12449_v41  ;;  %v7073_v33 = vsel %vm7072_vm10, %v7068_v18, %v12430_v50  ;;  %v7074_v5 = vsel %vm7072_vm10, %v7069_v21, %v12431_v6 }
 0x68c   : > { %v12436_v26 = vunpack.i.h.bf16 %v12434_v12  ;;  %v12435_v48 = vunpack.i.l.bf16 %v12434_v12 }
 0x68d   : > { %v7077_v37 = vsel %vm4686_vm4, %v7073_v33, %v12450_v19  ;;  %v7078_v4 = vsel %vm4686_vm4, %v7074_v5, %v12451_v38 }
 0x68e   : > { %v12454_v10 = vpop.permute.xlu0 %12453  ;;  %v7079_v27 = vsel %vm4686_vm4, %v7075_v57, %v12435_v48  ;;  %v7080_v29 = vsel %vm4686_vm4, %v7076_v62, %v12436_v26 }
 0x68f   : > { %v12439_v22 = vpop.permute.xlu1 %12438  ;;  %v12456_v58 = vunpack.i.h.bf16 %v12454_v10  ;;  %v12455_v28 = vunpack.i.l.bf16 %v12454_v10 }
 0x690   : > { %v12441_v2 = vunpack.i.h.bf16 %v12439_v22  ;;  %v12440_v45 = vunpack.i.l.bf16 %v12439_v22 }
 0x691   : > { %v7082_v49 = vsel %vm7081_vm11, %v7077_v37, %v12455_v28  ;;  %v7083_v1 = vsel %vm7081_vm11, %v7078_v4, %v12456_v58 }
 0x692   : > { %v12459_v13 = vpop.permute.xlu0 %12458  ;;  %v7084_v16 = vsel %vm7081_vm11, %v7079_v27, %v12440_v45  ;;  %v7085_v9 = vsel %vm7081_vm11, %v7080_v29, %v12441_v2  ;;  %v7273_v27 = vld [vmem:[%s13208_s28] sm:$0xff] }
 0x693   : > { %v12444_v40 = vpop.permute.xlu1 %12443  ;;  %v12461_v51 = vunpack.i.h.bf16 %v12459_v13  ;;  %v12460_v31 = vunpack.i.l.bf16 %v12459_v13  ;;  %v7281_v29 = vld [vmem:[%s13208_s28 + $0x40] sm:$0xff] }
 0x694   : > { %v12446_v36 = vunpack.i.h.bf16 %v12444_v40  ;;  %v12445_v3 = vunpack.i.l.bf16 %v12444_v40 }
 0x695   : > { %v7087_v8 = vsel %vm7086_vm12, %v7082_v49, %v12460_v31  ;;  %v7088_v44 = vsel %vm7086_vm12, %v7083_v1, %v12461_v51  ;;  %v7274_v49 = vld [vmem:[%s13208_s28 + $0x8] sm:$0xff]  ;;  %v11729_v1 = vcombine.low %v7273_v27, %v7281_v29 }
 0x696   : > { %v12464_v55 = vpop.permute.xlu0 %12463  ;;  %v7089_v0 = vsel %vm7086_vm12, %v7084_v16, %v12445_v3  ;;  %v7090_v60 = vsel %vm7086_vm12, %v7085_v9, %v12446_v36  ;;  %v7282_v16 = vld [vmem:[%s13208_s28 + $0x48] sm:$0xff]  ;;  %v7289_v9 = vld [vmem:[%s13208_s28 + $0x80] sm:$0xff] }
 0x697   : > { %v12469_v39 = vpop.permute.xlu1 %12468  ;;  %v12466_v7 = vunpack.i.h.bf16 %v12464_v55  ;;  %v12465_v59 = vunpack.i.l.bf16 %v12464_v55  ;;  %v11730_v55 = vcombine.high %v7273_v27, %v7281_v29  ;;  %v11728_v27 = vld [vmem:[%s17835_s24] ss:$0 sm:$0xff] }
 0x698   : > { %v12471_v46 = vunpack.i.h.bf16 %v12469_v39  ;;  %v12470_v17 = vunpack.i.l.bf16 %v12469_v39  ;;  %v7297_v39 = vld [vmem:[%s13208_s28 + $0xc0] sm:$0xff] }
 0x699   : > { %v7092_v53 = vsel %vm7091_vm13, %v7087_v8, %v12465_v59  ;;  %v7093_v32 = vsel %vm7091_vm13, %v7088_v44, %v12466_v7  ;;  %v11731_v7 = vcombine.low %v7274_v49, %v7282_v16  ;;  %v11732_v59 = vcombine.high %v7274_v49, %v7282_v16  ;;  %v7290_v44 = vld [vmem:[%s13208_s28 + $0x88] sm:$0xff]  ;;  %7747 = vmatprep.subr.bf16.mxu1 %v11730_v55  ;;  %v7291_v49 = vld [vmem:[%s13208_s28 + $0x90] sm:$0xff]  ;;  %v7292_v55 = vld [vmem:[%s13208_s28 + $0x98] sm:$0xff] }
 0x69a   : > { %v7094_v63 = vsel %vm7091_vm13, %v7089_v0, %v12470_v17  ;;  %v7095_v56 = vsel %vm7091_vm13, %v7090_v60, %v12471_v46  ;;  %v7096_v23 = vpack.c.bf16 %v7093_v32, %v7092_v53  ;;  %v11746_v8 = vcombine.high %v7289_v9, %v7297_v39  ;;  %v7298_v46 = vld [vmem:[%s13208_s28 + $0xc8] sm:$0xff]  ;;  %v7305_v17 = vld [vmem:[%s13208_s28 + $0x100] sm:$0xff]  ;;  %7748 = vmatpush1.bf16.msra.mxu1 %v11729_v1  ;;  %v7299_v1 = vld [vmem:[%s13208_s28 + $0xd0] sm:$0xff] }
 0x69b   : > { %v7097_v41 = vpack.c.bf16 %v7095_v56, %v7094_v63  ;;  %v11748_v0 = vcombine.high %v7290_v44, %v7298_v46  ;;  %v7313_v60 = vld [vmem:[%s13208_s28 + $0x140] sm:$0xff]  ;;  %v7306_v53 = vld [vmem:[%s13208_s28 + $0x108] sm:$0xff]  ;;  %7800 = vmatprep.subr.bf16.mxu0 %v11732_v59  ;;  %v11745_v63 = vcombine.low %v7289_v9, %v7297_v39  ;;  %v11747_v56 = vcombine.low %v7290_v44, %v7298_v46  ;;  %v7300_v16 = vld [vmem:[%s13208_s28 + $0xd8] sm:$0xff] }
 0x69c   : > { %12354 = vmatprep.mubr.msk.bf16.mxu0 %vm764_vm1, %v7096_v23  ;;  %v7314_v32 = vld [vmem:[%s13208_s28 + $0x148] sm:$0xff]  ;;  %7749 = vmatprep.subr.bf16.mxu1 %v11746_v8  ;;  %v11762_v23 = vcombine.high %v7305_v17, %v7313_v60  ;;  %v11750_v8 = vcombine.high %v7291_v49, %v7299_v1  ;;  %v11752_v44 = vcombine.high %v7292_v55, %v7300_v16  ;;  %v7307_v46 = vld [vmem:[%s13208_s28 + $0x110] sm:$0xff] }
 0x69d   : > { %12355 = vmatmul.mubr.msk.bf16.vlgmr.msra.gmra.mrb[28].mxu0 %vm764_vm1, %v7097_v41  ;;  %v7321_v41 = vld [vmem:[%s13208_s28 + $0x180] sm:$0xff] }
 0x69e   : > { %7832 = vmatprep.mubr.bf16.mxu0 %v17813_v25  ;;  %7801 = vmatpush1.bf16.msra.mxu0 %v11731_v7 }
 0x69f   : > { %7802 = vmatprep.subr.bf16.mxu0 %v11748_v0  ;;  %7750 = vmatpush1.bf16.msra.mxu1 %v11745_v63  ;;  %v7308_v0 = vld [vmem:[%s13208_s28 + $0x118] sm:$0xff] }
 0x6a0   : > { %7751 = vmatprep.subr.bf16.mxu1 %v11762_v23 }
 0x6a2   : > { %7803 = vmatpush1.bf16.msra.mxu0 %v11747_v56 }
 0x770   : > { %v12356_v15 = vpop.f32.mrb[28].mxu0 }
 0x771   : > { %v7177_v12 = vpop.f32.mrb[29].mxu0  ;;  %v7186_v34 = vadd.f32 %v12356_v15, %v11720_v35  ;;  %v15141_v15 = vld [vmem:[%s13208_s28 + $0x50] sm:$0xff] }
 0x772   : > { %v7178_v54 = vadd.f32 %v11720_v35, %v7177_v12  ;;  %v12357_v61 = vpop.f32.mrb[30].mxu0  ;;  %v11764_v12 = vcombine.high %v7306_v53, %v7314_v32 }
 0x773   : > { %v7180_v52 = vpop.f32.mrb[31].mxu0  ;;  %v7194_v24 = vadd.f32 %v13018_v11, %v7186_v34  ;;  %v7189_v14 = vadd.f32 %v12357_v61, %v11720_v35  ;;  %v7329_v34 = vld [vmem:[%s13208_s28 + $0x1c0] sm:$0xff]  ;;  %v15147_v61 = vld [vmem:[%s13208_s28 + $0x18] sm:$0xff]  ;;  %v11761_v11 = vcombine.low %v7305_v17, %v7313_v60  ;;  %v7315_v17 = vld [vmem:[%s13208_s28 + $0x150] sm:$0xff] }
 0x774   : > { %v7192_v30 = vadd.f32 %v13017_v20, %v7178_v54  ;;  %v7181_v10 = vadd.f32 %v11720_v35, %v7180_v52  ;;  %v15138_v35 = vld [vmem:[%s13208_s28 + $0x10] sm:$0xff]  ;;  %v15150_v52 = vld [vmem:[%s13208_s28 + $0x58] sm:$0xff]  ;;  %v7322_v20 = vld [vmem:[%s13208_s28 + $0x188] sm:$0xff]  ;;  %7804 = vmatprep.subr.bf16.mxu0 %v11764_v12  ;;  %v11766_v56 = vcombine.high %v7307_v46, %v7315_v17 }
 0x775   : > { %v7195_v42 = vadd.f32 %v13020_v43, %v7189_v14  ;;  %v7204_v18 = vsel %vm764_vm1, %v7194_v24, 0.0  ;;  %v11733_v54 = vcombine.low %v15138_v35, %v15141_v15  ;;  %v11778_v14 = vcombine.high %v7321_v41, %v7329_v34  ;;  %7752 = vmatpush1.bf16.msra.mxu1 %v11761_v11  ;;  %v7316_v60 = vld [vmem:[%s13208_s28 + $0x158] sm:$0xff]  ;;  %v7285_v11 = vld [vmem:[%s13208_s28 + $0x60] sm:$0xff] }
 0x776   : > { %v7193_v22 = vadd.f32 %v13019_v47, %v7181_v10  ;;  %v7198_v6 = vsel %vm764_vm1, %v7192_v30, 0.0  ;;  %v11735_v10 = vcombine.low %v15147_v61, %v15150_v52  ;;  %v11736_v43 = vcombine.high %v15147_v61, %v15150_v52  ;;  %v7332_v12 = vld [vmem:[%s13208_s28 + $0x1d8] sm:$0xff] }
 0x777   : > { %7199 = vadd.xlane.f32.xlu0 %v7198_v6  ;;  %v7207_v21 = vsel %vm764_vm1, %v7195_v42, 0.0  ;;  %7753 = vmatprep.subr.bf16.mxu1 %v11778_v14  ;;  %v11768_v23 = vcombine.high %v7308_v0, %v7316_v60  ;;  %v11767_v61 = vcombine.low %v7308_v0, %v7316_v60  ;;  %v7286_v14 = vld [vmem:[%s13208_s28 + $0x68] sm:$0xff]  ;;  %v7303_v0 = vld [vmem:[%s13208_s28 + $0xf0] sm:$0xff]  ;;  %v7296_v60 = vld [vmem:[%s13208_s28 + $0xb8] sm:$0xff] }
 0x778   : > { %v7201_v50 = vsel %vm764_vm1, %v7193_v22, 0.0 }
 0x779   : > { %7202 = vadd.xlane.f32.xlu1 %v7201_v50  ;;  %v11734_v50 = vcombine.high %v15138_v35, %v15141_v15  ;;  %v7331_v35 = vld [vmem:[%s13208_s28 + $0x1d0] sm:$0xff]  ;;  %v7324_v15 = vld [vmem:[%s13208_s28 + $0x198] sm:$0xff] }
 0x77b   : > { %7205 = vadd.xlane.f32.xlu0 %v7204_v18 }
 0x77f   : > { %7208 = vadd.xlane.f32.xlu0 %v7207_v21 }
 0x804   : > { %v7200_v38 = vpop.xlane.xlu0 %7199 }
 0x805   : > { %v7211_v19 = vmul.f32 0.015625, %v7200_v38 }
 0x806   : > { %v7203_v26 = vpop.xlane.xlu1 %7202 }
 0x807   : > { %v15104_v48 = vsub.f32 %v7192_v30, %v7211_v19  ;;  %v7212_v58 = vmul.f32 0.015625, %v7203_v26  ;;  %v7330_v30 = vld [vmem:[%s13208_s28 + $0x1c8] sm:$0xff] }
 0x808   : > { %v7206_v28 = vpop.xlane.xlu0 %7205  ;;  %v11780_v47 = vcombine.high %v7322_v20, %v7330_v30  ;;  %v11779_v6 = vcombine.low %v7322_v20, %v7330_v30  ;;  %v11784_v30 = vcombine.high %v7324_v15, %v7332_v12 }
 0x809   : > { %v15106_v13 = vsub.f32 %v7193_v22, %v7212_v58  ;;  %v7213_v57 = vmul.f32 0.015625, %v7206_v28  ;;  %v7219_v62 = vmul.f32 %v15104_v48, %v15104_v48  ;;  %v11777_v22 = vcombine.low %v7321_v41, %v7329_v34  ;;  %v7323_v41 = vld [vmem:[%s13208_s28 + $0x190] sm:$0xff] }
 0x80a   : > { %v11782_v20 = vcombine.high %v7323_v41, %v7331_v35 }
 0x80b   : > { %v15110_v2 = vsub.f32 %v7194_v24, %v7213_v57  ;;  %v7223_v45 = vsel %vm764_vm1, %v7219_v62, 0.0  ;;  %v7220_v40 = vmul.f32 %v15106_v13, %v15106_v13  ;;  %v11763_v24 = vcombine.low %v7306_v53, %v7314_v32  ;;  %7754 = vmatpush1.bf16.msra.mxu1 %v11777_v22 }
 0x80c   : > { %7224 = vadd.xlane.f32.xlu1 %v7223_v45  ;;  %v7209_v33 = vpop.xlane.xlu0 %7208  ;;  %7853 = vmatprep.subr.bf16.mxu1 %v11734_v50  ;;  %v11783_v22 = vcombine.low %v7324_v15, %v7332_v12  ;;  %v7320_v15 = vld [vmem:[%s13208_s28 + $0x178] sm:$0xff] }
 0x80d   : > { %v7214_v5 = vmul.f32 0.015625, %v7209_v33  ;;  %v7226_v51 = vsel %vm764_vm1, %v7220_v40, 0.0  ;;  %v7221_v31 = vmul.f32 %v15110_v2, %v15110_v2  ;;  %7805 = vmatpush1.bf16.msra.mxu0 %v11763_v24  ;;  %v7278_v24 = vld [vmem:[%s13208_s28 + $0x28] sm:$0xff] }
 0x80e   : > { %7227 = vadd.xlane.f32.xlu0 %v7226_v51  ;;  %7806 = vmatprep.subr.bf16.mxu0 %v11780_v47  ;;  %v11781_v47 = vcombine.low %v7323_v41, %v7331_v35  ;;  %v11740_v50 = vcombine.high %v7278_v24, %v7286_v14  ;;  %v7319_v41 = vld [vmem:[%s13208_s28 + $0x170] sm:$0xff]  ;;  %v7312_v35 = vld [vmem:[%s13208_s28 + $0x138] sm:$0xff] }
 0x80f   : > { %v15118_v37 = vsub.f32 %v7195_v42, %v7214_v5  ;;  %v7229_v4 = vsel %vm764_vm1, %v7221_v31, 0.0  ;;  %v11727_v5 = vld [vmem:[%s17834_s26] ss:$0 sm:$0xff] }
 0x810   : > { %7230 = vadd.xlane.f32.xlu1 %v7229_v4 }
 0x811   : > { %v7222_v36 = vmul.f32 %v15118_v37, %v15118_v37  ;;  %7807 = vmatpush1.bf16.msra.mxu0 %v11779_v6 }
 0x812   : > { %7906 = vmatprep.subr.bf16.mxu0 %v11736_v43  ;;  %v7293_v43 = vld [vmem:[%s13208_s28 + $0xa0] sm:$0xff] }
 0x813   : > { %v7232_v3 = vsel %vm764_vm1, %v7222_v36, 0.0 }
 0x814   : > { %7233 = vadd.xlane.f32.xlu0 %v7232_v3 }
 0x899   : > { %v7225_v42 = vpop.xlane.xlu1 %7224 }
 0x89a   : > { %v7235_v18 = vmul.f32 0.015625, %v7225_v42  ;;  %v7301_v42 = vld [vmem:[%s13208_s28 + $0xe0] sm:$0xff] }
 0x89b   : > { %v7228_v21 = vpop.xlane.xlu0 %7227 }
 0x89c   : > { %v7239_v38 = vadd.f32 1e-05, %v7235_v18  ;;  %v7236_v19 = vmul.f32 0.015625, %v7228_v21  ;;  %v7294_v18 = vld [vmem:[%s13208_s28 + $0xa8] sm:$0xff] }
 0x89d   : > { %v7231_v26 = vpop.xlane.xlu1 %7230  ;;  %v7302_v21 = vld [vmem:[%s13208_s28 + $0xe8] sm:$0xff] }
 0x89e   : > { %12744 = vrsqrt.f32 %v7239_v38  ;;  %v7240_v58 = vadd.f32 1e-05, %v7236_v19  ;;  %v7237_v28 = vmul.f32 0.015625, %v7231_v26  ;;  %v11739_v19 = vcombine.low %v7278_v24, %v7286_v14  ;;  %v7336_v24 = vld [vmem:[%s13208_s28 + $0x1f8] sm:$0xff] }
 0x89f   : > { %v11754_v26 = vcombine.high %v7293_v43, %v7301_v42 }
 0x8a0   : > { %12746 = vrsqrt.f32 %v7240_v58  ;;  %v7241_v57 = vadd.f32 1e-05, %v7237_v28  ;;  %v11756_v58 = vcombine.high %v7294_v18, %v7302_v21  ;;  %v7309_v28 = vld [vmem:[%s13208_s28 + $0x120] sm:$0xff] }
 0x8a1   : > { %v7234_v62 = vpop.xlane.xlu0 %7233 }
 0x8a2   : > { %12748 = vrsqrt.f32 %v7241_v57  ;;  %v7238_v45 = vmul.f32 0.015625, %v7234_v62  ;;  %v7317_v57 = vld [vmem:[%s13208_s28 + $0x160] sm:$0xff]  ;;  %v7310_v62 = vld [vmem:[%s13208_s28 + $0x128] sm:$0xff] }
 0x8a4   : > { %v7242_v40 = vadd.f32 1e-05, %v7238_v45  ;;  %v7318_v45 = vld [vmem:[%s13208_s28 + $0x168] sm:$0xff] }
 0x8a6   : > { %12750 = vrsqrt.f32 %v7242_v40  ;;  %v11753_v40 = vcombine.low %v7293_v43, %v7301_v42  ;;  %v17840_v42 = vld [vmem:[#allocation7_spill] sm:$0xff] }
 0x8a8   : > { %v12745_v33 = vpop.eup %12744 }
 0x8a9   : > { %v7247_v51 = vmul.f32 %v12745_v33, %v15104_v48  ;;  %v11755_v33 = vcombine.low %v7294_v18, %v7302_v21  ;;  %v17720_v18 = vsub.s32 2, %v17840_v42  ;;  %v15288_v21 = vld [vmem:[%s13214_s15] sm:$0xff] }
 0x8aa   : > { %v12747_v31 = vpop.eup %12746 }
 0x8ab   : > { %v7257_v4 = vmul.f32 %v11727_v5, %v7247_v51  ;;  %v7248_v36 = vmul.f32 %v12747_v31, %v15106_v13  ;;  %v11772_v51 = vcombine.high %v7310_v62, %v7318_v45  ;;  %v7325_v31 = vld [vmem:[%s13208_s28 + $0x1a0] sm:$0xff] }
 0x8ac   : > { %v12749_v3 = vpop.eup %12748 }
 0x8ad   : > { %v7258_v29 = vmul.f32 %v11727_v5, %v7248_v36  ;;  %v15176_v48 = vadd.f32 %v11728_v27, %v7257_v4  ;;  %v7249_v13 = vmul.f32 %v12749_v3, %v15110_v2  ;;  %v11749_v2 = vcombine.low %v7291_v49, %v7299_v1  ;;  %v7333_v4 = vld [vmem:[%s13208_s28 + $0x1e0] sm:$0xff]  ;;  %v7326_v36 = vld [vmem:[%s13208_s28 + $0x1a8] sm:$0xff] }
 0x8ae   : > { %v7334_v3 = vld [vmem:[%s13208_s28 + $0x1e8] sm:$0xff]  ;;  %v11786_v49 = vcombine.high %v7325_v31, %v7333_v4 }
 0x8af   : > { %17836 = vst [vmem:[#allocation10_spill] sm:$0xff] %v15176_v48  ;;  %v15178_v9 = vadd.f32 %v11728_v27, %v7258_v29  ;;  %v7259_v53 = vmul.f32 %v11727_v5, %v7249_v13  ;;  %v11771_v29 = vcombine.low %v7310_v62, %v7318_v45  ;;  %v11788_v1 = vcombine.high %v7326_v36, %v7334_v3  ;;  %v7280_v13 = vld [vmem:[%s13208_s28 + $0x38] sm:$0xff]  ;;  %v17842_v45 = vld [vmem:[#allocation16_spill] sm:$0xff] }
 0x8b0   : > { %v12751_v39 = vpop.eup %12750 }
 0x8b1   : > { %17837 = vst [vmem:[#allocation9_spill] sm:$0xff] %v15178_v9  ;;  %v15183_v7 = vpack.c.bf16 %v15178_v9, %v15176_v48  ;;  %v7250_v59 = vmul.f32 %v12751_v39, %v15118_v37  ;;  %v11751_v37 = vcombine.low %v7292_v55, %v7300_v16  ;;  %v15208_v34 = vadd.f32 %v11728_v27, %v7259_v53  ;;  %v7279_v55 = vld [vmem:[%s13208_s28 + $0x30] sm:$0xff]  ;;  %v7288_v39 = vld [vmem:[%s13208_s28 + $0x78] sm:$0xff] }
 0x8b2   : > { %v7287_v16 = vld [vmem:[%s13208_s28 + $0x70] sm:$0xff]  ;;  %v7304_v53 = vld [vmem:[%s13208_s28 + $0xf8] sm:$0xff] }
 0x8b3   : > { %v7260_v32 = vmul.f32 %v11727_v5, %v7250_v59  ;;  %11793 = vmatmul.mubr.msk.bf16.vlgmr.msra.gmra.mrb[44].mxu1 %vm764_vm1, %v15183_v7  ;;  %11795 = vmatmul.mubr.msk.bf16.vlgmr.msra.gmra.mrb[32].mxu0 %vm764_vm1, %v15183_v7  ;;  %17839 = vst [vmem:[#allocation13_spill] sm:$0xff] %v15208_v34  ;;  %v11770_v5 = vcombine.high %v7309_v28, %v7317_v57 }
 0x8b4   : > { %7854 = vmatpush1.bf16.msra.mxu1 %v11733_v54  ;;  %7907 = vmatpush1.bf16.msra.mxu0 %v11735_v10  ;;  %v11765_v54 = vcombine.low %v7307_v46, %v7315_v17  ;;  %v7277_v10 = vld [vmem:[%s13208_s28 + $0x20] sm:$0xff]  ;;  %v11785_v59 = vcombine.low %v7325_v31, %v7333_v4  ;;  %v11744_v46 = vcombine.high %v7280_v13, %v7288_v39  ;;  %v7295_v17 = vld [vmem:[%s13208_s28 + $0xb0] sm:$0xff] }
 0x8b5   : > { %v15200_v63 = vadd.f32 %v11728_v27, %v7260_v32  ;;  %7855 = vmatprep.subr.bf16.mxu1 %v11750_v8  ;;  %7908 = vmatprep.subr.bf16.mxu0 %v11752_v44  ;;  %v11738_v6 = vcombine.high %v7277_v10, %v7285_v11  ;;  %v11737_v38 = vcombine.low %v7277_v10, %v7285_v11  ;;  %v7335_v10 = vld [vmem:[%s13208_s28 + $0x1f0] sm:$0xff]  ;;  %v7328_v11 = vld [vmem:[%s13208_s28 + $0x1b8] sm:$0xff] }
 0x8b6   : > { %7789 = vmatprep.mubr.bf16.mxu1 %v17813_v25  ;;  %7842 = vmatprep.mubr.bf16.mxu0 %v17813_v25  ;;  %v11769_v27 = vcombine.low %v7309_v28, %v7317_v57  ;;  %v11787_v8 = vcombine.low %v7326_v36, %v7334_v3  ;;  %v11742_v44 = vcombine.high %v7279_v55, %v7287_v16 }
 0x8b7   : > { %17838 = vst [vmem:[#allocation11_spill] sm:$0xff] %v15200_v63  ;;  %v15212_v52 = vpack.c.bf16 %v15200_v63, %v15208_v34  ;;  %v11741_v32 = vcombine.low %v7279_v55, %v7287_v16  ;;  %v11757_v12 = vcombine.low %v7295_v17, %v7303_v0  ;;  %v11791_v43 = vcombine.low %v7328_v11, %v7336_v24 }
 0x8b8   : > { %7856 = vmatpush1.bf16.msra.mxu1 %v11749_v2  ;;  %7909 = vmatpush1.bf16.msra.mxu0 %v11751_v37  ;;  %v11743_v2 = vcombine.low %v7280_v13, %v7288_v39  ;;  %v11758_v37 = vcombine.high %v7295_v17, %v7303_v0 }
 0x8b9   : > { %7857 = vmatprep.subr.bf16.mxu1 %v11766_v56  ;;  %7910 = vmatprep.subr.bf16.mxu0 %v11768_v23  ;;  %v11760_v56 = vcombine.high %v7296_v60, %v7304_v53  ;;  %v7311_v23 = vld [vmem:[%s13208_s28 + $0x130] sm:$0xff] }
 0x8ba   : > { %v11773_v14 = vcombine.low %v7311_v23, %v7319_v41 }
 0x8bb   : > { %11794 = vmatmul.mubr.msk.bf16.gmra.mrb[48].mxu1 %vm764_vm1, %v15212_v52  ;;  %11796 = vmatmul.mubr.msk.bf16.gmra.mrb[36].mxu0 %vm764_vm1, %v15212_v52 }
 0x8bc   : > { %7858 = vmatpush1.bf16.msra.mxu1 %v11765_v54  ;;  %7911 = vmatpush1.bf16.msra.mxu0 %v11767_v61  ;;  %v11759_v54 = vcombine.low %v7296_v60, %v7304_v53  ;;  %v11774_v61 = vcombine.high %v7311_v23, %v7319_v41 }
 0x8bd   : > { %7859 = vmatprep.subr.bf16.mxu1 %v11782_v20  ;;  %7912 = vmatprep.subr.bf16.mxu0 %v11784_v30  ;;  %v11776_v20 = vcombine.high %v7312_v35, %v7320_v15  ;;  %v7327_v30 = vld [vmem:[%s13208_s28 + $0x1b0] sm:$0xff] }
 0x8be   : > { %7885 = vmatprep.mubr.bf16.mxu1 %v17813_v25  ;;  %7938 = vmatprep.mubr.bf16.mxu0 %v17813_v25 }
 0x8c0   : > { %7860 = vmatpush1.bf16.msra.mxu1 %v11781_v47  ;;  %7913 = vmatpush1.bf16.msra.mxu0 %v11783_v22  ;;  %v11775_v47 = vcombine.low %v7312_v35, %v7320_v15  ;;  %v11790_v22 = vcombine.high %v7327_v30, %v7335_v10 }
 0x8c1   : > { %7959 = vmatprep.subr.bf16.mxu1 %v11738_v6  ;;  %8012 = vmatprep.subr.bf16.mxu0 %v11740_v50  ;;  %v11792_v6 = vcombine.high %v7328_v11, %v7336_v24  ;;  %v11789_v50 = vcombine.low %v7327_v30, %v7335_v10 }
 0x8c3   : > { %11797 = vmatmul.mubr.msk.bf16.vlgmr.msra.gmra.mrb[52].mxu1 %vm764_vm1, %v15183_v7  ;;  %11799 = vmatmul.mubr.msk.bf16.vlgmr.msra.gmra.mrb[40].mxu0 %vm764_vm1, %v15183_v7 }
 0x8c4   : > { %7960 = vmatpush1.bf16.msra.mxu1 %v11737_v38  ;;  %8013 = vmatpush1.bf16.msra.mxu0 %v11739_v19  ;;  %v17841_v38 = vld [vmem:[#allocation8_spill] sm:$0xff] }
 0x8c5   : > { %7961 = vmatprep.subr.bf16.mxu1 %v11754_v26  ;;  %8014 = vmatprep.subr.bf16.mxu0 %v11756_v58  ;;  %v15292_v19 = vrot.slane %v15288_v21, %v17841_v38  ;;  %v17719_v58 = vsub.s32 3, %v17840_v42 }
 0x8c6   : > { %7895 = vmatprep.mubr.bf16.mxu1 %v17813_v25  ;;  %7948 = vmatprep.mubr.bf16.mxu0 %v17813_v25 }
 0x8c7   : > { %v15319_v4 = vrot.slane %v15288_v21, %v17719_v58 }
 0x8c8   : > { %7962 = vmatpush1.bf16.msra.mxu1 %v11753_v40  ;;  %8015 = vmatpush1.bf16.msra.mxu0 %v11755_v33  ;;  %v15308_v40 = vrot.slane %v15288_v21, %v17842_v45 }
 0x8c9   : > { %7963 = vmatprep.subr.bf16.mxu1 %v11770_v5  ;;  %8016 = vmatprep.subr.bf16.mxu0 %v11772_v51 }
 0x8cb   : > { %11798 = vmatmul.mubr.msk.bf16.gmra.mrb[56].mxu1 %vm764_vm1, %v15212_v52  ;;  %11800 = vmatmul.mubr.msk.bf16.gmra.mrb[44].mxu0 %vm764_vm1, %v15212_v52 }
 0x8cc   : > { %7964 = vmatpush1.bf16.msra.mxu1 %v11769_v27  ;;  %8017 = vmatpush1.bf16.msra.mxu0 %v11771_v29 }
 0x8cd   : > { %7965 = vmatprep.subr.bf16.mxu1 %v11786_v49  ;;  %8018 = vmatprep.subr.bf16.mxu0 %v11788_v1 }
 0x8ce   : > { %7991 = vmatprep.mubr.bf16.mxu1 %v17813_v25  ;;  %8044 = vmatprep.mubr.bf16.mxu0 %v17813_v25 }
 0x8d0   : > { %7966 = vmatpush1.bf16.msra.mxu1 %v11785_v59  ;;  %8019 = vmatpush1.bf16.msra.mxu0 %v11787_v8 }
 0x8d1   : > { %8065 = vmatprep.subr.bf16.mxu1 %v11742_v44  ;;  %8118 = vmatprep.subr.bf16.mxu0 %v11744_v46 }
 0x8d3   : > { %11801 = vmatmul.mubr.msk.bf16.vlgmr.msra.gmra.mrb[60].mxu1 %vm764_vm1, %v15183_v7  ;;  %11803 = vmatmul.mubr.msk.bf16.vlgmr.msra.gmra.mrb[48].mxu0 %vm764_vm1, %v15183_v7 }
 0x8d4   : > { %8066 = vmatpush1.bf16.msra.mxu1 %v11741_v32  ;;  %8119 = vmatpush1.bf16.msra.mxu0 %v11743_v2 }
 0x8d5   : > { %8067 = vmatprep.subr.bf16.mxu1 %v11758_v37  ;;  %8120 = vmatprep.subr.bf16.mxu0 %v11760_v56 }
 0x8d6   : > { %8001 = vmatprep.mubr.bf16.mxu1 %v17813_v25  ;;  %8054 = vmatprep.mubr.bf16.mxu0 %v17813_v25 }
 0x8d8   : > { %8068 = vmatpush1.bf16.msra.mxu1 %v11757_v12  ;;  %8121 = vmatpush1.bf16.msra.mxu0 %v11759_v54 }
 0x8d9   : > { %8069 = vmatprep.subr.bf16.mxu1 %v11774_v61  ;;  %8122 = vmatprep.subr.bf16.mxu0 %v11776_v20 }
 0x8db   : > { %11802 = vmatmul.mubr.msk.bf16.gmra.mrb[64].mxu1 %vm764_vm1, %v15212_v52  ;;  %11804 = vmatmul.mubr.msk.bf16.gmra.mrb[52].mxu0 %vm764_vm1, %v15212_v52 }
 0x8dc   : > { %8070 = vmatpush1.bf16.msra.mxu1 %v11773_v14  ;;  %8123 = vmatpush1.bf16.msra.mxu0 %v11775_v47 }
 0x8dd   : > { %8071 = vmatprep.subr.bf16.mxu1 %v11790_v22  ;;  %8124 = vmatprep.subr.bf16.mxu0 %v11792_v6 }
 0x8de   : > { %8097 = vmatprep.mubr.bf16.mxu1 %v17813_v25  ;;  %8150 = vmatprep.mubr.bf16.mxu0 %v17813_v25 }
 0x8e0   : > { %8072 = vmatpush1.bf16.msra.mxu1 %v11789_v50  ;;  %8125 = vmatpush1.bf16.msra.mxu0 %v11791_v43 }
 0x8e3   : > { %11805 = vmatmul.mubr.msk.bf16.vlgmr.msra.gmra.mrb[68].mxu1 %vm764_vm1, %v15183_v7  ;;  %11807 = vmatmul.mubr.msk.bf16.vlgmr.msra.gmra.mrb[56].mxu0 %vm764_vm1, %v15183_v7  ;;  %v15297_v7 = vrot.slane %v15288_v21, %v17720_v18  ;;  %v12489_v18 = vld [vmem:[%s13220_s23 + $0xc0] sm:$0xff]  }
 0x8e4   : > { %8107 = vmatprep.mubr.bf16.mxu1 %v17813_v25  ;;  %8160 = vmatprep.mubr.bf16.mxu0 %v17813_v25 }
 0x8e5   : > { %12038 = vmatprep.subr.bf16.mxu0 %v12489_v18 }
 0x8eb   : > { %11806 = vmatmul.mubr.msk.bf16.gmra.mrb[72].mxu1 %vm764_vm1, %v15212_v52  ;;  %11808 = vmatmul.mubr.msk.bf16.gmra.mrb[60].mxu0 %vm764_vm1, %v15212_v52 }
 0x986   : > { %v7781_v25 = vpop.f32.mrb[44].mxu1  ;;  %v7834_v26 = vpop.f32.mrb[32].mxu0 }
 0x987   : > { %v15301_v28 = vadd.f32 %v7781_v25, %v15292_v19  ;;  %v15304_v52 = vadd.f32 %v7834_v26, %v15297_v7  ;;  %v7783_v57 = vpop.f32.mrb[45].mxu1  ;;  %v7836_v62 = vpop.f32.mrb[33].mxu0 }
 0x988   : > { %v7785_v33 = vpop.f32.mrb[46].mxu1  ;;  %v7838_v5 = vpop.f32.mrb[34].mxu0  ;;  %v15324_v27 = vadd.f32 %v7783_v57, %v15308_v40  ;;  %v15327_v1 = vadd.f32 %v7836_v62, %v15319_v4 }
 0x989   : > { %v15311_v51 = vmul.f32 0.70710677, %v15301_v28  ;;  %v15314_v31 = vmul.f32 0.70710677, %v15304_v52  ;;  %v7787_v13 = vpop.f32.mrb[47].mxu1  ;;  %v7840_v39 = vpop.f32.mrb[35].mxu0  ;;  %v15335_v46 = vadd.f32 %v7785_v33, %v15292_v19  ;;  %v15345_v53 = vadd.f32 %v7838_v5, %v15297_v7 }
 0x98a   : > { %v15330_v59 = vmul.f32 0.70710677, %v15324_v27  ;;  %v15342_v60 = vmul.f32 0.70710677, %v15327_v1  ;;  %v15366_v12 = vadd.f32 %v7787_v13, %v15308_v40  ;;  %v15388_v25 = vadd.f32 %v7840_v39, %v15319_v4 }
 0x98b   : > { %v8299_v36 = vand.u32 2147483647, %v15311_v51  ;;  %v8301_v3 = vand.u32 2147483647, %v15314_v31  ;;  %v15352_v37 = vmul.f32 0.70710677, %v15335_v46 }
 0x98c   : > { %v15359_v41 = vand.u32 2147483647, %v15330_v59  ;;  %v15362_v35 = vmul.f32 0.70710677, %v15345_v53  ;;  %v15369_v61 = vand.u32 2147483647, %v15342_v60 }
 0x98d   : > { %v8363_v29 = vmul.f32 0.3275911, %v8299_v36  ;;  %v8365_v49 = vmul.f32 0.3275911, %v8301_v3  ;;  %v8315_v15 = vand.u32 2147483647, %v15352_v37 }
 0x98e   : > { %v7791_v8 = vpop.f32.mrb[48].mxu1  ;;  %v15332_v44 = vpop.f32.mrb[36].mxu0  ;;  %v9195_v54 = vsub.f32 0.0, %v8299_v36  ;;  %v15372_v20 = vand.u32 2147483647, %v15362_v35  ;;  %v9197_v10 = vsub.f32 0.0, %v8301_v3 }
 0x98f   : > { %v8427_v55 = vadd.f32 1.0, %v8363_v29  ;;  %v8429_v16 = vadd.f32 1.0, %v8365_v49  ;;  %v15337_v17 = vpop.f32.mrb[49].mxu1  ;;  %v15339_v0 = vpop.f32.mrb[37].mxu0  ;;  %v8379_v11 = vmul.f32 0.3275911, %v8315_v15 }
 0x990   : > { %v15347_v32 = vpop.f32.mrb[50].mxu1  ;;  %v15349_v2 = vpop.f32.mrb[38].mxu0  ;;  %v8364_v47 = vmul.f32 0.3275911, %v15359_v41  ;;  %v8381_v22 = vmul.f32 0.3275911, %v15372_v20  ;;  %v9259_v62 = vmul.f32 %v9195_v54, %v8299_v36 }
 0x991   : > { %12752 = vrcp.f32 %v8427_v55  ;;  %v15354_v56 = vpop.f32.mrb[51].mxu1  ;;  %v15356_v23 = vpop.f32.mrb[39].mxu0  ;;  %v8443_v50 = vadd.f32 1.0, %v8379_v11  ;;  %v15385_v43 = vmul.f32 0.70710677, %v15366_v12  ;;  %v9261_v55 = vmul.f32 %v9197_v10, %v8301_v3 }
 0x992   : > { %12754 = vrcp.f32 %v8429_v16  ;;  %v8445_v33 = vadd.f32 1.0, %v8381_v22  ;;  %v12488_v16 = vld [vmem:[%s13220_s23 + $0x40] sm:$0xff]   ;;  %v8428_v11 = vadd.f32 1.0, %v8364_v47  ;;  %v8366_v58 = vmul.f32 0.3275911, %v15369_v61 }
 0x993   : > { %12756 = vrcp.f32 %v8443_v50  ;;  %v15408_v54 = vand.u32 2147483647, %v15385_v43  ;;  %v15411_v22 = vmul.f32 0.70710677, %v15388_v25  ;;  %12010 = vmatprep.subr.bf16.mxu1 %v12488_v16  ;;  %v9323_v10 = vmul.f32 1.442695, %v9259_v62 }
 0x994   : > { %12758 = vrcp.f32 %v8445_v33  ;;  %v15414_v50 = vadd.f32 %v7791_v8, %v15292_v19  ;;  %v9327_v34 = vmul.f32 1.442695, %v9261_v55  ;;  %v8430_v45 = vadd.f32 1.0, %v8366_v58 }
 0x995   : > { %12760 = vrcp.f32 %v8428_v11  ;;  %v8380_v62 = vmul.f32 0.3275911, %v15408_v54  ;;  %v15426_v8 = vand.u32 2147483647, %v15411_v22  ;;  %v9213_v18 = vsub.f32 0.0, %v15372_v20 }
 0x996   : > { %v15374_v30 = vpop.f32.mrb[52].mxu1  ;;  %v15376_v24 = vpop.f32.mrb[40].mxu0  ;;  %12762 = vpow2.f32 %v9323_v10  ;;  %v15430_v55 = vmul.f32 0.70710677, %v15414_v50  ;;  %vm9579_vm14 = vcmp.ge.f32.partialorder %v15311_v51, 0.0  ;;  %vm9581_vm15 = vcmp.ge.f32.partialorder %v15314_v31, 0.0 }
 0x997   : > { %v15378_v14 = vpop.f32.mrb[53].mxu1  ;;  %v15382_v6 = vpop.f32.mrb[41].mxu0  ;;  %12764 = vpow2.f32 %v9327_v34  ;;  %vm9595_vm0 = vcmp.ge.f32.partialorder %v15352_v37, 0.0  ;;  %vm9597_vm2 = vcmp.ge.f32.partialorder %v15362_v35, 0.0  ;;  %vm9580_vm3 = vcmp.ge.f32.partialorder %v15330_v59, 0.0 }
 0x998   : > { %17843 = vst [vmem:[#allocation12_spill] sm:$0xff] %v15378_v14  ;;  %17844 = vst [vmem:[#allocation14_spill] sm:$0xff] %v15382_v6  ;;  %v15390_v26 = vpop.f32.mrb[54].mxu1  ;;  %v15392_v57 = vpop.f32.mrb[42].mxu0  ;;  %12766 = vrcp.f32 %v8430_v45  ;;  %v15442_v34 = vand.u32 2147483647, %v15430_v55 }
 0x999   : > { %17845 = vst [vmem:[#allocation15_spill] sm:$0xff] %v15390_v26  ;;  %17846 = vst [vmem:[#allocation17_spill] sm:$0xff] %v15392_v57  ;;  %v15394_v5 = vpop.f32.mrb[55].mxu1  ;;  %v15396_v29 = vpop.f32.mrb[43].mxu0  ;;  %vm9582_vm4 = vcmp.ge.f32.partialorder %v15342_v60, 0.0  ;;  %vm9596_vm5 = vcmp.ge.f32.partialorder %v15385_v43, 0.0 }
 0x99a   : > { %17847 = vst [vmem:[#allocation18_spill] sm:$0xff] %v15394_v5  ;;  %17848 = vst [vmem:[#allocation19_spill] sm:$0xff] %v15396_v29  ;;  %v9277_v29 = vmul.f32 %v9213_v18, %v15372_v20  ;;  %vm9598_vm6 = vcmp.ge.f32.partialorder %v15411_v22, 0.0 }
 0x99b   : > { %v15398_v49 = vpop.eup %12752  ;;  %17852 = vst [vmem:[#allocation23_spill] sm:$0xff] %v15430_v55 }
 0x99c   : > { %v15401_v13 = vpop.eup %12754  ;;  %v8619_v39 = vmul.f32 1.0614054, %v15398_v49  ;;  %v9359_v18 = vmul.f32 1.442695, %v9277_v29 }
 0x99d   : > { %v8621_v36 = vmul.f32 1.0614054, %v15401_v13  ;;  %v15433_v58 = vpop.eup %12756 }
 0x99e   : > { %v8683_v3 = vadd.f32 -1.4531521, %v8619_v39  ;;  %v15416_v63 = vpop.f32.mrb[56].mxu1  ;;  %v15418_v47 = vpop.f32.mrb[44].mxu0  ;;  %v9211_v39 = vsub.f32 0.0, %v8315_v15 }
 0x99f   : > { %17849 = vst [vmem:[#allocation20_spill] sm:$0xff] %v15416_v63  ;;  %17850 = vst [vmem:[#allocation21_spill] sm:$0xff] %v15418_v47  ;;  %v8685_v33 = vadd.f32 -1.4531521, %v8621_v36  ;;  %v15420_v9 = vpop.f32.mrb[57].mxu1 }
 0x9a0   : > { %17851 = vst [vmem:[#allocation22_spill] sm:$0xff] %v15420_v9  ;;  %v8747_v48 = vmul.f32 %v15398_v49, %v8683_v3  ;;  %v8444_v9 = vadd.f32 1.0, %v8380_v62  ;;  %v8382_v47 = vmul.f32 0.3275911, %v15426_v8  ;;  %v8635_v63 = vmul.f32 1.0614054, %v15433_v58 }
 0x9a1   : > { %v8749_v16 = vmul.f32 %v15401_v13, %v8685_v33  ;;  %v9275_v33 = vmul.f32 %v9211_v39, %v8315_v15 }
 0x9a2   : > { %v8811_v38 = vadd.f32 1.4214138, %v8747_v48  ;;  %v15437_v48 = vpop.eup %12758  ;;  %v8699_v39 = vadd.f32 -1.4531521, %v8635_v63  ;;  %12768 = vrcp.f32 %v8444_v9 }
 0x9a3   : > { %v8813_v36 = vadd.f32 1.4214138, %v8749_v16  ;;  %v8637_v45 = vmul.f32 1.0614054, %v15437_v48  ;;  %v15445_v16 = vpop.f32.mrb[45].mxu0 }
 0x9a4   : > { %v8875_v11 = vmul.f32 %v15398_v49, %v8811_v38  ;;  %17853 = vst [vmem:[#allocation24_spill] sm:$0xff] %v15445_v16  ;;  %v8763_v20 = vmul.f32 %v15433_v58, %v8699_v39  ;;  %v8446_v16 = vadd.f32 1.0, %v8382_v47 }
 0x9a5   : > { %v8877_v3 = vmul.f32 %v15401_v13, %v8813_v36  ;;  %v9355_v36 = vmul.f32 1.442695, %v9275_v33  ;;  %v8701_v5 = vadd.f32 -1.4531521, %v8637_v45 }
 0x9a6   : > { %v8939_v10 = vadd.f32 -0.28449672, %v8875_v11  ;;  %v15449_v11 = vpop.eup %12760  ;;  %v8827_v33 = vadd.f32 1.4214138, %v8763_v20 }
 0x9a7   : > { %v8941_v38 = vadd.f32 -0.28449672, %v8877_v3  ;;  %v8395_v3 = vmul.f32 0.3275911, %v15442_v34  ;;  %v8765_v6 = vmul.f32 %v15437_v48, %v8701_v5  ;;  %v12763_v14 = vpop.eup %12762  ;;  %12770 = vpow2.f32 %v9355_v36  ;;  %v15465_v36 = vpop.f32.mrb[58].mxu1 }
 0x9a8   : > { %v9003_v15 = vmul.f32 %v15398_v49, %v8939_v10  ;;  %v12765_v10 = vpop.eup %12764  ;;  %v8891_v39 = vmul.f32 %v15433_v58, %v8827_v33  ;;  %12772 = vpow2.f32 %v9359_v18  ;;  %17854 = vst [vmem:[#allocation25_spill] sm:$0xff] %v15465_v36  ;;  %v15508_v35 = vpop.f32.mrb[59].mxu1 }
 0x9a9   : > { %v9005_v62 = vmul.f32 %v15401_v13, %v8941_v38  ;;  %v8620_v38 = vmul.f32 1.0614054, %v15449_v11  ;;  %v8829_v45 = vadd.f32 1.4214138, %v8765_v6  ;;  %v15457_v29 = vpop.eup %12766  ;;  %v8459_v5 = vadd.f32 1.0, %v8395_v3  ;;  %17856 = vst [vmem:[#allocation27_spill] sm:$0xff] %v15508_v35 }
 0x9aa   : > { %v9067_v57 = vadd.f32 0.2548296, %v9003_v15  ;;  %12774 = vrcp.f32 %v8446_v16  ;;  %v8955_v20 = vadd.f32 -0.28449672, %v8891_v39  ;;  %v8622_v16 = vmul.f32 1.0614054, %v15457_v29 }
 0x9ab   : > { %v9069_v26 = vadd.f32 0.2548296, %v9005_v62  ;;  %v8893_v62 = vmul.f32 %v15437_v48, %v8829_v45  ;;  %v8684_v55 = vadd.f32 -1.4531521, %v8620_v38  ;;  %12776 = vrcp.f32 %v8459_v5 }
 0x9ac   : > { %v9131_v63 = vmul.f32 %v15398_v49, %v9067_v57  ;;  %v12490_v57 = vld [vmem:[%s13220_s23] sm:$0xff]   ;;  %v15467_v18 = vpop.eup %12768  ;;  %v8171_v45 = vmul.f32 0.5, %v15301_v28  ;;  %v15482_v28 = vadd.f32 %v15332_v44, %v15297_v7 }
 0x9ad   : > { %v9133_v9 = vmul.f32 %v15401_v13, %v9069_v26  ;;  %v12491_v49 = vld [vmem:[%s13220_s23 + $0x80] sm:$0xff]   ;;  %v9196_v26 = vsub.f32 0.0, %v15359_v41  ;;  %v8957_v13 = vadd.f32 -0.28449672, %v8893_v62  ;;  %12011 = vmatpush3.bf16.msra.mxu1 %v12490_v57  ;;  %v8636_v5 = vmul.f32 1.0614054, %v15467_v18 }
 0x9ae   : > { %v9451_v15 = vmul.f32 %v12763_v14, %v9131_v63  ;;  %12039 = vmatpush3.bf16.msra.mxu0 %v12491_v49  ;;  %v9019_v14 = vmul.f32 %v15433_v58, %v8955_v20  ;;  %v8686_v49 = vadd.f32 -1.4531521, %v8622_v16  ;;  %v15487_v16 = vpop.f32.mrb[46].mxu0 }
 0x9af   : > { %v9453_v47 = vmul.f32 %v12765_v10, %v9133_v9  ;;  %v9021_v63 = vmul.f32 %v15437_v48, %v8957_v13  ;;  %v8748_v10 = vmul.f32 %v15449_v11, %v8684_v55  ;;  %v9260_v9 = vmul.f32 %v9196_v26, %v15359_v41  ;;  %17855 = vst [vmem:[#allocation26_spill] sm:$0xff] %v15487_v16  ;;  %v15520_v35 = vpop.f32.mrb[47].mxu0 }
 0x9b0   : > { %v9515_v6 = vsub.f32 1.0, %v9451_v15  ;;  %v9083_v33 = vadd.f32 0.2548296, %v9019_v14  ;;  %17859 = vst [vmem:[#allocation30_spill] sm:$0xff] %v15520_v35 }
 0x9b1   : > { %v9517_v3 = vsub.f32 1.0, %v9453_v47  ;;  %v9085_v38 = vadd.f32 0.2548296, %v9021_v63  ;;  %v12771_v62 = vpop.eup %12770  ;;  %v8173_v47 = vmul.f32 0.5, %v15304_v52  ;;  %v9325_v26 = vmul.f32 1.442695, %v9260_v9 }
 0x9b2   : > { %v9643_v15 = vsub.f32 0.0, %v9515_v6  ;;  %v9147_v39 = vmul.f32 %v15433_v58, %v9083_v33  ;;  %v12773_v13 = vpop.eup %12772  ;;  %v8812_v58 = vadd.f32 1.4214138, %v8748_v10  ;;  %v9198_v52 = vsub.f32 0.0, %v15369_v61 }
 0x9b3   : > { %v9645_v57 = vsub.f32 0.0, %v9517_v3  ;;  %v9149_v20 = vmul.f32 %v15437_v48, %v9085_v38  ;;  %v8187_v63 = vmul.f32 0.5, %v15335_v46  ;;  %v8700_v33 = vadd.f32 -1.4531521, %v8636_v5 }
 0x9b4   : > { %v9467_v41 = vmul.f32 %v12771_v62, %v9147_v39  ;;  %v15484_v55 = vpop.eup %12774  ;;  %v9707_v48 = vsel %vm9579_vm14, %v9515_v6, %v9643_v15  ;;  %v8750_v38 = vmul.f32 %v15457_v29, %v8686_v49  ;;  %v15497_v62 = vmul.f32 0.70710677, %v15482_v28 }
 0x9b5   : > { %v9469_v14 = vmul.f32 %v12773_v13, %v9149_v20  ;;  %v9709_v31 = vsel %vm9581_vm15, %v9517_v3, %v9645_v57  ;;  %v15492_v39 = vpop.eup %12776  ;;  %v8638_v9 = vmul.f32 1.0614054, %v15484_v55  ;;  %v9771_v6 = vadd.f32 1.0, %v9707_v48 }
 0x9b6   : > { %v9531_v51 = vsub.f32 1.0, %v9467_v41  ;;  %v8876_v46 = vmul.f32 %v15449_v11, %v8812_v58  ;;  %v15502_v3 = vadd.f32 %v15337_v17, %v15308_v40  ;;  %v9773_v37 = vadd.f32 1.0, %v9709_v31 }
 0x9b7   : > { %v9533_v44 = vsub.f32 1.0, %v9469_v14  ;;  %v8764_v57 = vmul.f32 %v15467_v18, %v8700_v33  ;;  %v15506_v49 = vand.u32 2147483647, %v15497_v62  ;;  %v8814_v20 = vadd.f32 1.4214138, %v8750_v38 }
 0x9b8   : > { %v9659_v10 = vsub.f32 0.0, %v9531_v51  ;;  %v8651_v14 = vmul.f32 1.0614054, %v15492_v39  ;;  %v8189_v58 = vmul.f32 0.5, %v15345_v53  ;;  %v8702_v16 = vadd.f32 -1.4531521, %v8638_v9 }
 0x9b9   : > { %v9661_v15 = vsub.f32 0.0, %v9533_v44  ;;  %v8397_v17 = vmul.f32 0.3275911, %v15506_v49  ;;  %v15513_v31 = vmul.f32 %v9771_v6, %v8171_v45  ;;  %v15522_v38 = vmul.f32 %v9773_v37, %v8173_v47  ;;  %v15593_v45 = vpop.f32.mrb[48].mxu0 }
 0x9ba   : > { %v9723_v5 = vsel %vm9595_vm0, %v9531_v51, %v9659_v10  ;;  %v8940_v51 = vadd.f32 -0.28449672, %v8876_v46  ;;  %v15518_v10 = vmul.f32 0.70710677, %v15502_v3  ;;  %v8828_v53 = vadd.f32 1.4214138, %v8764_v57 }
 0x9bb   : > { %v9787_v13 = vadd.f32 1.0, %v9723_v5  ;;  %v9725_v41 = vsel %vm9597_vm2, %v9533_v44, %v9661_v15  ;;  %17857 = vst [vmem:[#allocation28_spill] sm:$0xff] %v15513_v31  ;;  %17860 = vst [vmem:[#allocation31_spill] sm:$0xff] %v15522_v38  ;;  %v8461_v9 = vadd.f32 1.0, %v8397_v17  ;;  %v9212_v6 = vsub.f32 0.0, %v15408_v54  ;;  %v12494_v17 = vld [vmem:[%s13220_s23 + $0x8] sm:$0xff]  }
 0x9bc   : > { %v9789_v48 = vadd.f32 1.0, %v9725_v41  ;;  %v15530_v46 = vand.u32 2147483647, %v15518_v10  ;;  %v9262_v15 = vmul.f32 %v9198_v52, %v15369_v61  ;;  %v8766_v37 = vmul.f32 %v15484_v55, %v8702_v16  ;;  %17865 = vst [vmem:[#allocation36_spill] sm:$0xff] %v15593_v45  ;;  %v12497_v31 = vld [vmem:[%s13220_s23 + $0xd0] sm:$0xff]  }
 0x9bd   : > { %v15515_v33 = vmul.f32 %v9787_v13, %v8187_v63  ;;  %v8715_v63 = vadd.f32 -1.4531521, %v8651_v14  ;;  %v9004_v5 = vmul.f32 %v15449_v11, %v8940_v51  ;;  %v8878_v57 = vmul.f32 %v15457_v29, %v8814_v20  ;;  %v12492_v14 = vld [vmem:[%s13220_s23 + $0x48] sm:$0xff]   ;;  %v12499_v45 = vld [vmem:[%s13220_s23 + $0x90] sm:$0xff]  }
 0x9be   : > { %v15524_v44 = vmul.f32 %v9789_v48, %v8189_v58  ;;  %12778 = vrcp.f32 %v8461_v9  ;;  %v8396_v13 = vmul.f32 0.3275911, %v15530_v46  ;;  %v8892_v41 = vmul.f32 %v15467_v18, %v8828_v53  ;;  %v12493_v58 = vld [vmem:[%s13220_s23 + $0xc8] sm:$0xff]   ;;  %12012 = vmatprep.subr.bf16.mxu1 %v12492_v14 }
 0x9bf   : > { %17858 = vst [vmem:[#allocation29_spill] sm:$0xff] %v15515_v33  ;;  %12780 = vpow2.f32 %v9325_v26  ;;  %v9276_v61 = vmul.f32 %v9212_v6, %v15408_v54  ;;  %v8779_v52 = vmul.f32 %v15492_v39, %v8715_v63  ;;  %v15546_v16 = vadd.f32 %v15339_v0, %v15319_v4  ;;  %v12495_v51 = vld [vmem:[%s13220_s23 + $0x88] sm:$0xff]   ;;  %12040 = vmatprep.subr.bf16.mxu0 %v12493_v58 }
 0x9c0   : > { %17861 = vst [vmem:[#allocation32_spill] sm:$0xff] %v15524_v44  ;;  %v8460_v48 = vadd.f32 1.0, %v8396_v13  ;;  %v9329_v20 = vmul.f32 1.442695, %v9262_v15  ;;  %v8830_v9 = vadd.f32 1.4214138, %v8766_v37  ;;  %v15552_v26 = vadd.f32 %v15347_v32, %v15292_v19  ;;  %12013 = vmatpush3.bf16.msra.mxu1 %v12494_v17  ;;  %12041 = vmatpush3.bf16.msra.mxu0 %v12495_v51 }
 0x9c1   : > { %v15556_v53 = vadd.f32 %v15349_v2, %v15297_v7  ;;  %v9068_v54 = vadd.f32 0.2548296, %v9004_v5  ;;  %v8942_v6 = vadd.f32 -0.28449672, %v8878_v57  ;;  %v9214_v63 = vsub.f32 0.0, %v15426_v8  ;;  %12042 = vmatprep.subr.bf16.mxu0 %v12497_v31 }
 0x9c2   : > { %12782 = vrcp.f32 %v8460_v48  ;;  %v8956_v0 = vadd.f32 -0.28449672, %v8892_v41  ;;  %v15560_v15 = vmul.f32 0.70710677, %v15546_v16  ;;  %v15563_v19 = vmul.f32 0.70710677, %v15552_v26 }
 0x9c3   : > { %v9357_v32 = vmul.f32 1.442695, %v9276_v61  ;;  %v8843_v37 = vadd.f32 1.4214138, %v8779_v52  ;;  %v15566_v7 = vmul.f32 0.70710677, %v15556_v53  ;;  %v8894_v2 = vmul.f32 %v15484_v55, %v8830_v9 }
 0x9c4   : > { %17862 = vst [vmem:[#allocation33_spill] sm:$0xff] %v15563_v19  ;;  %v9227_v5 = vsub.f32 0.0, %v15442_v34  ;;  %v15571_v57 = vand.u32 2147483647, %v15560_v15  ;;  %v15574_v13 = vand.u32 2147483647, %v15563_v19  ;;  %v9006_v41 = vmul.f32 %v15457_v29, %v8942_v6  ;;  %12043 = vmatpush3.bf16.msra.mxu0 %v12499_v45 }
 0x9c5   : > { %17863 = vst [vmem:[#allocation34_spill] sm:$0xff] %v15566_v7  ;;  %v9278_v14 = vmul.f32 %v9214_v63, %v15426_v8  ;;  %v9132_v61 = vmul.f32 %v15449_v11, %v9068_v54  ;;  %v9020_v52 = vmul.f32 %v15467_v18, %v8956_v0  ;;  %12784 = vpow2.f32 %v9329_v20  ;;  %v15590_v63 = vpop.f32.mrb[60].mxu1  ;;  %v12496_v8 = vld [vmem:[%s13220_s23 + $0x50] sm:$0xff]  }
 0x9c6   : > { %v8398_v48 = vmul.f32 0.3275911, %v15571_v57  ;;  %v8411_v17 = vmul.f32 0.3275911, %v15574_v13  ;;  %v8907_v9 = vmul.f32 %v15492_v39, %v8843_v37  ;;  %v15587_v6 = vand.u32 2147483647, %v15566_v7  ;;  %12014 = vmatprep.subr.bf16.mxu1 %v12496_v8 }
 0x9c7   : > { %17864 = vst [vmem:[#allocation35_spill] sm:$0xff] %v15590_v63  ;;  %12786 = vpow2.f32 %v9357_v32  ;;  %v8958_v54 = vadd.f32 -0.28449672, %v8894_v2  ;;  %v9291_v0 = vmul.f32 %v9227_v5, %v15442_v34  ;;  %v9361_v58 = vmul.f32 1.442695, %v9278_v14 }
 0x9c8   : > { %v15583_v51 = vpop.eup %12778  ;;  %v8462_v47 = vadd.f32 1.0, %v8398_v48  ;;  %v8475_v20 = vadd.f32 1.0, %v8411_v17  ;;  %v17866_v38 = vsub.s32 4, %v17840_v42  ;;  %v17731_v44 = vsub.s32 5, %v17840_v42 }
 0x9c9   : > { %v12781_v11 = vpop.eup %12780  ;;  %v9070_v63 = vadd.f32 0.2548296, %v9006_v41  ;;  %v9084_v32 = vadd.f32 0.2548296, %v9020_v52  ;;  %v8653_v2 = vmul.f32 1.0614054, %v15583_v51  ;;  %v15609_v48 = vadd.f32 %v15354_v56, %v15308_v40 }
 0x9ca   : > { %v15598_v37 = vrot.slane %v15288_v21, %v17866_v38  ;;  %v9452_v33 = vmul.f32 %v12781_v11, %v9132_v61  ;;  %v8971_v5 = vadd.f32 -0.28449672, %v8907_v9  ;;  %12788 = vrcp.f32 %v8462_v47  ;;  %v15613_v61 = vpop.f32.mrb[61].mxu1 }
 0x9cb   : > { %v8413_v14 = vmul.f32 0.3275911, %v15587_v6  ;;  %v9022_v38 = vmul.f32 %v15484_v55, %v8958_v54  ;;  %v9387_v17 = vmul.f32 1.442695, %v9291_v0  ;;  %12790 = vrcp.f32 %v8475_v20  ;;  %17867 = vst [vmem:[#allocation37_spill] sm:$0xff] %v15613_v61 }
 0x9cc   : > { %v15604_v34 = vpop.eup %12782  ;;  %12792 = vpow2.f32 %v9361_v58  ;;  %v15617_v47 = vadd.f32 %v15374_v30, %v15598_v37  ;;  %v9516_v52 = vsub.f32 1.0, %v9452_v33  ;;  %v9134_v9 = vmul.f32 %v15457_v29, %v9070_v63 }
 0x9cd   : > { %v8652_v41 = vmul.f32 1.0614054, %v15604_v34  ;;  %v8717_v40 = vadd.f32 -1.4531521, %v8653_v2  ;;  %v17868_v56 = vsub.s32 6, %v17840_v42  ;;  %v9148_v8 = vmul.f32 %v15467_v18, %v9084_v32 }
 0x9ce   : > { %v9035_v11 = vmul.f32 %v15492_v39, %v8971_v5  ;;  %v8477_v54 = vadd.f32 1.0, %v8413_v14  ;;  %v15628_v58 = vmul.f32 0.70710677, %v15609_v48  ;;  %v9086_v0 = vadd.f32 0.2548296, %v9022_v38 }
 0x9cf   : > { %v15623_v31 = vrot.slane %v15288_v21, %v17868_v56  ;;  %12794 = vpow2.f32 %v9387_v17  ;;  %v8716_v30 = vadd.f32 -1.4531521, %v8652_v41  ;;  %v15633_v29 = vrot.slane %v15288_v21, %v17731_v44  ;;  %v12785_v33 = vpop.eup %12784  ;;  %v15661_v44 = vpop.f32.mrb[49].mxu0 }
 0x9d0   : > { %17869 = vst [vmem:[#allocation38_spill] sm:$0xff] %v15628_v58  ;;  %v15636_v63 = vmul.f32 0.5, %v15324_v27  ;;  %v15640_v18 = vadd.f32 %v15356_v23, %v15319_v4  ;;  %v15643_v20 = vmul.f32 0.70710677, %v15617_v47  ;;  %v9644_v5 = vsub.f32 0.0, %v9516_v52  ;;  %17871 = vst [vmem:[#allocation40_spill] sm:$0xff] %v15661_v44 }
 0x9d1   : > { %v12787_v2 = vpop.eup %12786  ;;  %v15647_v14 = vmul.f32 0.5, %v15327_v1  ;;  %v9454_v38 = vmul.f32 %v12785_v33, %v9134_v9  ;;  %v8781_v17 = vmul.f32 %v15583_v51, %v8717_v40  ;;  %v9099_v27 = vadd.f32 0.2548296, %v9035_v11 }
 0x9d2   : > { %17870 = vst [vmem:[#allocation39_spill] sm:$0xff] %v15643_v20  ;;  %v15650_v41 = vmul.f32 %v12787_v2, %v9148_v8  ;;  %12796 = vrcp.f32 %v8477_v54  ;;  %v15653_v4 = vand.u32 2147483647, %v15628_v58  ;;  %v15657_v23 = vmul.f32 0.5, %v15366_v12  ;;  %v15708_v58 = vpop.f32.mrb[62].mxu1 }
 0x9d3   : > { %v9150_v56 = vmul.f32 %v15484_v55, %v9086_v0  ;;  %v8780_v1 = vmul.f32 %v15604_v34, %v8716_v30  ;;  %v15667_v40 = vmul.f32 0.5, %v15388_v25  ;;  %v15670_v8 = vmul.f32 0.5, %v15414_v50  ;;  %17874 = vst [vmem:[#allocation42_spill] sm:$0xff] %v15708_v58 }
 0x9d4   : > { %v15663_v9 = vpop.eup %12788  ;;  %v15673_v59 = vmul.f32 0.70710677, %v15640_v18  ;;  %v15676_v12 = vand.u32 2147483647, %v15643_v20  ;;  %v9708_v11 = vsel %vm9580_vm3, %v9516_v52, %v9644_v5  ;;  %v9518_v54 = vsub.f32 1.0, %v9454_v38 }
 0x9d5   : > { %v15678_v55 = vpop.eup %12790  ;;  %v8845_v0 = vadd.f32 1.4214138, %v8781_v17  ;;  %v9229_v25 = vsub.f32 0.0, %v15506_v49  ;;  %v9532_v50 = vsub.f32 1.0, %v15650_v41  ;;  %v9163_v33 = vmul.f32 %v15492_v39, %v9099_v27  ;;  %v12498_v17 = vld [vmem:[%s13220_s23 + $0x10] sm:$0xff]  }
 0x9d6   : > { %17872 = vst [vmem:[#allocation41_spill] sm:$0xff] %v15673_v59  ;;  %v12793_v30 = vpop.eup %12792  ;;  %v9228_v2 = vsub.f32 0.0, %v15530_v46  ;;  %v8412_v32 = vmul.f32 0.3275911, %v15653_v4  ;;  %v8844_v44 = vadd.f32 1.4214138, %v8780_v1  ;;  %12015 = vmatpush3.bf16.msra.mxu1 %v12498_v17 }
 0x9d7   : > { %v15686_v61 = vmul.f32 %v12793_v30, %v9150_v56  ;;  %v8654_v52 = vmul.f32 1.0614054, %v15663_v9  ;;  %v17873_v5 = vsub.s32 7, %v17840_v42  ;;  %v8667_v41 = vmul.f32 1.0614054, %v15678_v55  ;;  %v17875_v17 = vld [vmem:[#allocation23_spill] sm:$0xff] }
 0x9d8   : > { %v15698_v39 = vand.u32 2147483647, %v15673_v59  ;;  %v8367_v27 = vmul.f32 0.3275911, %v15676_v12  ;;  %v15703_v56 = vadd.f32 %v15376_v24, %v15623_v31  ;;  %v9772_v30 = vadd.f32 1.0, %v9708_v11 }
 0x9d9   : > { %v15692_v38 = vrot.slane %v15288_v21, %v17873_v5  ;;  %v12795_v1 = vpop.eup %12794  ;;  %v9646_v35 = vsub.f32 0.0, %v9518_v54  ;;  %v8909_v42 = vmul.f32 %v15583_v51, %v8845_v0  ;;  %v9293_v21 = vmul.f32 %v9229_v25, %v15506_v49 }
 0x9da   : > { %v9660_v5 = vsub.f32 0.0, %v9532_v50  ;;  %v9483_v36 = vmul.f32 %v12795_v1, %v9163_v33  ;;  %v9292_v59 = vmul.f32 %v9228_v2, %v15530_v46  ;;  %v8476_v20 = vadd.f32 1.0, %v8412_v32 }
 0x9db   : > { %v15711_v7 = vmul.f32 0.5, %v15482_v28  ;;  %v8908_v24 = vmul.f32 %v15604_v34, %v8844_v44  ;;  %v8718_v11 = vadd.f32 -1.4531521, %v8654_v52  ;;  %v15715_v19 = vmul.f32 0.70710677, %v15703_v56 }
 0x9dc   : > { %v15717_v0 = vpop.eup %12796  ;;  %v9534_v49 = vsub.f32 1.0, %v15686_v61  ;;  %v8731_v45 = vadd.f32 -1.4531521, %v8667_v41  ;;  %v8414_v46 = vmul.f32 0.3275911, %v15698_v39  ;;  %v8431_v32 = vadd.f32 1.0, %v8367_v27 }
 0x9dd   : > { %v9710_v28 = vsel %vm9582_vm4, %v9518_v54, %v9646_v35  ;;  %v8973_v25 = vadd.f32 -0.28449672, %v8909_v42  ;;  %v9391_v33 = vmul.f32 1.442695, %v9293_v21  ;;  %v15725_v44 = vand.u32 2147483647, %v15715_v19 }
 0x9de   : > { %v9724_v2 = vsel %vm9596_vm5, %v9532_v50, %v9660_v5  ;;  %v9547_v52 = vsub.f32 1.0, %v9483_v36  ;;  %vm9611_vm7 = vcmp.ge.f32.partialorder %v17875_v17, 0.0  ;;  %v9389_v61 = vmul.f32 1.442695, %v9292_v59 }
 0x9df   : > { %12798 = vrcp.f32 %v8476_v20  ;;  %v8972_v41 = vadd.f32 -0.28449672, %v8908_v24  ;;  %v8782_v1 = vmul.f32 %v15663_v9, %v8718_v11  ;;  %v8669_v27 = vmul.f32 1.0614054, %v15717_v0 }
 0x9e0   : > { %v8369_v60 = vmul.f32 0.3275911, %v15725_v44  ;;  %v9774_v42 = vadd.f32 1.0, %v9710_v28  ;;  %v8795_v35 = vmul.f32 %v15678_v55, %v8731_v45  ;;  %v8478_v54 = vadd.f32 1.0, %v8414_v46 }
 0x9e1   : > { %12800 = vrcp.f32 %v8431_v32  ;;  %v9662_v21 = vsub.f32 0.0, %v9534_v49  ;;  %v9037_v43 = vmul.f32 %v15583_v51, %v8973_v25  ;;  %v9788_v50 = vadd.f32 1.0, %v9724_v2  ;;  %v15744_v25 = vpop.f32.mrb[50].mxu0 }
 0x9e2   : > { %12802 = vpow2.f32 %v9391_v33  ;;  %v8433_v36 = vadd.f32 1.0, %v8369_v60  ;;  %v9230_v20 = vsub.f32 0.0, %v15571_v57  ;;  %v9243_v59 = vsub.f32 0.0, %v15574_v13  ;;  %17878 = vst [vmem:[#allocation44_spill] sm:$0xff] %v15744_v25 }
 0x9e3   : > { %12804 = vpow2.f32 %v9389_v61  ;;  %v9675_v5 = vsub.f32 0.0, %v9547_v52  ;;  %v9036_v24 = vmul.f32 %v15604_v34, %v8972_v41  ;;  %v8846_v11 = vadd.f32 1.4214138, %v8782_v1 }
 0x9e4   : > { %v8733_v28 = vadd.f32 -1.4531521, %v8669_v27  ;;  %v15739_v45 = vmul.f32 %v9772_v30, %v15636_v63  ;;  %v15742_v46 = vmul.f32 %v9774_v42, %v15647_v14  ;;  %v8859_v32 = vadd.f32 1.4214138, %v8795_v35 }
 0x9e5   : > { %12806 = vrcp.f32 %v8478_v54  ;;  %v9726_v33 = vsel %vm9598_vm6, %v9534_v49, %v9662_v21  ;;  %v9101_v2 = vadd.f32 0.2548296, %v9037_v43  ;;  %v9245_v61 = vsub.f32 0.0, %v15587_v6  ;;  %v15779_v21 = vpop.f32.mrb[63].mxu1 }
 0x9e6   : > { %17876 = vst [vmem:[#allocation23_spill] sm:$0xff] %v15739_v45  ;;  %17877 = vst [vmem:[#allocation43_spill] sm:$0xff] %v15742_v46  ;;  %12808 = vrcp.f32 %v8433_v36  ;;  %v15750_v41 = vmul.f32 %v9788_v50, %v15657_v23  ;;  %v15753_v63 = vmul.f32 0.5, %v15502_v3  ;;  %v9294_v14 = vmul.f32 %v9230_v20, %v15571_v57  ;;  %v17880_v57 = vld [vmem:[#allocation12_spill] sm:$0xff] }
 0x9e7   : > { %v9307_v30 = vmul.f32 %v9243_v59, %v15574_v13  ;;  %v9739_v1 = vsel %vm9611_vm7, %v9547_v52, %v9675_v5  ;;  %v9100_v27 = vadd.f32 0.2548296, %v9036_v24  ;;  %v8910_v22 = vmul.f32 %v15663_v9, %v8846_v11  ;;  %17881 = vst [vmem:[#allocation12_spill] sm:$0xff] %v15779_v21 }
 0x9e8   : > { %17879 = vst [vmem:[#allocation45_spill] sm:$0xff] %v15750_v41  ;;  %v8797_v49 = vmul.f32 %v15717_v0, %v8733_v28  ;;  %v9790_v42 = vadd.f32 1.0, %v9726_v33  ;;  %v15764_v23 = vmul.f32 0.5, %v15546_v16  ;;  %v8923_v3 = vmul.f32 %v15678_v55, %v8859_v32 }
 0x9e9   : > { %v15761_v60 = vpop.eup %12798  ;;  %v15769_v35 = vadd.f32 %v17880_v57, %v15633_v29  ;;  %v9165_v13 = vmul.f32 %v15583_v51, %v9101_v2  ;;  %v15773_v52 = vmul.f32 0.5, %v15552_v26  ;;  %v15776_v17 = vmul.f32 0.5, %v15556_v53 }
 0x9ea   : > { %v9309_v54 = vmul.f32 %v9245_v61, %v15587_v6  ;;  %v9803_v43 = vadd.f32 1.0, %v9739_v1  ;;  %v9393_v36 = vmul.f32 1.442695, %v9294_v14  ;;  %v9244_v50 = vsub.f32 0.0, %v15653_v4 }
 0x9eb   : > { %v15781_v16 = vpop.eup %12800  ;;  %v9246_v20 = vsub.f32 0.0, %v15698_v39  ;;  %v9164_v51 = vmul.f32 %v15604_v34, %v9100_v27  ;;  %v8974_v26 = vadd.f32 -0.28449672, %v8910_v22  ;;  %v9419_v5 = vmul.f32 1.442695, %v9307_v30  ;;  %v15806_v27 = vpop.f32.mrb[51].mxu0 }
 0x9ec   : > { %v12803_v59 = vpop.eup %12802  ;;  %v8861_v24 = vadd.f32 1.4214138, %v8797_v49  ;;  %v15787_v11 = vmul.f32 %v9790_v42, %v15667_v40  ;;  %v8987_v6 = vadd.f32 -0.28449672, %v8923_v3  ;;  %v8668_v28 = vmul.f32 1.0614054, %v15761_v60 }
 0x9ed   : > { %v12805_v53 = vpop.eup %12804  ;;  %v15791_v32 = vmul.f32 0.70710677, %v15769_v35  ;;  %v15793_v33 = vmul.f32 %v12803_v59, %v9165_v13  ;;  %v9423_v2 = vmul.f32 1.442695, %v9309_v54  ;;  %v15796_v61 = vmul.f32 0.5, %v15609_v48  ;;  %17884 = vst [vmem:[#allocation48_spill] sm:$0xff] %v15806_v27 }
 0x9ee   : > { %17882 = vst [vmem:[#allocation46_spill] sm:$0xff] %v15787_v11  ;;  %v8623_v34 = vmul.f32 1.0614054, %v15781_v16  ;;  %v15802_v30 = vmul.f32 %v9803_v43, %v15670_v8  ;;  %12810 = vpow2.f32 %v9393_v36  ;;  %v9308_v40 = vmul.f32 %v9244_v50, %v15653_v4 }
 0x9ef   : > { %v15799_v14 = vpop.eup %12806  ;;  %v9310_v1 = vmul.f32 %v9246_v20, %v15698_v39  ;;  %v9484_v49 = vmul.f32 %v12805_v53, %v9164_v51  ;;  %v9038_v48 = vmul.f32 %v15663_v9, %v8974_v26  ;;  %v9199_v42 = vsub.f32 0.0, %v15676_v12 }
 0x9f0   : > { %17883 = vst [vmem:[#allocation47_spill] sm:$0xff] %v15802_v30  ;;  %v15808_v22 = vpop.eup %12808  ;;  %v15813_v3 = vand.u32 2147483647, %v15791_v32  ;;  %vm9613_vm8 = vcmp.ge.f32.partialorder %v15497_v62, 0.0  ;;  %v9051_v8 = vmul.f32 %v15678_v55, %v8987_v6  ;;  %12812 = vpow2.f32 %v9419_v5  ;;  %v17885_v6 = vld [vmem:[#allocation14_spill] sm:$0xff] }
 0x9f1   : > { %v8925_v4 = vmul.f32 %v15717_v0, %v8861_v24  ;;  %v8732_v39 = vadd.f32 -1.4531521, %v8668_v28  ;;  %v9549_v57 = vsub.f32 1.0, %v15793_v33  ;;  %v15820_v13 = vmul.f32 0.5, %v15640_v18 }
 0x9f2   : > { %v8670_v54 = vmul.f32 1.0614054, %v15799_v14  ;;  %v8687_v43 = vadd.f32 -1.4531521, %v8623_v34  ;;  %vm9612_vm9 = vcmp.ge.f32.partialorder %v15518_v10, 0.0  ;;  %12814 = vpow2.f32 %v9423_v2 }
 0x9f3   : > { %v9421_v36 = vmul.f32 1.442695, %v9308_v40  ;;  %v8625_v50 = vmul.f32 1.0614054, %v15808_v22  ;;  %v8368_v20 = vmul.f32 0.3275911, %v15813_v3  ;;  %v9263_v18 = vmul.f32 %v9199_v42, %v15676_v12 }
 0x9f4   : > { %v9548_v59 = vsub.f32 1.0, %v9484_v49  ;;  %v9102_v51 = vadd.f32 0.2548296, %v9038_v48  ;;  %v9425_v26 = vmul.f32 1.442695, %v9310_v1  ;;  %v8796_v53 = vmul.f32 %v15761_v60, %v8732_v39  ;;  %v17886_v40 = vld [vmem:[#allocation15_spill] sm:$0xff] }
 0x9f5   : > { %v9115_v5 = vadd.f32 0.2548296, %v9051_v8  ;;  %v8989_v24 = vadd.f32 -0.28449672, %v8925_v4  ;;  %v15830_v28 = vadd.f32 %v17885_v6, %v15692_v38  ;;  %v9677_v33 = vsub.f32 0.0, %v9549_v57  ;;  %v12500_v1 = vld [vmem:[%s13220_s23 + $0x58] sm:$0xff]  }
 0x9f6   : > { %v8734_v2 = vadd.f32 -1.4531521, %v8670_v54  ;;  %v8751_v34 = vmul.f32 %v15781_v16, %v8687_v43  ;;  %v15835_v49 = vadd.f32 %v17886_v40, %v15598_v37  ;;  %v12501_v48 = vld [vmem:[%s13220_s23 + $0xd8] sm:$0xff]   ;;  %12816 = vpow2.f32 %v9421_v36  ;;  %12016 = vmatprep.subr.bf16.mxu1 %v12500_v1 }
 0x9f7   : > { %v15840_v12 = vmul.f32 0.5, %v15617_v47  ;;  %v8689_v42 = vadd.f32 -1.4531521, %v8625_v50  ;;  %v8432_v8 = vadd.f32 1.0, %v8368_v20  ;;  %v12502_v4 = vld [vmem:[%s13220_s23 + $0x18] sm:$0xff]   ;;  %v9676_v6 = vsub.f32 0.0, %v9548_v59  ;;  %12044 = vmatprep.subr.bf16.mxu0 %v12501_v48 }
 0x9f8   : > { %v12503_v39 = vld [vmem:[%s13220_s23 + $0x98] sm:$0xff]   ;;  %v9166_v30 = vmul.f32 %v15663_v9, %v9102_v51  ;;  %12818 = vpow2.f32 %v9425_v26  ;;  %v15846_v54 = vmul.f32 0.70710677, %v15830_v28  ;;  %v12811_v43 = vpop.eup %12810  ;;  %v9179_v40 = vmul.f32 %v15678_v55, %v9115_v5  ;;  %12017 = vmatpush3.bf16.msra.mxu1 %v12502_v4  ;;  %v15877_v4 = vpop.f32.mrb[52].mxu0 }
 0x9f9   : > { %v9053_v36 = vmul.f32 %v15717_v0, %v8989_v24  ;;  %v8860_v47 = vadd.f32 1.4214138, %v8796_v53  ;;  %v15851_v50 = vmul.f32 0.70710677, %v15835_v49  ;;  %12045 = vmatpush3.bf16.msra.mxu0 %v12503_v39  ;;  %v9741_v9 = vsel %vm9613_vm8, %v9549_v57, %v9677_v33  ;;  %17888 = vst [vmem:[#allocation15_spill] sm:$0xff] %v15877_v4 }
 0x9fa   : > { %v8798_v20 = vmul.f32 %v15799_v14, %v8734_v2  ;;  %v8815_v51 = vadd.f32 1.4214138, %v8751_v34  ;;  %v9331_v26 = vmul.f32 1.442695, %v9263_v18  ;;  %v12813_v1 = vpop.eup %12812  ;;  %v8753_v48 = vmul.f32 %v15808_v22, %v8689_v42  ;;  %v15871_v18 = vpop.f32.mrb[64].mxu1 }
 0x9fb   : > { %12820 = vrcp.f32 %v8432_v8  ;;  %v15858_v55 = vand.u32 2147483647, %v15846_v54  ;;  %v15861_v5 = vand.u32 2147483647, %v15851_v50  ;;  %v9740_v24 = vsel %vm9612_vm9, %v9548_v59, %v9676_v6  ;;  %17887 = vst [vmem:[#allocation14_spill] sm:$0xff] %v15871_v18 }
 0x9fc   : > { %v15865_v53 = vmul.f32 %v12811_v43, %v9166_v30  ;;  %v15868_v62 = vmul.f32 0.5, %v15703_v56  ;;  %v9201_v57 = vsub.f32 0.0, %v15725_v44  ;;  %v12815_v33 = vpop.eup %12814  ;;  %v15873_v2 = vmul.f32 %v12813_v1, %v9179_v40  ;;  %v17889_v56 = vld [vmem:[#allocation17_spill] sm:$0xff] }
 0x9fd   : > { %v9117_v34 = vadd.f32 0.2548296, %v9053_v36  ;;  %v8924_v42 = vmul.f32 %v15761_v60, %v8860_v47  ;;  %v8383_v8 = vmul.f32 0.3275911, %v15861_v5  ;;  %v9805_v10 = vadd.f32 1.0, %v9741_v9 }
 0x9fe   : > { %v8862_v30 = vadd.f32 1.4214138, %v8798_v20  ;;  %v8879_v59 = vmul.f32 %v15781_v16, %v8815_v51  ;;  %v15882_v39 = vadd.f32 %v17889_v56, %v15623_v31  ;;  %12822 = vpow2.f32 %v9331_v26  ;;  %v17890_v26 = vld [vmem:[#allocation33_spill] sm:$0xff] }
 0x9ff   : > { %v8817_v6 = vadd.f32 1.4214138, %v8753_v48  ;;  %v8370_v43 = vmul.f32 0.3275911, %v15858_v55  ;;  %v8447_v40 = vadd.f32 1.0, %v8383_v8  ;;  %v9804_v36 = vadd.f32 1.0, %v9740_v24 }
 0xa00   : > { %v9550_v47 = vsub.f32 1.0, %v15865_v53  ;;  %vm9614_vm10 = vcmp.ge.f32.partialorder %v15560_v15, 0.0  ;;  %v9265_v9 = vmul.f32 %v9201_v57, %v15725_v44  ;;  %v15889_v20 = vmul.f32 0.70710677, %v15882_v39  ;;  %v15891_v51 = vpop.eup %12816  ;;  %v12504_v24 = vld [vmem:[%s13220_s23 + $0x60] sm:$0xff]  }
 0xa01   : > { %v9563_v1 = vsub.f32 1.0, %v15873_v2  ;;  %vm9627_vm11 = vcmp.ge.f32.partialorder %v17890_v26, 0.0  ;;  %v9181_v48 = vmul.f32 %v15717_v0, %v9117_v34  ;;  %v8988_v56 = vadd.f32 -0.28449672, %v8924_v42  ;;  %v12505_v8 = vld [vmem:[%s13220_s23 + $0xe0] sm:$0xff]   ;;  %v17893_v42 = vld [vmem:[#allocation19_spill] sm:$0xff]  ;;  %12018 = vmatprep.subr.bf16.mxu1 %v12504_v24 }
 0xa02   : > { %12824 = vrcp.f32 %v8447_v40  ;;  %v15898_v53 = vpop.eup %12818  ;;  %v15901_v11 = vmul.f32 %v9805_v10, %v15711_v7  ;;  %v8926_v44 = vmul.f32 %v15799_v14, %v8862_v30  ;;  %v8943_v57 = vadd.f32 -0.28449672, %v8879_v59  ;;  %v17892_v0 = vld [vmem:[#allocation18_spill] sm:$0xff]  ;;  %12046 = vmatprep.subr.bf16.mxu0 %v12505_v8 }
 0xa03   : > { %v15905_v46 = vand.u32 2147483647, %v15889_v20  ;;  %v8881_v2 = vmul.f32 %v15808_v22, %v8817_v6  ;;  %v8434_v41 = vadd.f32 1.0, %v8370_v43  ;;  %v15910_v34 = vadd.f32 %v17892_v0, %v15633_v29 }
 0xa04   : > { %17891 = vst [vmem:[#allocation17_spill] sm:$0xff] %v15901_v11  ;;  %v15914_v40 = vadd.f32 %v17893_v42, %v15692_v38  ;;  %v15917_v7 = vmul.f32 %v9804_v36, %v15753_v63  ;;  %v9678_v10 = vsub.f32 0.0, %v9550_v47  ;;  %v9335_v30 = vmul.f32 1.442695, %v9265_v9  ;;  %v15920_v11 = vpop.f32.mrb[65].mxu1 }
 0xa05   : > { %v8385_v59 = vmul.f32 0.3275911, %v15905_v46  ;;  %17895 = vst [vmem:[#allocation18_spill] sm:$0xff] %v15920_v11  ;;  %v15922_v6 = vpop.eup %12820  ;;  %v9691_v43 = vsub.f32 0.0, %v9563_v1  ;;  %v15924_v0 = vmul.f32 %v12815_v33, %v9181_v48  ;;  %v9052_v45 = vmul.f32 %v15761_v60, %v8988_v56  ;;  %v15938_v33 = vpop.f32.mrb[53].mxu0 }
 0xa06   : > { %17894 = vst [vmem:[#allocation33_spill] sm:$0xff] %v15917_v7  ;;  %v15928_v42 = vmul.f32 0.70710677, %v15910_v34  ;;  %v8990_v24 = vadd.f32 -0.28449672, %v8926_v44  ;;  %v9007_v63 = vmul.f32 %v15781_v16, %v8943_v57  ;;  %12826 = vrcp.f32 %v8434_v41  ;;  %17898 = vst [vmem:[#allocation50_spill] sm:$0xff] %v15938_v33 }
 0xa07   : > { %v8449_v36 = vadd.f32 1.0, %v8385_v59  ;;  %v15932_v9 = vmul.f32 0.70710677, %v15914_v40  ;;  %v8945_v8 = vadd.f32 -0.28449672, %v8881_v2  ;;  %v9215_v7 = vsub.f32 0.0, %v15861_v5 }
 0xa08   : > { %17896 = vst [vmem:[#allocation19_spill] sm:$0xff] %v15928_v42  ;;  %v15936_v11 = vand.u32 2147483647, %v15928_v42  ;;  %v15941_v48 = vmul.f32 0.5, %v15769_v35  ;;  %v8624_v56 = vmul.f32 1.0614054, %v15922_v6  ;;  %v12823_v57 = vpop.eup %12822  ;;  %v9742_v41 = vsel %vm9614_vm10, %v9550_v47, %v9678_v10 }
 0xa09   : > { %17897 = vst [vmem:[#allocation49_spill] sm:$0xff] %v15932_v9  ;;  %12828 = vrcp.f32 %v8449_v36  ;;  %v15945_v44 = vand.u32 2147483647, %v15932_v9  ;;  %v9565_v2 = vsub.f32 1.0, %v15924_v0  ;;  %v9116_v59 = vadd.f32 0.2548296, %v9052_v45 }
 0xa0a   : > { %v8384_v4 = vmul.f32 0.3275911, %v15936_v11  ;;  %v9755_v33 = vsel %vm9627_vm11, %v9563_v1, %v9691_v43  ;;  %v9054_v35 = vmul.f32 %v15799_v14, %v8990_v24  ;;  %v17899_v36 = vld [vmem:[#allocation20_spill] sm:$0xff]  ;;  %v9071_v15 = vadd.f32 0.2548296, %v9007_v63  ;;  %v17900_v0 = vld [vmem:[#allocation34_spill] sm:$0xff] }
 0xa0b   : > { %v8386_v18 = vmul.f32 0.3275911, %v15945_v44  ;;  %v15957_v27 = vadd.f32 %v17899_v36, %v15598_v37  ;;  %v9009_v47 = vmul.f32 %v15808_v22, %v8945_v8  ;;  %12830 = vpow2.f32 %v9335_v30 }
 0xa0c   : > { %v15959_v21 = vpop.eup %12824  ;;  %v9279_v45 = vmul.f32 %v9215_v7, %v15861_v5  ;;  %v9806_v10 = vadd.f32 1.0, %v9742_v41  ;;  %vm9629_vm12 = vcmp.ge.f32.partialorder %v17900_v0, 0.0  ;;  %v8688_v1 = vadd.f32 -1.4531521, %v8624_v56 }
 0xa0d   : > { %v8639_v26 = vmul.f32 1.0614054, %v15959_v21  ;;  %v8448_v43 = vadd.f32 1.0, %v8384_v4  ;;  %v9819_v24 = vadd.f32 1.0, %v9755_v33  ;;  %v9693_v25 = vsub.f32 0.0, %v9565_v2  ;;  %v17901_v4 = vld [vmem:[#allocation21_spill] sm:$0xff] }
 0xa0e   : > { %v9217_v36 = vsub.f32 0.0, %v15905_v46  ;;  %v8450_v58 = vadd.f32 1.0, %v8386_v18  ;;  %v9180_v63 = vmul.f32 %v15761_v60, %v9116_v59  ;;  %v9118_v8 = vadd.f32 0.2548296, %v9054_v35  ;;  %v12506_v18 = vld [vmem:[%s13220_s23 + $0x20] sm:$0xff]  }
 0xa0f   : > { %v8703_v30 = vadd.f32 -1.4531521, %v8639_v26  ;;  %v15968_v5 = vmul.f32 0.70710677, %v15957_v27  ;;  %v9135_v7 = vmul.f32 %v15781_v16, %v9071_v15  ;;  %v9073_v56 = vadd.f32 0.2548296, %v9009_v47  ;;  %12019 = vmatpush3.bf16.msra.mxu1 %v12506_v18 }
 0xa10   : > { %v9363_v41 = vmul.f32 1.442695, %v9279_v45  ;;  %v15973_v33 = vadd.f32 %v17901_v4, %v15623_v31  ;;  %v8752_v9 = vmul.f32 %v15922_v6, %v8688_v1  ;;  %12832 = vrcp.f32 %v8448_v43  ;;  %v12507_v59 = vld [vmem:[%s13220_s23 + $0xa0] sm:$0xff]   ;;  %v15982_v35 = vpop.eup %12826 }
 0xa11   : > { %v8767_v42 = vmul.f32 %v15959_v21, %v8703_v30  ;;  %v15978_v60 = vand.u32 2147483647, %v15968_v5  ;;  %v15985_v16 = vmul.f32 %v9806_v10, %v15764_v23  ;;  %v9281_v15 = vmul.f32 %v9217_v36, %v15905_v46  ;;  %12047 = vmatpush3.bf16.msra.mxu0 %v12507_v59  ;;  %v16002_v10 = vpop.f32.mrb[66].mxu1 }
 0xa12   : > { %12834 = vrcp.f32 %v8450_v58  ;;  %v15989_v47 = vmul.f32 0.70710677, %v15973_v33  ;;  %v15994_v1 = vmul.f32 %v15891_v51, %v9180_v63  ;;  %v9200_v26 = vsub.f32 0.0, %v15813_v3  ;;  %17903 = vst [vmem:[#allocation34_spill] sm:$0xff] %v16002_v10  ;;  %v17906_v10 = vld [vmem:[#allocation39_spill] sm:$0xff] }
 0xa13   : > { %17902 = vst [vmem:[#allocation20_spill] sm:$0xff] %v15985_v16  ;;  %v15991_v45 = vpop.eup %12828  ;;  %v8831_v43 = vadd.f32 1.4214138, %v8767_v42  ;;  %v8399_v30 = vmul.f32 0.3275911, %v15978_v60  ;;  %v9455_v23 = vmul.f32 %v12823_v57, %v9135_v7  ;;  %12836 = vpow2.f32 %v9363_v41  ;;  %v17905_v16 = vld [vmem:[#allocation38_spill] sm:$0xff] }
 0xa14   : > { %v8641_v46 = vmul.f32 1.0614054, %v15991_v45  ;;  %v16000_v58 = vand.u32 2147483647, %v15989_v47  ;;  %v9182_v36 = vmul.f32 %v15799_v14, %v9118_v8  ;;  %v9137_v51 = vmul.f32 %v15808_v22, %v9073_v56 }
 0xa15   : > { %v8816_v63 = vadd.f32 1.4214138, %v8752_v9  ;;  %v8895_v42 = vmul.f32 %v15959_v21, %v8831_v43  ;;  %v12831_v4 = vpop.eup %12830  ;;  %v9757_v18 = vsel %vm9629_vm12, %v9565_v2, %v9693_v25  ;;  %v8626_v57 = vmul.f32 1.0614054, %v15982_v35 }
 0xa16   : > { %v8705_v7 = vadd.f32 -1.4531521, %v8641_v46  ;;  %v9367_v41 = vmul.f32 1.442695, %v9281_v15  ;;  %v16011_v59 = vmul.f32 %v9819_v24, %v15773_v52  ;;  %vm9628_vm13 = vcmp.ge.f32.partialorder %v17905_v16, 0.0  ;;  %v17907_v46 = vld [vmem:[#allocation22_spill] sm:$0xff] }
 0xa17   : > { %vm9583_vm14 = vcmp.ge.f32.partialorder %v17906_v10, 0.0  ;;  %v9264_v14 = vmul.f32 %v9200_v26, %v15813_v3  ;;  %v8959_v22 = vadd.f32 -0.28449672, %v8895_v42  ;;  %v8463_v9 = vadd.f32 1.0, %v8399_v30 }
 0xa18   : > { %17904 = vst [vmem:[#allocation21_spill] sm:$0xff] %v16011_v59  ;;  %v9564_v8 = vsub.f32 1.0, %v15994_v1  ;;  %v9519_v56 = vsub.f32 1.0, %v9455_v23  ;;  %v8769_v25 = vmul.f32 %v15991_v45, %v8705_v7  ;;  %v8401_v2 = vmul.f32 0.3275911, %v16000_v58 }
 0xa19   : > { %v16019_v0 = vadd.f32 1.0, %v9757_v18  ;;  %v16022_v52 = vmul.f32 %v15898_v53, %v9182_v36  ;;  %v9457_v24 = vmul.f32 %v12831_v4, %v9137_v51  ;;  %v9023_v15 = vmul.f32 %v15959_v21, %v8959_v22  ;;  %v16036_v4 = vpop.f32.mrb[54].mxu0 }
 0xa1a   : > { %v8880_v43 = vmul.f32 %v15922_v6, %v8816_v63  ;;  %v8690_v3 = vadd.f32 -1.4531521, %v8626_v57  ;;  %v8833_v26 = vadd.f32 1.4214138, %v8769_v25  ;;  %12838 = vpow2.f32 %v9367_v41  ;;  %v16026_v30 = vpop.eup %12832  ;;  %17908 = vst [vmem:[#allocation38_spill] sm:$0xff] %v16036_v4 }
 0xa1b   : > { %v9333_v1 = vmul.f32 1.442695, %v9264_v14  ;;  %v9087_v23 = vadd.f32 0.2548296, %v9023_v15  ;;  %12840 = vrcp.f32 %v8463_v9  ;;  %v16030_v42 = vadd.f32 %v17907_v46, %v15633_v29 }
 0xa1c   : > { %v16032_v18 = vpop.eup %12834  ;;  %v9692_v53 = vsub.f32 0.0, %v9564_v8  ;;  %v9647_v36 = vsub.f32 0.0, %v9519_v56  ;;  %vm9585_vm15 = vcmp.ge.f32.partialorder %v15715_v19, 0.0  ;;  %v8897_v51 = vmul.f32 %v15991_v45, %v8833_v26 }
 0xa1d   : > { %v8465_v63 = vadd.f32 1.0, %v8401_v2  ;;  %v9521_v7 = vsub.f32 1.0, %v9457_v24  ;;  %v9202_v41 = vsub.f32 0.0, %v15858_v55  ;;  %v9151_v14 = vmul.f32 %v15959_v21, %v9087_v23  ;;  %v12837_v22 = vpop.eup %12836 }
 0xa1e   : > { %v8944_v9 = vadd.f32 -0.28449672, %v8880_v43  ;;  %v8754_v25 = vmul.f32 %v15982_v35, %v8690_v3  ;;  %v8961_v15 = vadd.f32 -0.28449672, %v8897_v51  ;;  %v8640_v46 = vmul.f32 1.0614054, %v16026_v30 }
 0xa1f   : > { %12842 = vpow2.f32 %v9333_v1  ;;  %v9471_v59 = vmul.f32 %v12837_v22, %v9151_v14  ;;  %v8642_v2 = vmul.f32 1.0614054, %v16032_v18  ;;  %v16045_v26 = vmul.f32 0.70710677, %v16030_v42 }
 0xa20   : > { %v16049_v24 = vsel %vm9628_vm13, %v9564_v8, %v9692_v53  ;;  %v9711_v21 = vsel %vm9583_vm14, %v9519_v56, %v9647_v36  ;;  %v9025_v43 = vmul.f32 %v15991_v45, %v8961_v15  ;;  %12844 = vrcp.f32 %v8465_v63 }
 0xa21   : > { %17909 = vst [vmem:[#allocation39_spill] sm:$0xff] %v16045_v26  ;;  %v9649_v3 = vsub.f32 0.0, %v9521_v7  ;;  %v9266_v23 = vmul.f32 %v9202_v41, %v15858_v55  ;;  %v9535_v1 = vsub.f32 1.0, %v9471_v59  ;;  %v16056_v51 = vand.u32 2147483647, %v16045_v26  ;;  %v16067_v41 = vpop.f32.mrb[67].mxu1 }
 0xa22   : > { %v9008_v14 = vmul.f32 %v15922_v6, %v8944_v9  ;;  %v8818_v22 = vadd.f32 1.4214138, %v8754_v25  ;;  %v9089_v57 = vadd.f32 0.2548296, %v9025_v43  ;;  %v8704_v16 = vadd.f32 -1.4531521, %v8640_v46 }
 0xa23   : > { %v9775_v8 = vadd.f32 1.0, %v9711_v21  ;;  %v9663_v53 = vsub.f32 0.0, %v9535_v1  ;;  %v8706_v4 = vadd.f32 -1.4531521, %v8642_v2  ;;  %v8400_v10 = vmul.f32 0.3275911, %v16056_v51 }
 0xa24   : > { %v12839_v56 = vpop.eup %12838  ;;  %v17910_v36 = vsub.f32 1.0, %v16022_v52  ;;  %v8191_v55 = vmul.f32 0.5, %v15835_v49  ;;  %vm9599_vm0 = vcmp.ge.f32.partialorder %v15851_v50, 0.0  ;;  %v9153_v59 = vmul.f32 %v15991_v45, %v9089_v57  ;;  %17911 = vst [vmem:[#allocation22_spill] sm:$0xff] %v16067_v41  ;;  %v17913_v57 = vld [vmem:[#allocation24_spill] sm:$0xff] }
 0xa25   : > { %v16069_v9 = vpop.eup %12840  ;;  %v9713_v25 = vsel %vm9585_vm15, %v9521_v7, %v9649_v3  ;;  %v9337_v15 = vmul.f32 1.442695, %v9266_v23  ;;  %v9727_v46 = vsel %vm9599_vm0, %v9535_v1, %v9663_v53  ;;  %v8464_v2 = vadd.f32 1.0, %v8400_v10  ;;  %v16095_v10 = vpop.f32.mrb[55].mxu0 }
 0xa26   : > { %v16062_v63 = vsub.f32 0.0, %v17910_v36  ;;  %v9072_v21 = vadd.f32 0.2548296, %v9008_v14  ;;  %v8882_v43 = vmul.f32 %v15982_v35, %v8818_v22  ;;  %v9791_v36 = vadd.f32 1.0, %v9727_v46  ;;  %v17915_v14 = vld [vmem:[#allocation41_spill] sm:$0xff] }
 0xa27   : > { %v9473_v26 = vmul.f32 %v12839_v56, %v9153_v59  ;;  %v16075_v49 = vmul.f32 %v9775_v8, %v15840_v12  ;;  %v8768_v50 = vmul.f32 %v16026_v30, %v8704_v16  ;;  %v8770_v45 = vmul.f32 %v16032_v18, %v8706_v4  ;;  %17916 = vst [vmem:[#allocation41_spill] sm:$0xff] %v16095_v10  ;;  %v17917_v59 = vld [vmem:[#allocation25_spill] sm:$0xff] }
 0xa28   : > { %v16081_v41 = vadd.f32 %v17913_v57, %v15692_v38  ;;  %v16083_v19 = vmul.f32 %v9791_v36, %v8191_v55  ;;  %v9216_v3 = vsub.f32 0.0, %v15936_v11  ;;  %v8655_v23 = vmul.f32 1.0614054, %v16069_v9  ;;  %v12509_v57 = vld [vmem:[%s13220_s23 + $0xe8] sm:$0xff]  }
 0xa29   : > { %17912 = vst [vmem:[#allocation51_spill] sm:$0xff] %v16075_v49  ;;  %v9537_v7 = vsub.f32 1.0, %v9473_v26  ;;  %v12843_v1 = vpop.eup %12842  ;;  %vm9630_vm2 = vcmp.ge.f32.partialorder %v17915_v14, 0.0  ;;  %v9777_v12 = vadd.f32 1.0, %v9713_v25  ;;  %vm9601_vm3 = vcmp.ge.f32.partialorder %v15889_v20, 0.0  ;;  %12048 = vmatprep.subr.bf16.mxu0 %v12509_v57 }
 0xa2a   : > { %17914 = vst [vmem:[#allocation24_spill] sm:$0xff] %v16083_v19  ;;  %v9218_v22 = vsub.f32 0.0, %v15945_v44  ;;  %12846 = vrcp.f32 %v8464_v2  ;;  %v16090_v4 = vpop.eup %12844  ;;  %v9136_v16 = vmul.f32 %v15922_v6, %v9072_v21  ;;  %v8946_v8 = vadd.f32 -0.28449672, %v8882_v43 }
 0xa2b   : > { %v9665_v53 = vsub.f32 0.0, %v9537_v7  ;;  %v8832_v56 = vadd.f32 1.4214138, %v8768_v50  ;;  %v8834_v55 = vadd.f32 1.4214138, %v8770_v45  ;;  %v16102_v25 = vadd.f32 %v17917_v59, %v15598_v37  ;;  %v12508_v45 = vld [vmem:[%s13220_s23 + $0x68] sm:$0xff]  }
 0xa2c   : > { %v16098_v20 = vmul.f32 0.70710677, %v16081_v41  ;;  %v8193_v6 = vmul.f32 0.5, %v15882_v39  ;;  %v9280_v2 = vmul.f32 %v9216_v3, %v15936_v11  ;;  %v8719_v21 = vadd.f32 -1.4531521, %v8655_v23  ;;  %v12511_v11 = vld [vmem:[%s13220_s23 + $0xa8] sm:$0xff]   ;;  %12020 = vmatprep.subr.bf16.mxu1 %v12508_v45 }
 0xa2d   : > { %v9729_v46 = vsel %vm9601_vm3, %v9537_v7, %v9665_v53  ;;  %v16107_v43 = vmul.f32 %v9777_v12, %v15868_v62  ;;  %12848 = vpow2.f32 %v9337_v15  ;;  %v8657_v50 = vmul.f32 1.0614054, %v16090_v4  ;;  %v12510_v7 = vld [vmem:[%s13220_s23 + $0x28] sm:$0xff]   ;;  %12049 = vmatpush3.bf16.msra.mxu0 %v12511_v11 }
 0xa2e   : > { %v9793_v36 = vadd.f32 1.0, %v9729_v46  ;;  %v9456_v26 = vmul.f32 %v12843_v1, %v9136_v16  ;;  %v9010_v37 = vmul.f32 %v15982_v35, %v8946_v8  ;;  %v9282_v59 = vmul.f32 %v9218_v22, %v15945_v44  ;;  %12021 = vmatpush3.bf16.msra.mxu1 %v12510_v7  ;;  %v16149_v7 = vpop.f32.mrb[68].mxu1 }
 0xa2f   : > { %17918 = vst [vmem:[#allocation25_spill] sm:$0xff] %v16107_v43  ;;  %v16115_v39 = vand.u32 2147483647, %v16098_v20  ;;  %v8896_v62 = vmul.f32 %v16026_v30, %v8832_v56  ;;  %v8898_v15 = vmul.f32 %v16032_v18, %v8834_v55  ;;  %v16124_v23 = vmul.f32 0.70710677, %v16102_v25  ;;  %17922 = vst [vmem:[#allocation54_spill] sm:$0xff] %v16149_v7 }
 0xa30   : > { %v16119_v3 = vmul.f32 %v9793_v36, %v8193_v6  ;;  %v9365_v1 = vmul.f32 1.442695, %v9280_v2  ;;  %v8783_v12 = vmul.f32 %v16069_v9, %v8719_v21  ;;  %v9231_v44 = vsub.f32 0.0, %v15978_v60 }
 0xa31   : > { %v8402_v22 = vmul.f32 0.3275911, %v16115_v39  ;;  %vm9584_vm4 = vcmp.ge.f32.partialorder %v15791_v32, 0.0  ;;  %v16131_v16 = vmul.f32 0.5, %v15830_v28  ;;  %v8721_v53 = vadd.f32 -1.4531521, %v8657_v50 }
 0xa32   : > { %17919 = vst [vmem:[#allocation52_spill] sm:$0xff] %v16119_v3  ;;  %v16136_v56 = vand.u32 2147483647, %v16124_v23  ;;  %v17920_v55 = vsub.f32 1.0, %v16022_v52  ;;  %v9520_v46 = vsub.f32 1.0, %v9456_v26  ;;  %v16147_v28 = vmul.f32 %v16019_v0, %v15776_v17 }
 0xa33   : > { %v9074_v2 = vadd.f32 0.2548296, %v9010_v37  ;;  %v9369_v21 = vmul.f32 1.442695, %v9282_v59  ;;  %v8960_v45 = vadd.f32 -0.28449672, %v8896_v62  ;;  %12850 = vpow2.f32 %v9365_v1 }
 0xa34   : > { %v9758_v6 = vsel %vm9630_vm2, %v17920_v55, %v16062_v63  ;;  %v16143_v36 = vpop.eup %12846  ;;  %17921 = vst [vmem:[#allocation53_spill] sm:$0xff] %v16147_v28  ;;  %v8962_v50 = vadd.f32 -0.28449672, %v8898_v15  ;;  %v8466_v57 = vadd.f32 1.0, %v8402_v22  ;;  %v8847_v11 = vadd.f32 1.4214138, %v8783_v12 }
 0xa35   : > { %v9295_v52 = vmul.f32 %v9231_v44, %v15978_v60  ;;  %v8415_v63 = vmul.f32 0.3275911, %v16136_v56  ;;  %v9820_v14 = vadd.f32 1.0, %v16049_v24  ;;  %v16154_v26 = vadd.f32 1.0, %v9758_v6  ;;  %v17923_v24 = vld [vmem:[#allocation26_spill] sm:$0xff] }
 0xa36   : > { %v8785_v37 = vmul.f32 %v16090_v4, %v8721_v53  ;;  %12852 = vrcp.f32 %v8466_v57  ;;  %v9648_v17 = vsub.f32 0.0, %v9520_v46  ;;  %v9138_v0 = vmul.f32 %v15982_v35, %v9074_v2  ;;  %v17925_v2 = vld [vmem:[#allocation27_spill] sm:$0xff] }
 0xa37   : > { %v8656_v59 = vmul.f32 1.0614054, %v16143_v36  ;;  %v8479_v62 = vadd.f32 1.0, %v8415_v63  ;;  %v12849_v15 = vpop.eup %12848  ;;  %v9024_v60 = vmul.f32 %v16026_v30, %v8960_v45  ;;  %v9026_v1 = vmul.f32 %v16032_v18, %v8962_v50  ;;  %v12512_v45 = vld [vmem:[%s13220_s23 + $0x70] sm:$0xff]  }
 0xa38   : > { %12854 = vpow2.f32 %v9369_v21  ;;  %v16163_v12 = vadd.f32 %v17923_v24, %v15623_v31  ;;  %v8911_v44 = vmul.f32 %v16069_v9, %v8847_v11  ;;  %v9395_v22 = vmul.f32 1.442695, %v9295_v52  ;;  %v12513_v31 = vld [vmem:[%s13220_s23 + $0xf0] sm:$0xff]   ;;  %12022 = vmatprep.subr.bf16.mxu1 %v12512_v45 }
 0xa39   : > { %v9233_v35 = vsub.f32 0.0, %v16000_v58  ;;  %12856 = vrcp.f32 %v8479_v62  ;;  %v16168_v53 = vmul.f32 %v9820_v14, %v15796_v61  ;;  %v8849_v55 = vadd.f32 1.4214138, %v8785_v37  ;;  %v16184_v61 = vpop.f32.mrb[56].mxu0  ;;  %12050 = vmatprep.subr.bf16.mxu0 %v12513_v31 }
 0xa3a   : > { %v16171_v6 = vmul.f32 0.70710677, %v16163_v12  ;;  %v16175_v21 = vadd.f32 %v17925_v2, %v15633_v29  ;;  %v9712_v50 = vsel %vm9584_vm4, %v9520_v46, %v9648_v17  ;;  %v9458_v57 = vmul.f32 %v12849_v15, %v9138_v0  ;;  %17926 = vst [vmem:[#allocation27_spill] sm:$0xff] %v16184_v61  ;;  %v17927_v29 = vld [vmem:[#allocation30_spill] sm:$0xff]  ;;  %v16200_v0 = vpop.f32.mrb[69].mxu1 }
 0xa3b   : > { %17924 = vst [vmem:[#allocation26_spill] sm:$0xff] %v16168_v53  ;;  %v16182_v11 = vmul.f32 0.5, %v15910_v34  ;;  %v8720_v52 = vadd.f32 -1.4531521, %v8656_v59  ;;  %v9088_v63 = vadd.f32 0.2548296, %v9024_v60  ;;  %v16191_v62 = vadd.f32 %v17927_v29, %v15692_v38 }
 0xa3c   : > { %v9090_v14 = vadd.f32 0.2548296, %v9026_v1  ;;  %v16187_v37 = vand.u32 2147483647, %v16171_v6  ;;  %v16194_v32 = vmul.f32 0.5, %v15914_v40  ;;  %v9297_v34 = vmul.f32 %v9233_v35, %v16000_v58  ;;  %17928 = vst [vmem:[#allocation30_spill] sm:$0xff] %v16200_v0 }
 0xa3d   : > { %v8975_v46 = vadd.f32 -0.28449672, %v8911_v44  ;;  %v16198_v17 = vmul.f32 0.70710677, %v16175_v21  ;;  %vm9586_vm5 = vcmp.ge.f32.partialorder %v15846_v54, 0.0  ;;  %v16204_v59 = vmul.f32 0.5, %v15957_v27  ;;  %v12851_v40 = vpop.eup %12850 }
 0xa3e   : > { %12858 = vpow2.f32 %v9395_v22  ;;  %v8913_v38 = vmul.f32 %v16090_v4, %v8849_v55  ;;  %v8417_v15 = vmul.f32 0.3275911, %v16187_v37  ;;  %v9776_v60 = vadd.f32 1.0, %v9712_v50  ;;  %v12514_v54 = vld [vmem:[%s13220_s23 + $0x30] sm:$0xff]  }
 0xa3f   : > { %v9522_v1 = vsub.f32 1.0, %v9458_v57  ;;  %v8784_v58 = vmul.f32 %v16143_v36, %v8720_v52  ;;  %v16210_v24 = vand.u32 2147483647, %v16198_v17  ;;  %v9152_v35 = vmul.f32 %v16026_v30, %v9088_v63  ;;  %12023 = vmatpush3.bf16.msra.mxu1 %v12514_v54 }
 0xa40   : > { %v16212_v44 = vpop.eup %12852  ;;  %v9154_v27 = vmul.f32 %v16032_v18, %v9090_v14  ;;  %v8481_v2 = vadd.f32 1.0, %v8417_v15  ;;  %v16217_v22 = vmul.f32 0.70710677, %v16191_v62  ;;  %v9039_v55 = vmul.f32 %v16069_v9, %v8975_v46  ;;  %v16232_v15 = vpop.f32.mrb[57].mxu0 }
 0xa41   : > { %v9399_v45 = vmul.f32 1.442695, %v9297_v34  ;;  %v9232_v31 = vsub.f32 0.0, %v16056_v51  ;;  %v8658_v50 = vmul.f32 1.0614054, %v16212_v44  ;;  %v16230_v63 = vmul.f32 %v16154_v26, %v15820_v13  ;;  %17931 = vst [vmem:[#allocation57_spill] sm:$0xff] %v16232_v15 }
 0xa42   : > { %17929 = vst [vmem:[#allocation55_spill] sm:$0xff] %v16217_v22  ;;  %v12855_v57 = vpop.eup %12854  ;;  %v8977_v52 = vadd.f32 -0.28449672, %v8913_v38  ;;  %12860 = vrcp.f32 %v8481_v2  ;;  %v8416_v29 = vmul.f32 0.3275911, %v16210_v24  ;;  %v9650_v14 = vsub.f32 0.0, %v9522_v1 }
 0xa43   : > { %v16224_v30 = vand.u32 2147483647, %v16217_v22  ;;  %v16226_v18 = vpop.eup %12856  ;;  %17930 = vst [vmem:[#allocation56_spill] sm:$0xff] %v16230_v63  ;;  %v8848_v46 = vadd.f32 1.4214138, %v8784_v58  ;;  %v16234_v8 = vmul.f32 %v12851_v40, %v9152_v35  ;;  %v16236_v38 = vmul.f32 %v12855_v57, %v9154_v27  ;;  %v16247_v26 = vld [vmem:[%s13214_s15 + $0x8] sm:$0xff] }
 0xa44   : > { %v8722_v34 = vadd.f32 -1.4531521, %v8658_v50  ;;  %v8671_v2 = vmul.f32 1.0614054, %v16226_v18  ;;  %v8480_v43 = vadd.f32 1.0, %v8416_v29  ;;  %v16240_v3 = vmul.f32 %v9776_v60, %v15941_v48  ;;  %17933 = vst [vmem:[#allocation59_spill] sm:$0xff] %v16247_v26 }
 0xa45   : > { %v9103_v49 = vadd.f32 0.2548296, %v9039_v55  ;;  %v16243_v19 = vmul.f32 0.5, %v15973_v33  ;;  %v9296_v13 = vmul.f32 %v9232_v31, %v16056_v51  ;;  %v9041_v40 = vmul.f32 %v16090_v4, %v8977_v52  ;;  %v17934_v31 = vld [vmem:[#allocation8_spill] sm:$0xff] }
 0xa46   : > { %17932 = vst [vmem:[#allocation58_spill] sm:$0xff] %v16240_v3  ;;  %12862 = vpow2.f32 %v9399_v45  ;;  %v8735_v58 = vadd.f32 -1.4531521, %v8671_v2  ;;  %v8418_v35 = vmul.f32 0.3275911, %v16224_v30  ;;  %v9714_v48 = vsel %vm9586_vm5, %v9522_v1, %v9650_v14  ;;  %v17935_v45 = vld [vmem:[#allocation7_spill] sm:$0xff] }
 0xa47   : > { %v8912_v60 = vmul.f32 %v16143_v36, %v8848_v46  ;;  %v8786_v33 = vmul.f32 %v16212_v44, %v8722_v34  ;;  %12864 = vrcp.f32 %v8480_v43  ;;  %v9536_v51 = vsub.f32 1.0, %v16234_v8  ;;  %v12515_v1 = vld [vmem:[%s13220_s23 + $0xb0] sm:$0xff]   ;;  %v17937_v46 = vld [vmem:[#allocation19_spill] sm:$0xff]  ;;  %v17938_v34 = vld [vmem:[#allocation49_spill] sm:$0xff] }
 0xa48   : > { %v12859_v27 = vpop.eup %12858  ;;  %v9538_v55 = vsub.f32 1.0, %v16236_v38  ;;  %v16259_v50 = vrot.slane %v16247_v26, %v17934_v31  ;;  %v17936_v57 = vsub.s32 2, %v17935_v45  ;;  %v9167_v29 = vmul.f32 %v16069_v9, %v9103_v49  ;;  %v17939_v31 = vld [vmem:[#allocation35_spill] sm:$0xff]  ;;  %v17940_v3 = vld [vmem:[#allocation36_spill] sm:$0xff]  ;;  %12051 = vmatpush3.bf16.msra.mxu0 %v12515_v1 }
 0xa49   : > { %v16270_v43 = vmul.f32 0.5, %v16030_v42  ;;  %v9397_v14 = vmul.f32 1.442695, %v9296_v13  ;;  %v8799_v8 = vmul.f32 %v16226_v18, %v8735_v58  ;;  %vm9600_vm6 = vcmp.ge.f32.partialorder %v17937_v46, 0.0 }
 0xa4a   : > { %v16264_v52 = vrot.slane %v16247_v26, %v17936_v57  ;;  %vm9602_vm7 = vcmp.ge.f32.partialorder %v17938_v34, 0.0  ;;  %v9105_v38 = vadd.f32 0.2548296, %v9041_v40  ;;  %v8482_v2 = vadd.f32 1.0, %v8418_v35  ;;  %v16288_v40 = vpop.f32.mrb[70].mxu1 }
 0xa4b   : > { %v16277_v57 = vadd.f32 %v17939_v31, %v16259_v50  ;;  %v9778_v42 = vadd.f32 1.0, %v9714_v48  ;;  %v8976_v9 = vadd.f32 -0.28449672, %v8912_v60  ;;  %v8850_v49 = vadd.f32 1.4214138, %v8786_v33  ;;  %17942 = vst [vmem:[#allocation8_spill] sm:$0xff] %v16288_v40 }
 0xa4c   : > { %v16281_v28 = vadd.f32 %v17940_v3, %v16264_v52  ;;  %v17941_v13 = vsub.s32 3, %v17935_v45  ;;  %v16290_v35 = vpop.eup %12860  ;;  %v9664_v31 = vsub.f32 0.0, %v9536_v51  ;;  %v9666_v63 = vsub.f32 0.0, %v9538_v55 }
 0xa4d   : > { %v9234_v53 = vsub.f32 0.0, %v16115_v39  ;;  %v16294_v3 = vmul.f32 0.70710677, %v16277_v57  ;;  %v9487_v54 = vmul.f32 %v12859_v27, %v9167_v29  ;;  %v8863_v48 = vadd.f32 1.4214138, %v8799_v8  ;;  %v17945_v29 = vld [vmem:[#allocation40_spill] sm:$0xff] }
 0xa4e   : > { %v16286_v58 = vrot.slane %v16247_v26, %v17941_v13  ;;  %v8673_v60 = vmul.f32 1.0614054, %v16290_v35  ;;  %v16298_v33 = vmul.f32 0.70710677, %v16281_v28  ;;  %v9169_v1 = vmul.f32 %v16090_v4, %v9105_v38 }
 0xa4f   : > { %17943 = vst [vmem:[#allocation19_spill] sm:$0xff] %v16294_v3  ;;  %v9247_v13 = vsub.f32 0.0, %v16136_v56  ;;  %12866 = vrcp.f32 %v8482_v2  ;;  %v16303_v40 = vand.u32 2147483647, %v16294_v3  ;;  %v9040_v15 = vmul.f32 %v16143_v36, %v8976_v9  ;;  %v17946_v2 = vld [vmem:[#allocation16_spill] sm:$0xff] }
 0xa50   : > { %17944 = vst [vmem:[#allocation49_spill] sm:$0xff] %v16298_v33  ;;  %v8914_v0 = vmul.f32 %v16212_v44, %v8850_v49  ;;  %v16308_v27 = vand.u32 2147483647, %v16298_v33  ;;  %v16312_v8 = vadd.f32 %v17945_v29, %v16286_v58  ;;  %v12863_v61 = vpop.eup %12862  ;;  %vm9615_vm8 = vcmp.ge.f32.partialorder %v15968_v5, 0.0  ;;  %v16325_v33 = vpop.f32.mrb[58].mxu0 }
 0xa51   : > { %12868 = vpow2.f32 %v9397_v14  ;;  %v9298_v4 = vmul.f32 %v9234_v53, %v16115_v39  ;;  %v8371_v38 = vmul.f32 0.3275911, %v16303_v40  ;;  %v16319_v9 = vrot.slane %v16247_v26, %v17946_v2  ;;  %v16321_v49 = vpop.eup %12864  ;;  %17947 = vst [vmem:[#allocation35_spill] sm:$0xff] %v16325_v33  ;;  %v17949_v33 = vld [vmem:[#allocation37_spill] sm:$0xff] }
 0xa52   : > { %v9551_v7 = vsub.f32 1.0, %v9487_v54  ;;  %v8927_v45 = vmul.f32 %v16226_v18, %v8863_v48  ;;  %v8737_v10 = vadd.f32 -1.4531521, %v8673_v60  ;;  %v8373_v29 = vmul.f32 0.3275911, %v16308_v27 }
 0xa53   : > { %v16328_v14 = vmul.f32 %v9778_v42, %v16131_v16  ;;  %v9489_v39 = vmul.f32 %v12863_v61, %v9169_v1  ;;  %v9311_v53 = vmul.f32 %v9247_v13, %v16136_v56  ;;  %v8435_v3 = vadd.f32 1.0, %v8371_v38 }
 0xa54   : > { %v9728_v2 = vsel %vm9600_vm6, %v9536_v51, %v9664_v31  ;;  %v9730_v54 = vsel %vm9602_vm7, %v9538_v55, %v9666_v63  ;;  %v9104_v26 = vadd.f32 0.2548296, %v9040_v15  ;;  %v8978_v48 = vadd.f32 -0.28449672, %v8914_v0 }
 0xa55   : > { %17948 = vst [vmem:[#allocation36_spill] sm:$0xff] %v16328_v14  ;;  %v8672_v60 = vmul.f32 1.0614054, %v16321_v49  ;;  %12870 = vrcp.f32 %v8435_v3  ;;  %v8437_v22 = vadd.f32 1.0, %v8373_v29  ;;  %v16338_v16 = vadd.f32 %v17949_v33, %v16319_v9 }
 0xa56   : > { %v9679_v61 = vsub.f32 0.0, %v9551_v7  ;;  %vm9617_vm9 = vcmp.ge.f32.partialorder %v15989_v47, 0.0  ;;  %v9401_v56 = vmul.f32 1.442695, %v9298_v4  ;;  %v8991_v42 = vadd.f32 -0.28449672, %v8927_v45 }
 0xa57   : > { %v8801_v51 = vmul.f32 %v16290_v35, %v8737_v10  ;;  %v9553_v46 = vsub.f32 1.0, %v9489_v39  ;;  %v16343_v63 = vmul.f32 0.5, %v16081_v41  ;;  %v9427_v0 = vmul.f32 1.442695, %v9311_v53 }
 0xa58   : > { %v9249_v15 = vsub.f32 0.0, %v16187_v37  ;;  %v9792_v55 = vadd.f32 1.0, %v9728_v2  ;;  %v9794_v34 = vadd.f32 1.0, %v9730_v54  ;;  %v9168_v31 = vmul.f32 %v16143_v36, %v9104_v26 }
 0xa59   : > { %v16348_v3 = vmul.f32 0.5, %v16102_v25  ;;  %v16350_v33 = vpop.eup %12866  ;;  %v9042_v45 = vmul.f32 %v16212_v44, %v8978_v48  ;;  %v8736_v1 = vadd.f32 -1.4531521, %v8672_v60  ;;  %12872 = vrcp.f32 %v8437_v22 }
 0xa5a   : > { %v16354_v10 = vmul.f32 0.70710677, %v16338_v16  ;;  %v9743_v41 = vsel %vm9615_vm8, %v9551_v7, %v9679_v61  ;;  %12874 = vpow2.f32 %v9401_v56  ;;  %v9055_v13 = vmul.f32 %v16226_v18, %v8991_v42  ;;  %v16366_v7 = vpop.f32.mrb[71].mxu1  ;;  %v16379_v56 = vpop.f32.mrb[59].mxu0 }
 0xa5b   : > { %v8865_v4 = vadd.f32 1.4214138, %v8801_v51  ;;  %v12869_v36 = vpop.eup %12868  ;;  %v9681_v26 = vsub.f32 0.0, %v9553_v46  ;;  %12876 = vpow2.f32 %v9427_v0  ;;  %v9313_v25 = vmul.f32 %v9249_v15, %v16187_v37  ;;  %17951 = vst [vmem:[#allocation16_spill] sm:$0xff] %v16366_v7  ;;  %17953 = vst [vmem:[#allocation60_spill] sm:$0xff] %v16379_v56  ;;  %v17954_v51 = vld [vmem:[#allocation39_spill] sm:$0xff] }
 0xa5c   : > { %v9248_v38 = vsub.f32 0.0, %v16210_v24  ;;  %v16362_v29 = vmul.f32 %v9792_v55, %v16182_v11  ;;  %v9488_v22 = vmul.f32 %v12869_v36, %v9168_v31  ;;  %v8674_v39 = vmul.f32 1.0614054, %v16350_v33 }
 0xa5d   : > { %v9250_v5 = vsub.f32 0.0, %v16224_v30  ;;  %v16369_v53 = vmul.f32 %v9794_v34, %v16194_v32  ;;  %v9106_v2 = vadd.f32 0.2548296, %v9042_v45  ;;  %v8800_v54 = vmul.f32 %v16321_v49, %v8736_v1 }
 0xa5e   : > { %17950 = vst [vmem:[#allocation40_spill] sm:$0xff] %v16362_v29  ;;  %v16373_v37 = vand.u32 2147483647, %v16354_v10  ;;  %v9807_v48 = vadd.f32 1.0, %v9743_v41  ;;  %v9119_v60 = vadd.f32 0.2548296, %v9055_v13  ;;  %v8929_v61 = vmul.f32 %v16290_v35, %v8865_v4 }
 0xa5f   : > { %17952 = vst [vmem:[#allocation37_spill] sm:$0xff] %v16369_v53  ;;  %v16376_v11 = vmul.f32 0.5, %v16163_v12  ;;  %v16381_v42 = vpop.eup %12870  ;;  %v9745_v32 = vsel %vm9617_vm9, %v9553_v46, %v9681_v26  ;;  %vm9616_vm10 = vcmp.ge.f32.partialorder %v17954_v51, 0.0  ;;  %v9431_v0 = vmul.f32 1.442695, %v9313_v25 }
 0xa60   : > { %v9312_v15 = vmul.f32 %v9248_v38, %v16210_v24  ;;  %v16388_v55 = vmul.f32 0.70710677, %v16312_v8  ;;  %v9552_v34 = vsub.f32 1.0, %v9488_v22  ;;  %v16391_v12 = vmul.f32 0.5, %v16175_v21 }
 0xa61   : > { %v8738_v31 = vadd.f32 -1.4531521, %v8674_v39  ;;  %v9314_v45 = vmul.f32 %v9250_v5, %v16224_v30  ;;  %v9170_v1 = vmul.f32 %v16212_v44, %v9106_v2  ;;  %v8864_v41 = vadd.f32 1.4214138, %v8800_v54 }
 0xa62   : > { %v8627_v47 = vmul.f32 1.0614054, %v16381_v42  ;;  %v8372_v46 = vmul.f32 0.3275911, %v16373_v37  ;;  %v16398_v13 = vmul.f32 %v9807_v48, %v16204_v59  ;;  %v9809_v24 = vadd.f32 1.0, %v9745_v32  ;;  %v17956_v48 = vld [vmem:[#allocation42_spill] sm:$0xff] }
 0xa63   : > { %v9183_v4 = vmul.f32 %v16226_v18, %v9119_v60  ;;  %v8993_v36 = vadd.f32 -0.28449672, %v8929_v61  ;;  %v16401_v26 = vpop.eup %12872  ;;  %12878 = vpow2.f32 %v9431_v0  ;;  %v9429_v21 = vmul.f32 1.442695, %v9312_v15 }
 0xa64   : > { %17955 = vst [vmem:[#allocation39_spill] sm:$0xff] %v16398_v13  ;;  %v8691_v25 = vadd.f32 -1.4531521, %v8627_v47  ;;  %v16404_v44 = vand.u32 2147483647, %v16388_v55  ;;  %v12875_v30 = vpop.eup %12874  ;;  %v9680_v38 = vsub.f32 0.0, %v9552_v34  ;;  %v8802_v22 = vmul.f32 %v16350_v33, %v8738_v31 }
 0xa65   : > { %v9433_v59 = vmul.f32 1.442695, %v9314_v45  ;;  %v8629_v39 = vmul.f32 1.0614054, %v16401_v26  ;;  %v12877_v18 = vpop.eup %12876  ;;  %v16408_v5 = vmul.f32 %v12875_v30, %v9170_v1  ;;  %v8928_v2 = vmul.f32 %v16321_v49, %v8864_v41  ;;  %v12516_v31 = vld [vmem:[%s13220_s23 + $0x78] sm:$0xff]   ;;  %v17961_v13 = vld [vmem:[#allocation12_spill] sm:$0xff] }
 0xa66   : > { %v8436_v54 = vadd.f32 1.0, %v8372_v46  ;;  %v16413_v60 = vadd.f32 %v17956_v48, %v16259_v50  ;;  %v16415_v61 = vmul.f32 %v12877_v18, %v9183_v4  ;;  %v9057_v32 = vmul.f32 %v16290_v35, %v8993_v36  ;;  %v12517_v45 = vld [vmem:[%s13220_s23 + $0xf8] sm:$0xff]   ;;  %12024 = vmatprep.subr.bf16.mxu1 %v12516_v31  ;;  %v17958_v18 = vld [vmem:[#allocation44_spill] sm:$0xff] }
 0xa67   : > { %v8755_v0 = vmul.f32 %v16381_v42, %v8691_v25  ;;  %v9203_v15 = vsub.f32 0.0, %v16303_v40  ;;  %12880 = vpow2.f32 %v9429_v21  ;;  %v16423_v1 = vmul.f32 0.5, %v16191_v62  ;;  %v12518_v46 = vld [vmem:[%s13220_s23 + $0x38] sm:$0xff]   ;;  %12052 = vmatprep.subr.bf16.mxu0 %v12517_v45 }
 0xa68   : > { %v8693_v41 = vadd.f32 -1.4531521, %v8629_v39  ;;  %v8374_v47 = vmul.f32 0.3275911, %v16404_v44  ;;  %v16428_v4 = vmul.f32 %v9809_v24, %v16243_v19  ;;  %v9744_v36 = vsel %vm9616_vm10, %v9552_v34, %v9680_v38  ;;  %v12519_v21 = vld [vmem:[%s13220_s23 + $0xb8] sm:$0xff]   ;;  %12025 = vmatpush3.bf16.msra.mxu1 %v12518_v46 }
 0xa69   : > { %vm9618_vm11 = vcmp.ge.f32.partialorder %v16098_v20, 0.0  ;;  %v8866_v25 = vadd.f32 1.4214138, %v8802_v22  ;;  %12882 = vpow2.f32 %v9433_v59  ;;  %v9554_v62 = vsub.f32 1.0, %v16408_v5  ;;  %12053 = vmatpush3.bf16.msra.mxu0 %v12519_v21 }
 0xa6a   : > { %17957 = vst [vmem:[#allocation42_spill] sm:$0xff] %v16428_v4  ;;  %vm9631_vm12 = vcmp.ge.f32.partialorder %v16124_v23, 0.0  ;;  %v8992_v30 = vadd.f32 -0.28449672, %v8928_v2  ;;  %12884 = vrcp.f32 %v8436_v54  ;;  %v16437_v39 = vmul.f32 0.70710677, %v16413_v60 }
 0xa6b   : > { %v9567_v19 = vsub.f32 1.0, %v16415_v61  ;;  %v9121_v51 = vadd.f32 0.2548296, %v9057_v32  ;;  %v8819_v34 = vadd.f32 1.4214138, %v8755_v0  ;;  %v9267_v24 = vmul.f32 %v9203_v15, %v16303_v40  ;;  %v16454_v40 = vpop.f32.mrb[72].mxu1 }
 0xa6c   : > { %v8757_v38 = vmul.f32 %v16401_v26, %v8693_v41  ;;  %v8438_v22 = vadd.f32 1.0, %v8374_v47  ;;  %v16443_v59 = vand.u32 2147483647, %v16437_v39  ;;  %v16447_v5 = vadd.f32 %v17958_v18, %v16264_v52  ;;  %17959 = vst [vmem:[#allocation44_spill] sm:$0xff] %v16454_v40  ;;  %v16456_v32 = vpop.f32.mrb[60].mxu0 }
 0xa6d   : > { %v9808_v2 = vadd.f32 1.0, %v9744_v36  ;;  %v8930_v54 = vmul.f32 %v16350_v33, %v8866_v25  ;;  %v16451_v48 = vmul.f32 0.5, %v16277_v57  ;;  %v9205_v61 = vsub.f32 0.0, %v16308_v27  ;;  %17960 = vst [vmem:[#allocation61_spill] sm:$0xff] %v16456_v32  ;;  %v12879_v0 = vpop.eup %12878 }
 0xa6e   : > { %v9682_v15 = vsub.f32 0.0, %v9554_v62  ;;  %v9056_v31 = vmul.f32 %v16321_v49, %v8992_v30  ;;  %v16460_v45 = vmul.f32 0.5, %v16281_v28  ;;  %v8387_v41 = vmul.f32 0.3275911, %v16443_v59 }
 0xa6f   : > { %v9695_v47 = vsub.f32 0.0, %v9567_v19  ;;  %v9185_v46 = vmul.f32 %v16290_v35, %v9121_v51  ;;  %v8883_v57 = vmul.f32 %v16381_v42, %v8819_v34  ;;  %v9339_v36 = vmul.f32 1.442695, %v9267_v24 }
 0xa70   : > { %v8821_v25 = vadd.f32 1.4214138, %v8757_v38  ;;  %12886 = vrcp.f32 %v8438_v22  ;;  %v8451_v21 = vadd.f32 1.0, %v8387_v41  ;;  %v16466_v18 = vmul.f32 0.70710677, %v16447_v5 }
 0xa71   : > { %v8994_v4 = vadd.f32 -0.28449672, %v8930_v54  ;;  %v9269_v30 = vmul.f32 %v9205_v61, %v16308_v27  ;;  %v9204_v28 = vsub.f32 0.0, %v16373_v37  ;;  %v16472_v53 = vadd.f32 %v17961_v13, %v16319_v9  ;;  %v12881_v14 = vpop.eup %12880  ;;  %v17962_v54 = vld [vmem:[#allocation48_spill] sm:$0xff] }
 0xa72   : > { %v9746_v35 = vsel %vm9618_vm11, %v9554_v62, %v9682_v15  ;;  %v9120_v51 = vadd.f32 0.2548296, %v9056_v31  ;;  %12888 = vrcp.f32 %v8451_v21  ;;  %v16477_v34 = vand.u32 2147483647, %v16466_v18 }
 0xa73   : > { %v16479_v24 = vpop.eup %12882  ;;  %v9759_v27 = vsel %vm9631_vm12, %v9567_v19, %v9695_v47  ;;  %v9505_v38 = vmul.f32 %v12879_v0, %v9185_v46  ;;  %v8947_v22 = vadd.f32 -0.28449672, %v8883_v57  ;;  %v16485_v13 = vadd.f32 %v17962_v54, %v16286_v58 }
 0xa74   : > { %v16487_v61 = vpop.eup %12884  ;;  %v16490_v20 = vmul.f32 %v9808_v2, %v16270_v43  ;;  %12890 = vpow2.f32 %v9339_v36  ;;  %v8885_v62 = vmul.f32 %v16401_v26, %v8821_v25  ;;  %v8389_v15 = vmul.f32 0.3275911, %v16477_v34 }
 0xa75   : > { %v9058_v31 = vmul.f32 %v16350_v33, %v8994_v4  ;;  %v9343_v23 = vmul.f32 1.442695, %v9269_v30  ;;  %v9268_v19 = vmul.f32 %v9204_v28, %v16373_v37  ;;  %v16497_v0 = vmul.f32 0.70710677, %v16472_v53  ;;  %v12520_v30 = vld [vmem:[%s13220_s23 + $0x140] sm:$0xff]  }
 0xa76   : > { %17963 = vst [vmem:[#allocation12_spill] sm:$0xff] %v16490_v20  ;;  %v9810_v41 = vadd.f32 1.0, %v9746_v35  ;;  %v9823_v47 = vadd.f32 1.0, %v9759_v27  ;;  %vm9633_vm13 = vcmp.ge.f32.partialorder %v16171_v6, 0.0  ;;  %v9184_v43 = vmul.f32 %v16321_v49, %v9120_v51  ;;  %v12521_v28 = vld [vmem:[%s13220_s23 + $0x1c0] sm:$0xff]   ;;  %12066 = vmatprep.subr.bf16.mxu1 %v12520_v30 }
 0xa77   : > { %v8453_v2 = vadd.f32 1.0, %v8389_v15  ;;  %v9569_v46 = vsub.f32 1.0, %v9505_v38  ;;  %v9011_v57 = vmul.f32 %v16381_v42, %v8947_v22  ;;  %v8628_v4 = vmul.f32 1.0614054, %v16487_v61  ;;  %12094 = vmatprep.subr.bf16.mxu0 %v12521_v28 }
 0xa78   : > { %v16504_v36 = vand.u32 2147483647, %v16497_v0  ;;  %v8949_v37 = vadd.f32 -0.28449672, %v8885_v62  ;;  %v16507_v25 = vmul.f32 0.5, %v16338_v16  ;;  %v9219_v21 = vsub.f32 0.0, %v16443_v59 }
 0xa79   : > { %12892 = vrcp.f32 %v8453_v2  ;;  %v9122_v35 = vadd.f32 0.2548296, %v9058_v31  ;;  %v9341_v49 = vmul.f32 1.442695, %v9268_v19  ;;  %v16516_v38 = vmul.f32 %v9810_v41, %v16343_v63  ;;  %v16527_v19 = vpop.f32.mrb[73].mxu1 }
 0xa7a   : > { %12894 = vpow2.f32 %v9343_v23  ;;  %v8388_v51 = vmul.f32 0.3275911, %v16504_v36  ;;  %v16513_v27 = vpop.eup %12886  ;;  %v16518_v22 = vmul.f32 %v12881_v14, %v9184_v43  ;;  %v16521_v16 = vmul.f32 0.5, %v16312_v8  ;;  %17966 = vst [vmem:[#allocation63_spill] sm:$0xff] %v16527_v19  ;;  %v16536_v43 = vpop.f32.mrb[61].mxu0 }
 0xa7b   : > { %17964 = vst [vmem:[#allocation48_spill] sm:$0xff] %v16516_v38  ;;  %v9206_v54 = vsub.f32 0.0, %v16404_v44  ;;  %v16525_v62 = vmul.f32 %v9823_v47, %v16348_v3  ;;  %v9697_v15 = vsub.f32 0.0, %v9569_v46  ;;  %v9075_v31 = vadd.f32 0.2548296, %v9011_v57  ;;  %17967 = vst [vmem:[#allocation64_spill] sm:$0xff] %v16536_v43 }
 0xa7c   : > { %v8692_v23 = vadd.f32 -1.4531521, %v8628_v4  ;;  %v16529_v2 = vpop.eup %12888  ;;  %v9013_v14 = vmul.f32 %v16401_v26, %v8949_v37  ;;  %v9283_v63 = vmul.f32 %v9219_v21, %v16443_v59  ;;  %v8452_v8 = vadd.f32 1.0, %v8388_v51  ;;  %v17968_v37 = vld [vmem:[#allocation14_spill] sm:$0xff]  ;;  %v16622_v19 = vpop.f32.mrb[62].mxu0 }
 0xa7d   : > { %17965 = vst [vmem:[#allocation62_spill] sm:$0xff] %v16525_v62  ;;  %v16534_v41 = vmul.f32 0.70710677, %v16485_v13  ;;  %v9186_v3 = vmul.f32 %v16350_v33, %v9122_v35  ;;  %12896 = vpow2.f32 %v9341_v49  ;;  %v8630_v47 = vmul.f32 1.0614054, %v16513_v27 }
 0xa7e   : > { %v9221_v57 = vsub.f32 0.0, %v16477_v34  ;;  %v12891_v4 = vpop.eup %12890  ;;  %v9568_v30 = vsub.f32 1.0, %v16518_v22  ;;  %vm9632_vm14 = vcmp.ge.f32.partialorder %v16198_v17, 0.0  ;;  %v8643_v59 = vmul.f32 1.0614054, %v16529_v2 }
 0xa7f   : > { %12898 = vrcp.f32 %v8452_v8  ;;  %v16546_v21 = vadd.f32 %v17968_v37, %v16259_v50  ;;  %v9761_v33 = vsel %vm9633_vm13, %v9569_v46, %v9697_v15  ;;  %v9139_v28 = vmul.f32 %v16381_v42, %v9075_v31 }
 0xa80   : > { %v8756_v35 = vmul.f32 %v16487_v61, %v8692_v23  ;;  %v16553_v49 = vand.u32 2147483647, %v16534_v41  ;;  %v9077_v51 = vadd.f32 0.2548296, %v9013_v14  ;;  %v9270_v22 = vmul.f32 %v9206_v54, %v16404_v44 }
 0xa81   : > { %v8707_v62 = vadd.f32 -1.4531521, %v8643_v59  ;;  %v9371_v38 = vmul.f32 1.442695, %v9283_v63  ;;  %v16557_v8 = vmul.f32 %v16479_v24, %v9186_v3  ;;  %v8694_v37 = vadd.f32 -1.4531521, %v8630_v47 }
 0xa82   : > { %v9285_v20 = vmul.f32 %v9221_v57, %v16477_v34  ;;  %v8390_v6 = vmul.f32 0.3275911, %v16553_v49  ;;  %v16563_v42 = vadd.f32 1.0, %v9761_v33  ;;  %v9696_v15 = vsub.f32 0.0, %v9568_v30  ;;  %v17970_v33 = vld [vmem:[#allocation55_spill] sm:$0xff] }
 0xa83   : > { %v16561_v46 = vpop.eup %12892  ;;  %v8771_v31 = vmul.f32 %v16529_v2, %v8707_v62  ;;  %v16567_v23 = vmul.f32 0.70710677, %v16546_v21  ;;  %v16569_v54 = vmul.f32 %v12891_v4, %v9139_v28  ;;  %v8820_v24 = vadd.f32 1.4214138, %v8756_v35 }
 0xa84   : > { %v12895_v44 = vpop.eup %12894  ;;  %v8645_v14 = vmul.f32 1.0614054, %v16561_v46  ;;  %v8454_v63 = vadd.f32 1.0, %v8390_v6  ;;  %v9141_v34 = vmul.f32 %v16401_v26, %v9077_v51  ;;  %12900 = vpow2.f32 %v9371_v38  ;;  %v17971_v6 = vld [vmem:[#allocation15_spill] sm:$0xff] }
 0xa85   : > { %17969 = vst [vmem:[#allocation14_spill] sm:$0xff] %v16567_v23  ;;  %v8835_v3 = vadd.f32 1.4214138, %v8771_v31  ;;  %v16574_v47 = vand.u32 2147483647, %v16567_v23  ;;  %v8758_v57 = vmul.f32 %v16513_v27, %v8694_v37  ;;  %vm9634_vm15 = vcmp.ge.f32.partialorder %v17970_v33, 0.0 }
 0xa86   : > { %v8709_v62 = vadd.f32 -1.4531521, %v8645_v14  ;;  %v9375_v59 = vmul.f32 1.442695, %v9285_v20  ;;  %12902 = vrcp.f32 %v8454_v63  ;;  %v9345_v4 = vmul.f32 1.442695, %v9270_v22 }
 0xa87   : > { %v8899_v28 = vmul.f32 %v16529_v2, %v8835_v3  ;;  %v8403_v35 = vmul.f32 0.3275911, %v16574_v47  ;;  %v16582_v26 = vadd.f32 %v17971_v6, %v16264_v52  ;;  %v16584_v38 = vpop.eup %12896  ;;  %v9760_v51 = vsel %vm9632_vm14, %v9568_v30, %v9696_v15  ;;  %v16591_v22 = vpop.f32.mrb[74].mxu1  ;;  %v17973_v3 = vld [vmem:[#allocation19_spill] sm:$0xff] }
 0xa88   : > { %v9570_v37 = vsub.f32 1.0, %v16557_v8  ;;  %v8884_v20 = vmul.f32 %v16487_v61, %v8820_v24  ;;  %v8773_v31 = vmul.f32 %v16561_v46, %v8709_v62  ;;  %17972 = vst [vmem:[#allocation55_spill] sm:$0xff] %v16591_v22  ;;  %v9523_v63 = vsub.f32 1.0, %v16569_v54  ;;  %v17974_v8 = vld [vmem:[#allocation18_spill] sm:$0xff] }
 0xa89   : > { %v16593_v14 = vpop.eup %12898  ;;  %vm9587_vm0 = vcmp.ge.f32.partialorder %v17973_v3, 0.0  ;;  %v16597_v6 = vmul.f32 %v12895_v44, %v9141_v34  ;;  %v8963_v29 = vadd.f32 -0.28449672, %v8899_v28  ;;  %v8467_v43 = vadd.f32 1.0, %v8403_v35  ;;  %17978 = vst [vmem:[#allocation18_spill] sm:$0xff] %v16622_v19 }
 0xa8a   : > { %v8822_v17 = vadd.f32 1.4214138, %v8758_v57  ;;  %v8837_v30 = vadd.f32 1.4214138, %v8773_v31  ;;  %12904 = vpow2.f32 %v9375_v59  ;;  %v16601_v15 = vadd.f32 %v17974_v8, %v16319_v9  ;;  %v17976_v31 = vld [vmem:[#allocation49_spill] sm:$0xff] }
 0xa8b   : > { %v9027_v24 = vmul.f32 %v16529_v2, %v8963_v29  ;;  %v8644_v62 = vmul.f32 1.0614054, %v16593_v14  ;;  %12906 = vrcp.f32 %v8467_v43  ;;  %v16606_v54 = vmul.f32 0.70710677, %v16582_v26 }
 0xa8c   : > { %v16608_v22 = vadd.f32 1.0, %v9760_v51  ;;  %v9698_v44 = vsub.f32 0.0, %v9570_v37  ;;  %v16611_v34 = vmul.f32 0.5, %v16413_v60  ;;  %v8901_v57 = vmul.f32 %v16561_v46, %v8837_v30 }
 0xa8d   : > { %17975 = vst [vmem:[#allocation15_spill] sm:$0xff] %v16606_v54  ;;  %v8948_v59 = vadd.f32 -0.28449672, %v8884_v20  ;;  %12908 = vpow2.f32 %v9345_v4  ;;  %v9091_v28 = vadd.f32 0.2548296, %v9027_v24  ;;  %v9651_v29 = vsub.f32 0.0, %v9523_v63 }
 0xa8e   : > { %v16615_v35 = vand.u32 2147483647, %v16606_v54  ;;  %vm9589_vm2 = vcmp.ge.f32.partialorder %v17976_v31, 0.0  ;;  %v8886_v43 = vmul.f32 %v16513_v27, %v8822_v17  ;;  %v8965_v8 = vadd.f32 -0.28449672, %v8901_v57  ;;  %v12901_v60 = vpop.eup %12900 }
 0xa8f   : > { %v16620_v51 = vmul.f32 0.70710677, %v16601_v15  ;;  %v9525_v30 = vsub.f32 1.0, %v16597_v6  ;;  %v9155_v4 = vmul.f32 %v16529_v2, %v9091_v28  ;;  %v8708_v20 = vadd.f32 -1.4531521, %v8644_v62 }
 0xa90   : > { %v8405_v24 = vmul.f32 0.3275911, %v16615_v35  ;;  %v16627_v32 = vpop.eup %12902  ;;  %v16631_v40 = vsel %vm9634_vm15, %v9570_v37, %v9698_v44  ;;  %vm9603_vm3 = vcmp.ge.f32.partialorder %v16437_v39, 0.0  ;;  %v9029_v17 = vmul.f32 %v16561_v46, %v8965_v8 }
 0xa91   : > { %17977 = vst [vmem:[#allocation19_spill] sm:$0xff] %v16620_v51  ;;  %v16636_v57 = vand.u32 2147483647, %v16620_v51  ;;  %v9012_v6 = vmul.f32 %v16487_v61, %v8948_v59  ;;  %v9475_v19 = vmul.f32 %v12901_v60, %v9155_v4  ;;  %v8646_v2 = vmul.f32 1.0614054, %v16627_v32 }
 0xa92   : > { %v8469_v62 = vadd.f32 1.0, %v8405_v24  ;;  %v9715_v28 = vsel %vm9587_vm0, %v9523_v63, %v9651_v29  ;;  %v8950_v56 = vadd.f32 -0.28449672, %v8886_v43  ;;  %v9093_v33 = vadd.f32 0.2548296, %v9029_v17  ;;  %v17979_v43 = vld [vmem:[#allocation50_spill] sm:$0xff] }
 0xa93   : > { %v8404_v37 = vmul.f32 0.3275911, %v16636_v57  ;;  %v9653_v44 = vsub.f32 0.0, %v9525_v30  ;;  %v9539_v7 = vsub.f32 1.0, %v9475_v19  ;;  %v8772_v8 = vmul.f32 %v16593_v14, %v8708_v20 }
 0xa94   : > { %12910 = vrcp.f32 %v8469_v62  ;;  %v12905_v51 = vpop.eup %12904  ;;  %v9157_v54 = vmul.f32 %v16561_v46, %v9093_v33  ;;  %v9220_v59 = vsub.f32 0.0, %v16504_v36  ;;  %v8710_v60 = vadd.f32 -1.4531521, %v8646_v2  ;;  %v16654_v46 = vpop.f32.mrb[75].mxu1 }
 0xa95   : > { %v8468_v4 = vadd.f32 1.0, %v8404_v37  ;;  %v16646_v24 = vpop.eup %12906  ;;  %v9779_v3 = vadd.f32 1.0, %v9715_v28  ;;  %v9076_v63 = vadd.f32 0.2548296, %v9012_v6  ;;  %v9667_v29 = vsub.f32 0.0, %v9539_v7  ;;  %17980 = vst [vmem:[#allocation49_spill] sm:$0xff] %v16654_v46 }
 0xa96   : > { %v16650_v17 = vadd.f32 %v17979_v43, %v16286_v58  ;;  %v9014_v19 = vmul.f32 %v16513_v27, %v8950_v56  ;;  %v9477_v20 = vmul.f32 %v12905_v51, %v9157_v54  ;;  %v8659_v62 = vmul.f32 1.0614054, %v16646_v24 }
 0xa97   : > { %12912 = vrcp.f32 %v8468_v4  ;;  %v12909_v33 = vpop.eup %12908  ;;  %v9717_v2 = vsel %vm9589_vm2, %v9525_v30, %v9653_v44  ;;  %v9731_v6 = vsel %vm9603_vm3, %v9539_v7, %v9667_v29  ;;  %v8197_v28 = vmul.f32 0.5, %v16447_v5  ;;  %v16673_v44 = vpop.f32.mrb[63].mxu0 }
 0xa98   : > { %v8836_v37 = vadd.f32 1.4214138, %v8772_v8  ;;  %v9795_v43 = vadd.f32 1.0, %v9731_v6  ;;  %v9541_v23 = vsub.f32 1.0, %v9477_v20  ;;  %v9284_v56 = vmul.f32 %v9220_v59, %v16504_v36  ;;  %17983 = vst [vmem:[#allocation66_spill] sm:$0xff] %v16673_v44 }
 0xa99   : > { %v8774_v54 = vmul.f32 %v16627_v32, %v8710_v60  ;;  %v16664_v51 = vmul.f32 %v9779_v3, %v16451_v48  ;;  %v9140_v4 = vmul.f32 %v16487_v61, %v9076_v63  ;;  %v8723_v46 = vadd.f32 -1.4531521, %v8659_v62  ;;  %v17984_v61 = vld [vmem:[#allocation34_spill] sm:$0xff] }
 0xa9a   : > { %v16668_v31 = vmul.f32 0.70710677, %v16650_v17  ;;  %v9781_v39 = vadd.f32 1.0, %v9717_v2  ;;  %v9078_v7 = vadd.f32 0.2548296, %v9014_v19  ;;  %v16671_v5 = vmul.f32 %v9795_v43, %v16611_v34 }
 0xa9b   : > { %17981 = vst [vmem:[#allocation50_spill] sm:$0xff] %v16664_v51  ;;  %v9669_v30 = vsub.f32 0.0, %v9541_v23  ;;  %vm9605_vm4 = vcmp.ge.f32.partialorder %v16466_v18, 0.0  ;;  %v8900_v36 = vmul.f32 %v16593_v14, %v8836_v37  ;;  %v16682_v8 = vadd.f32 %v17984_v61, %v16259_v50 }
 0xa9c   : > { %17982 = vst [vmem:[#allocation65_spill] sm:$0xff] %v16671_v5  ;;  %v16678_v48 = vand.u32 2147483647, %v16668_v31  ;;  %v8838_v34 = vadd.f32 1.4214138, %v8774_v54  ;;  %v9222_v3 = vsub.f32 0.0, %v16553_v49  ;;  %v8787_v19 = vmul.f32 %v16646_v24, %v8723_v46 }
 0xa9d   : > { %v9733_v60 = vsel %vm9605_vm4, %v9541_v23, %v9669_v30  ;;  %v9373_v18 = vmul.f32 1.442695, %v9284_v56  ;;  %v16692_v62 = vmul.f32 %v9781_v39, %v16460_v45  ;;  %v9460_v50 = vmul.f32 %v16584_v38, %v9140_v4 }
 0xa9e   : > { %v16687_v63 = vpop.eup %12910  ;;  %v9797_v29 = vadd.f32 1.0, %v9733_v60  ;;  %v8406_v20 = vmul.f32 0.3275911, %v16678_v48  ;;  %v9142_v2 = vmul.f32 %v16513_v27, %v9078_v7  ;;  %v8964_v37 = vadd.f32 -0.28449672, %v8900_v36 }
 0xa9f   : > { %17985 = vst [vmem:[#allocation34_spill] sm:$0xff] %v16692_v62  ;;  %v8661_v23 = vmul.f32 1.0614054, %v16687_v63  ;;  %v16700_v54 = vmul.f32 0.70710677, %v16682_v8  ;;  %v8902_v46 = vmul.f32 %v16627_v32, %v8838_v34  ;;  %v9286_v45 = vmul.f32 %v9222_v3, %v16553_v49 }
 0xaa0   : > { %v16697_v6 = vmul.f32 %v9797_v29, %v8197_v28  ;;  %v8470_v43 = vadd.f32 1.0, %v8406_v20  ;;  %v9235_v39 = vsub.f32 0.0, %v16574_v47  ;;  %v8851_v4 = vadd.f32 1.4214138, %v8787_v19  ;;  %v17987_v20 = vld [vmem:[#allocation38_spill] sm:$0xff] }
 0xaa1   : > { %v16702_v56 = vpop.eup %12912  ;;  %v8725_v38 = vadd.f32 -1.4531521, %v8661_v23  ;;  %v9826_v7 = vadd.f32 1.0, %v16631_v40  ;;  %v9524_v30 = vsub.f32 1.0, %v9460_v50  ;;  %vm9588_vm5 = vcmp.ge.f32.partialorder %v16354_v10, 0.0 }
 0xaa2   : > { %17986 = vst [vmem:[#allocation67_spill] sm:$0xff] %v16697_v6  ;;  %v8660_v28 = vmul.f32 1.0614054, %v16702_v56  ;;  %12914 = vrcp.f32 %v8470_v43  ;;  %v9462_v61 = vmul.f32 %v12909_v33, %v9142_v2  ;;  %v9028_v49 = vmul.f32 %v16593_v14, %v8964_v37 }
 0xaa3   : > { %12916 = vpow2.f32 %v9373_v18  ;;  %v8789_v36 = vmul.f32 %v16687_v63, %v8725_v38  ;;  %v16715_v34 = vand.u32 2147483647, %v16700_v54  ;;  %v8966_v3 = vadd.f32 -0.28449672, %v8902_v46 }
 0xaa4   : > { %v8724_v60 = vadd.f32 -1.4531521, %v8660_v28  ;;  %v9377_v29 = vmul.f32 1.442695, %v9286_v45  ;;  %v9299_v19 = vmul.f32 %v9235_v39, %v16574_v47  ;;  %v16720_v40 = vadd.f32 %v17987_v20, %v16264_v52 }
 0xaa5   : > { %v16724_v18 = vmul.f32 %v16563_v42, %v16376_v11  ;;  %v8915_v33 = vmul.f32 %v16646_v24, %v8851_v4  ;;  %v9237_v50 = vsub.f32 0.0, %v16615_v35  ;;  %v8419_v2 = vmul.f32 0.3275911, %v16715_v34 }
 0xaa6   : > { %v16731_v23 = vmul.f32 %v16608_v22, %v16391_v12  ;;  %v16734_v47 = vmul.f32 %v9826_v7, %v16423_v1  ;;  %v8853_v37 = vadd.f32 1.4214138, %v8789_v36  ;;  %v8788_v52 = vmul.f32 %v16702_v56, %v8724_v60 }
 0xaa7   : > { %17988 = vst [vmem:[#allocation38_spill] sm:$0xff] %v16724_v18  ;;  %v9652_v43 = vsub.f32 0.0, %v9524_v30  ;;  %v9092_v46 = vadd.f32 0.2548296, %v9028_v49  ;;  %v8483_v11 = vadd.f32 1.0, %v8419_v2  ;;  %v9526_v45 = vsub.f32 1.0, %v9462_v61 }
 0xaa8   : > { %17989 = vst [vmem:[#allocation68_spill] sm:$0xff] %v16731_v23  ;;  %17990 = vst [vmem:[#allocation69_spill] sm:$0xff] %v16734_v47  ;;  %v16738_v42 = vmul.f32 0.70710677, %v16720_v40  ;;  %vm9590_vm6 = vcmp.ge.f32.partialorder %v16388_v55, 0.0  ;;  %v9030_v39 = vmul.f32 %v16627_v32, %v8966_v3  ;;  %12918 = vpow2.f32 %v9377_v29 }
 0xaa9   : > { %v9403_v12 = vmul.f32 1.442695, %v9299_v19  ;;  %v8979_v22 = vadd.f32 -0.28449672, %v8915_v33  ;;  %v9301_v1 = vmul.f32 %v9237_v50, %v16615_v35  ;;  %12920 = vrcp.f32 %v8483_v11  ;;  %v17991_v33 = vld [vmem:[#allocation22_spill] sm:$0xff] }
 0xaaa   : > { %v16744_v38 = vand.u32 2147483647, %v16738_v42  ;;  %v16747_v4 = vmul.f32 0.5, %v16472_v53  ;;  %v8917_v28 = vmul.f32 %v16687_v63, %v8853_v37  ;;  %v8852_v7 = vadd.f32 1.4214138, %v8788_v52 }
 0xaab   : > { %v9236_v36 = vsub.f32 0.0, %v16636_v57  ;;  %v9716_v49 = vsel %vm9588_vm5, %v9524_v30, %v9652_v43  ;;  %v9156_v60 = vmul.f32 %v16593_v14, %v9092_v46  ;;  %v16757_v35 = vmul.f32 0.5, %v16485_v13 }
 0xaac   : > { %v16751_v61 = vpop.eup %12914  ;;  %v8421_v3 = vmul.f32 0.3275911, %v16744_v38  ;;  %v9654_v53 = vsub.f32 0.0, %v9526_v45  ;;  %v9094_v19 = vadd.f32 0.2548296, %v9030_v39  ;;  %v16763_v50 = vadd.f32 %v17991_v33, %v16319_v9 }
 0xaad   : > { %v12917_v29 = vpop.eup %12916  ;;  %v8662_v20 = vmul.f32 1.0614054, %v16751_v61  ;;  %v9043_v2 = vmul.f32 %v16646_v24, %v8979_v22  ;;  %12922 = vpow2.f32 %v9403_v12  ;;  %v9407_v10 = vmul.f32 1.442695, %v9301_v1  ;;  %v17992_v22 = vld [vmem:[#allocation41_spill] sm:$0xff] }
 0xaae   : > { %v8485_v30 = vadd.f32 1.0, %v8421_v3  ;;  %v8981_v14 = vadd.f32 -0.28449672, %v8917_v28  ;;  %v8916_v13 = vmul.f32 %v16702_v56, %v8852_v7  ;;  %v9300_v37 = vmul.f32 %v9236_v36, %v16636_v57  ;;  %v17993_v7 = vld [vmem:[#allocation7_spill] sm:$0xff] }
 0xaaf   : > { %v8726_v52 = vadd.f32 -1.4531521, %v8662_v20  ;;  %v9780_v43 = vadd.f32 1.0, %v9716_v49  ;;  %v9476_v46 = vmul.f32 %v12917_v29, %v9156_v60  ;;  %v16769_v11 = vmul.f32 0.5, %v16546_v21  ;;  %v17995_v36 = vld [vmem:[#allocation59_spill] sm:$0xff]  ;;  %v17996_v20 = vld [vmem:[#allocation54_spill] sm:$0xff] }
 0xab0   : > { %12924 = vrcp.f32 %v8485_v30  ;;  %v9158_v9 = vmul.f32 %v16627_v32, %v9094_v19  ;;  %v16774_v12 = vmul.f32 0.70710677, %v16763_v50  ;;  %v16778_v1 = vadd.f32 %v17992_v22, %v16286_v58 }
 0xab1   : > { %v8790_v39 = vmul.f32 %v16751_v61, %v8726_v52  ;;  %v9718_v57 = vsel %vm9590_vm6, %v9526_v45, %v9654_v53  ;;  %v9107_v28 = vadd.f32 0.2548296, %v9043_v2  ;;  %12926 = vpow2.f32 %v9407_v10 }
 0xab2   : > { %v17994_v21 = vsub.s32 4, %v17993_v7  ;;  %v12919_v32 = vpop.eup %12918  ;;  %v9045_v60 = vmul.f32 %v16687_v63, %v8981_v14  ;;  %v8980_v3 = vadd.f32 -0.28449672, %v8916_v13  ;;  %v9405_v29 = vmul.f32 1.442695, %v9300_v37 }
 0xab3   : > { %v16789_v19 = vand.u32 2147483647, %v16774_v12  ;;  %v16791_v58 = vpop.eup %12920  ;;  %vm9604_vm7 = vcmp.ge.f32.partialorder %v16497_v0, 0.0  ;;  %v8854_v55 = vadd.f32 1.4214138, %v8790_v39  ;;  %v9238_v45 = vsub.f32 0.0, %v16678_v48 }
 0xab4   : > { %v16785_v49 = vrot.slane %v17995_v36, %v17994_v21  ;;  %v16796_v53 = vmul.f32 0.70710677, %v16778_v1  ;;  %v9540_v2 = vsub.f32 1.0, %v9476_v46  ;;  %v9478_v10 = vmul.f32 %v12919_v32, %v9158_v9 }
 0xab5   : > { %v8675_v30 = vmul.f32 1.0614054, %v16791_v58  ;;  %v8420_v14 = vmul.f32 0.3275911, %v16789_v19  ;;  %v9782_v13 = vadd.f32 1.0, %v9718_v57  ;;  %v9171_v37 = vmul.f32 %v16646_v24, %v9107_v28 }
 0xab6   : > { %v16800_v33 = vadd.f32 %v17996_v20, %v16785_v49  ;;  %v16806_v52 = vmul.f32 0.5, %v16582_v26  ;;  %v16809_v39 = vand.u32 2147483647, %v16796_v53  ;;  %v9109_v22 = vadd.f32 0.2548296, %v9045_v60 }
 0xab7   : > { %v9044_v21 = vmul.f32 %v16702_v56, %v8980_v3  ;;  %v8739_v36 = vadd.f32 -1.4531521, %v8675_v30  ;;  %v8484_v20 = vadd.f32 1.0, %v8420_v14  ;;  %v12923_v46 = vpop.eup %12922  ;;  %vm9606_vm8 = vcmp.ge.f32.partialorder %v16534_v41, 0.0 }
 0xab8   : > { %12928 = vpow2.f32 %v9405_v29  ;;  %v8918_v9 = vmul.f32 %v16751_v61, %v8854_v55  ;;  %v9302_v57 = vmul.f32 %v9238_v45, %v16678_v48  ;;  %v8422_v24 = vmul.f32 0.3275911, %v16809_v39 }
 0xab9   : > { %v9668_v26 = vsub.f32 0.0, %v9540_v2  ;;  %v9542_v28 = vsub.f32 1.0, %v9478_v10  ;;  %v8803_v32 = vmul.f32 %v16791_v58, %v8739_v36  ;;  %12930 = vrcp.f32 %v8484_v20 }
 0xaba   : > { %v16817_v60 = vpop.eup %12924  ;;  %v16820_v3 = vmul.f32 %v9780_v43, %v16507_v25  ;;  %v16823_v30 = vmul.f32 0.5, %v16601_v15  ;;  %v9251_v29 = vsub.f32 0.0, %v16715_v34  ;;  %v8486_v55 = vadd.f32 1.0, %v8422_v24 }
 0xabb   : > { %v9491_v14 = vmul.f32 %v12923_v46, %v9171_v37  ;;  %v9173_v48 = vmul.f32 %v16687_v63, %v9109_v22  ;;  %v9108_v45 = vadd.f32 0.2548296, %v9044_v21  ;;  %v8867_v10 = vadd.f32 1.4214138, %v8803_v32  ;;  %v12927_v27 = vpop.eup %12926  ;;  %v17999_v63 = vld [vmem:[#allocation14_spill] sm:$0xff] }
 0xabc   : > { %17997 = vst [vmem:[#allocation22_spill] sm:$0xff] %v16820_v3  ;;  %v16828_v36 = vmul.f32 %v9782_v13, %v16521_v16  ;;  %v8982_v20 = vadd.f32 -0.28449672, %v8918_v9  ;;  %v8677_v25 = vmul.f32 1.0614054, %v16817_v60  ;;  %v9732_v15 = vsel %vm9604_vm7, %v9540_v2, %v9668_v26  ;;  %v13021_v13 = vld [vmem:[%s13214_s15 + $0x8] sm:$0xff] }
 0xabd   : > { %v16832_v43 = vmul.f32 0.70710677, %v16800_v33  ;;  %v9670_v24 = vsub.f32 0.0, %v9542_v28  ;;  %v9409_v37 = vmul.f32 1.442695, %v9302_v57  ;;  %12932 = vrcp.f32 %v8486_v55 }
 0xabe   : > { %17998 = vst [vmem:[#allocation41_spill] sm:$0xff] %v16828_v36  ;;  %vm9619_vm9 = vcmp.ge.f32.partialorder %v17999_v63, 0.0  ;;  %v9315_v22 = vmul.f32 %v9251_v29, %v16715_v34  ;;  %v8741_v21 = vadd.f32 -1.4531521, %v8677_v25  ;;  %v18000_v46 = vsub.s32 6, %v17993_v7  ;;  %v18001_v25 = vld [vmem:[#allocation27_spill] sm:$0xff] }
 0xabf   : > { %v16839_v16 = vand.u32 2147483647, %v16832_v43  ;;  %v9555_v32 = vsub.f32 1.0, %v9491_v14  ;;  %v9493_v59 = vmul.f32 %v12927_v27, %v9173_v48  ;;  %v16847_v0 = vmul.f32 0.5, %v16650_v17 }
 0xac0   : > { %v16844_v9 = vrot.slane %v13021_v13, %v18000_v46  ;;  %v8931_v2 = vmul.f32 %v16791_v58, %v8867_v10  ;;  %v9796_v57 = vadd.f32 1.0, %v9732_v15  ;;  %v9172_v26 = vmul.f32 %v16702_v56, %v9108_v45  ;;  %v18003_v10 = vld [vmem:[#allocation15_spill] sm:$0xff] }
 0xac1   : > { %v9046_v34 = vmul.f32 %v16751_v61, %v8982_v20  ;;  %v8375_v29 = vmul.f32 0.3275911, %v16839_v16  ;;  %v9734_v55 = vsel %vm9606_vm8, %v9542_v28, %v9670_v24  ;;  %12934 = vpow2.f32 %v9409_v37 }
 0xac2   : > { %v16857_v14 = vadd.f32 %v18001_v25, %v16844_v9  ;;  %v18002_v17 = vsub.s32 5, %v17993_v7  ;;  %v12929_v48 = vpop.eup %12928  ;;  %vm9621_vm10 = vcmp.ge.f32.partialorder %v18003_v10, 0.0  ;;  %v9435_v56 = vmul.f32 1.442695, %v9315_v22  ;;  %v18009_v10 = vld [vmem:[#allocation57_spill] sm:$0xff] }
 0xac3   : > { %v8805_v45 = vmul.f32 %v16817_v60, %v8741_v21  ;;  %v9253_v20 = vsub.f32 0.0, %v16744_v38  ;;  %v8439_v15 = vadd.f32 1.0, %v8375_v29  ;;  %v16866_v41 = vpop.eup %12930  ;;  %v9683_v28 = vsub.f32 0.0, %v9555_v32 }
 0xac4   : > { %v16861_v27 = vrot.slane %v13021_v13, %v18002_v17  ;;  %v9557_v24 = vsub.f32 1.0, %v9493_v59  ;;  %v8995_v37 = vadd.f32 -0.28449672, %v8931_v2  ;;  %v16869_v46 = vmul.f32 0.70710677, %v16857_v14  ;;  %v18005_v59 = vld [vmem:[#allocation30_spill] sm:$0xff] }
 0xac5   : > { %v9492_v25 = vmul.f32 %v12929_v48, %v9172_v26  ;;  %v9110_v17 = vadd.f32 0.2548296, %v9046_v34  ;;  %v8676_v62 = vmul.f32 1.0614054, %v16866_v41  ;;  %12936 = vrcp.f32 %v8439_v15 }
 0xac6   : > { %v16873_v22 = vmul.f32 %v9796_v57, %v16747_v4  ;;  %v16876_v21 = vmul.f32 0.5, %v16682_v8  ;;  %v16879_v29 = vand.u32 2147483647, %v16869_v46  ;;  %v16883_v2 = vadd.f32 %v18005_v59, %v16861_v27  ;;  %v18006_v57 = vld [vmem:[#allocation19_spill] sm:$0xff] }
 0xac7   : > { %v9798_v6 = vadd.f32 1.0, %v9734_v55  ;;  %v16886_v26 = vmul.f32 0.5, %v16720_v40  ;;  %v8869_v34 = vadd.f32 1.4214138, %v8805_v45  ;;  %v9317_v48 = vmul.f32 %v9253_v20, %v16744_v38  ;;  %v16889_v15 = vpop.eup %12932 }
 0xac8   : > { %18004 = vst [vmem:[#allocation7_spill] sm:$0xff] %v16873_v22  ;;  %v9747_v8 = vsel %vm9619_vm9, %v9555_v32, %v9683_v28  ;;  %v9685_v4 = vsub.f32 0.0, %v9557_v24  ;;  %vm9620_vm11 = vcmp.ge.f32.partialorder %v18006_v57, 0.0  ;;  %v9059_v51 = vmul.f32 %v16791_v58, %v8995_v37  ;;  %v18011_v57 = vld [vmem:[#allocation8_spill] sm:$0xff] }
 0xac9   : > { %v8377_v59 = vmul.f32 0.3275911, %v16879_v29  ;;  %v9556_v5 = vsub.f32 1.0, %v9492_v25  ;;  %v9174_v55 = vmul.f32 %v16751_v61, %v9110_v17  ;;  %12938 = vpow2.f32 %v9435_v56 }
 0xaca   : > { %v8740_v40 = vadd.f32 -1.4531521, %v8676_v62  ;;  %v8678_v45 = vmul.f32 1.0614054, %v16889_v15  ;;  %v16899_v20 = vmul.f32 0.70710677, %v16883_v2  ;;  %v16906_v28 = vmul.f32 %v9798_v6, %v16757_v35 }
 0xacb   : > { %v8441_v38 = vadd.f32 1.0, %v8377_v59  ;;  %v18007_v63 = vsub.s32 7, %v17993_v7  ;;  %v9811_v37 = vadd.f32 1.0, %v9747_v8  ;;  %v8933_v25 = vmul.f32 %v16817_v60, %v8869_v34  ;;  %v12935_v61 = vpop.eup %12934 }
 0xacc   : > { %18008 = vst [vmem:[#allocation59_spill] sm:$0xff] %v16906_v28  ;;  %v9439_v36 = vmul.f32 1.442695, %v9317_v48  ;;  %v9749_v62 = vsel %vm9621_vm10, %v9557_v24, %v9685_v4  ;;  %v9123_v56 = vadd.f32 0.2548296, %v9059_v51  ;;  %v9684_v59 = vsub.f32 0.0, %v9556_v5 }
 0xacd   : > { %v16903_v32 = vrot.slane %v13021_v13, %v18007_v63  ;;  %12940 = vrcp.f32 %v8441_v38  ;;  %v16912_v17 = vand.u32 2147483647, %v16899_v20  ;;  %v16914_v7 = vmul.f32 %v12935_v61, %v9174_v55 }
 0xace   : > { %v8804_v13 = vmul.f32 %v16866_v41, %v8740_v40  ;;  %v9252_v6 = vsub.f32 0.0, %v16789_v19  ;;  %v16919_v35 = vmul.f32 0.5, %v16763_v50  ;;  %v8742_v34 = vadd.f32 -1.4531521, %v8678_v45 }
 0xacf   : > { %v8376_v48 = vmul.f32 0.3275911, %v16912_v17  ;;  %v16924_v51 = vadd.f32 %v18009_v10, %v16903_v32  ;;  %v16926_v24 = vpop.eup %12936  ;;  %v16929_v8 = vmul.f32 %v9811_v37, %v16769_v11  ;;  %v9813_v4 = vadd.f32 1.0, %v9749_v62 }
 0xad0   : > { %v8997_v55 = vadd.f32 -0.28449672, %v8933_v25  ;;  %12942 = vpow2.f32 %v9439_v36  ;;  %v9187_v40 = vmul.f32 %v16791_v58, %v9123_v56  ;;  %v8631_v50 = vmul.f32 1.0614054, %v16926_v24 }
 0xad1   : > { %18010 = vst [vmem:[#allocation54_spill] sm:$0xff] %v16929_v8  ;;  %v9207_v45 = vsub.f32 0.0, %v16839_v16  ;;  %v8440_v38 = vadd.f32 1.0, %v8376_v48  ;;  %v9748_v63 = vsel %vm9620_vm11, %v9556_v5, %v9684_v59  ;;  %v9558_v61 = vsub.f32 1.0, %v16914_v7 }
 0xad2   : > { %v8868_v10 = vadd.f32 1.4214138, %v8804_v13  ;;  %v9316_v28 = vmul.f32 %v9252_v6, %v16789_v19  ;;  %v8806_v11 = vmul.f32 %v16889_v15, %v8742_v34  ;;  %v8695_v37 = vadd.f32 -1.4531521, %v8631_v50 }
 0xad3   : > { %12944 = vrcp.f32 %v8440_v38  ;;  %v16940_v36 = vmul.f32 0.70710677, %v16924_v51  ;;  %v12939_v58 = vpop.eup %12938  ;;  %v9061_v25 = vmul.f32 %v16817_v60, %v8997_v55  ;;  %v16944_v62 = vmul.f32 0.5, %v16778_v1 }
 0xad4   : > { %v9254_v5 = vsub.f32 0.0, %v16809_v39  ;;  %v16949_v56 = vadd.f32 %v18011_v57, %v16785_v49  ;;  %vm9622_vm12 = vcmp.ge.f32.partialorder %v16668_v31, 0.0  ;;  %v9507_v19 = vmul.f32 %v12939_v58, %v9187_v40 }
 0xad5   : > { %v8759_v59 = vmul.f32 %v16926_v24, %v8695_v37  ;;  %v9271_v7 = vmul.f32 %v9207_v45, %v16839_v16  ;;  %v16955_v13 = vand.u32 2147483647, %v16940_v36  ;;  %v9812_v6 = vadd.f32 1.0, %v9748_v63 }
 0xad6   : > { %v9686_v34 = vsub.f32 0.0, %v9558_v61  ;;  %v8932_v1 = vmul.f32 %v16866_v41, %v8868_v10  ;;  %v9437_v48 = vmul.f32 1.442695, %v9316_v28  ;;  %v16961_v50 = vmul.f32 %v9813_v4, %v16806_v52 }
 0xad7   : > { %v16958_v55 = vpop.eup %12940  ;;  %v8870_v38 = vadd.f32 1.4214138, %v8806_v11  ;;  %v8823_v57 = vadd.f32 1.4214138, %v8759_v59  ;;  %v8378_v40 = vmul.f32 0.3275911, %v16955_v13  ;;  %v9318_v16 = vmul.f32 %v9254_v5, %v16809_v39 }
 0xad8   : > { %18012 = vst [vmem:[#allocation14_spill] sm:$0xff] %v16961_v50  ;;  %v9125_v37 = vadd.f32 0.2548296, %v9061_v25  ;;  %v8633_v45 = vmul.f32 1.0614054, %v16958_v55  ;;  %v9571_v58 = vsub.f32 1.0, %v9507_v19  ;;  %12946 = vpow2.f32 %v9437_v48 }
 0xad9   : > { %v16967_v63 = vmul.f32 0.70710677, %v16949_v56  ;;  %vm9635_vm13 = vcmp.ge.f32.partialorder %v16700_v54, 0.0  ;;  %v8887_v28 = vmul.f32 %v16926_v24, %v8823_v57  ;;  %v9347_v10 = vmul.f32 1.442695, %v9271_v7 }
 0xada   : > { %v8442_v52 = vadd.f32 1.0, %v8378_v40  ;;  %v12943_v4 = vpop.eup %12942  ;;  %v8996_v11 = vadd.f32 -0.28449672, %v8932_v1  ;;  %v8697_v59 = vadd.f32 -1.4531521, %v8633_v45  ;;  %v8934_v39 = vmul.f32 %v16889_v15, %v8870_v38  ;;  %v18013_v45 = vld [vmem:[#allocation35_spill] sm:$0xff] }
 0xadb   : > { %v16972_v25 = vand.u32 2147483647, %v16967_v63  ;;  %v8951_v5 = vadd.f32 -0.28449672, %v8887_v28  ;;  %v9209_v50 = vsub.f32 0.0, %v16879_v29  ;;  %v9189_v19 = vmul.f32 %v16817_v60, %v9125_v37 }
 0xadc   : > { %12948 = vrcp.f32 %v8442_v52  ;;  %v9441_v8 = vmul.f32 1.442695, %v9318_v16  ;;  %v8761_v57 = vmul.f32 %v16958_v55, %v8697_v59  ;;  %v16982_v1 = vmul.f32 0.5, %v16800_v33 }
 0xadd   : > { %v8391_v7 = vmul.f32 0.3275911, %v16972_v25  ;;  %v16979_v40 = vpop.eup %12944  ;;  %v9015_v48 = vmul.f32 %v16926_v24, %v8951_v5  ;;  %v9208_v38 = vsub.f32 0.0, %v16912_v17  ;;  %v16988_v28 = vadd.f32 %v18013_v45, %v16844_v9 }
 0xade   : > { %v9750_v60 = vsel %vm9622_vm12, %v9558_v61, %v9686_v34  ;;  %v9699_v37 = vsub.f32 0.0, %v9571_v58  ;;  %v9060_v16 = vmul.f32 %v16866_v41, %v8996_v11  ;;  %12950 = vpow2.f32 %v9347_v10 }
 0xadf   : > { %v8998_v52 = vadd.f32 -0.28449672, %v8934_v39  ;;  %v8825_v59 = vadd.f32 1.4214138, %v8761_v57  ;;  %v9273_v33 = vmul.f32 %v9209_v50, %v16879_v29  ;;  %v8455_v22 = vadd.f32 1.0, %v8391_v7 }
 0xae0   : > { %v16995_v5 = vmul.f32 %v9812_v6, %v16823_v30  ;;  %v9509_v3 = vmul.f32 %v12943_v4, %v9189_v19  ;;  %12952 = vpow2.f32 %v9441_v8  ;;  %v8632_v45 = vmul.f32 1.0614054, %v16979_v40 }
 0xae1   : > { %v9079_v18 = vadd.f32 0.2548296, %v9015_v48  ;;  %v16999_v31 = vmul.f32 0.5, %v16857_v14  ;;  %v9272_v61 = vmul.f32 %v9208_v38, %v16912_v17  ;;  %12954 = vrcp.f32 %v8455_v22  ;;  %v18015_v14 = vld [vmem:[#allocation16_spill] sm:$0xff] }
 0xae2   : > { %18014 = vst [vmem:[#allocation27_spill] sm:$0xff] %v16995_v5  ;;  %v9814_v34 = vadd.f32 1.0, %v9750_v60  ;;  %v9763_v10 = vsel %vm9635_vm13, %v9571_v58, %v9699_v37  ;;  %v9124_v29 = vadd.f32 0.2548296, %v9060_v16  ;;  %v17005_v50 = vmul.f32 0.70710677, %v16988_v28  ;;  %v12947_v22 = vpop.eup %12946 }
 0xae3   : > { %vm9637_vm14 = vcmp.ge.f32.partialorder %v16738_v42, 0.0  ;;  %v9062_v30 = vmul.f32 %v16889_v15, %v8998_v52  ;;  %v8889_v8 = vmul.f32 %v16958_v55, %v8825_v59  ;;  %v9351_v6 = vmul.f32 1.442695, %v9273_v33 }
 0xae4   : > { %v17012_v4 = vadd.f32 %v18015_v14, %v16861_v27  ;;  %v9573_v17 = vsub.f32 1.0, %v9509_v3  ;;  %v17015_v54 = vmul.f32 0.5, %v16883_v2  ;;  %v8696_v58 = vadd.f32 -1.4531521, %v8632_v45 }
 0xae5   : > { %v17018_v11 = vand.u32 2147483647, %v17005_v50  ;;  %v9827_v19 = vadd.f32 1.0, %v9763_v10  ;;  %v9143_v57 = vmul.f32 %v16926_v24, %v9079_v18  ;;  %v9349_v7 = vmul.f32 1.442695, %v9272_v61 }
 0xae6   : > { %v17020_v39 = vpop.eup %12948  ;;  %v17024_v48 = vmul.f32 0.70710677, %v17012_v4  ;;  %v9188_v38 = vmul.f32 %v16866_v41, %v9124_v29  ;;  %v9210_v2 = vsub.f32 0.0, %v16955_v13  ;;  %v17031_v37 = vmul.f32 %v9814_v34, %v16847_v0 }
 0xae7   : > { %v8634_v3 = vmul.f32 1.0614054, %v17020_v39  ;;  %v8393_v60 = vmul.f32 0.3275911, %v17018_v11  ;;  %v9126_v16 = vadd.f32 0.2548296, %v9062_v30  ;;  %v8760_v33 = vmul.f32 %v16979_v40, %v8696_v58 }
 0xae8   : > { %18016 = vst [vmem:[#allocation15_spill] sm:$0xff] %v17031_v37  ;;  %v8953_v52 = vadd.f32 -0.28449672, %v8889_v8  ;;  %v17034_v59 = vand.u32 2147483647, %v17024_v48  ;;  %v12951_v18 = vpop.eup %12950  ;;  %v9701_v24 = vsub.f32 0.0, %v9573_v17  ;;  %12956 = vpow2.f32 %v9351_v6 }
 0xae9   : > { %v9223_v41 = vsub.f32 0.0, %v16972_v25  ;;  %v8457_v45 = vadd.f32 1.0, %v8393_v60  ;;  %v9463_v61 = vmul.f32 %v12951_v18, %v9143_v57  ;;  %v17039_v10 = vmul.f32 0.5, %v16924_v51 }
 0xaea   : > { %v8392_v0 = vmul.f32 0.3275911, %v17034_v59  ;;  %v12953_v34 = vpop.eup %12952  ;;  %v17043_v29 = vmul.f32 %v9827_v19, %v16876_v21  ;;  %v9508_v30 = vmul.f32 %v12947_v22, %v9188_v38  ;;  %v8698_v8 = vadd.f32 -1.4531521, %v8634_v3 }
 0xaeb   : > { %v9274_v14 = vmul.f32 %v9210_v2, %v16955_v13  ;;  %v17046_v37 = vpop.eup %12954  ;;  %v9190_v58 = vmul.f32 %v16889_v15, %v9126_v16  ;;  %v9017_v57 = vmul.f32 %v16958_v55, %v8953_v52  ;;  %12958 = vrcp.f32 %v8457_v45  ;;  %v18018_v15 = vld [vmem:[#allocation60_spill] sm:$0xff] }
 0xaec   : > { %18017 = vst [vmem:[#allocation30_spill] sm:$0xff] %v17043_v29  ;;  %v8456_v6 = vadd.f32 1.0, %v8392_v0  ;;  %v9765_v51 = vsel %vm9637_vm14, %v9573_v17, %v9701_v24  ;;  %vm9591_vm15 = vcmp.ge.f32.partialorder %v16832_v43, 0.0  ;;  %v8824_v60 = vadd.f32 1.4214138, %v8760_v33  ;;  %v18019_v24 = vld [vmem:[#allocation44_spill] sm:$0xff] }
 0xaed   : > { %12960 = vpow2.f32 %v9349_v7  ;;  %v9287_v21 = vmul.f32 %v9223_v41, %v16972_v25  ;;  %v9527_v22 = vsub.f32 1.0, %v9463_v61  ;;  %v17055_v13 = vmul.f32 0.5, %v16949_v56 }
 0xaee   : > { %v8647_v19 = vmul.f32 1.0614054, %v17046_v37  ;;  %v17060_v38 = vadd.f32 %v18018_v15, %v16903_v32  ;;  %v9572_v3 = vsub.f32 1.0, %v9508_v30  ;;  %vm9636_vm0 = vcmp.ge.f32.partialorder %v16774_v12, 0.0 }
 0xaef   : > { %v8762_v42 = vmul.f32 %v17020_v39, %v8698_v8  ;;  %v9353_v17 = vmul.f32 1.442695, %v9274_v14  ;;  %12962 = vrcp.f32 %v8456_v6  ;;  %v17064_v7 = vmul.f32 %v12953_v34, %v9190_v58 }
 0xaf0   : > { %v9081_v25 = vadd.f32 0.2548296, %v9017_v57  ;;  %v8711_v2 = vadd.f32 -1.4531521, %v8647_v19  ;;  %v17067_v56 = vmul.f32 0.70710677, %v17060_v38  ;;  %v8888_v16 = vmul.f32 %v16979_v40, %v8824_v60 }
 0xaf1   : > { %v9379_v52 = vmul.f32 1.442695, %v9287_v21  ;;  %v9225_v18 = vsub.f32 0.0, %v17018_v11  ;;  %v17073_v33 = vadd.f32 %v18019_v24, %v16785_v49  ;;  %v17075_v41 = vadd.f32 1.0, %v9765_v51 }
 0xaf2   : > { %v9655_v45 = vsub.f32 0.0, %v9527_v22  ;;  %v8775_v61 = vmul.f32 %v17046_v37, %v8711_v2  ;;  %v17079_v0 = vand.u32 2147483647, %v17067_v56  ;;  %v9700_v34 = vsub.f32 0.0, %v9572_v3  ;;  %v12957_v14 = vpop.eup %12956 }
 0xaf3   : > { %18020 = vst [vmem:[#allocation19_spill] sm:$0xff] %v17073_v33  ;;  %v8826_v30 = vadd.f32 1.4214138, %v8762_v42  ;;  %12964 = vpow2.f32 %v9353_v17  ;;  %v17082_v8 = vmul.f32 0.70710677, %v17073_v33  ;;  %v17780_v58 = vsub.f32 1.0, %v17064_v7 }
 0xaf4   : > { %v9145_v57 = vmul.f32 %v16958_v55, %v9081_v25  ;;  %v8839_v6 = vadd.f32 1.4214138, %v8775_v61  ;;  %v8394_v51 = vmul.f32 0.3275911, %v17079_v0  ;;  %v8952_v60 = vadd.f32 -0.28449672, %v8888_v16 }
 0xaf5   : > { %18021 = vst [vmem:[#allocation57_spill] sm:$0xff] %v17082_v8  ;;  %12966 = vpow2.f32 %v9379_v52  ;;  %v9289_v21 = vmul.f32 %v9225_v18, %v17018_v11  ;;  %v17089_v19 = vand.u32 2147483647, %v17082_v8  ;;  %v17091_v15 = vpop.eup %12958  ;;  %v9719_v42 = vsel %vm9591_vm15, %v9527_v22, %v9655_v45  ;;  %v18022_v55 = vld [vmem:[#allocation61_spill] sm:$0xff] }
 0xaf6   : > { %v8903_v17 = vmul.f32 %v17046_v37, %v8839_v6  ;;  %v8458_v2 = vadd.f32 1.0, %v8394_v51  ;;  %v17098_v25 = vadd.f32 %v18022_v55, %v16844_v9  ;;  %v8890_v16 = vmul.f32 %v17020_v39, %v8826_v30 }
 0xaf7   : > { %v17100_v24 = vpop.eup %12960  ;;  %v8649_v11 = vmul.f32 1.0614054, %v17091_v15  ;;  %v9224_v52 = vsub.f32 0.0, %v17034_v59  ;;  %v8407_v18 = vmul.f32 0.3275911, %v17089_v19  ;;  %v17108_v43 = vsel %vm9636_vm0, %v9572_v3, %v9700_v34 }
 0xaf8   : > { %18023 = vst [vmem:[#allocation8_spill] sm:$0xff] %v17098_v25  ;;  %v17110_v22 = vmul.f32 %v12957_v14, %v9145_v57  ;;  %v8967_v45 = vadd.f32 -0.28449672, %v8903_v17  ;;  %12968 = vrcp.f32 %v8458_v2  ;;  %v9016_v6 = vmul.f32 %v16979_v40, %v8952_v60  ;;  %v18024_v2 = vld [vmem:[#allocation23_spill] sm:$0xff] }
 0xaf9   : > { %v17112_v61 = vpop.eup %12962  ;;  %v8713_v51 = vadd.f32 -1.4531521, %v8649_v11  ;;  %v9383_v30 = vmul.f32 1.442695, %v9289_v21  ;;  %v8471_v55 = vadd.f32 1.0, %v8407_v18  ;;  %v17117_v33 = vsub.f32 0.0, %v17780_v58 }
 0xafa   : > { %v9783_v8 = vadd.f32 1.0, %v9719_v42  ;;  %v9031_v12 = vmul.f32 %v17046_v37, %v8967_v45  ;;  %v8648_v3 = vmul.f32 1.0614054, %v17112_v61  ;;  %v8954_v34 = vadd.f32 -0.28449672, %v8890_v16  ;;  %v18025_v42 = vld [vmem:[#allocation45_spill] sm:$0xff] }
 0xafb   : > { %v8777_v14 = vmul.f32 %v17091_v15, %v8713_v51  ;;  %v9288_v57 = vmul.f32 %v9224_v52, %v17034_v59  ;;  %12970 = vrcp.f32 %v8471_v55  ;;  %vm9593_vm2 = vcmp.ge.f32.partialorder %v16869_v46, 0.0  ;;  %v12522_v18 = vld [vmem:[%s13220_s23 + $0x100] sm:$0xff]   ;;  %v18026_v59 = vld [vmem:[#allocation43_spill] sm:$0xff]  ;;  %v12533_v46 = vld [vmem:[%s13220_s23 + $0x1d8] sm:$0xff]  }
 0xafc   : > { %v9095_v21 = vadd.f32 0.2548296, %v9031_v12  ;;  %v8712_v17 = vadd.f32 -1.4531521, %v8648_v3  ;;  %v9900_v11 = vpack.c.bf16 %v18025_v42, %v18024_v2  ;;  %v9080_v16 = vadd.f32 0.2548296, %v9016_v6 }
 0xafd   : > { %v17128_v45 = vpop.eup %12964  ;;  %vm9607_vm3 = vcmp.ge.f32.partialorder %v16967_v63, 0.0  ;;  %v8841_v51 = vadd.f32 1.4214138, %v8777_v14  ;;  %12972 = vpow2.f32 %v9383_v30  ;;  %v18027_v52 = vld [vmem:[#allocation46_spill] sm:$0xff]  ;;  %v12524_v12 = vld [vmem:[%s13220_s23 + $0x148] sm:$0xff]   ;;  %v17150_v29 = vmul.f32 0.5, %v16988_v28 }
 0xafe   : > { %v9902_v55 = vpack.c.bf16 %v18027_v52, %v18026_v59  ;;  %v12523_v58 = vld [vmem:[%s13220_s23 + $0x180] sm:$0xff]   ;;  %v9159_v3 = vmul.f32 %v17046_v37, %v9095_v21  ;;  %v8776_v60 = vmul.f32 %v17112_v61, %v8712_v17  ;;  %v17138_v2 = vmul.f32 0.70710677, %v17098_v25  ;;  %10994 = vmatprep.mubr.bf16.mxu1 %v9900_v11  ;;  %v18029_v6 = vld [vmem:[#allocation63_spill] sm:$0xff]  ;;  %v18032_v21 = vld [vmem:[#allocation29_spill] sm:$0xff] }
 0xaff   : > { %v17142_v42 = vadd.f32 %v18029_v6, %v16861_v27  ;;  %v12525_v30 = vld [vmem:[%s13220_s23 + $0x1c8] sm:$0xff]   ;;  %v12967_v14 = vpop.eup %12966  ;;  %v17146_v59 = vmul.f32 %v9783_v8, %v16982_v1  ;;  %v9018_v52 = vmul.f32 %v17020_v39, %v8954_v34  ;;  %v8905_v37 = vmul.f32 %v17091_v15, %v8841_v51  ;;  %v18033_v17 = vld [vmem:[#allocation28_spill] sm:$0xff] }
 0xb00   : > { %18028 = vst [vmem:[#allocation35_spill] sm:$0xff] %v17138_v2  ;;  %11043 = vmatprep.mubr.bf16.mxu0 %v9902_v55  ;;  %v18034_v11 = vpack.c.bf16 %v18032_v21, %v18033_v17  ;;  %v12526_v6 = vld [vmem:[%s13220_s23 + $0x108] sm:$0xff]   ;;  %v9479_v5 = vmul.f32 %v12967_v14, %v9159_v3  ;;  %v8840_v47 = vadd.f32 1.4214138, %v8776_v60  ;;  %v9381_v23 = vmul.f32 1.442695, %v9288_v57 }
 0xb01   : > { %18030 = vst [vmem:[#allocation16_spill] sm:$0xff] %v17142_v42  ;;  %18031 = vst [vmem:[#allocation60_spill] sm:$0xff] %v17146_v59  ;;  %v12527_v25 = vld [vmem:[%s13220_s23 + $0x188] sm:$0xff]   ;;  %v17159_v1 = vand.u32 2147483647, %v17138_v2  ;;  %v18035_v8 = vld [vmem:[#allocation32_spill] sm:$0xff]  ;;  %v9144_v21 = vmul.f32 %v16979_v40, %v9080_v16 }
 0xb02   : > { %10995 = vmatmul.mubr.bf16.vlgmr.msra.gmra.mrb[76].mxu1 %v18034_v11  ;;  %v18036_v34 = vld [vmem:[#allocation31_spill] sm:$0xff]  ;;  %v18038_v51 = vsub.f32 1.0, %v17110_v22  ;;  %v8969_v17 = vadd.f32 -0.28449672, %v8905_v37  ;;  %v17168_v3 = vmul.f32 0.70710677, %v17142_v42  ;;  %v17171_v60 = vpop.eup %12968  ;;  %v8904_v11 = vmul.f32 %v17112_v61, %v8840_v47 }
 0xb03   : > { %v18037_v28 = vpack.c.bf16 %v18035_v8, %v18036_v34  ;;  %12067 = vmatpush3.bf16.msra.mxu1 %v12522_v18  ;;  %v12528_v57 = vld [vmem:[%s13220_s23 + $0x150] sm:$0xff]   ;;  %v9543_v14 = vsub.f32 1.0, %v9479_v5  ;;  %v9226_v18 = vsub.f32 0.0, %v17079_v0  ;;  %v8409_v8 = vmul.f32 0.3275911, %v17159_v1  ;;  %v18084_v59 = vld [vmem:[#allocation57_spill] sm:$0xff] }
 0xb04   : > { %v9657_v55 = vsub.f32 0.0, %v18038_v51  ;;  %18039 = vst [vmem:[#allocation44_spill] sm:$0xff] %v17168_v3  ;;  %12068 = vmatprep.subr.bf16.mxu1 %v12524_v12  ;;  %v12529_v40 = vld [vmem:[%s13220_s23 + $0x1d0] sm:$0xff]   ;;  %vm9638_vm4 = vcmp.ge.f32.partialorder %v16796_v53, 0.0  ;;  %v9082_v37 = vadd.f32 0.2548296, %v9018_v52  ;;  %12974 = vpow2.f32 %v9381_v23 }
 0xb05   : > { %11044 = vmatmul.mubr.bf16.vlgmr.msra.gmra.mrb[64].mxu0 %v18037_v28  ;;  %v12530_v16 = vld [vmem:[%s13220_s23 + $0x110] sm:$0xff]   ;;  %v8650_v12 = vmul.f32 1.0614054, %v17171_v60  ;;  %v17182_v5 = vand.u32 2147483647, %v17168_v3  ;;  %v9671_v47 = vsub.f32 0.0, %v9543_v14  ;;  %v17186_v42 = vpop.eup %12970 }
 0xb06   : > { %12095 = vmatpush3.bf16.msra.mxu0 %v12523_v58  ;;  %v9033_v58 = vmul.f32 %v17091_v15, %v8969_v17  ;;  %v8968_v34 = vadd.f32 -0.28449672, %v8904_v11  ;;  %v8473_v28 = vadd.f32 1.0, %v8409_v8  ;;  %v12531_v51 = vld [vmem:[%s13220_s23 + $0x190] sm:$0xff]   ;;  %v18040_v2 = vsub.f32 1.0, %v17110_v22  ;;  %v12539_v53 = vld [vmem:[%s13220_s23 + $0x1a0] sm:$0xff]  }
 0xb07   : > { %12096 = vmatprep.subr.bf16.mxu0 %v12525_v30  ;;  %12069 = vmatpush3.bf16.msra.mxu1 %v12526_v6  ;;  %v12532_v30 = vld [vmem:[%s13220_s23 + $0x158] sm:$0xff]   ;;  %v8714_v44 = vadd.f32 -1.4531521, %v8650_v12  ;;  %v8408_v3 = vmul.f32 0.3275911, %v17182_v5  ;;  %v9735_v23 = vsel %vm9607_vm3, %v9543_v14, %v9671_v47  ;;  %vm9609_vm5 = vcmp.ge.f32.partialorder %v17005_v50, 0.0  ;;  %v12973_v22 = vpop.eup %12972 }
 0xb08   : > { %v9721_v52 = vsel %vm9593_vm2, %v18040_v2, %v9657_v55  ;;  %v9097_v17 = vadd.f32 0.2548296, %v9033_v58  ;;  %12070 = vmatprep.subr.bf16.mxu1 %v12528_v57  ;;  %v9290_v6 = vmul.f32 %v9226_v18, %v17079_v0  ;;  %v8663_v11 = vmul.f32 1.0614054, %v17186_v42  ;;  %v18041_v0 = vld [vmem:[#allocation64_spill] sm:$0xff]  ;;  %v12535_v58 = vld [vmem:[%s13220_s23 + $0x198] sm:$0xff]  }
 0xb09   : > { %12976 = vrcp.f32 %v8473_v28  ;;  %v9146_v2 = vmul.f32 %v17020_v39, %v9082_v37  ;;  %v9799_v55 = vadd.f32 1.0, %v9735_v23  ;;  %v8778_v63 = vmul.f32 %v17171_v60, %v8714_v44 }
 0xb0a   : > { %12097 = vmatpush3.bf16.msra.mxu0 %v12527_v25  ;;  %v9161_v25 = vmul.f32 %v17091_v15, %v9097_v17  ;;  %v9032_v57 = vmul.f32 %v17112_v61, %v8968_v34  ;;  %v8727_v14 = vadd.f32 -1.4531521, %v8663_v11  ;;  %v8472_v8 = vadd.f32 1.0, %v8408_v3  ;;  %v12536_v3 = vld [vmem:[%s13220_s23 + $0x160] sm:$0xff]  }
 0xb0b   : > { %12098 = vmatprep.subr.bf16.mxu0 %v12529_v40  ;;  %v17205_v18 = vadd.f32 %v18041_v0, %v16903_v32  ;;  %12071 = vmatpush3.bf16.msra.mxu1 %v12530_v16  ;;  %v12534_v40 = vld [vmem:[%s13220_s23 + $0x118] sm:$0xff]   ;;  %v17209_v39 = vmul.f32 %v17100_v24, %v9144_v21  ;;  %v17212_v37 = vmul.f32 %v9799_v55, %v17055_v13  ;;  %v8842_v44 = vadd.f32 1.4214138, %v8778_v63  ;;  %v12537_v16 = vld [vmem:[%s13220_s23 + $0x1e0] sm:$0xff]  }
 0xb0c   : > { %v9481_v15 = vmul.f32 %v12973_v22, %v9161_v25  ;;  %12072 = vmatprep.subr.bf16.mxu1 %v12532_v30  ;;  %v9385_v12 = vmul.f32 1.442695, %v9290_v6  ;;  %v8791_v47 = vmul.f32 %v17186_v42, %v8727_v14  ;;  %v9239_v34 = vsub.f32 0.0, %v17089_v19  ;;  %v18043_v22 = vld [vmem:[#allocation55_spill] sm:$0xff]  ;;  %v18044_v55 = vld [vmem:[#allocation18_spill] sm:$0xff] }
 0xb0d   : > { %12978 = vrcp.f32 %v8472_v8  ;;  %v17220_v24 = vmul.f32 %v17128_v45, %v9146_v2  ;;  %v8906_v28 = vmul.f32 %v17171_v60, %v8842_v44  ;;  %v18042_v30 = vsub.f32 1.0, %v17064_v7  ;;  %v12540_v7 = vld [vmem:[%s13220_s23 + $0x168] sm:$0xff]  }
 0xb0e   : > { %12099 = vmatpush3.bf16.msra.mxu0 %v12531_v51  ;;  %v9545_v21 = vsub.f32 1.0, %v9481_v15  ;;  %v12538_v51 = vld [vmem:[%s13220_s23 + $0x120] sm:$0xff]   ;;  %v9096_v23 = vadd.f32 0.2548296, %v9032_v57  ;;  %v8855_v6 = vadd.f32 1.4214138, %v8791_v47  ;;  %v17236_v2 = vadd.f32 %v18043_v22, %v16785_v49 }
 0xb0f   : > { %12100 = vmatprep.subr.bf16.mxu0 %v12533_v46  ;;  %v9766_v17 = vsel %vm9638_vm4, %v18042_v30, %v17117_v33  ;;  %v17232_v45 = vmul.f32 0.70710677, %v17205_v18  ;;  %12073 = vmatpush3.bf16.msra.mxu1 %v12534_v40  ;;  %v8970_v46 = vadd.f32 -0.28449672, %v8906_v28  ;;  %v17240_v25 = vadd.f32 %v18044_v55, %v16844_v9  ;;  %v12975_v33 = vpop.eup %12974  ;;  %v12541_v14 = vld [vmem:[%s13220_s23 + $0x1e8] sm:$0xff]  }
 0xb10   : > { %v9673_v11 = vsub.f32 0.0, %v9545_v21  ;;  %12074 = vmatprep.subr.bf16.mxu1 %v12536_v3  ;;  %v9785_v63 = vadd.f32 1.0, %v9721_v52  ;;  %vm9592_vm6 = vcmp.ge.f32.partialorder %v16899_v20, 0.0  ;;  %vm9594_vm7 = vcmp.ge.f32.partialorder %v16940_v36, 0.0  ;;  %v12542_v3 = vld [vmem:[%s13220_s23 + $0x128] sm:$0xff]   ;;  %v12552_v20 = vld [vmem:[%s13220_s23 + $0x240] sm:$0xff]  }
 0xb11   : > { %v8919_v57 = vmul.f32 %v17186_v42, %v8855_v6  ;;  %v9303_v49 = vmul.f32 %v9239_v34, %v17089_v19  ;;  %v17249_v9 = vand.u32 2147483647, %v17232_v45  ;;  %v9528_v8 = vsub.f32 1.0, %v17209_v39  ;;  %v12543_v47 = vld [vmem:[%s13220_s23 + $0x1a8] sm:$0xff]   ;;  %v12544_v39 = vld [vmem:[%s13220_s23 + $0x170] sm:$0xff]  }
 0xb12   : > { %12101 = vmatpush3.bf16.msra.mxu0 %v12535_v58  ;;  %v9530_v52 = vsub.f32 1.0, %v17220_v24  ;;  %v9737_v0 = vsel %vm9609_vm5, %v9545_v21, %v9673_v11  ;;  %v9034_v40 = vmul.f32 %v17171_v60, %v8970_v46  ;;  %v9160_v19 = vmul.f32 %v17112_v61, %v9096_v23  ;;  %v12546_v46 = vld [vmem:[%s13220_s23 + $0x130] sm:$0xff]  }
 0xb13   : > { %12102 = vmatprep.subr.bf16.mxu0 %v12537_v16  ;;  %v17257_v15 = vpop.eup %12976  ;;  %v9801_v44 = vadd.f32 1.0, %v9737_v0  ;;  %12980 = vpow2.f32 %v9385_v12  ;;  %v8410_v58 = vmul.f32 0.3275911, %v17249_v9  ;;  %12075 = vmatpush3.bf16.msra.mxu1 %v12538_v51  ;;  %v9828_v34 = vadd.f32 1.0, %v17108_v43  ;;  %v12545_v51 = vld [vmem:[%s13220_s23 + $0x1f0] sm:$0xff]  }
 0xb14   : > { %v9830_v16 = vadd.f32 1.0, %v9766_v17  ;;  %v8983_v50 = vadd.f32 -0.28449672, %v8919_v57  ;;  %v8665_v24 = vmul.f32 1.0614054, %v17257_v15  ;;  %12076 = vmatprep.subr.bf16.mxu1 %v12540_v7  ;;  %v17267_v21 = vmul.f32 %v9785_v63, %v16999_v31  ;;  %v12548_v63 = vld [vmem:[%s13220_s23 + $0x178] sm:$0xff]  }
 0xb15   : > { %v17270_v61 = vmul.f32 %v9801_v44, %v17150_v29  ;;  %v9411_v12 = vmul.f32 1.442695, %v9303_v49  ;;  %v8474_v28 = vadd.f32 1.0, %v8410_v58  ;;  %v9656_v30 = vsub.f32 0.0, %v9528_v8  ;;  %v12549_v49 = vld [vmem:[%s13220_s23 + $0x1f8] sm:$0xff]   ;;  %v18080_v31 = vld [vmem:[#allocation14_spill] sm:$0xff] }
 0xb16   : > { %12103 = vmatpush3.bf16.msra.mxu0 %v12539_v53  ;;  %18045 = vst [vmem:[#allocation61_spill] sm:$0xff] %v17267_v21  ;;  %v9658_v23 = vsub.f32 0.0, %v9530_v52  ;;  %v9098_v43 = vadd.f32 0.2548296, %v9034_v40  ;;  %v8729_v17 = vadd.f32 -1.4531521, %v8665_v24  ;;  %v17277_v11 = vmul.f32 %v12975_v33, %v9160_v19 }
 0xb17   : > { %18046 = vst [vmem:[#allocation23_spill] sm:$0xff] %v17270_v61  ;;  %12104 = vmatprep.subr.bf16.mxu0 %v12541_v14  ;;  %v17273_v6 = vpop.eup %12978  ;;  %12982 = vrcp.f32 %v8474_v28  ;;  %v17280_v29 = vmul.f32 0.70710677, %v17236_v2  ;;  %12077 = vmatpush3.bf16.msra.mxu1 %v12542_v3  ;;  %v17285_v22 = vmul.f32 %v17075_v41, %v16886_v26  ;;  %v9047_v55 = vmul.f32 %v17186_v42, %v8983_v50  ;;  %v12547_v33 = vld [vmem:[%s13220_s23 + $0x1b0] sm:$0xff]   ;;  %v12551_v19 = vld [vmem:[%s13220_s23 + $0x1b8] sm:$0xff]   ;;  %v12553_v24 = vld [vmem:[%s13220_s23 + $0x2c0] sm:$0xff]  }
 0xb18   : > { %v8793_v53 = vmul.f32 %v17257_v15, %v8729_v17  ;;  %v8664_v7 = vmul.f32 1.0614054, %v17273_v6  ;;  %12078 = vmatprep.subr.bf16.mxu1 %v12544_v39  ;;  %v17293_v57 = vmul.f32 %v9828_v34, %v16919_v35  ;;  %12984 = vpow2.f32 %v9411_v12  ;;  %v12550_v35 = vld [vmem:[%s13220_s23 + $0x138] sm:$0xff]   ;;  %v12562_v61 = vld [vmem:[%s13220_s23 + $0x210] sm:$0xff]  }
 0xb19   : > { %v9241_v26 = vsub.f32 0.0, %v17159_v1  ;;  %v17297_v41 = vand.u32 2147483647, %v17280_v29  ;;  %v9720_v14 = vsel %vm9592_vm6, %v9528_v8, %v9656_v30  ;;  %v9722_v0 = vsel %vm9594_vm7, %v9530_v52, %v9658_v23 }
 0xb1a   : > { %12105 = vmatpush3.bf16.msra.mxu0 %v12543_v47  ;;  %v9162_v40 = vmul.f32 %v17171_v60, %v9098_v43  ;;  %v8857_v44 = vadd.f32 1.4214138, %v8793_v53  ;;  %v17308_v58 = vmul.f32 %v9830_v16, %v16944_v62  ;;  %v9544_v3 = vsub.f32 1.0, %v17277_v11  ;;  %v18047_v43 = vld [vmem:[#allocation49_spill] sm:$0xff] }
 0xb1b   : > { %12106 = vmatprep.subr.bf16.mxu0 %v12545_v51  ;;  %v8728_v47 = vadd.f32 -1.4531521, %v8664_v7  ;;  %v8423_v39 = vmul.f32 0.3275911, %v17297_v41  ;;  %12079 = vmatpush3.bf16.msra.mxu1 %v12546_v46  ;;  %v17314_v8 = vmul.f32 0.5, %v17012_v4  ;;  %vm9608_vm8 = vcmp.ge.f32.partialorder %v17024_v48, 0.0 }
 0xb1c   : > { %v9111_v36 = vadd.f32 0.2548296, %v9047_v55  ;;  %v17318_v60 = vmul.f32 0.70710677, %v17240_v25  ;;  %12080 = vmatprep.subr.bf16.mxu1 %v12548_v63  ;;  %v9784_v52 = vadd.f32 1.0, %v9720_v14  ;;  %v9786_v34 = vadd.f32 1.0, %v9722_v0 }
 0xb1d   : > { %v12981_v62 = vpop.eup %12980  ;;  %v9305_v16 = vmul.f32 %v9241_v26, %v17159_v1  ;;  %v8487_v50 = vadd.f32 1.0, %v8423_v39  ;;  %v8921_v4 = vmul.f32 %v17257_v15, %v8857_v44  ;;  %v9240_v28 = vsub.f32 0.0, %v17182_v5  ;;  %v18050_v39 = vld [vmem:[#allocation26_spill] sm:$0xff] }
 0xb1e   : > { %12107 = vmatpush3.bf16.msra.mxu0 %v12547_v33  ;;  %v9482_v12 = vmul.f32 %v12981_v62, %v9162_v40  ;;  %v8361_v51 = vand.u32 2147483647, %v17318_v60  ;;  %v9672_v30 = vsub.f32 0.0, %v9544_v3  ;;  %v8792_v23 = vmul.f32 %v17273_v6, %v8728_v47 }
 0xb1f   : > { %12108 = vmatprep.subr.bf16.mxu0 %v12549_v49  ;;  %12986 = vrcp.f32 %v8487_v50  ;;  %v17328_v17 = vadd.f32 %v18047_v43, %v16861_v27  ;;  %12081 = vmatpush3.bf16.msra.mxu1 %v12550_v35  ;;  %v17331_v1 = vmul.f32 0.5, %v17060_v38  ;;  %v9175_v11 = vmul.f32 %v17186_v42, %v9111_v36  ;;  %v18048_v35 = vld [vmem:[#allocation66_spill] sm:$0xff] }
 0xb20   : > { %v9242_v46 = vsub.f32 0.0, %v17249_v9  ;;  %v8425_v55 = vmul.f32 0.3275911, %v8361_v51  ;;  %12122 = vmatprep.subr.bf16.mxu1 %v12552_v20  ;;  %v17338_v7 = vmul.f32 %v9784_v52, %v17015_v54  ;;  %v17341_v33 = vmul.f32 %v9786_v34, %v17039_v10 }
 0xb21   : > { %v17335_v53 = vpop.eup %12982  ;;  %vm9610_vm9 = vcmp.ge.f32.partialorder %v17067_v56, 0.0  ;;  %v9415_v27 = vmul.f32 1.442695, %v9305_v16  ;;  %v9546_v38 = vsub.f32 1.0, %v9482_v12  ;;  %v8985_v63 = vadd.f32 -0.28449672, %v8921_v4 }
 0xb22   : > { %12109 = vmatpush3.bf16.msra.mxu0 %v12551_v19  ;;  %v9304_v42 = vmul.f32 %v9240_v28, %v17182_v5  ;;  %v8489_v26 = vadd.f32 1.0, %v8425_v55  ;;  %v12985_v49 = vpop.eup %12984  ;;  %v9736_v14 = vsel %vm9608_vm8, %v9544_v3, %v9672_v30  ;;  %v8856_v0 = vadd.f32 1.4214138, %v8792_v23  ;;  %v18049_v3 = vld [vmem:[#allocation33_spill] sm:$0xff]  ;;  %v18051_v4 = vld [vmem:[#allocation20_spill] sm:$0xff]  ;;  %v18053_v55 = vld [vmem:[#allocation47_spill] sm:$0xff] }
 0xb23   : > { %12150 = vmatprep.subr.bf16.mxu0 %v12553_v24  ;;  %v8666_v54 = vmul.f32 1.0614054, %v17335_v53  ;;  %v17349_v40 = vmul.f32 0.70710677, %v17328_v17  ;;  %v17351_v10 = vmul.f32 %v12985_v49, %v9175_v11  ;;  %v9306_v44 = vmul.f32 %v9242_v46, %v17249_v9  ;;  %v18052_v28 = vld [vmem:[#allocation56_spill] sm:$0xff] }
 0xb24   : > { %12988 = vrcp.f32 %v8489_v26  ;;  %v17356_v19 = vadd.f32 %v18048_v35, %v16903_v32  ;;  %v9255_v47 = vsub.f32 0.0, %v17297_v41  ;;  %v9916_v20 = vpack.c.bf16 %v18050_v39, %v18049_v3 }
 0xb25   : > { %v8730_v5 = vadd.f32 -1.4531521, %v8666_v54  ;;  %v17360_v48 = vand.u32 2147483647, %v17349_v40  ;;  %v9674_v36 = vsub.f32 0.0, %v9546_v38  ;;  %v9049_v62 = vmul.f32 %v17257_v15, %v8985_v63 }
 0xb26   : > { %12990 = vpow2.f32 %v9415_v27  ;;  %v9413_v52 = vmul.f32 1.442695, %v9304_v42  ;;  %v8920_v9 = vmul.f32 %v17273_v6, %v8856_v0  ;;  %v9257_v32 = vsub.f32 0.0, %v8361_v51  ;;  %11002 = vmatprep.mubr.bf16.mxu1 %v9916_v20  ;;  %v18054_v27 = vld [vmem:[#allocation21_spill] sm:$0xff] }
 0xb27   : > { %v8794_v34 = vmul.f32 %v17335_v53, %v8730_v5  ;;  %v8424_v16 = vmul.f32 0.3275911, %v17360_v48  ;;  %v9800_v50 = vadd.f32 1.0, %v9736_v14  ;;  %v9417_v24 = vmul.f32 1.442695, %v9306_v44  ;;  %v18055_v20 = vld [vmem:[#allocation17_spill] sm:$0xff] }
 0xb28   : > { %v17369_v12 = vmul.f32 0.70710677, %v17356_v19  ;;  %v9918_v30 = vpack.c.bf16 %v18052_v28, %v18051_v4  ;;  %v17787_v43 = vsub.f32 1.0, %v17351_v10  ;;  %v9319_v11 = vmul.f32 %v9255_v47, %v17297_v41  ;;  %v18058_v4 = vld [vmem:[#allocation40_spill] sm:$0xff] }
 0xb29   : > { %v17373_v23 = vpop.eup %12986  ;;  %v8488_v46 = vadd.f32 1.0, %v8424_v16  ;;  %v9915_v63 = vpack.c.bf16 %v18054_v27, %v18053_v55  ;;  %v9738_v42 = vsel %vm9610_vm9, %v9546_v38, %v9674_v36  ;;  %v9113_v26 = vadd.f32 0.2548296, %v9049_v62  ;;  %v18056_v36 = vld [vmem:[#allocation53_spill] sm:$0xff]  ;;  %v18059_v55 = vld [vmem:[#allocation36_spill] sm:$0xff] }
 0xb2a   : > { %v8679_v49 = vmul.f32 1.0614054, %v17373_v23  ;;  %v17383_v14 = vand.u32 2147483647, %v17369_v12  ;;  %11051 = vmatprep.mubr.bf16.mxu0 %v9918_v30  ;;  %v8984_v0 = vadd.f32 -0.28449672, %v8920_v9  ;;  %v9321_v44 = vmul.f32 %v9257_v32, %v8361_v51 }
 0xb2b   : > { %v8858_v54 = vadd.f32 1.4214138, %v8794_v34  ;;  %12992 = vrcp.f32 %v8488_v46  ;;  %11003 = vmatmul.mubr.bf16.gmra.mrb[80].mxu1 %v9915_v63  ;;  %v17386_v41 = vmul.f32 %v9800_v50, %v17314_v8  ;;  %v9802_v38 = vadd.f32 1.0, %v9738_v42  ;;  %v12554_v30 = vld [vmem:[%s13220_s23 + $0x200] sm:$0xff]   ;;  %v18060_v27 = vld [vmem:[#allocation37_spill] sm:$0xff]  ;;  %v12556_v42 = vld [vmem:[%s13220_s23 + $0x248] sm:$0xff]  }
 0xb2c   : > { %12994 = vpow2.f32 %v9413_v52  ;;  %v8743_v35 = vadd.f32 -1.4531521, %v8679_v49  ;;  %v8426_v56 = vmul.f32 0.3275911, %v17383_v14  ;;  %v17391_v5 = vsub.f32 0.0, %v17787_v43  ;;  %v18081_v43 = vld [vmem:[#allocation52_spill] sm:$0xff] }
 0xb2d   : > { %12996 = vpow2.f32 %v9417_v24  ;;  %v9443_v47 = vmul.f32 1.442695, %v9319_v11  ;;  %v9177_v51 = vmul.f32 %v17257_v15, %v9113_v26  ;;  %v9917_v62 = vpack.c.bf16 %v18056_v36, %v18055_v20  ;;  %v18057_v15 = vld [vmem:[#allocation58_spill] sm:$0xff]  ;;  %v18066_v20 = vld [vmem:[#allocation51_spill] sm:$0xff] }
 0xb2e   : > { %v17393_v3 = vpop.eup %12988  ;;  %v8807_v39 = vmul.f32 %v17373_v23, %v8743_v35  ;;  %v8490_v8 = vadd.f32 1.0, %v8426_v56  ;;  %v9048_v52 = vmul.f32 %v17273_v6, %v8984_v0  ;;  %v8922_v9 = vmul.f32 %v17335_v53, %v8858_v54  ;;  %v18061_v0 = vld [vmem:[#allocation12_spill] sm:$0xff]  ;;  %v18064_v56 = vld [vmem:[#allocation69_spill] sm:$0xff] }
 0xb2f   : > { %v8681_v34 = vmul.f32 1.0614054, %v17393_v3  ;;  %v9447_v32 = vmul.f32 1.442695, %v9321_v44  ;;  %v9256_v24 = vsub.f32 0.0, %v17360_v48  ;;  %11052 = vmatmul.mubr.bf16.gmra.mrb[68].mxu0 %v9917_v62  ;;  %v9904_v28 = vpack.c.bf16 %v18058_v4, %v18057_v15  ;;  %v18062_v54 = vld [vmem:[#allocation68_spill] sm:$0xff] }
 0xb30   : > { %v12991_v16 = vpop.eup %12990  ;;  %v8871_v50 = vadd.f32 1.4214138, %v8807_v39  ;;  %12998 = vrcp.f32 %v8490_v8  ;;  %v17407_v11 = vmul.f32 %v9802_v38, %v17331_v1  ;;  %v9906_v63 = vpack.c.bf16 %v18060_v27, %v18059_v55  ;;  %v18063_v35 = vld [vmem:[#allocation48_spill] sm:$0xff]  ;;  %v18071_v15 = vld [vmem:[#allocation38_spill] sm:$0xff] }
 0xb31   : > { %13000 = vpow2.f32 %v9443_v47  ;;  %v8745_v46 = vadd.f32 -1.4531521, %v8681_v34  ;;  %v17412_v26 = vmul.f32 %v12991_v16, %v9177_v51  ;;  %11092 = vmatprep.mubr.bf16.mxu1 %v9904_v28  ;;  %v9920_v44 = vpack.c.bf16 %v18062_v54, %v18061_v0  ;;  %v18065_v8 = vld [vmem:[#allocation24_spill] sm:$0xff]  ;;  %v12558_v34 = vld [vmem:[%s13220_s23 + $0x208] sm:$0xff]   ;;  %v12555_v55 = vld [vmem:[%s13220_s23 + $0x280] sm:$0xff]  }
 0xb32   : > { %v8935_v49 = vmul.f32 %v17373_v23, %v8871_v50  ;;  %v9922_v39 = vpack.c.bf16 %v18064_v56, %v18063_v35  ;;  %v9112_v1 = vadd.f32 0.2548296, %v9048_v52  ;;  %v8986_v38 = vadd.f32 -0.28449672, %v8922_v9  ;;  %11141 = vmatprep.mubr.bf16.mxu0 %v9906_v63  ;;  %v18068_v16 = vld [vmem:[#allocation39_spill] sm:$0xff]  ;;  %v18069_v52 = vld [vmem:[#allocation62_spill] sm:$0xff] }
 0xb33   : > { %v8809_v47 = vmul.f32 %v17393_v3, %v8745_v46  ;;  %13002 = vpow2.f32 %v9447_v32  ;;  %v18067_v51 = vpack.c.bf16 %v18065_v8, %v18066_v20  ;;  %v9320_v62 = vmul.f32 %v9256_v24, %v17360_v48  ;;  %v18070_v9 = vld [vmem:[#allocation42_spill] sm:$0xff]  ;;  %v18073_v48 = vld [vmem:[#allocation7_spill] sm:$0xff]  ;;  %v18074_v63 = vld [vmem:[#allocation41_spill] sm:$0xff] }
 0xb34   : > { %v8999_v36 = vadd.f32 -0.28449672, %v8935_v49  ;;  %v9919_v50 = vpack.c.bf16 %v18069_v52, %v18068_v16  ;;  %v9258_v46 = vsub.f32 0.0, %v17383_v14  ;;  %v18072_v27 = vld [vmem:[#allocation22_spill] sm:$0xff]  ;;  %v18075_v49 = vld [vmem:[#allocation59_spill] sm:$0xff]  ;;  %v12560_v56 = vld [vmem:[%s13220_s23 + $0x250] sm:$0xff]   ;;  %v9050_v16 = vmul.f32 %v17335_v53, %v8986_v38 }
 0xb35   : > { %11093 = vmatmul.mubr.bf16.vlgmr.msra.gmra.mrb[84].mxu1 %v18067_v51  ;;  %v17429_v32 = vpop.eup %12992  ;;  %v8873_v28 = vadd.f32 1.4214138, %v8809_v47  ;;  %v9908_v24 = vpack.c.bf16 %v18073_v48, %v18072_v27  ;;  %v12557_v35 = vld [vmem:[%s13220_s23 + $0x2c8] sm:$0xff]   ;;  %v18078_v27 = vld [vmem:[#allocation54_spill] sm:$0xff]  ;;  %v18082_v8 = vld [vmem:[#allocation25_spill] sm:$0xff]  ;;  %v9176_v13 = vmul.f32 %v17273_v6, %v9112_v1  ;;  %vm9623_vm10 = vcmp.ge.f32.partialorder %v18084_v59, 0.0 }
 0xb36   : > { %11100 = vmatprep.mubr.bf16.mxu1 %v9920_v44  ;;  %12123 = vmatpush3.bf16.msra.mxu1 %v12554_v30  ;;  %v12995_v0 = vpop.eup %12994  ;;  %v9063_v54 = vmul.f32 %v17373_v23, %v8999_v36  ;;  %v8680_v44 = vmul.f32 1.0614054, %v17429_v32  ;;  %v18076_v47 = vld [vmem:[#allocation27_spill] sm:$0xff]  ;;  %v18079_v48 = vld [vmem:[#allocation30_spill] sm:$0xff]  ;;  %v18083_v21 = vpack.c.bf16 %v18081_v43, %v18082_v8  ;;  %v9561_v36 = vsub.f32 1.0, %v17412_v26  ;;  %v12564_v43 = vld [vmem:[%s13220_s23 + $0x258] sm:$0xff]  }
 0xb37   : > { %12124 = vmatprep.subr.bf16.mxu1 %v12556_v42  ;;  %v18077_v20 = vld [vmem:[#allocation15_spill] sm:$0xff]  ;;  %v17445_v51 = vpop.eup %12996  ;;  %v8937_v52 = vmul.f32 %v17393_v3, %v8873_v28  ;;  %v9322_v38 = vmul.f32 %v9258_v46, %v17383_v14  ;;  %v12561_v28 = vld [vmem:[%s13220_s23 + $0x2d0] sm:$0xff]   ;;  %v9114_v6 = vadd.f32 0.2548296, %v9050_v16  ;;  %v12566_v59 = vld [vmem:[%s13220_s23 + $0x218] sm:$0xff]   ;;  %vm9639_vm12 = vcmp.ge.f32.partialorder %v17280_v29, 0.0 }
 0xb38   : > { %v9127_v30 = vadd.f32 0.2548296, %v9063_v54  ;;  %v8744_v4 = vadd.f32 -1.4531521, %v8680_v44  ;;  %11142 = vmatmul.mubr.bf16.vlgmr.msra.gmra.mrb[72].mxu0 %v18083_v21  ;;  %v12559_v42 = vld [vmem:[%s13220_s23 + $0x288] sm:$0xff]   ;;  %vm9641_vm13 = vcmp.ge.f32.partialorder %v17318_v60, 0.0 }
 0xb39   : > { %v9001_v54 = vadd.f32 -0.28449672, %v8937_v52  ;;  %v9445_v44 = vmul.f32 1.442695, %v9320_v62  ;;  %11149 = vmatprep.mubr.bf16.mxu0 %v9922_v39  ;;  %12151 = vmatpush3.bf16.msra.mxu0 %v12555_v55  ;;  %v18085_v62 = vld [vmem:[#allocation19_spill] sm:$0xff]  ;;  %v17480_v52 = vmul.f32 %v12995_v0, %v9176_v13  ;;  %v8231_v13 = vmul.f32 0.5, %v17236_v2 }
 0xb3a   : > { %12125 = vmatpush3.bf16.msra.mxu1 %v12558_v34  ;;  %v17465_v21 = vpop.eup %12998  ;;  %v9191_v34 = vmul.f32 %v17373_v23, %v9127_v30  ;;  %v8808_v8 = vmul.f32 %v17429_v32, %v8744_v4  ;;  %12152 = vmatprep.subr.bf16.mxu0 %v12557_v35  ;;  %v8215_v23 = vmul.f32 0.5, %v18085_v62  ;;  %v18086_v4 = vsub.f32 1.0, %v17351_v10  ;;  %v12567_v2 = vld [vmem:[%s13220_s23 + $0x298] sm:$0xff]   ;;  %v12572_v29 = vld [vmem:[%s13220_s23 + $0x268] sm:$0xff]  }
 0xb3b   : > { %12126 = vmatprep.subr.bf16.mxu1 %v12560_v56  ;;  %v13001_v26 = vpop.eup %13000  ;;  %v9065_v39 = vmul.f32 %v17393_v3, %v9001_v54  ;;  %v8682_v1 = vmul.f32 1.0614054, %v17465_v21  ;;  %v9689_v35 = vsub.f32 0.0, %v9561_v36  ;;  %13004 = vpow2.f32 %v9445_v44 }
 0xb3c   : > { %v9751_v14 = vsel %vm9623_vm10, %v18086_v4, %v17391_v5  ;;  %v9511_v46 = vmul.f32 %v13001_v26, %v9191_v34  ;;  %v8872_v55 = vadd.f32 1.4214138, %v8808_v8  ;;  %v9449_v5 = vmul.f32 1.442695, %v9322_v38  ;;  %v18087_v34 = vld [vmem:[#allocation35_spill] sm:$0xff] }
 0xb3d   : > { %11101 = vmatmul.mubr.bf16.gmra.mrb[88].mxu1 %v9919_v50  ;;  %v13003_v30 = vpop.eup %13002  ;;  %v9129_v56 = vadd.f32 0.2548296, %v9065_v39  ;;  %v8746_v16 = vadd.f32 -1.4531521, %v8682_v1  ;;  %12153 = vmatpush3.bf16.msra.mxu0 %v12559_v42  ;;  %v12563_v50 = vld [vmem:[%s13220_s23 + $0x290] sm:$0xff]   ;;  %vm9625_vm11 = vcmp.ge.f32.partialorder %v18087_v34, 0.0  ;;  %v9178_v8 = vmul.f32 %v17335_v53, %v9114_v6 }
 0xb3e   : > { %12127 = vmatpush3.bf16.msra.mxu1 %v12562_v61  ;;  %11190 = vmatprep.mubr.bf16.mxu1 %v9908_v24  ;;  %v9575_v54 = vsub.f32 1.0, %v9511_v46  ;;  %v8936_v10 = vmul.f32 %v17429_v32, %v8872_v55  ;;  %v12565_v61 = vld [vmem:[%s13220_s23 + $0x2d8] sm:$0xff]   ;;  %v12568_v24 = vld [vmem:[%s13220_s23 + $0x260] sm:$0xff]   ;;  %v18088_v38 = vpack.c.bf16 %v18071_v15, %v18070_v9  ;;  %v9815_v53 = vadd.f32 1.0, %v9751_v14  ;;  %v12574_v46 = vld [vmem:[%s13220_s23 + $0x228] sm:$0xff]  }
 0xb3f   : > { %12128 = vmatprep.subr.bf16.mxu1 %v12564_v43  ;;  %12154 = vmatprep.subr.bf16.mxu0 %v12561_v28  ;;  %v9193_v44 = vmul.f32 %v17393_v3, %v9129_v56  ;;  %v8810_v42 = vmul.f32 %v17465_v21, %v8746_v16  ;;  %v12570_v28 = vld [vmem:[%s13220_s23 + $0x220] sm:$0xff]   ;;  %v9753_v26 = vsel %vm9625_vm11, %v9561_v36, %v9689_v35  ;;  %v9560_v1 = vsub.f32 1.0, %v17480_v52  ;;  %v12576_v16 = vld [vmem:[%s13220_s23 + $0x270] sm:$0xff]  }
 0xb40   : > { %v9703_v0 = vsub.f32 0.0, %v9575_v54  ;;  %v9000_v43 = vadd.f32 -0.28449672, %v8936_v10  ;;  %11150 = vmatmul.mubr.bf16.gmra.mrb[76].mxu0 %v18088_v38  ;;  %v18089_v39 = vpack.c.bf16 %v18075_v49, %v18074_v63  ;;  %13006 = vpow2.f32 %v9449_v5  ;;  %v12569_v15 = vld [vmem:[%s13220_s23 + $0x2e0] sm:$0xff]   ;;  %v18090_v34 = vld [vmem:[#allocation8_spill] sm:$0xff]  ;;  %v12580_v38 = vld [vmem:[%s13220_s23 + $0x278] sm:$0xff]  }
 0xb41   : > { %v9513_v6 = vmul.f32 %v13003_v30, %v9193_v44  ;;  %v8874_v3 = vadd.f32 1.4214138, %v8810_v42  ;;  %12155 = vmatpush3.bf16.msra.mxu0 %v12563_v50  ;;  %v17504_v36 = vmul.f32 %v17445_v51, %v9178_v8  ;;  %v17508_v55 = vmul.f32 %v9815_v53, %v8215_v23  ;;  %v12571_v56 = vld [vmem:[%s13220_s23 + $0x2a0] sm:$0xff]   ;;  %v12578_v42 = vld [vmem:[%s13220_s23 + $0x230] sm:$0xff]  }
 0xb42   : > { %12129 = vmatpush3.bf16.msra.mxu1 %v12566_v59  ;;  %11239 = vmatprep.mubr.bf16.mxu0 %v18089_v39  ;;  %v9767_v62 = vsel %vm9639_vm12, %v9575_v54, %v9703_v0  ;;  %v9064_v9 = vmul.f32 %v17429_v32, %v9000_v43  ;;  %v9817_v51 = vadd.f32 1.0, %v9753_v26  ;;  %v9688_v50 = vsub.f32 0.0, %v9560_v1  ;;  %v12573_v54 = vld [vmem:[%s13220_s23 + $0x2e8] sm:$0xff]  }
 0xb43   : > { %12156 = vmatprep.subr.bf16.mxu0 %v12565_v61  ;;  %12130 = vmatprep.subr.bf16.mxu1 %v12568_v24  ;;  %v9831_v4 = vadd.f32 1.0, %v9767_v62  ;;  %v9577_v63 = vsub.f32 1.0, %v9513_v6  ;;  %v8938_v49 = vmul.f32 %v17465_v21, %v8874_v3  ;;  %v9562_v10 = vsub.f32 1.0, %v17504_v36  ;;  %v12575_v43 = vld [vmem:[%s13220_s23 + $0x2a8] sm:$0xff]   ;;  %v12577_v6 = vld [vmem:[%s13220_s23 + $0x2f0] sm:$0xff]   ;;  %v12582_v62 = vld [vmem:[%s13220_s23 + $0x238] sm:$0xff]  }
 0xb44   : > { %v9128_v14 = vadd.f32 0.2548296, %v9064_v9  ;;  %v8217_v8 = vmul.f32 0.5, %v18090_v34  ;;  %v8233_v44 = vmul.f32 0.5, %v17240_v25  ;;  %vm9640_vm15 = vcmp.ge.f32.partialorder %v17349_v40, 0.0  ;;  %v12579_v36 = vld [vmem:[%s13220_s23 + $0x2b0] sm:$0xff]  }
 0xb45   : > { %v17510_v59 = vmul.f32 %v9831_v4, %v8231_v13  ;;  %v9705_v30 = vsub.f32 0.0, %v9577_v63  ;;  %v9002_v35 = vadd.f32 -0.28449672, %v8938_v49  ;;  %12157 = vmatpush3.bf16.msra.mxu0 %v12567_v2  ;;  %v13005_v23 = vpop.eup %13004  ;;  %v18091_v13 = vld [vmem:[#allocation44_spill] sm:$0xff]  ;;  %v9690_v3 = vsub.f32 0.0, %v9562_v10  ;;  %v12584_v4 = vld [vmem:[%s13220_s23 + $0x340] sm:$0xff]  }
 0xb46   : > { %12131 = vmatpush3.bf16.msra.mxu1 %v12570_v28  ;;  %v9192_v52 = vmul.f32 %v17429_v32, %v9128_v14  ;;  %12158 = vmatprep.subr.bf16.mxu0 %v12569_v15  ;;  %vm9624_vm14 = vcmp.ge.f32.partialorder %v18091_v13, 0.0  ;;  %v17527_v28 = vmul.f32 %v9817_v51, %v8217_v8  ;;  %vm9626_vm0 = vcmp.ge.f32.partialorder %v17232_v45, 0.0  ;;  %v12581_v14 = vld [vmem:[%s13220_s23 + $0x2f8] sm:$0xff]  }
 0xb47   : > { %12132 = vmatprep.subr.bf16.mxu1 %v12572_v29  ;;  %v9769_v5 = vsel %vm9641_vm13, %v9577_v63, %v9705_v30  ;;  %v9066_v61 = vmul.f32 %v17465_v21, %v9002_v35  ;;  %v9927_v24 = vpack.c.bf16 %v17510_v59, %v17508_v55  ;;  %v9752_v53 = vsel %vm9624_vm14, %v9560_v1, %v9688_v50  ;;  %v18092_v63 = vld [vmem:[#allocation16_spill] sm:$0xff]  ;;  %v12583_v45 = vld [vmem:[%s13220_s23 + $0x2b8] sm:$0xff]  }
 0xb48   : > { %v9833_v60 = vadd.f32 1.0, %v9769_v5  ;;  %v9512_v32 = vmul.f32 %v13005_v23, %v9192_v52  ;;  %v9816_v15 = vadd.f32 1.0, %v9752_v53  ;;  %v8232_v30 = vmul.f32 0.5, %v17328_v17  ;;  %v12588_v52 = vld [vmem:[%s13220_s23 + $0x348] sm:$0xff]   ;;  %v12585_v17 = vld [vmem:[%s13220_s23 + $0x3c0] sm:$0xff]  }
 0xb49   : > { %v9130_v0 = vadd.f32 0.2548296, %v9066_v61  ;;  %12159 = vmatpush3.bf16.msra.mxu0 %v12571_v56  ;;  %v12586_v56 = vld [vmem:[%s13220_s23 + $0x300] sm:$0xff]   ;;  %vm9642_vm2 = vcmp.ge.f32.partialorder %v17369_v12, 0.0  ;;  %v8218_v8 = vmul.f32 0.5, %v17205_v18  ;;  %v18096_v12 = vpack.c.bf16 %v17293_v57, %v18076_v47  ;;  %v12589_v18 = vld [vmem:[%s13220_s23 + $0x3c8] sm:$0xff]  }
 0xb4a   : > { %12133 = vmatpush3.bf16.msra.mxu1 %v12574_v46  ;;  %v17529_v26 = vmul.f32 %v9833_v60, %v8233_v44  ;;  %v9576_v25 = vsub.f32 1.0, %v9512_v32  ;;  %12160 = vmatprep.subr.bf16.mxu0 %v12573_v54  ;;  %v13007_v2 = vpop.eup %13006  ;;  %v9754_v46 = vsel %vm9626_vm0, %v9562_v10, %v9690_v3  ;;  %v18093_v10 = vld [vmem:[#allocation65_spill] sm:$0xff]  ;;  %v18094_v5 = vld [vmem:[#allocation50_spill] sm:$0xff]  ;;  %v8234_v44 = vmul.f32 0.5, %v17356_v19  ;;  %v12590_v32 = vld [vmem:[%s13220_s23 + $0x308] sm:$0xff]  }
 0xb4b   : > { %12134 = vmatprep.subr.bf16.mxu1 %v12576_v16  ;;  %v9194_v39 = vmul.f32 %v17465_v21, %v9130_v0  ;;  %v8216_v21 = vmul.f32 0.5, %v18092_v63  ;;  %v9818_v54 = vadd.f32 1.0, %v9754_v46  ;;  %v18095_v61 = vpack.c.bf16 %v18093_v10, %v18094_v5  ;;  %v12592_v19 = vld [vmem:[%s13220_s23 + $0x350] sm:$0xff]   ;;  %v12596_v3 = vld [vmem:[%s13220_s23 + $0x358] sm:$0xff]   ;;  %v12607_v63 = vld [vmem:[%s13220_s23 + $0x3a8] sm:$0xff]  }
 0xb4c   : > { %v9704_v29 = vsub.f32 0.0, %v9576_v25  ;;  %v9929_v9 = vpack.c.bf16 %v17529_v26, %v17527_v28  ;;  %v12594_v47 = vld [vmem:[%s13220_s23 + $0x310] sm:$0xff]  }
 0xb4d   : > { %v9514_v1 = vmul.f32 %v13007_v2, %v9194_v39  ;;  %12161 = vmatpush3.bf16.msra.mxu0 %v12575_v43  ;;  %v17544_v16 = vmul.f32 %v9816_v15, %v8216_v21  ;;  %v17564_v13 = vmul.f32 %v9818_v54, %v8218_v8  ;;  %v18097_v43 = vld [vmem:[#allocation67_spill] sm:$0xff]  ;;  %v12593_v39 = vld [vmem:[%s13220_s23 + $0x3d0] sm:$0xff]   ;;  %v18101_v2 = vpack.c.bf16 %v18079_v48, %v18078_v27  ;;  %v12600_v15 = vld [vmem:[%s13220_s23 + $0x360] sm:$0xff]  }
 0xb4e   : > { %12135 = vmatpush3.bf16.msra.mxu1 %v12578_v42  ;;  %v9768_v49 = vsel %vm9640_vm15, %v9576_v25, %v9704_v29  ;;  %12162 = vmatprep.subr.bf16.mxu0 %v12577_v6  ;;  %v12587_v42 = vld [vmem:[%s13220_s23 + $0x380] sm:$0xff]   ;;  %v18100_v25 = vpack.c.bf16 %v17308_v58, %v18077_v20  ;;  %v12591_v6 = vld [vmem:[%s13220_s23 + $0x388] sm:$0xff]   ;;  %v18102_v58 = vpack.c.bf16 %v17386_v41, %v17338_v7  ;;  %v12598_v20 = vld [vmem:[%s13220_s23 + $0x318] sm:$0xff]  }
 0xb4f   : > { %12136 = vmatprep.subr.bf16.mxu1 %v12580_v38  ;;  %v9832_v40 = vadd.f32 1.0, %v9768_v49  ;;  %v9578_v35 = vsub.f32 1.0, %v9514_v1  ;;  %v18098_v38 = vld [vmem:[#allocation34_spill] sm:$0xff]  ;;  %v12595_v29 = vld [vmem:[%s13220_s23 + $0x390] sm:$0xff]   ;;  %v18103_v27 = vpack.c.bf16 %v17285_v22, %v18080_v31  ;;  %v18104_v7 = vpack.c.bf16 %v17407_v11, %v17341_v33  ;;  %v12599_v41 = vld [vmem:[%s13220_s23 + $0x398] sm:$0xff]  }
 0xb50   : > { %v18099_v57 = vpack.c.bf16 %v18097_v43, %v18098_v38  ;;  %v12602_v48 = vld [vmem:[%s13220_s23 + $0x320] sm:$0xff]   ;;  %v12604_v1 = vld [vmem:[%s13220_s23 + $0x368] sm:$0xff]   ;;  %v12610_v11 = vld [vmem:[%s13220_s23 + $0x330] sm:$0xff]  }
 0xb51   : > { %v17546_v51 = vmul.f32 %v9832_v40, %v8232_v30  ;;  %v9706_v50 = vsub.f32 0.0, %v9578_v35  ;;  %12163 = vmatpush3.bf16.msra.mxu0 %v12579_v36  ;;  %v12601_v36 = vld [vmem:[%s13220_s23 + $0x3e0] sm:$0xff]   ;;  %v12606_v31 = vld [vmem:[%s13220_s23 + $0x328] sm:$0xff]   ;;  %v12612_v21 = vld [vmem:[%s13220_s23 + $0x378] sm:$0xff]  }
 0xb52   : > { %12137 = vmatpush3.bf16.msra.mxu1 %v12582_v62  ;;  %12164 = vmatprep.subr.bf16.mxu0 %v12581_v14  ;;  %v12597_v62 = vld [vmem:[%s13220_s23 + $0x3d8] sm:$0xff]   ;;  %v12603_v22 = vld [vmem:[%s13220_s23 + $0x3a0] sm:$0xff]   ;;  %v12605_v33 = vld [vmem:[%s13220_s23 + $0x3e8] sm:$0xff]  }
 0xb53   : > { %12178 = vmatprep.subr.bf16.mxu1 %v12584_v4  ;;  %v9770_v23 = vsel %vm9642_vm2, %v9578_v35, %v9706_v50  ;;  %v9928_v34 = vpack.c.bf16 %v17546_v51, %v17544_v16  ;;  %v12608_v4 = vld [vmem:[%s13220_s23 + $0x370] sm:$0xff]   ;;  %v12614_v14 = vld [vmem:[%s13220_s23 + $0x338] sm:$0xff]   ;;  %v18107_v50 = vld [vmem:[#allocation23_spill] sm:$0xff] }
 0xb54   : > { %v9834_v60 = vadd.f32 1.0, %v9770_v23  ;;  %v12609_v49 = vld [vmem:[%s13220_s23 + $0x3f0] sm:$0xff]   ;;  %v12613_v30 = vld [vmem:[%s13220_s23 + $0x3f8] sm:$0xff]  }
 0xb55   : > { %11191 = vmatmul.mubr.bf16.vlgmr.msra.gmra.mrb[92].mxu1 %v18095_v61  ;;  %12165 = vmatpush3.bf16.msra.mxu0 %v12583_v45  ;;  %v12611_v46 = vld [vmem:[%s13220_s23 + $0x3b0] sm:$0xff]   ;;  %v12615_v40 = vld [vmem:[%s13220_s23 + $0x3b8] sm:$0xff]   ;;  %s18110_s23 = scalar_lea.vmem %s17699_s12, %s13172_s20  ;;  %s13022_s20 = scalar_lea.vmem %s11443_s0, 512 }
 0xb56   : > { %11198 = vmatprep.mubr.bf16.mxu1 %v18096_v12  ;;  %12179 = vmatpush3.bf16.msra.mxu1 %v12586_v56  ;;  %v17566_v0 = vmul.f32 %v9834_v60, %v8234_v44  ;;  %v18105_v35 = vld [vmem:[#allocation60_spill] sm:$0xff]  ;;  %v18108_v45 = vld [vmem:[#allocation61_spill] sm:$0xff]  ;;  %v11809_v16 = vld [vmem:[%s18110_s23] ss:$0 sm:$0xff]  ;;  %p13023_p6 = scmp.ne.s32.totalorder %s11443_s0, %s13022_s20  ;;  %p13030_p10 = scmp.lt.s32.totalorder %s13022_s20, %s13022_s20 }
 0xb57   : > { %12180 = vmatprep.subr.bf16.mxu1 %v12588_v52  ;;  %12206 = vmatprep.subr.bf16.mxu0 %v12585_v17  ;;  %v18106_v56 = vpack.c.bf16 %v17212_v37, %v18105_v35  ;;  %v18109_v52 = vpack.c.bf16 %v18107_v50, %v18108_v45 }
 0xb58   : > { %11240 = vmatmul.mubr.bf16.vlgmr.msra.gmra.mrb[80].mxu0 %v18099_v57  ;;  %v9930_v53 = vpack.c.bf16 %v17566_v0, %v17564_v13  ;;  %p13024_p7 = pnand %p13023_p6, %p12370_p5  ;;  %p13031_p11 = por %p13030_p10, %p13029_p9 }
 0xb59   : > { %11247 = vmatprep.mubr.bf16.mxu0 %v18100_v25  ;;  %12207 = vmatpush3.bf16.msra.mxu0 %v12587_v42 }
 0xb5a   : > { %12181 = vmatpush3.bf16.msra.mxu1 %v12590_v32  ;;  %12208 = vmatprep.subr.bf16.mxu0 %v12589_v18  ;;  %p13025_p8 = pneg %p13024_p7 }
 0xb5b   : > { %12182 = vmatprep.subr.bf16.mxu1 %v12592_v19 }
 0xb5c   : > { %p13032_p12 = pnand %p13031_p11, %p13025_p8 }
 0xb5d   : > { %11199 = vmatmul.mubr.bf16.gmra.mrb[96].mxu1 %v18101_v2  ;;  %12209 = vmatpush3.bf16.msra.mxu0 %v12591_v6 }
 0xb5e   : > { %12183 = vmatpush3.bf16.msra.mxu1 %v12594_v47  ;;  %11288 = vmatprep.mubr.bf16.mxu1 %v18102_v58 }
 0xb5f   : > { %12184 = vmatprep.subr.bf16.mxu1 %v12596_v3  ;;  %12210 = vmatprep.subr.bf16.mxu0 %v12593_v39 }
 0xb60   : > { %11248 = vmatmul.mubr.bf16.gmra.mrb[84].mxu0 %v18103_v27 }
 0xb61   : > { %12211 = vmatpush3.bf16.msra.mxu0 %v12595_v29  ;;  %11337 = vmatprep.mubr.bf16.mxu0 %v18104_v7 }
 0xb62   : > { %12185 = vmatpush3.bf16.msra.mxu1 %v12598_v20  ;;  %12212 = vmatprep.subr.bf16.mxu0 %v12597_v62 }
 0xb63   : > { %12186 = vmatprep.subr.bf16.mxu1 %v12600_v15 }
 0xb65   : > { %12213 = vmatpush3.bf16.msra.mxu0 %v12599_v41 }
 0xb66   : > { %12187 = vmatpush3.bf16.msra.mxu1 %v12602_v48  ;;  %12214 = vmatprep.subr.bf16.mxu0 %v12601_v36 }
 0xb67   : > { %12188 = vmatprep.subr.bf16.mxu1 %v12604_v1 }
 0xb69   : > { %12215 = vmatpush3.bf16.msra.mxu0 %v12603_v22 }
 0xb6a   : > { %12189 = vmatpush3.bf16.msra.mxu1 %v12606_v31  ;;  %12216 = vmatprep.subr.bf16.mxu0 %v12605_v33 }
 0xb6b   : > { %12190 = vmatprep.subr.bf16.mxu1 %v12608_v4 }
 0xb6d   : > { %12217 = vmatpush3.bf16.msra.mxu0 %v12607_v63 }
 0xb6e   : > { %12191 = vmatpush3.bf16.msra.mxu1 %v12610_v11  ;;  %12218 = vmatprep.subr.bf16.mxu0 %v12609_v49 }
 0xb6f   : > { %12192 = vmatprep.subr.bf16.mxu1 %v12612_v21 }
 0xb71   : > { %12219 = vmatpush3.bf16.msra.mxu0 %v12611_v46 }
 0xb72   : > { %12193 = vmatpush3.bf16.msra.mxu1 %v12614_v14  ;;  %12220 = vmatprep.subr.bf16.mxu0 %v12613_v30 }
 0xb75   : > { %11289 = vmatmul.mubr.bf16.vlgmr.msra.gmra.mrb[100].mxu1 %v18106_v56  ;;  %12221 = vmatpush3.bf16.msra.mxu0 %v12615_v40 }
 0xb76   : > { %11296 = vmatprep.mubr.bf16.mxu1 %v9928_v34 }
 0xb78   : > { %11338 = vmatmul.mubr.bf16.vlgmr.msra.gmra.mrb[88].mxu0 %v18109_v52 }
 0xb79   : > { %11345 = vmatprep.mubr.bf16.mxu0 %v9930_v53 }
 0xb7d   : > { %11297 = vmatmul.mubr.bf16.gmra.mrb[104].mxu1 %v9927_v24 }
 0xb80   : > { %11346 = vmatmul.mubr.bf16.gmra.mrb[92].mxu0 %v9929_v9 }
 0xbd5   : > { %v12026_v37 = vpop.f32.mrb[76].mxu1 }
 0xbd6   : > { %v12027_v51 = vpop.f32.mrb[77].mxu1 }
 0xbd7   : > { %v12028_v17 = vadd.f32 %v12027_v51, %v12026_v37  ;;  %v12029_v10 = vpop.f32.mrb[78].mxu1 }
 0xbd8   : > { %v12054_v54 = vpop.f32.mrb[64].mxu0  ;;  %v12030_v34 = vpop.f32.mrb[79].mxu1 }
 0xbd9   : > { %v12055_v23 = vpop.f32.mrb[65].mxu0  ;;  %v10997_v55 = vadd.f32 %v12028_v17, %v11809_v16  ;;  %v12031_v59 = vadd.f32 %v12030_v34, %v12029_v10 }
 0xbda   : > { %v12056_v5 = vadd.f32 %v12055_v23, %v12054_v54  ;;  %v12057_v61 = vpop.f32.mrb[66].mxu0 }
 0xbdb   : > { %v12058_v24 = vpop.f32.mrb[67].mxu0  ;;  %v11000_v26 = vadd.f32 %v12031_v59, %v11809_v16 }
 0xbdc   : > { %v12059_v8 = vadd.f32 %v12058_v24, %v12057_v61  ;;  %v11046_v28 = vadd.f32 %v12056_v5, %v10997_v55 }
 0xbde   : > { %v11049_v9 = vadd.f32 %v12059_v8, %v11000_v26 }
 0xbfe   : > { %v12032_v44 = vpop.f32.mrb[80].mxu1 }
 0xbff   : > { %v12033_v60 = vpop.f32.mrb[81].mxu1 }
 0xc00   : > { %v12034_v12 = vadd.f32 %v12033_v60, %v12032_v44  ;;  %v12035_v32 = vpop.f32.mrb[82].mxu1 }
 0xc01   : > { %v12036_v42 = vpop.f32.mrb[83].mxu1 }
 0xc02   : > { %v12037_v13 = vadd.f32 %v12036_v42, %v12035_v32  ;;  %v12060_v0 = vpop.f32.mrb[68].mxu0  ;;  %v11005_v18 = vadd.f32 %v12034_v12, %v11809_v16 }
 0xc03   : > { %v12061_v19 = vpop.f32.mrb[69].mxu0 }
 0xc04   : > { %v12062_v43 = vadd.f32 %v12061_v19, %v12060_v0  ;;  %v12063_v38 = vpop.f32.mrb[70].mxu0  ;;  %v11008_v57 = vadd.f32 %v12037_v13, %v11809_v16 }
 0xc05   : > { %v12064_v47 = vpop.f32.mrb[71].mxu0 }
 0xc06   : > { %v11054_v25 = vadd.f32 %v12062_v43, %v11005_v18  ;;  %v12065_v6 = vadd.f32 %v12064_v47, %v12063_v38 }
 0xc08   : > { %v12082_v53 = vpop.f32.mrb[84].mxu1  ;;  %v11057_v58 = vadd.f32 %v12065_v6, %v11008_v57 }
 0xc09   : > { %v12083_v3 = vpop.f32.mrb[85].mxu1 }
 0xc0a   : > { %v12084_v39 = vadd.f32 %v12083_v3, %v12082_v53  ;;  %v12085_v2 = vpop.f32.mrb[86].mxu1 }
 0xc0b   : > { %v12086_v20 = vpop.f32.mrb[87].mxu1  ;;  %v12110_v15 = vpop.f32.mrb[72].mxu0 }
 0xc0c   : > { %v11095_v29 = vadd.f32 %v12084_v39, %v11046_v28  ;;  %v12087_v62 = vadd.f32 %v12086_v20, %v12085_v2  ;;  %v12111_v27 = vpop.f32.mrb[73].mxu0 }
 0xc0d   : > { %v12112_v7 = vadd.f32 %v12111_v27, %v12110_v15  ;;  %v12113_v41 = vpop.f32.mrb[74].mxu0 }
 0xc0e   : > { %v11098_v48 = vadd.f32 %v12087_v62, %v11049_v9  ;;  %v12114_v1 = vpop.f32.mrb[75].mxu0 }
 0xc0f   : > { %v11144_v31 = vadd.f32 %v12112_v7, %v11095_v29  ;;  %v12115_v22 = vadd.f32 %v12114_v1, %v12113_v41 }
 0xc10   : > { %v12088_v36 = vpop.f32.mrb[88].mxu1 }
 0xc11   : > { %v12089_v4 = vpop.f32.mrb[89].mxu1  ;;  %v11147_v63 = vadd.f32 %v12115_v22, %v11098_v48 }
 0xc12   : > { %v12090_v33 = vadd.f32 %v12089_v4, %v12088_v36  ;;  %v12091_v11 = vpop.f32.mrb[90].mxu1 }
 0xc13   : > { %v12092_v21 = vpop.f32.mrb[91].mxu1  ;;  %v12116_v46 = vpop.f32.mrb[76].mxu0 }
 0xc14   : > { %v11103_v49 = vadd.f32 %v12090_v33, %v11054_v25  ;;  %v12093_v14 = vadd.f32 %v12092_v21, %v12091_v11  ;;  %v12117_v30 = vpop.f32.mrb[77].mxu0 }
 0xc15   : > { %v12118_v35 = vadd.f32 %v12117_v30, %v12116_v46  ;;  %v12119_v56 = vpop.f32.mrb[78].mxu0 }
 0xc16   : > { %v11106_v40 = vadd.f32 %v12093_v14, %v11057_v58  ;;  %v12120_v50 = vpop.f32.mrb[79].mxu0 }
 0xc17   : > { %v11152_v45 = vadd.f32 %v12118_v35, %v11103_v49  ;;  %v12121_v52 = vadd.f32 %v12120_v50, %v12119_v56  ;;  %v18111_v49 = vld [vmem:[#allocation10_spill] sm:$0xff]  ;;  %v18112_v56 = vld [vmem:[#allocation9_spill] sm:$0xff] }
 0xc19   : > { %v11155_v37 = vadd.f32 %v12121_v52, %v11106_v40 }
 0xc28   : > { %v12138_v54 = vpop.f32.mrb[92].mxu1 }
 0xc29   : > { %v12139_v16 = vpop.f32.mrb[93].mxu1 }
 0xc2a   : > { %v12140_v51 = vadd.f32 %v12139_v16, %v12138_v54  ;;  %v12141_v17 = vpop.f32.mrb[94].mxu1 }
 0xc2b   : > { %v12142_v23 = vpop.f32.mrb[95].mxu1  ;;  %v12166_v61 = vpop.f32.mrb[80].mxu0 }
 0xc2c   : > { %v11193_v10 = vadd.f32 %v12140_v51, %v11144_v31  ;;  %v12143_v5 = vadd.f32 %v12142_v23, %v12141_v17  ;;  %v12167_v34 = vpop.f32.mrb[81].mxu0 }
 0xc2d   : > { %v12168_v59 = vadd.f32 %v12167_v34, %v12166_v61  ;;  %v12169_v24 = vpop.f32.mrb[82].mxu0 }
 0xc2e   : > { %v11196_v55 = vadd.f32 %v12143_v5, %v11147_v63  ;;  %v12170_v8 = vpop.f32.mrb[83].mxu0  ;;  %v18113_v5 = vld [vmem:[#allocation13_spill] sm:$0xff] }
 0xc2f   : > { %v11242_v26 = vadd.f32 %v12168_v59, %v11193_v10  ;;  %v12171_v9 = vadd.f32 %v12170_v8, %v12169_v24 }
 0xc30   : > { %v12144_v28 = vpop.f32.mrb[96].mxu1 }
 0xc31   : > { %v12145_v44 = vpop.f32.mrb[97].mxu1  ;;  %v11245_v32 = vadd.f32 %v12171_v9, %v11196_v55  ;;  %v18114_v55 = vld [vmem:[#allocation11_spill] sm:$0xff] }
 0xc32   : > { %v12146_v60 = vadd.f32 %v12145_v44, %v12144_v28  ;;  %v12147_v12 = vpop.f32.mrb[98].mxu1 }
 0xc33   : > { %v12148_v42 = vpop.f32.mrb[99].mxu1  ;;  %v12172_v18 = vpop.f32.mrb[84].mxu0 }
 0xc34   : > { %v11201_v13 = vadd.f32 %v12146_v60, %v11152_v45  ;;  %v12149_v0 = vadd.f32 %v12148_v42, %v12147_v12  ;;  %v12173_v19 = vpop.f32.mrb[85].mxu0 }
 0xc35   : > { %v12174_v38 = vadd.f32 %v12173_v19, %v12172_v18  ;;  %v12175_v57 = vpop.f32.mrb[86].mxu0 }
 0xc36   : > { %v11204_v43 = vadd.f32 %v12149_v0, %v11155_v37  ;;  %v12176_v47 = vpop.f32.mrb[87].mxu0 }
 0xc37   : > { %v11250_v53 = vadd.f32 %v12174_v38, %v11201_v13  ;;  %v12177_v25 = vadd.f32 %v12176_v47, %v12175_v57 }
 0xc39   : > { %v11253_v6 = vadd.f32 %v12177_v25, %v11204_v43 }
 0xc48   : > { %v12194_v3 = vpop.f32.mrb[100].mxu1 }
 0xc49   : > { %v12195_v39 = vpop.f32.mrb[101].mxu1 }
 0xc4a   : > { %v12196_v2 = vadd.f32 %v12195_v39, %v12194_v3  ;;  %v12197_v58 = vpop.f32.mrb[102].mxu1 }
 0xc4b   : > { %v12198_v20 = vpop.f32.mrb[103].mxu1  ;;  %v12222_v15 = vpop.f32.mrb[88].mxu0 }
 0xc4c   : > { %v11291_v29 = vadd.f32 %v12196_v2, %v11242_v26  ;;  %v12199_v62 = vadd.f32 %v12198_v20, %v12197_v58  ;;  %v12223_v27 = vpop.f32.mrb[89].mxu0 }
 0xc4d   : > { %v12224_v7 = vadd.f32 %v12223_v27, %v12222_v15  ;;  %v12225_v41 = vpop.f32.mrb[90].mxu0 }
 0xc4e   : > { %v11294_v48 = vadd.f32 %v12199_v62, %v11245_v32  ;;  %v12226_v1 = vpop.f32.mrb[91].mxu0 }
 0xc4f   : > { %v11340_v31 = vadd.f32 %v12224_v7, %v11291_v29  ;;  %v12227_v22 = vadd.f32 %v12226_v1, %v12225_v41 }
 0xc50   : > { %v12200_v36 = vpop.f32.mrb[104].mxu1 }
 0xc51   : > { %v12201_v4 = vpop.f32.mrb[105].mxu1  ;;  %v11343_v63 = vadd.f32 %v12227_v22, %v11294_v48  ;;  %v11354_v14 = vadd.f32 %v11340_v31, %v18111_v49 }
 0xc52   : > { %v12202_v33 = vadd.f32 %v12201_v4, %v12200_v36  ;;  %v12203_v11 = vpop.f32.mrb[106].mxu1  ;;  %v11938_v36 = vld [vmem:[%s18115_s30] ss:$0 sm:$0xff] }
 0xc53   : > { %v12204_v21 = vpop.f32.mrb[107].mxu1  ;;  %v12228_v40 = vpop.f32.mrb[92].mxu0  ;;  %v11360_v35 = vsel %vm764_vm1, %v11354_v14, 0.0  ;;  %v11355_v50 = vadd.f32 %v11343_v63, %v18112_v56  ;;  %v11939_v4 = vld [vmem:[%s18116_s18] ss:$0 sm:$0xff] }
 0xc54   : > { %v11299_v46 = vadd.f32 %v12202_v33, %v11250_v53  ;;  %v12205_v30 = vadd.f32 %v12204_v21, %v12203_v11  ;;  %v12229_v45 = vpop.f32.mrb[93].mxu0  ;;  %11361 = vadd.xlane.f32.xlu1 %v11360_v35 }
 0xc55   : > { %v12230_v37 = vadd.f32 %v12229_v45, %v12228_v40  ;;  %v12231_v54 = vpop.f32.mrb[94].mxu0  ;;  %v11363_v16 = vsel %vm764_vm1, %v11355_v50, 0.0 }
 0xc56   : > { %v11302_v52 = vadd.f32 %v12205_v30, %v11253_v6  ;;  %v12232_v51 = vpop.f32.mrb[95].mxu0  ;;  %11364 = vadd.xlane.f32.xlu0 %v11363_v16 }
 0xc57   : > { %v11348_v17 = vadd.f32 %v12230_v37, %v11299_v46  ;;  %v12233_v23 = vadd.f32 %v12232_v51, %v12231_v54 }
 0xc59   : > { %v11351_v10 = vadd.f32 %v12233_v23, %v11302_v52  ;;  %v11356_v61 = vadd.f32 %v11348_v17, %v18113_v5 }
 0xc5b   : > { %v11366_v34 = vsel %vm764_vm1, %v11356_v61, 0.0  ;;  %v11357_v59 = vadd.f32 %v11351_v10, %v18114_v55 }
 0xc5c   : > { %11367 = vadd.xlane.f32.xlu1 %v11366_v34 }
 0xc5d   : > { %v11369_v24 = vsel %vm764_vm1, %v11357_v59, 0.0 }
 0xc5e   : > { %11370 = vadd.xlane.f32.xlu0 %v11369_v24 }
 0xce1   : > { %v11362_v8 = vpop.xlane.xlu1 %11361 }
 0xce2   : > { %v11372_v28 = vmul.f32 0.015625, %v11362_v8 }
 0xce3   : > { %v11365_v26 = vpop.xlane.xlu0 %11364 }
 0xce4   : > { %v11376_v9 = vsub.f32 %v11354_v14, %v11372_v28  ;;  %v11373_v44 = vmul.f32 0.015625, %v11365_v26 }
 0xce6   : > { %v11377_v60 = vsub.f32 %v11355_v50, %v11373_v44  ;;  %v11380_v12 = vmul.f32 %v11376_v9, %v11376_v9 }
 0xce8   : > { %v11384_v32 = vsel %vm764_vm1, %v11380_v12, 0.0  ;;  %v11381_v42 = vmul.f32 %v11377_v60, %v11377_v60 }
 0xce9   : > { %11385 = vadd.xlane.f32.xlu1 %v11384_v32  ;;  %v11368_v13 = vpop.xlane.xlu1 %11367 }
 0xcea   : > { %v11374_v0 = vmul.f32 0.015625, %v11368_v13  ;;  %v11387_v18 = vsel %vm764_vm1, %v11381_v42, 0.0 }
 0xceb   : > { %11388 = vadd.xlane.f32.xlu0 %v11387_v18  ;;  %v11371_v19 = vpop.xlane.xlu0 %11370 }
 0xcec   : > { %v11378_v43 = vsub.f32 %v11356_v61, %v11374_v0  ;;  %v11375_v38 = vmul.f32 0.015625, %v11371_v19 }
 0xcee   : > { %v11379_v57 = vsub.f32 %v11357_v59, %v11375_v38  ;;  %v11382_v47 = vmul.f32 %v11378_v43, %v11378_v43 }
 0xcf0   : > { %v11390_v53 = vsel %vm764_vm1, %v11382_v47, 0.0  ;;  %v11383_v25 = vmul.f32 %v11379_v57, %v11379_v57 }
 0xcf1   : > { %11391 = vadd.xlane.f32.xlu1 %v11390_v53 }
 0xcf2   : > { %v11393_v6 = vsel %vm764_vm1, %v11383_v25, 0.0 }
 0xcf3   : > { %11394 = vadd.xlane.f32.xlu0 %v11393_v6 }
 0xd76   : > { %v11386_v3 = vpop.xlane.xlu1 %11385 }
 0xd77   : > { %v11396_v39 = vmul.f32 0.015625, %v11386_v3 }
 0xd78   : > { %v11389_v2 = vpop.xlane.xlu0 %11388 }
 0xd79   : > { %v11400_v58 = vadd.f32 1e-05, %v11396_v39  ;;  %v11397_v20 = vmul.f32 0.015625, %v11389_v2 }
 0xd7b   : > { %13008 = vrsqrt.f32 %v11400_v58  ;;  %v11401_v29 = vadd.f32 1e-05, %v11397_v20 }
 0xd7d   : > { %13010 = vrsqrt.f32 %v11401_v29 }
 0xd7e   : > { %v11392_v62 = vpop.xlane.xlu1 %11391 }
 0xd7f   : > { %v11398_v15 = vmul.f32 0.015625, %v11392_v62 }
 0xd80   : > { %v11395_v27 = vpop.xlane.xlu0 %11394 }
 0xd81   : > { %v11402_v48 = vadd.f32 1e-05, %v11398_v15  ;;  %v11399_v7 = vmul.f32 0.015625, %v11395_v27 }
 0xd83   : > { %13012 = vrsqrt.f32 %v11402_v48  ;;  %v11403_v41 = vadd.f32 1e-05, %v11399_v7 }
 0xd85   : > { %v13009_v1 = vpop.eup %13008  ;;  %13014 = vrsqrt.f32 %v11403_v41 }
 0xd86   : > { %v11408_v31 = vmul.f32 %v13009_v1, %v11376_v9 }
 0xd87   : > { %v13011_v22 = vpop.eup %13010 }
 0xd88   : > { %v11418_v33 = vmul.f32 %v11938_v36, %v11408_v31  ;;  %v11409_v11 = vmul.f32 %v13011_v22, %v11377_v60 }
 0xd8a   : > { %v11428_v63 = vadd.f32 %v11939_v4, %v11418_v33  ;;  %v11419_v21 = vmul.f32 %v11938_v36, %v11409_v11 }
 0xd8c   : > { %11432 = vst.msk [vmem:[#allocation2] sm:$0xff] %vm764_vm1, %v11428_v63  ;;  %v11429_v49 = vadd.f32 %v11939_v4, %v11419_v21 }
 0xd8d   : > { %v13013_v14 = vpop.eup %13012 }
 0xd8e   : > { %11433 = vst.msk [vmem:[#allocation2 + $0x8] sm:$0xff] %vm764_vm1, %v11429_v49  ;;  %v11410_v46 = vmul.f32 %v13013_v14, %v11378_v43 }
 0xd8f   : > { %v13015_v30 = vpop.eup %13014 }
 0xd90   : > { %v11420_v40 = vmul.f32 %v11938_v36, %v11410_v46  ;;  %v11411_v35 = vmul.f32 %v13015_v30, %v11379_v57 }
 0xd92   : > { %v11430_v56 = vadd.f32 %v11939_v4, %v11420_v40  ;;  %v11421_v50 = vmul.f32 %v11938_v36, %v11411_v35 }
 0xd94   : > { %11434 = vst.msk [vmem:[#allocation2 + $0x10] sm:$0xff] %vm764_vm1, %v11430_v56  ;;  %v11431_v45 = vadd.f32 %v11939_v4, %v11421_v50 }
 0xd96   : > { %11435 = vst.msk [vmem:[#allocation2 + $0x18] sm:$0xff] %vm764_vm1, %v11431_v45 }
 0xd97   : > { %13035 = shalt.err (!%p13032_p12)
}
 0xd98   : > { %s18117_s26 = sld [smem:[#allocation75_spill]] }
 0xd9e   : > { %s13036_s22 = scalar_lea.hbm %s18117_s26, 512 }
 0xd9f   : > { %p13037_p13 = scmp.ne.s32.totalorder %s18117_s26, %s13036_s22  ;;  %p13042_p2 = scmp.lt.u32.totalorder %s13036_s22, %s18117_s26 }
 0xda1   : > { %p13038_p0 = pnand %p13037_p13, %p12370_p5 }
 0xda3   : > { %p13039_p1 = pneg %p13038_p0 }
 0xda5   : > { %p13044_p3 = pnand %p13042_p2, %p13039_p1 }
 0xda7   : > { %13047 = shalt.err (!%p13044_p3)
}
 0xda8   : > { %s13079_s23 = smov 128  }
 0xda9   : > { %12367 = dma.vmem_to_hbm [thread:$0]  (%p12370_p5), %s11443_s0, 512, %s18117_s26, [#allocation3], %s13079_s23, %s13079_s23, %s13072_s25  }
 0xdaa   : > { %13053 = dma.done.wait (%p12370_p5), [#allocation3], 512  }
 0xdab   : > { %13055 = vsyncadd (%p12370_p5), [#allocation3], 4294966784 }
 0xdac PF: > { %s18118_s30 = sld [smem:[#allocation5_spill]] }
 0xdb2   : > { %s26_s18 = sadd.s32 1, %s18118_s30  }
 0xdb3   : > { %p23_p4 = scmp.ge.s32.totalorder %s26_s18, 5  }
 0xdb5   :  { %25 = sbr.rel (!%p23_p4) target bundleno = 8 (0x8), region = 144 }
 0xdbc   :  { %11458 = vsyncpa [#allocation3], 1 }
 0xdbd   :  { %11460 = vsyncpa [#allocation3 + $0x1], 1 }

</bundles_post_ra>
